<compile_context>
chip_gen: v7x
topology: tpu7x:2x2x1
jax: 0.10.0
libtpu: 0.0.40
codegen_flags: <defaults>
</compile_context>

<pallas_src>
import functools

import jax
import jax.numpy as jnp
from jax.experimental import pallas as pl
from jax.experimental.pallas import tpu as pltpu

BN_EPS = 1e-5


def _round_up(x, m):
    return ((x + m - 1) // m) * m


@functools.lru_cache(maxsize=1)
def _num_tensorcores_per_chip():
    """Best-effort TC-per-chip detection (perf heuristic only)."""
    try:
        kind = jax.devices()[0].device_kind.lower()
    except Exception:
        return 1
    return 2 if ("v7" in kind or "tpu7" in kind or "7x" in kind) else 1


def _pick_tm(M, cap=512):
    """Largest row tile <= cap (multiple of 8).  Single grid step on 1-TC chips
    (v5e/v6e: extra steps are pure per-step overhead); >=2 steps per core on v7x."""
    tm = min(cap, _round_up(M, 8))
    ntc = _num_tensorcores_per_chip()
    if ntc > 1:
        min_steps = 2 * ntc
        if M > 8 * min_steps:
            tm = min(tm, max(8, _round_up(pl.cdiv(M, min_steps), 8)))
    return tm


# ----------------------------------------------------------------------------
# Kernel 1: 1x1 conv (matmul) + eval-BatchNorm affine + ReLU
# ----------------------------------------------------------------------------
def _matmul_bn_act_kernel(x_ref, w_ref, sc_ref, sh_ref, o_ref, *, relu_before, relu_after):
    acc = jnp.dot(x_ref[...], w_ref[...], preferred_element_type=jnp.float32)
    if relu_before:                       # conv -> ReLU -> BN
        acc = jnp.maximum(acc, 0.0)
    acc = acc * sc_ref[...] + sh_ref[...]
    if relu_after:                        # conv -> BN -> ReLU
        acc = jnp.maximum(acc, 0.0)
    o_ref[...] = acc.astype(o_ref.dtype)


def matmul_bn_act(x, w, scale, shift, *, relu_before=False, relu_after=False, tm_cap=512):
    """(M, K) bf16 @ (K, N) bf16 -> bf16, fused per-channel affine (+ReLU) in f32."""
    M, K = x.shape
    N = w.shape[1]
    tm = _pick_tm(M, tm_cap)
    return pl.pallas_call(
        functools.partial(_matmul_bn_act_kernel,
                          relu_before=relu_before, relu_after=relu_after),
        out_shape=jax.ShapeDtypeStruct((M, N), jnp.bfloat16),
        grid=(pl.cdiv(M, tm),),
        in_specs=[
            pl.BlockSpec((tm, K), lambda i: (i, 0)),
            pl.BlockSpec((K, N), lambda i: (0, 0)),
            pl.BlockSpec((1, N), lambda i: (0, 0)),
            pl.BlockSpec((1, N), lambda i: (0, 0)),
        ],
        out_specs=pl.BlockSpec((tm, N), lambda i: (i, 0)),
        compiler_params=pltpu.CompilerParams(dimension_semantics=("parallel",)),
    )(x, w, scale.reshape(1, N).astype(jnp.float32), shift.reshape(1, N).astype(jnp.float32))


# ----------------------------------------------------------------------------
# Kernel 2 (fused): blur + BN(shortcut) + concat + ReLU + 3x3 conv -> ReLU -> BN
#                   (+ optional fastai SelfAttention)
# ----------------------------------------------------------------------------
def _fused_block_kernel(*refs, H2, W2, up_out, x_in_c, sa):
    if sa:
        (gamma_ref, u_ref, s_ref, ssc_ref, ssh_ref, cw_ref, csc_ref, csh_ref,
         wqk_ref, wv_ref, o_ref, ub_ref, pad_ref) = refs
    else:
        (u_ref, s_ref, ssc_ref, ssh_ref, cw_ref, csc_ref, csh_ref,
         o_ref, ub_ref, pad_ref) = refs

    ni_pad = cw_ref.shape[1]
    nf = cw_ref.shape[2]

    # --- blur of the up path: ReplicationPad2d((1,0,1,0)) + AvgPool2d(2, stride=1) ---
    # Replicate pad is built in a tiny VMEM scratch (no wrapper-side jnp.pad / HBM pass).
    u = u_ref[0]                                            # (H2, W2, up_out) bf16
    ub_ref[1:, 1:, :] = u
    ub_ref[0:1, 1:, :] = u[0:1, :, :]                       # replicate top row
    ub_ref[1:, 0:1, :] = u[:, 0:1, :]                       # replicate left col
    ub_ref[0:1, 0:1, :] = u[0:1, 0:1, :]                    # corner
    up = ub_ref[...].astype(jnp.float32)                    # (H2+1, W2+1, up_out)
    blurred = 0.25 * (up[1:, 1:, :] + up[:-1, 1:, :] + up[1:, :-1, :] + up[:-1, :-1, :])
    blurred = jnp.maximum(blurred, 0.0)                     # ReLU on cat (up half)

    # --- BN(shortcut) + ReLU (other half of the cat) ---
    sv = s_ref[0].astype(jnp.float32) * ssc_ref[...] + ssh_ref[...]
    sv = jnp.maximum(sv, 0.0)

    # --- zero-bordered cat slab in VMEM (fuses the 3x3 conv's padding); never hits HBM ---
    pad_ref[...] = jnp.zeros_like(pad_ref)                  # VMEM-only; also zeros channel pad
    pad_ref[1:H2 + 1, 1:W2 + 1, 0:up_out] = blurred.astype(pad_ref.dtype)
    pad_ref[1:H2 + 1, 1:W2 + 1, up_out:up_out + x_in_c] = sv.astype(pad_ref.dtype)

    # --- 3x3 conv (pad=1, no bias): 9 shifted matmuls, no im2col, no junk output rows ---
    acc = jnp.zeros((H2 * W2, nf), jnp.float32)
    for t in range(9):                                      # static unroll
        ky, kx = t // 3, t % 3
        patch = pad_ref[ky:ky + H2, kx:kx + W2, :].reshape(H2 * W2, ni_pad)
        acc = acc + jnp.dot(patch, cw_ref[t], preferred_element_type=jnp.float32)
    y = jnp.maximum(acc, 0.0) * csc_ref[...] + csh_ref[...]  # conv -> ReLU -> BN, (N, nf) f32

    # --- optional fastai SelfAttention on the flattened (N, nf) conv output ---
    if sa:
        c8 = wqk_ref.shape[1] // 2
        xb = y.astype(jnp.bfloat16)
        fg = jnp.dot(xb, wqk_ref[...], preferred_element_type=jnp.float32)   # fused q/k proj
        f = fg[:, :c8]
        g = fg[:, c8:]
        h = jnp.dot(xb, wv_ref[...], preferred_element_type=jnp.float32)     # (N, nf)
        # Transposed score: st[j, i] = sum_c g[j,c] f[i,c] (== s[i,j]); softmax(dim=1) of the
        # original score becomes a reduction over the last (lane) axis here.
        st = jax.lax.dot_general(g, f, (((1,), (1,)), ((), ())),
                                 preferred_element_type=jnp.float32)         # (N, N)
        st = st - jnp.max(st, axis=-1, keepdims=True)
        e = jnp.exp(st)
        beta = e * pl.reciprocal(jnp.sum(e, axis=-1, keepdims=True), approx=True)
        o = jnp.dot(beta, h, preferred_element_type=jnp.float32)             # (N, nf)
        y = gamma_ref[0] * o + y                                             # residual

    o_ref[0] = y.astype(o_ref.dtype)                        # (N, nf); wrapper reshape is free


def fused_block(u, s_nhwc, p, *, H2, W2):
    """u: (B, H2, W2, up_out) bf16 (pixel-shuffled up path); s_nhwc: (B, H2, W2, x_in_c) bf16.
    Returns (B, H2*W2, x_out) bf16 (row-major NHWC flattened)."""
    B = u.shape[0]
    up_out = u.shape[-1]
    x_in_c = s_nhwc.shape[-1]
    cw = p["conv_w"]                                        # (9, ni_pad, nf)
    ni_pad, nf = cw.shape[1], cw.shape[2]
    sa = p["self_attention"]
    Wpa = _round_up(W2 + 2, 8)                              # sublane-friendly scratch width

    kernel = functools.partial(_fused_block_kernel, H2=H2, W2=W2,
                               up_out=up_out, x_in_c=x_in_c, sa=sa)

    in_specs = [
        pl.BlockSpec((1, H2, W2, up_out), lambda b: (b, 0, 0, 0)),
        pl.BlockSpec((1, H2, W2, x_in_c), lambda b: (b, 0, 0, 0)),
        pl.BlockSpec((1, 1, x_in_c), lambda b: (0, 0, 0)),
        pl.BlockSpec((1, 1, x_in_c), lambda b: (0, 0, 0)),
        pl.BlockSpec((9, ni_pad, nf), lambda b: (0, 0, 0)),
        pl.BlockSpec((1, nf), lambda b: (0, 0)),
        pl.BlockSpec((1, nf), lambda b: (0, 0)),
    ]
    args = [u, s_nhwc, p["bn_s_scale"], p["bn_s_shift"], cw, p["conv_scale"], p["conv_shift"]]
    if sa:
        in_specs = ([pl.BlockSpec(memory_space=pltpu.MemorySpace.SMEM)]      # gamma scalar
                    + in_specs
                    + [pl.BlockSpec(p["sa_wqk"].shape, lambda b: (0, 0)),
                       pl.BlockSpec(p["sa_wv"].shape, lambda b: (0, 0))])
        args = [p["sa_gamma"]] + args + [p["sa_wqk"], p["sa_wv"]]

    # TODO(synk): for large H2/W2 add a row-tile grid axis with a 1-row halo (manual DMA) and
    #             flash-tile the SA score; also pass vmem_limit_bytes for v7x's 64 MiB VMEM.
    return pl.pallas_call(
        kernel,
        out_shape=jax.ShapeDtypeStruct((B, H2 * W2, nf), jnp.bfloat16),
        grid=(B,),
        in_specs=in_specs,
        out_specs=pl.BlockSpec((1, H2 * W2, nf), lambda b: (b, 0, 0)),
        scratch_shapes=[
            pltpu.VMEM((H2 + 1, W2 + 1, up_out), jnp.bfloat16),   # replicate-padded up path
            pltpu.VMEM((H2 + 2, Wpa, ni_pad), jnp.bfloat16),      # zero-bordered cat slab
        ],
        compiler_params=pltpu.CompilerParams(dimension_semantics=("parallel",)),
    )(*args)


# ----------------------------------------------------------------------------
# UnetBlockWide forward
# ----------------------------------------------------------------------------
def unet_block_wide_forward(p, up_in, s):
    B, Cin, H, W = up_in.shape
    up_out, x_out = p["up_out"], p["x_out"]

    # shuf: 1x1 conv -> BN -> ReLU  (phase-major output channels)
    x_flat = up_in.transpose(0, 2, 3, 1).reshape(B * H * W, Cin).astype(jnp.bfloat16)
    y = matmul_bn_act(x_flat, p["shuf_w"], p["shuf_scale"], p["shuf_shift"], relu_after=True)

    # PixelShuffle(2): with phase-major channels this is a pure layout op.
    y = (y.reshape(B, H, W, 2, 2, up_out)
          .transpose(0, 1, 3, 2, 4, 5)
          .reshape(B, 2 * H, 2 * W, up_out))

    Hs, Ws = s.shape[-2:]
    if (2 * H, 2 * W) != (Hs, Ws):
        # TODO(synk): F.interpolate(mode='nearest') index convention not reproduced bit-exactly;
        # this branch is never taken with the shapes used in this script.
        y = jax.image.resize(y, (B, Hs, Ws, up_out), method="nearest")
    H2, W2 = Hs, Ws

    s_nhwc = s.transpose(0, 2, 3, 1).astype(jnp.bfloat16)

    # blur + relu(cat([up, bn(s)])) + 3x3 conv -> ReLU -> BN (+ SelfAttention), one kernel.
    yc = fused_block(y, s_nhwc, p, H2=H2, W2=W2)             # (B, H2*W2, x_out) bf16
    yc = yc.reshape(B, H2, W2, x_out)                        # free (row-major) reshape

    return yc.transpose(0, 3, 1, 2).astype(jnp.float32)      # NCHW f32 at the block boundary


# ----------------------------------------------------------------------------
# Deterministic synthetic parameters (spectral-norm folded into the weights)
# ----------------------------------------------------------------------------
def init_params(key, up_in_c, x_in_c, n_out, *, with_self_attention=True):
    up_out = x_out = n_out // 2
    ni = up_out + x_in_c
    ni_pad = _round_up(ni, 128)
    ks = jax.random.split(key, 8)

    def conv_w(k, cout, cin, ksz):
        fan_in = cin * ksz * ksz
        return jax.random.normal(k, (cout, cin, ksz, ksz), jnp.float32) * (2.0 / fan_in) ** 0.5

    def bn_affine(k, c):
        k1, k2, k3, k4 = jax.random.split(k, 4)
        gamma = 1.0 + 0.1 * jax.random.normal(k1, (c,), jnp.float32)
        beta = 0.1 * jax.random.normal(k2, (c,), jnp.float32)
        mean = 0.1 * jax.random.normal(k3, (c,), jnp.float32)
        var = 1.0 + 0.1 * jax.random.uniform(k4, (c,), jnp.float32)
        scale = gamma / jnp.sqrt(var + BN_EPS)
        shift = beta - mean * scale
        return scale, shift

    p = dict(up_out=up_out, x_out=x_out, x_in_c=x_in_c, self_attention=with_self_attention)

    # shuf 1x1 conv (no bias) + BN; columns permuted phase-major: new col = (py*2+px)*up_out + c.
    w = conv_w(ks[0], up_out * 4, up_in_c, 1).reshape(up_out * 4, up_in_c).T   # (K, 4*up_out)
    sc, sh = bn_affine(ks[1], up_out * 4)
    perm = jnp.array([c * 4 + ph for ph in range(4) for c in range(up_out)], jnp.int32)
    p["shuf_w"] = w[:, perm].astype(jnp.bfloat16)
    p["shuf_scale"] = sc[perm]
    p["shuf_shift"] = sh[perm]

    # BatchNorm on the shortcut.
    ssc, ssh = bn_affine(ks[2], x_in_c)
    p["bn_s_scale"] = ssc.reshape(1, 1, x_in_c)
    p["bn_s_shift"] = ssh.reshape(1, 1, x_in_c)

    # 3x3 conv (no bias) stored as 9 taps (t = ky*3 + kx), each (ni, x_out), zero-padded on the
    # input-channel (K) dim to 128 lanes; + BN.
    wc = conv_w(ks[3], x_out, ni, 3)                                           # (x_out, ni, 3, 3)
    taps = jnp.stack([wc[:, :, ky, kx].T for ky in range(3) for kx in range(3)])   # (9, ni, x_out)
    p["conv_w"] = jnp.pad(taps, ((0, 0), (0, ni_pad - ni), (0, 0))).astype(jnp.bfloat16)
    csc, csh = bn_affine(ks[4], x_out)
    p["conv_scale"] = csc.reshape(1, x_out)
    p["conv_shift"] = csh.reshape(1, x_out)

    if with_self_attention:
        c8 = max(x_out // 8, 1)
        wq = conv_w(ks[5], c8, x_out, 1).reshape(c8, x_out).T                  # (x_out, c8)
        wk = conv_w(ks[6], c8, x_out, 1).reshape(c8, x_out).T
        p["sa_wqk"] = jnp.concatenate([wq, wk], axis=1).astype(jnp.bfloat16)   # fused q/k
        p["sa_wv"] = conv_w(ks[7], x_out, x_out, 1).reshape(x_out, x_out).T.astype(jnp.bfloat16)
        # PyTorch init is 0.0; use a nonzero value so the attention path contributes.
        p["sa_gamma"] = jnp.array([0.1], jnp.float32)
    return p


# ----------------------------------------------------------------------------
# Main
# ----------------------------------------------------------------------------
if __name__ == "__main__":
    key = jax.random.PRNGKey(0)
    B, up_in_c, x_in_c, n_out = 2, 64, 32, 128
    H, W = 8, 8                                   # up_in spatial; shortcut is 2x

    kp, ku, ksc = jax.random.split(key, 3)
    params = init_params(kp, up_in_c, x_in_c, n_out, with_self_attention=True)

    up_in = jax.random.normal(ku, (B, up_in_c, H, W), jnp.float32)
    s = jax.random.normal(ksc, (B, x_in_c, 2 * H, 2 * W), jnp.float32)

    fwd = jax.jit(functools.partial(unet_block_wide_forward, params))
    out = jax.block_until_ready(fwd(up_in, s))

    expected = (B, n_out // 2, 2 * H, 2 * W)
    assert out.shape == expected, (out.shape, expected)
    assert bool(jnp.all(jnp.isfinite(out)))
    print("KERNEL_OK")
</pallas_src>

<mosaic_0001>
module attributes {stable_mosaic.version = 11 : i64} {
  func.func @_matmul_bn_act_kernel(%arg0: i32, %arg1: memref<128x64xbf16, #tpu.memory_space<vmem>>, %arg2: memref<64x256xbf16, #tpu.memory_space<vmem>>, %arg3: memref<1x256xf32, #tpu.memory_space<vmem>>, %arg4: memref<1x256xf32, #tpu.memory_space<vmem>>, %arg5: memref<128x256xbf16, #tpu.memory_space<vmem>>) attributes {dimension_semantics = [#tpu.dimension_semantics<parallel>], iteration_bounds = array<i64: 1>, scalar_prefetch = 0 : i64, scratch_operands = 0 : i64, tpu.core_type = #tpu.core_type<tc>, window_params = [{transform_indices = @transform_0, window_bounds = array<i64: 128, 64>}, {pipeline_mode = #tpu.pipeline_mode<synchronous>, transform_indices = @transform_1, window_bounds = array<i64: 64, 256>}, {pipeline_mode = #tpu.pipeline_mode<synchronous>, transform_indices = @transform_2, window_bounds = array<i64: 1, 256>}, {pipeline_mode = #tpu.pipeline_mode<synchronous>, transform_indices = @transform_3, window_bounds = array<i64: 1, 256>}, {transform_indices = @transform_4, window_bounds = array<i64: 128, 256>}]} {
    %c0 = arith.constant 0 : index
    %c0_0 = arith.constant 0 : index
    %0 = vector.load %arg1[%c0, %c0_0] : memref<128x64xbf16, #tpu.memory_space<vmem>>, vector<128x64xbf16>
    %c0_1 = arith.constant 0 : index
    %c0_2 = arith.constant 0 : index
    %1 = vector.load %arg2[%c0_1, %c0_2] : memref<64x256xbf16, #tpu.memory_space<vmem>>, vector<64x256xbf16>
    %cst = arith.constant dense<0.000000e+00> : vector<128x256xf32>
    %2 = tpu.matmul %0, %1, %cst {dimension_numbers = #tpu.dot_dimension_numbers<[1], [0], [0], [1], [0, 0, 1, 1], [], []>} : vector<128x64xbf16>, vector<64x256xbf16>, vector<128x256xf32> -> vector<128x256xf32>
    %c0_3 = arith.constant 0 : index
    %c0_4 = arith.constant 0 : index
    %3 = vector.load %arg3[%c0_3, %c0_4] : memref<1x256xf32, #tpu.memory_space<vmem>>, vector<1x256xf32>
    %4 = vector.broadcast %3 : vector<1x256xf32> to vector<128x256xf32>
    %5 = arith.mulf %2, %4 : vector<128x256xf32>
    %c0_5 = arith.constant 0 : index
    %c0_6 = arith.constant 0 : index
    %6 = vector.load %arg4[%c0_5, %c0_6] : memref<1x256xf32, #tpu.memory_space<vmem>>, vector<1x256xf32>
    %7 = vector.broadcast %6 : vector<1x256xf32> to vector<128x256xf32>
    %8 = arith.addf %5, %7 : vector<128x256xf32>
    %cst_7 = arith.constant 0.000000e+00 : f32
    %9 = vector.broadcast %cst_7 : f32 to vector<128x256xf32>
    %10 = arith.maximumf %8, %9 : vector<128x256xf32>
    %11 = arith.truncf %10 : vector<128x256xf32> to vector<128x256xbf16>
    %c0_8 = arith.constant 0 : index
    %c0_9 = arith.constant 0 : index
    %12 = vector.load %arg5[%c0_8, %c0_9] : memref<128x256xbf16, #tpu.memory_space<vmem>>, vector<128x256xbf16>
    tpu.vector_store %arg5[%c0_8, %c0_9], %11 {strides = array<i32>} : memref<128x256xbf16, #tpu.memory_space<vmem>>, vector<128x256xbf16>,
    return
  }
  func.func @transform_0(%arg0: i32) -> (i32, i32) {
    %c0_i32 = arith.constant 0 : i32
    %c0_i32_0 = arith.constant 0 : i32
    return %arg0, %c0_i32 : i32, i32
  }
  func.func @transform_1(%arg0: i32) -> (i32, i32) {
    %c0_i32 = arith.constant 0 : i32
    %c0_i32_0 = arith.constant 0 : i32
    %c0_i32_1 = arith.constant 0 : i32
    return %c0_i32, %c0_i32_0 : i32, i32
  }
  func.func @transform_2(%arg0: i32) -> (i32, i32) {
    %c0_i32 = arith.constant 0 : i32
    %c0_i32_0 = arith.constant 0 : i32
    %c0_i32_1 = arith.constant 0 : i32
    return %c0_i32, %c0_i32_0 : i32, i32
  }
  func.func @transform_3(%arg0: i32) -> (i32, i32) {
    %c0_i32 = arith.constant 0 : i32
    %c0_i32_0 = arith.constant 0 : i32
    %c0_i32_1 = arith.constant 0 : i32
    return %c0_i32, %c0_i32_0 : i32, i32
  }
  func.func @transform_4(%arg0: i32) -> (i32, i32) {
    %c0_i32 = arith.constant 0 : i32
    %c0_i32_0 = arith.constant 0 : i32
    return %arg0, %c0_i32 : i32, i32
  }
}

module attributes {stable_mosaic.version = 11 : i64} {
  func.func @_fused_block_kernel(%arg0: i32, %arg1: memref<1xf32, #tpu.memory_space<smem>>, %arg2: memref<1x16x16x64xbf16, #tpu.memory_space<vmem>>, %arg3: memref<1x16x16x32xbf16, #tpu.memory_space<vmem>>, %arg4: memref<1x1x32xf32, #tpu.memory_space<vmem>>, %arg5: memref<1x1x32xf32, #tpu.memory_space<vmem>>, %arg6: memref<9x128x64xbf16, #tpu.memory_space<vmem>>, %arg7: memref<1x64xf32, #tpu.memory_space<vmem>>, %arg8: memref<1x64xf32, #tpu.memory_space<vmem>>, %arg9: memref<64x16xbf16, #tpu.memory_space<vmem>>, %arg10: memref<64x64xbf16, #tpu.memory_space<vmem>>, %arg11: memref<1x256x64xbf16, #tpu.memory_space<vmem>>, %arg12: memref<17x17x64xbf16, #tpu.memory_space<vmem>>, %arg13: memref<18x24x128xbf16, #tpu.memory_space<vmem>>) attributes {dimension_semantics = [#tpu.dimension_semantics<parallel>], iteration_bounds = array<i64: 2>, scalar_prefetch = 0 : i64, scratch_operands = 2 : i64, tpu.core_type = #tpu.core_type<tc>, window_params = [{transform_indices = @transform_0, window_bounds = array<i64: 1>}, {transform_indices = @transform_1, window_bounds = array<i64: 1, 16, 16, 64>}, {transform_indices = @transform_2, window_bounds = array<i64: 1, 16, 16, 32>}, {pipeline_mode = #tpu.pipeline_mode<synchronous>, transform_indices = @transform_3, window_bounds = array<i64: 1, 1, 32>}, {pipeline_mode = #tpu.pipeline_mode<synchronous>, transform_indices = @transform_4, window_bounds = array<i64: 1, 1, 32>}, {pipeline_mode = #tpu.pipeline_mode<synchronous>, transform_indices = @transform_5, window_bounds = array<i64: 9, 128, 64>}, {pipeline_mode = #tpu.pipeline_mode<synchronous>, transform_indices = @transform_6, window_bounds = array<i64: 1, 64>}, {pipeline_mode = #tpu.pipeline_mode<synchronous>, transform_indices = @transform_7, window_bounds = array<i64: 1, 64>}, {pipeline_mode = #tpu.pipeline_mode<synchronous>, transform_indices = @transform_8, window_bounds = array<i64: 64, 16>}, {pipeline_mode = #tpu.pipeline_mode<synchronous>, transform_indices = @transform_9, window_bounds = array<i64: 64, 64>}, {transform_indices = @transform_10, window_bounds = array<i64: 1, 256, 64>}]} {
    %c0 = arith.constant 0 : index
    %c0_0 = arith.constant 0 : index
    %c0_1 = arith.constant 0 : index
    %c0_2 = arith.constant 0 : index
    %0 = vector.load %arg2[%c0, %c0_0, %c0_1, %c0_2] : memref<1x16x16x64xbf16, #tpu.memory_space<vmem>>, vector<1x16x16x64xbf16>
    %1 = vector.shape_cast %0 : vector<1x16x16x64xbf16> to vector<16x16x64xbf16>
    %c1 = arith.constant 1 : index
    %c1_3 = arith.constant 1 : index
    %c0_4 = arith.constant 0 : index
    %2 = vector.load %arg12[%c1, %c1_3, %c0_4] : memref<17x17x64xbf16, #tpu.memory_space<vmem>>, vector<16x16x64xbf16>
    tpu.vector_store %arg12[%c1, %c1_3, %c0_4], %1 {strides = array<i32>} : memref<17x17x64xbf16, #tpu.memory_space<vmem>>, vector<16x16x64xbf16>,
    %3 = vector.extract_strided_slice %1 {offsets = [0, 0, 0], sizes = [1, 16, 64], strides = [1, 1, 1]} : vector<16x16x64xbf16> to vector<1x16x64xbf16>
    %c0_5 = arith.constant 0 : index
    %c1_6 = arith.constant 1 : index
    %c0_7 = arith.constant 0 : index
    %4 = vector.load %arg12[%c0_5, %c1_6, %c0_7] : memref<17x17x64xbf16, #tpu.memory_space<vmem>>, vector<1x16x64xbf16>
    tpu.vector_store %arg12[%c0_5, %c1_6, %c0_7], %3 {strides = array<i32>} : memref<17x17x64xbf16, #tpu.memory_space<vmem>>, vector<1x16x64xbf16>,
    %5 = vector.extract_strided_slice %1 {offsets = [0, 0, 0], sizes = [16, 1, 64], strides = [1, 1, 1]} : vector<16x16x64xbf16> to vector<16x1x64xbf16>
    %c1_8 = arith.constant 1 : index
    %c0_9 = arith.constant 0 : index
    %c0_10 = arith.constant 0 : index
    %6 = vector.load %arg12[%c1_8, %c0_9, %c0_10] : memref<17x17x64xbf16, #tpu.memory_space<vmem>>, vector<16x1x64xbf16>
    tpu.vector_store %arg12[%c1_8, %c0_9, %c0_10], %5 {strides = array<i32>} : memref<17x17x64xbf16, #tpu.memory_space<vmem>>, vector<16x1x64xbf16>,
    %7 = vector.extract_strided_slice %1 {offsets = [0, 0, 0], sizes = [1, 1, 64], strides = [1, 1, 1]} : vector<16x16x64xbf16> to vector<1x1x64xbf16>
    %c0_11 = arith.constant 0 : index
    %c0_12 = arith.constant 0 : index
    %c0_13 = arith.constant 0 : index
    %8 = vector.load %arg12[%c0_11, %c0_12, %c0_13] : memref<17x17x64xbf16, #tpu.memory_space<vmem>>, vector<1x1x64xbf16>
    tpu.vector_store %arg12[%c0_11, %c0_12, %c0_13], %7 {strides = array<i32>} : memref<17x17x64xbf16, #tpu.memory_space<vmem>>, vector<1x1x64xbf16>,
    %c0_14 = arith.constant 0 : index
    %c0_15 = arith.constant 0 : index
    %c0_16 = arith.constant 0 : index
    %9 = vector.load %arg12[%c0_14, %c0_15, %c0_16] : memref<17x17x64xbf16, #tpu.memory_space<vmem>>, vector<17x17x64xbf16>
    %10 = arith.extf %9 : vector<17x17x64xbf16> to vector<17x17x64xf32>
    %11 = vector.extract_strided_slice %10 {offsets = [1, 1, 0], sizes = [16, 16, 64], strides = [1, 1, 1]} : vector<17x17x64xf32> to vector<16x16x64xf32>
    %12 = vector.extract_strided_slice %10 {offsets = [0, 1, 0], sizes = [16, 16, 64], strides = [1, 1, 1]} : vector<17x17x64xf32> to vector<16x16x64xf32>
    %13 = arith.addf %11, %12 : vector<16x16x64xf32>
    %14 = vector.extract_strided_slice %10 {offsets = [1, 0, 0], sizes = [16, 16, 64], strides = [1, 1, 1]} : vector<17x17x64xf32> to vector<16x16x64xf32>
    %15 = arith.addf %13, %14 : vector<16x16x64xf32>
    %16 = vector.extract_strided_slice %10 {offsets = [0, 0, 0], sizes = [16, 16, 64], strides = [1, 1, 1]} : vector<17x17x64xf32> to vector<16x16x64xf32>
    %17 = arith.addf %15, %16 : vector<16x16x64xf32>
    %cst = arith.constant 2.500000e-01 : f32
    %18 = vector.broadcast %cst : f32 to vector<16x16x64xf32>
    %19 = arith.mulf %18, %17 : vector<16x16x64xf32>
    %cst_17 = arith.constant 0.000000e+00 : f32
    %20 = vector.broadcast %cst_17 : f32 to vector<16x16x64xf32>
    %21 = arith.maximumf %19, %20 : vector<16x16x64xf32>
    %c0_18 = arith.constant 0 : index
    %c0_19 = arith.constant 0 : index
    %c0_20 = arith.constant 0 : index
    %c0_21 = arith.constant 0 : index
    %22 = vector.load %arg3[%c0_18, %c0_19, %c0_20, %c0_21] : memref<1x16x16x32xbf16, #tpu.memory_space<vmem>>, vector<1x16x16x32xbf16>
    %23 = vector.shape_cast %22 : vector<1x16x16x32xbf16> to vector<16x16x32xbf16>
    %24 = arith.extf %23 : vector<16x16x32xbf16> to vector<16x16x32xf32>
    %c0_22 = arith.constant 0 : index
    %c0_23 = arith.constant 0 : index
    %c0_24 = arith.constant 0 : index
    %25 = vector.load %arg4[%c0_22, %c0_23, %c0_24] : memref<1x1x32xf32, #tpu.memory_space<vmem>>, vector<1x1x32xf32>
    %26 = vector.broadcast %25 : vector<1x1x32xf32> to vector<16x16x32xf32>
    %27 = arith.mulf %24, %26 : vector<16x16x32xf32>
    %c0_25 = arith.constant 0 : index
    %c0_26 = arith.constant 0 : index
    %c0_27 = arith.constant 0 : index
    %28 = vector.load %arg5[%c0_25, %c0_26, %c0_27] : memref<1x1x32xf32, #tpu.memory_space<vmem>>, vector<1x1x32xf32>
    %29 = vector.broadcast %28 : vector<1x1x32xf32> to vector<16x16x32xf32>
    %30 = arith.addf %27, %29 : vector<16x16x32xf32>
    %cst_28 = arith.constant 0.000000e+00 : f32
    %31 = vector.broadcast %cst_28 : f32 to vector<16x16x32xf32>
    %32 = arith.maximumf %30, %31 : vector<16x16x32xf32>
    %cst_29 = arith.constant 0.000000e+00 : bf16
    %33 = vector.broadcast %cst_29 : bf16 to vector<18x24x128xbf16>
    %c0_30 = arith.constant 0 : index
    %c0_31 = arith.constant 0 : index
    %c0_32 = arith.constant 0 : index
    %34 = vector.load %arg13[%c0_30, %c0_31, %c0_32] : memref<18x24x128xbf16, #tpu.memory_space<vmem>>, vector<18x24x128xbf16>
    tpu.vector_store %arg13[%c0_30, %c0_31, %c0_32], %33 {strides = array<i32>} : memref<18x24x128xbf16, #tpu.memory_space<vmem>>, vector<18x24x128xbf16>,
    %35 = arith.truncf %21 : vector<16x16x64xf32> to vector<16x16x64xbf16>
    %c1_33 = arith.constant 1 : index
    %c1_34 = arith.constant 1 : index
    %c0_35 = arith.constant 0 : index
    %36 = vector.load %arg13[%c1_33, %c1_34, %c0_35] : memref<18x24x128xbf16, #tpu.memory_space<vmem>>, vector<16x16x64xbf16>
    tpu.vector_store %arg13[%c1_33, %c1_34, %c0_35], %35 {strides = array<i32>} : memref<18x24x128xbf16, #tpu.memory_space<vmem>>, vector<16x16x64xbf16>,
    %37 = arith.truncf %32 : vector<16x16x32xf32> to vector<16x16x32xbf16>
    %c1_36 = arith.constant 1 : index
    %c1_37 = arith.constant 1 : index
    %c64 = arith.constant 64 : index
    %38 = vector.load %arg13[%c1_36, %c1_37, %c64] : memref<18x24x128xbf16, #tpu.memory_space<vmem>>, vector<16x16x32xbf16>
    tpu.vector_store %arg13[%c1_36, %c1_37, %c64], %37 {strides = array<i32>} : memref<18x24x128xbf16, #tpu.memory_space<vmem>>, vector<16x16x32xbf16>,
    %cst_38 = arith.constant 0.000000e+00 : f32
    %39 = vector.broadcast %cst_38 : f32 to vector<256x64xf32>
    %c0_39 = arith.constant 0 : index
    %c0_40 = arith.constant 0 : index
    %c0_41 = arith.constant 0 : index
    %40 = vector.load %arg13[%c0_39, %c0_40, %c0_41] : memref<18x24x128xbf16, #tpu.memory_space<vmem>>, vector<16x16x128xbf16>
    %41 = vector.shape_cast %40 : vector<16x16x128xbf16> to vector<256x128xbf16>
    %c0_42 = arith.constant 0 : index
    %c0_43 = arith.constant 0 : index
    %c0_44 = arith.constant 0 : index
    %42 = vector.load %arg6[%c0_42, %c0_43, %c0_44] : memref<9x128x64xbf16, #tpu.memory_space<vmem>>, vector<1x128x64xbf16>
    %43 = vector.shape_cast %42 : vector<1x128x64xbf16> to vector<128x64xbf16>
    %cst_45 = arith.constant dense<0.000000e+00> : vector<256x64xf32>
    %44 = tpu.matmul %41, %43, %cst_45 {dimension_numbers = #tpu.dot_dimension_numbers<[1], [0], [0], [1], [0, 0, 1, 1], [], []>} : vector<256x128xbf16>, vector<128x64xbf16>, vector<256x64xf32> -> vector<256x64xf32>
    %45 = arith.addf %39, %44 : vector<256x64xf32>
    %c0_46 = arith.constant 0 : index
    %c1_47 = arith.constant 1 : index
    %c0_48 = arith.constant 0 : index
    %46 = vector.load %arg13[%c0_46, %c1_47, %c0_48] : memref<18x24x128xbf16, #tpu.memory_space<vmem>>, vector<16x16x128xbf16>
    %47 = vector.shape_cast %46 : vector<16x16x128xbf16> to vector<256x128xbf16>
    %c1_49 = arith.constant 1 : index
    %c0_50 = arith.constant 0 : index
    %c0_51 = arith.constant 0 : index
    %48 = vector.load %arg6[%c1_49, %c0_50, %c0_51] : memref<9x128x64xbf16, #tpu.memory_space<vmem>>, vector<1x128x64xbf16>
    %49 = vector.shape_cast %48 : vector<1x128x64xbf16> to vector<128x64xbf16>
    %cst_52 = arith.constant dense<0.000000e+00> : vector<256x64xf32>
    %50 = tpu.matmul %47, %49, %cst_52 {dimension_numbers = #tpu.dot_dimension_numbers<[1], [0], [0], [1], [0, 0, 1, 1], [], []>} : vector<256x128xbf16>, vector<128x64xbf16>, vector<256x64xf32> -> vector<256x64xf32>
    %51 = arith.addf %45, %50 : vector<256x64xf32>
    %c0_53 = arith.constant 0 : index
    %c2 = arith.constant 2 : index
    %c0_54 = arith.constant 0 : index
    %52 = vector.load %arg13[%c0_53, %c2, %c0_54] : memref<18x24x128xbf16, #tpu.memory_space<vmem>>, vector<16x16x128xbf16>
    %53 = vector.shape_cast %52 : vector<16x16x128xbf16> to vector<256x128xbf16>
    %c2_55 = arith.constant 2 : index
    %c0_56 = arith.constant 0 : index
    %c0_57 = arith.constant 0 : index
    %54 = vector.load %arg6[%c2_55, %c0_56, %c0_57] : memref<9x128x64xbf16, #tpu.memory_space<vmem>>, vector<1x128x64xbf16>
    %55 = vector.shape_cast %54 : vector<1x128x64xbf16> to vector<128x64xbf16>
    %cst_58 = arith.constant dense<0.000000e+00> : vector<256x64xf32>
    %56 = tpu.matmul %53, %55, %cst_58 {dimension_numbers = #tpu.dot_dimension_numbers<[1], [0], [0], [1], [0, 0, 1, 1], [], []>} : vector<256x128xbf16>, vector<128x64xbf16>, vector<256x64xf32> -> vector<256x64xf32>
    %57 = arith.addf %51, %56 : vector<256x64xf32>
    %c1_59 = arith.constant 1 : index
    %c0_60 = arith.constant 0 : index
    %c0_61 = arith.constant 0 : index
    %58 = vector.load %arg13[%c1_59, %c0_60, %c0_61] : memref<18x24x128xbf16, #tpu.memory_space<vmem>>, vector<16x16x128xbf16>
    %59 = vector.shape_cast %58 : vector<16x16x128xbf16> to vector<256x128xbf16>
    %c3 = arith.constant 3 : index
    %c0_62 = arith.constant 0 : index
    %c0_63 = arith.constant 0 : index
    %60 = vector.load %arg6[%c3, %c0_62, %c0_63] : memref<9x128x64xbf16, #tpu.memory_space<vmem>>, vector<1x128x64xbf16>
    %61 = vector.shape_cast %60 : vector<1x128x64xbf16> to vector<128x64xbf16>
    %cst_64 = arith.constant dense<0.000000e+00> : vector<256x64xf32>
    %62 = tpu.matmul %59, %61, %cst_64 {dimension_numbers = #tpu.dot_dimension_numbers<[1], [0], [0], [1], [0, 0, 1, 1], [], []>} : vector<256x128xbf16>, vector<128x64xbf16>, vector<256x64xf32> -> vector<256x64xf32>
    %63 = arith.addf %57, %62 : vector<256x64xf32>
    %c1_65 = arith.constant 1 : index
    %c1_66 = arith.constant 1 : index
    %c0_67 = arith.constant 0 : index
    %64 = vector.load %arg13[%c1_65, %c1_66, %c0_67] : memref<18x24x128xbf16, #tpu.memory_space<vmem>>, vector<16x16x128xbf16>
    %65 = vector.shape_cast %64 : vector<16x16x128xbf16> to vector<256x128xbf16>
    %c4 = arith.constant 4 : index
    %c0_68 = arith.constant 0 : index
    %c0_69 = arith.constant 0 : index
    %66 = vector.load %arg6[%c4, %c0_68, %c0_69] : memref<9x128x64xbf16, #tpu.memory_space<vmem>>, vector<1x128x64xbf16>
    %67 = vector.shape_cast %66 : vector<1x128x64xbf16> to vector<128x64xbf16>
    %cst_70 = arith.constant dense<0.000000e+00> : vector<256x64xf32>
    %68 = tpu.matmul %65, %67, %cst_70 {dimension_numbers = #tpu.dot_dimension_numbers<[1], [0], [0], [1], [0, 0, 1, 1], [], []>} : vector<256x128xbf16>, vector<128x64xbf16>, vector<256x64xf32> -> vector<256x64xf32>
    %69 = arith.addf %63, %68 : vector<256x64xf32>
    %c1_71 = arith.constant 1 : index
    %c2_72 = arith.constant 2 : index
    %c0_73 = arith.constant 0 : index
    %70 = vector.load %arg13[%c1_71, %c2_72, %c0_73] : memref<18x24x128xbf16, #tpu.memory_space<vmem>>, vector<16x16x128xbf16>
    %71 = vector.shape_cast %70 : vector<16x16x128xbf16> to vector<256x128xbf16>
    %c5 = arith.constant 5 : index
    %c0_74 = arith.constant 0 : index
    %c0_75 = arith.constant 0 : index
    %72 = vector.load %arg6[%c5, %c0_74, %c0_75] : memref<9x128x64xbf16, #tpu.memory_space<vmem>>, vector<1x128x64xbf16>
    %73 = vector.shape_cast %72 : vector<1x128x64xbf16> to vector<128x64xbf16>
    %cst_76 = arith.constant dense<0.000000e+00> : vector<256x64xf32>
    %74 = tpu.matmul %71, %73, %cst_76 {dimension_numbers = #tpu.dot_dimension_numbers<[1], [0], [0], [1], [0, 0, 1, 1], [], []>} : vector<256x128xbf16>, vector<128x64xbf16>, vector<256x64xf32> -> vector<256x64xf32>
    %75 = arith.addf %69, %74 : vector<256x64xf32>
    %c2_77 = arith.constant 2 : index
    %c0_78 = arith.constant 0 : index
    %c0_79 = arith.constant 0 : index
    %76 = vector.load %arg13[%c2_77, %c0_78, %c0_79] : memref<18x24x128xbf16, #tpu.memory_space<vmem>>, vector<16x16x128xbf16>
    %77 = vector.shape_cast %76 : vector<16x16x128xbf16> to vector<256x128xbf16>
    %c6 = arith.constant 6 : index
    %c0_80 = arith.constant 0 : index
    %c0_81 = arith.constant 0 : index
    %78 = vector.load %arg6[%c6, %c0_80, %c0_81] : memref<9x128x64xbf16, #tpu.memory_space<vmem>>, vector<1x128x64xbf16>
    %79 = vector.shape_cast %78 : vector<1x128x64xbf16> to vector<128x64xbf16>
    %cst_82 = arith.constant dense<0.000000e+00> : vector<256x64xf32>
    %80 = tpu.matmul %77, %79, %cst_82 {dimension_numbers = #tpu.dot_dimension_numbers<[1], [0], [0], [1], [0, 0, 1, 1], [], []>} : vector<256x128xbf16>, vector<128x64xbf16>, vector<256x64xf32> -> vector<256x64xf32>
    %81 = arith.addf %75, %80 : vector<256x64xf32>
    %c2_83 = arith.constant 2 : index
    %c1_84 = arith.constant 1 : index
    %c0_85 = arith.constant 0 : index
    %82 = vector.load %arg13[%c2_83, %c1_84, %c0_85] : memref<18x24x128xbf16, #tpu.memory_space<vmem>>, vector<16x16x128xbf16>
    %83 = vector.shape_cast %82 : vector<16x16x128xbf16> to vector<256x128xbf16>
    %c7 = arith.constant 7 : index
    %c0_86 = arith.constant 0 : index
    %c0_87 = arith.constant 0 : index
    %84 = vector.load %arg6[%c7, %c0_86, %c0_87] : memref<9x128x64xbf16, #tpu.memory_space<vmem>>, vector<1x128x64xbf16>
    %85 = vector.shape_cast %84 : vector<1x128x64xbf16> to vector<128x64xbf16>
    %cst_88 = arith.constant dense<0.000000e+00> : vector<256x64xf32>
    %86 = tpu.matmul %83, %85, %cst_88 {dimension_numbers = #tpu.dot_dimension_numbers<[1], [0], [0], [1], [0, 0, 1, 1], [], []>} : vector<256x128xbf16>, vector<128x64xbf16>, vector<256x64xf32> -> vector<256x64xf32>
    %87 = arith.addf %81, %86 : vector<256x64xf32>
    %c2_89 = arith.constant 2 : index
    %c2_90 = arith.constant 2 : index
    %c0_91 = arith.constant 0 : index
    %88 = vector.load %arg13[%c2_89, %c2_90, %c0_91] : memref<18x24x128xbf16, #tpu.memory_space<vmem>>, vector<16x16x128xbf16>
    %89 = vector.shape_cast %88 : vector<16x16x128xbf16> to vector<256x128xbf16>
    %c8 = arith.constant 8 : index
    %c0_92 = arith.constant 0 : index
    %c0_93 = arith.constant 0 : index
    %90 = vector.load %arg6[%c8, %c0_92, %c0_93] : memref<9x128x64xbf16, #tpu.memory_space<vmem>>, vector<1x128x64xbf16>
    %91 = vector.shape_cast %90 : vector<1x128x64xbf16> to vector<128x64xbf16>
    %cst_94 = arith.constant dense<0.000000e+00> : vector<256x64xf32>
    %92 = tpu.matmul %89, %91, %cst_94 {dimension_numbers = #tpu.dot_dimension_numbers<[1], [0], [0], [1], [0, 0, 1, 1], [], []>} : vector<256x128xbf16>, vector<128x64xbf16>, vector<256x64xf32> -> vector<256x64xf32>
    %93 = arith.addf %87, %92 : vector<256x64xf32>
    %cst_95 = arith.constant 0.000000e+00 : f32
    %94 = vector.broadcast %cst_95 : f32 to vector<256x64xf32>
    %95 = arith.maximumf %93, %94 : vector<256x64xf32>
    %c0_96 = arith.constant 0 : index
    %c0_97 = arith.constant 0 : index
    %96 = vector.load %arg7[%c0_96, %c0_97] : memref<1x64xf32, #tpu.memory_space<vmem>>, vector<1x64xf32>
    %97 = vector.broadcast %96 : vector<1x64xf32> to vector<256x64xf32>
    %98 = arith.mulf %95, %97 : vector<256x64xf32>
    %c0_98 = arith.constant 0 : index
    %c0_99 = arith.constant 0 : index
    %99 = vector.load %arg8[%c0_98, %c0_99] : memref<1x64xf32, #tpu.memory_space<vmem>>, vector<1x64xf32>
    %100 = vector.broadcast %99 : vector<1x64xf32> to vector<256x64xf32>
    %101 = arith.addf %98, %100 : vector<256x64xf32>
    %102 = arith.truncf %101 : vector<256x64xf32> to vector<256x64xbf16>
    %c0_100 = arith.constant 0 : index
    %c0_101 = arith.constant 0 : index
    %103 = vector.load %arg9[%c0_100, %c0_101] : memref<64x16xbf16, #tpu.memory_space<vmem>>, vector<64x16xbf16>
    %cst_102 = arith.constant dense<0.000000e+00> : vector<256x16xf32>
    %104 = tpu.matmul %102, %103, %cst_102 {dimension_numbers = #tpu.dot_dimension_numbers<[1], [0], [0], [1], [0, 0, 1, 1], [], []>} : vector<256x64xbf16>, vector<64x16xbf16>, vector<256x16xf32> -> vector<256x16xf32>
    %105 = vector.extract_strided_slice %104 {offsets = [0, 0], sizes = [256, 8], strides = [1, 1]} : vector<256x16xf32> to vector<256x8xf32>
    %106 = vector.extract_strided_slice %104 {offsets = [0, 8], sizes = [256, 8], strides = [1, 1]} : vector<256x16xf32> to vector<256x8xf32>
    %c0_103 = arith.constant 0 : index
    %c0_104 = arith.constant 0 : index
    %107 = vector.load %arg10[%c0_103, %c0_104] : memref<64x64xbf16, #tpu.memory_space<vmem>>, vector<64x64xbf16>
    %cst_105 = arith.constant dense<0.000000e+00> : vector<256x64xf32>
    %108 = tpu.matmul %102, %107, %cst_105 {dimension_numbers = #tpu.dot_dimension_numbers<[1], [0], [0], [1], [0, 0, 1, 1], [], []>} : vector<256x64xbf16>, vector<64x64xbf16>, vector<256x64xf32> -> vector<256x64xf32>
    %cst_106 = arith.constant dense<0.000000e+00> : vector<256x256xf32>
    %109 = tpu.matmul %106, %105, %cst_106 {dimension_numbers = #tpu.dot_dimension_numbers<[1], [1], [0], [0], [0, 0, 1, 0], [], []>} : vector<256x8xf32>, vector<256x8xf32>, vector<256x256xf32> -> vector<256x256xf32>
    %cst_107 = arith.constant dense<0xFF800000> : vector<256xf32>
    %110 = vector.multi_reduction <maximumf>, %109, %cst_107 [1] : vector<256x256xf32> to vector<256xf32>
    %111 = vector.shape_cast %110 : vector<256xf32> to vector<256x1xf32>
    %112 = vector.broadcast %111 : vector<256x1xf32> to vector<256x256xf32>
    %113 = arith.subf %109, %112 : vector<256x256xf32>
    %114 = math.exp %113 : vector<256x256xf32>
    %cst_108 = arith.constant dense<0.000000e+00> : vector<256xf32>
    %115 = vector.multi_reduction <add>, %114, %cst_108 [1] : vector<256x256xf32> to vector<256xf32>
    %116 = vector.shape_cast %115 : vector<256xf32> to vector<256x1xf32>
    %117 = tpu.reciprocal %116 {approx = true} : vector<256x1xf32> -> vector<256x1xf32>
    %118 = vector.broadcast %117 : vector<256x1xf32> to vector<256x256xf32>
    %119 = arith.mulf %114, %118 : vector<256x256xf32>
    %cst_109 = arith.constant dense<0.000000e+00> : vector<256x64xf32>
    %120 = tpu.matmul %119, %108, %cst_109 {dimension_numbers = #tpu.dot_dimension_numbers<[1], [0], [0], [1], [0, 0, 1, 1], [], []>} : vector<256x256xf32>, vector<256x64xf32>, vector<256x64xf32> -> vector<256x64xf32>
    %c0_110 = arith.constant 0 : index
    %121 = memref.load %arg1[%c0_110] : memref<1xf32, #tpu.memory_space<smem>>
    %122 = vector.broadcast %121 : f32 to vector<256x64xf32>
    %123 = arith.mulf %122, %120 : vector<256x64xf32>
    %124 = arith.addf %123, %101 : vector<256x64xf32>
    %125 = arith.truncf %124 : vector<256x64xf32> to vector<256x64xbf16>
    %c0_111 = arith.constant 0 : index
    %c0_112 = arith.constant 0 : index
    %c0_113 = arith.constant 0 : index
    %126 = vector.load %arg11[%c0_111, %c0_112, %c0_113] : memref<1x256x64xbf16, #tpu.memory_space<vmem>>, vector<1x256x64xbf16>
    %127 = vector.shape_cast %126 : vector<1x256x64xbf16> to vector<256x64xbf16>
    %128 = vector.shape_cast %125 : vector<256x64xbf16> to vector<1x256x64xbf16>
    tpu.vector_store %arg11[%c0_111, %c0_112, %c0_113], %128 {strides = array<i32>} : memref<1x256x64xbf16, #tpu.memory_space<vmem>>, vector<1x256x64xbf16>,
    return
  }
  func.func @transform_0(%arg0: i32) -> i32 {
    %c0_i32 = arith.constant 0 : i32
    %c0_i32_0 = arith.constant 0 : i32
    return %c0_i32 : i32
  }
  func.func @transform_1(%arg0: i32) -> (i32, i32, i32, i32) {
    %c0_i32 = arith.constant 0 : i32
    %c0_i32_0 = arith.constant 0 : i32
    %c0_i32_1 = arith.constant 0 : i32
    %c0_i32_2 = arith.constant 0 : i32
    return %arg0, %c0_i32, %c0_i32_0, %c0_i32_1 : i32, i32, i32, i32
  }
  func.func @transform_2(%arg0: i32) -> (i32, i32, i32, i32) {
    %c0_i32 = arith.constant 0 : i32
    %c0_i32_0 = arith.constant 0 : i32
    %c0_i32_1 = arith.constant 0 : i32
    %c0_i32_2 = arith.constant 0 : i32
    return %arg0, %c0_i32, %c0_i32_0, %c0_i32_1 : i32, i32, i32, i32
  }
  func.func @transform_3(%arg0: i32) -> (i32, i32, i32) {
    %c0_i32 = arith.constant 0 : i32
    %c0_i32_0 = arith.constant 0 : i32
    %c0_i32_1 = arith.constant 0 : i32
    %c0_i32_2 = arith.constant 0 : i32
    return %c0_i32, %c0_i32_0, %c0_i32_1 : i32, i32, i32
  }
  func.func @transform_4(%arg0: i32) -> (i32, i32, i32) {
    %c0_i32 = arith.constant 0 : i32
    %c0_i32_0 = arith.constant 0 : i32
    %c0_i32_1 = arith.constant 0 : i32
    %c0_i32_2 = arith.constant 0 : i32
    return %c0_i32, %c0_i32_0, %c0_i32_1 : i32, i32, i32
  }
  func.func @transform_5(%arg0: i32) -> (i32, i32, i32) {
    %c0_i32 = arith.constant 0 : i32
    %c0_i32_0 = arith.constant 0 : i32
    %c0_i32_1 = arith.constant 0 : i32
    %c0_i32_2 = arith.constant 0 : i32
    return %c0_i32, %c0_i32_0, %c0_i32_1 : i32, i32, i32
  }
  func.func @transform_6(%arg0: i32) -> (i32, i32) {
    %c0_i32 = arith.constant 0 : i32
    %c0_i32_0 = arith.constant 0 : i32
    %c0_i32_1 = arith.constant 0 : i32
    return %c0_i32, %c0_i32_0 : i32, i32
  }
  func.func @transform_7(%arg0: i32) -> (i32, i32) {
    %c0_i32 = arith.constant 0 : i32
    %c0_i32_0 = arith.constant 0 : i32
    %c0_i32_1 = arith.constant 0 : i32
    return %c0_i32, %c0_i32_0 : i32, i32
  }
  func.func @transform_8(%arg0: i32) -> (i32, i32) {
    %c0_i32 = arith.constant 0 : i32
    %c0_i32_0 = arith.constant 0 : i32
    %c0_i32_1 = arith.constant 0 : i32
    return %c0_i32, %c0_i32_0 : i32, i32
  }
  func.func @transform_9(%arg0: i32) -> (i32, i32) {
    %c0_i32 = arith.constant 0 : i32
    %c0_i32_0 = arith.constant 0 : i32
    %c0_i32_1 = arith.constant 0 : i32
    return %c0_i32, %c0_i32_0 : i32, i32
  }
  func.func @transform_10(%arg0: i32) -> (i32, i32, i32) {
    %c0_i32 = arith.constant 0 : i32
    %c0_i32_0 = arith.constant 0 : i32
    %c0_i32_1 = arith.constant 0 : i32
    return %arg0, %c0_i32, %c0_i32_0 : i32, i32, i32
  }
}

</mosaic_0001>

<bundles_post_ra>
// kernel: unet_block_wide_forward.2
= control target key start
LH: loop header
LB: loop body
LE: loop exit
PB: predicated region body
PF: predicated region fallthrough
CT: control target
= control target key end

     0   :  { %v581_v1 = vmov 0   ;;  %vm122_vm0 = vcmask 523264   ;;  %v262_v17 = vlaneseq  ;;  %s789_s1 = inlined_call_operand.vmem [shape: bf16[64,256], index: 1, kind: input, shape index: {}]   ;;  %s790_s0 = inlined_call_operand.vmem [shape: bf16[128,64], index: 0, kind: input, shape index: {}]   ;;  %s791_s2 = inlined_call_operand.vmem [shape: f32[1,256], index: 2, kind: input, shape index: {}]   ;;  %s792_s3 = inlined_call_operand.vmem [shape: f32[1,256], index: 3, kind: input, shape index: {}]   ;;  %s793_s4 = inlined_call_operand.vmem [shape: bf16[128,256], index: 4, kind: output, shape index: {}]  }
   0x1   :  { %v561_v0 = vld [vmem:[%s789_s1 + $0x4] ss:$8 sps:$4 sm:$0xff]   ;;  %179 = vmatprep.mubr.bf16.mxu0 %v581_v1  ;;  %219 = vmatprep.mubr.bf16.mxu1 %v581_v1  ;;  %v563_v2 = vld [vmem:[%s789_s1] ss:$8 sps:$4 sm:$0xff]   ;;  %v564_v3 = vld [vmem:[%s789_s1 + $0x14] ss:$8 sps:$4 sm:$0xff]  }
   0x2   :  { %147 = vmatprep.subr.bf16.mxu0 %v561_v0  ;;  %552 = vmatprep.subr.bf16.mxu1 %v561_v0  ;;  %v566_v4 = vld [vmem:[%s789_s1 + $0x10] ss:$8 sps:$4 sm:$0xff]   ;;  %v567_v5 = vld [vmem:[%s789_s1 + $0x24] ss:$8 sps:$4 sm:$0xff]   ;;  %v569_v6 = vld [vmem:[%s789_s1 + $0x20] ss:$8 sps:$4 sm:$0xff]  }
   0x3   :  { %148 = vmatpush1.bf16.msra.mxu0 %v563_v2  ;;  %556 = vmatpush1.bf16.msra.mxu1 %v563_v2  ;;  %v570_v7 = vld [vmem:[%s789_s1 + $0x34] ss:$8 sps:$4 sm:$0xff]   ;;  %v572_v8 = vld [vmem:[%s789_s1 + $0x30] ss:$8 sps:$4 sm:$0xff]   ;;  %v573_v9 = vld [vmem:[%s790_s0] sm:$0xff]   ;;  %v263_v18 = vshrl.u32 %v262_v17, 7 }
   0x4   :  { %149 = vmatprep.subr.bf16.mxu0 %v564_v3  ;;  %553 = vmatprep.subr.bf16.mxu1 %v564_v3  ;;  %v574_v10 = vld [vmem:[%s790_s0 + $0x20] sm:$0xff]   ;;  %v575_v11 = vld [vmem:[%s790_s0 + $0x8] sm:$0xff]   ;;  %v577_v13 = vld [vmem:[%s790_s0 + $0x10] sm:$0xff]  }
   0x5   :  { %v576_v12 = vld [vmem:[%s790_s0 + $0x28] sm:$0xff]   ;;  %v578_v14 = vld [vmem:[%s790_s0 + $0x30] sm:$0xff]   ;;  %v579_v15 = vld [vmem:[%s790_s0 + $0x18] sm:$0xff]   ;;  %v264_v19 = vsub.s32 0, %v263_v18  ;;  %v268_v21 = vsub.s32 1, %v263_v18 }
   0x6   :  { %v580_v16 = vld [vmem:[%s790_s0 + $0x38] sm:$0xff]   ;;  %v260_v20 = vld [vmem:[%s791_s2] sm:$0x3] }
   0x7   :  { %150 = vmatpush1.bf16.msra.mxu0 %v566_v4  ;;  %557 = vmatpush1.bf16.msra.mxu1 %v566_v4  ;;  %v304_v22 = vld [vmem:[%s792_s3] sm:$0x3]  ;;  %v669_v23 = vrot.slane %v260_v20, %v264_v19  ;;  %v671_v24 = vrot.slane %v260_v20, %v268_v21 }
   0x8   :  { %151 = vmatprep.subr.bf16.mxu0 %v567_v5  ;;  %554 = vmatprep.subr.bf16.mxu1 %v567_v5  ;;  %v673_v25 = vrot.slane %v304_v22, %v264_v19  ;;  %v675_v28 = vrot.slane %v304_v22, %v268_v21 }
   0xb   :  { %152 = vmatpush1.bf16.msra.mxu0 %v569_v6  ;;  %558 = vmatpush1.bf16.msra.mxu1 %v569_v6 }
   0xc   :  { %153 = vmatprep.subr.bf16.mxu0 %v570_v7  ;;  %555 = vmatprep.subr.bf16.mxu1 %v570_v7 }
   0xf   :  { %154 = vmatpush1.bf16.msra.mxu0 %v572_v8  ;;  %559 = vmatpush1.bf16.msra.mxu1 %v572_v8 }
  0x12   :  { %512 = vmatmul.mubr.msk.bf16.vlgmr.msra.gmra.mrb[0].mxu0 %vm122_vm0, %v573_v9  ;;  %516 = vmatmul.mubr.msk.bf16.vlgmr.msra.gmra.mrb[0].mxu1 %vm122_vm0, %v574_v10 }
  0x13   :  { %189 = vmatprep.mubr.bf16.mxu0 %v581_v1  ;;  %229 = vmatprep.mubr.bf16.mxu1 %v581_v1 }
  0x1a   :  { %513 = vmatmul.mubr.msk.bf16.gmra.mrb[4].mxu0 %vm122_vm0, %v575_v11  ;;  %517 = vmatmul.mubr.msk.bf16.gmra.mrb[4].mxu1 %vm122_vm0, %v576_v12 }
  0x1b   :  { %199 = vmatprep.mubr.bf16.mxu0 %v581_v1  ;;  %239 = vmatprep.mubr.bf16.mxu1 %v581_v1 }
  0x22   :  { %514 = vmatmul.mubr.msk.bf16.gmra.mrb[8].mxu0 %vm122_vm0, %v577_v13  ;;  %518 = vmatmul.mubr.msk.bf16.gmra.mrb[8].mxu1 %vm122_vm0, %v578_v14 }
  0x23   :  { %209 = vmatprep.mubr.bf16.mxu0 %v581_v1  ;;  %249 = vmatprep.mubr.bf16.mxu1 %v581_v1 }
  0x2a   :  { %515 = vmatmul.mubr.msk.bf16.gmra.mrb[12].mxu0 %vm122_vm0, %v579_v15  ;;  %519 = vmatmul.mubr.msk.bf16.gmra.mrb[12].mxu1 %vm122_vm0, %v580_v16 }
  0xe5   :  { %v181_v26 = vpop.f32.mrb[0].mxu0  ;;  %v221_v27 = vpop.f32.mrb[0].mxu1 }
  0xe6   :  { %v272_v29 = vmul.f32 %v669_v23, %v181_v26  ;;  %v288_v30 = vmul.f32 %v669_v23, %v221_v27  ;;  %v183_v31 = vpop.f32.mrb[1].mxu0  ;;  %v223_v32 = vpop.f32.mrb[1].mxu1 }
  0xe7   :  { %v273_v33 = vmul.f32 %v671_v24, %v183_v31  ;;  %v289_v34 = vmul.f32 %v671_v24, %v223_v32  ;;  %v185_v35 = vpop.f32.mrb[2].mxu0  ;;  %v225_v36 = vpop.f32.mrb[2].mxu1 }
  0xe8   :  { %v316_v37 = vadd.f32 %v673_v25, %v272_v29  ;;  %v332_v38 = vadd.f32 %v673_v25, %v288_v30  ;;  %v274_v39 = vmul.f32 %v669_v23, %v185_v35  ;;  %v290_v40 = vmul.f32 %v669_v23, %v225_v36  ;;  %v187_v41 = vpop.f32.mrb[3].mxu0  ;;  %v227_v42 = vpop.f32.mrb[3].mxu1 }
  0xe9   :  { %v317_v43 = vadd.f32 %v675_v28, %v273_v33  ;;  %v333_v44 = vadd.f32 %v675_v28, %v289_v34  ;;  %v275_v45 = vmul.f32 %v671_v24, %v187_v41  ;;  %v291_v46 = vmul.f32 %v671_v24, %v227_v42 }
  0xea   :  { %v348_v47 = vmax.f32 %v316_v37, 0.0  ;;  %v364_v48 = vmax.f32 %v332_v38, 0.0  ;;  %v318_v49 = vadd.f32 %v673_v25, %v274_v39  ;;  %v334_v50 = vadd.f32 %v673_v25, %v290_v40 }
  0xeb   :  { %v349_v51 = vmax.f32 %v317_v43, 0.0  ;;  %v365_v52 = vmax.f32 %v333_v44, 0.0  ;;  %v319_v53 = vadd.f32 %v675_v28, %v275_v45  ;;  %v335_v54 = vadd.f32 %v675_v28, %v291_v46 }
  0xec   :  { %v350_v55 = vmax.f32 %v318_v49, 0.0  ;;  %v366_v56 = vmax.f32 %v334_v50, 0.0 }
  0xed   :  { %v536_v57 = vpack.c.bf16 %v349_v51, %v348_v47  ;;  %v544_v58 = vpack.c.bf16 %v365_v52, %v364_v48  ;;  %v351_v59 = vmax.f32 %v319_v53, 0.0  ;;  %v367_v60 = vmax.f32 %v335_v54, 0.0  ;;  %v191_v61 = vpop.f32.mrb[4].mxu0  ;;  %v231_v62 = vpop.f32.mrb[4].mxu1 }
  0xee   :  { %v276_v63 = vmul.f32 %v669_v23, %v191_v61  ;;  %v292_v0 = vmul.f32 %v669_v23, %v231_v62  ;;  %v193_v1 = vpop.f32.mrb[5].mxu0  ;;  %v233_v2 = vpop.f32.mrb[5].mxu1 }
  0xef   :  { %476 = vst [vmem:[%s793_s4] sm:$0xff] %v536_v57  ;;  %484 = vst [vmem:[%s793_s4 + $0x40] sm:$0xff] %v544_v58  ;;  %v537_v3 = vpack.c.bf16 %v351_v59, %v350_v55  ;;  %v545_v4 = vpack.c.bf16 %v367_v60, %v366_v56  ;;  %v277_v5 = vmul.f32 %v671_v24, %v193_v1  ;;  %v195_v7 = vpop.f32.mrb[6].mxu0  ;;  %v235_v8 = vpop.f32.mrb[6].mxu1 }
  0xf0   :  { %v293_v6 = vmul.f32 %v671_v24, %v233_v2  ;;  %v320_v9 = vadd.f32 %v673_v25, %v276_v63  ;;  %v336_v10 = vadd.f32 %v673_v25, %v292_v0  ;;  %v278_v11 = vmul.f32 %v669_v23, %v195_v7  ;;  %v197_v13 = vpop.f32.mrb[7].mxu0  ;;  %v237_v14 = vpop.f32.mrb[7].mxu1 }
  0xf1   :  { %v294_v12 = vmul.f32 %v669_v23, %v235_v8  ;;  %477 = vst [vmem:[%s793_s4 + $0x8] sm:$0xff] %v537_v3  ;;  %485 = vst [vmem:[%s793_s4 + $0x48] sm:$0xff] %v545_v4  ;;  %v321_v15 = vadd.f32 %v675_v28, %v277_v5  ;;  %v279_v17 = vmul.f32 %v671_v24, %v197_v13 }
  0xf2   :  { %v337_v16 = vadd.f32 %v675_v28, %v293_v6  ;;  %v295_v18 = vmul.f32 %v671_v24, %v237_v14  ;;  %v352_v19 = vmax.f32 %v320_v9, 0.0  ;;  %v368_v20 = vmax.f32 %v336_v10, 0.0 }
  0xf3   :  { %v322_v21 = vadd.f32 %v673_v25, %v278_v11  ;;  %v338_v22 = vadd.f32 %v673_v25, %v294_v12  ;;  %v353_v26 = vmax.f32 %v321_v15, 0.0  ;;  %v323_v29 = vadd.f32 %v675_v28, %v279_v17 }
  0xf4   :  { %v369_v27 = vmax.f32 %v337_v16, 0.0  ;;  %v339_v30 = vadd.f32 %v675_v28, %v295_v18 }
  0xf5   :  { %v354_v31 = vmax.f32 %v322_v21, 0.0  ;;  %v370_v32 = vmax.f32 %v338_v22, 0.0  ;;  %v538_v33 = vpack.c.bf16 %v353_v26, %v352_v19  ;;  %v355_v35 = vmax.f32 %v323_v29, 0.0  ;;  %v201_v37 = vpop.f32.mrb[8].mxu0  ;;  %v241_v38 = vpop.f32.mrb[8].mxu1 }
  0xf6   :  { %v546_v34 = vpack.c.bf16 %v369_v27, %v368_v20  ;;  %v371_v36 = vmax.f32 %v339_v30, 0.0  ;;  %v280_v39 = vmul.f32 %v669_v23, %v201_v37  ;;  %v296_v40 = vmul.f32 %v669_v23, %v241_v38  ;;  %v203_v41 = vpop.f32.mrb[9].mxu0  ;;  %v243_v42 = vpop.f32.mrb[9].mxu1 }
  0xf7   :  { %478 = vst [vmem:[%s793_s4 + $0x10] sm:$0xff] %v538_v33  ;;  %v539_v43 = vpack.c.bf16 %v355_v35, %v354_v31  ;;  %v281_v45 = vmul.f32 %v671_v24, %v203_v41  ;;  %v297_v46 = vmul.f32 %v671_v24, %v243_v42  ;;  %v205_v47 = vpop.f32.mrb[10].mxu0  ;;  %v245_v48 = vpop.f32.mrb[10].mxu1 }
  0xf8   :  { %486 = vst [vmem:[%s793_s4 + $0x50] sm:$0xff] %v546_v34  ;;  %v547_v44 = vpack.c.bf16 %v371_v36, %v370_v32  ;;  %v324_v49 = vadd.f32 %v673_v25, %v280_v39  ;;  %v340_v50 = vadd.f32 %v673_v25, %v296_v40  ;;  %v282_v51 = vmul.f32 %v669_v23, %v205_v47  ;;  %v207_v53 = vpop.f32.mrb[11].mxu0  ;;  %v247_v54 = vpop.f32.mrb[11].mxu1 }
  0xf9   :  { %v298_v52 = vmul.f32 %v669_v23, %v245_v48  ;;  %479 = vst [vmem:[%s793_s4 + $0x18] sm:$0xff] %v539_v43  ;;  %v325_v55 = vadd.f32 %v675_v28, %v281_v45  ;;  %v341_v56 = vadd.f32 %v675_v28, %v297_v46  ;;  %v283_v57 = vmul.f32 %v671_v24, %v207_v53 }
  0xfa   :  { %487 = vst [vmem:[%s793_s4 + $0x58] sm:$0xff] %v547_v44  ;;  %v299_v58 = vmul.f32 %v671_v24, %v247_v54  ;;  %v356_v59 = vmax.f32 %v324_v49, 0.0  ;;  %v372_v60 = vmax.f32 %v340_v50, 0.0  ;;  %v326_v61 = vadd.f32 %v673_v25, %v282_v51 }
  0xfb   :  { %v342_v62 = vadd.f32 %v673_v25, %v298_v52  ;;  %v357_v63 = vmax.f32 %v325_v55, 0.0  ;;  %v373_v0 = vmax.f32 %v341_v56, 0.0  ;;  %v327_v1 = vadd.f32 %v675_v28, %v283_v57 }
  0xfc   :  { %v343_v2 = vadd.f32 %v675_v28, %v299_v58  ;;  %v358_v3 = vmax.f32 %v326_v61, 0.0 }
  0xfd   :  { %v374_v4 = vmax.f32 %v342_v62, 0.0  ;;  %v540_v5 = vpack.c.bf16 %v357_v63, %v356_v59  ;;  %v548_v6 = vpack.c.bf16 %v373_v0, %v372_v60  ;;  %v359_v7 = vmax.f32 %v327_v1, 0.0  ;;  %v211_v9 = vpop.f32.mrb[12].mxu0  ;;  %v251_v10 = vpop.f32.mrb[12].mxu1 }
  0xfe   :  { %v375_v8 = vmax.f32 %v343_v2, 0.0  ;;  %v284_v11 = vmul.f32 %v669_v23, %v211_v9  ;;  %v300_v12 = vmul.f32 %v669_v23, %v251_v10  ;;  %v213_v13 = vpop.f32.mrb[13].mxu0  ;;  %v253_v14 = vpop.f32.mrb[13].mxu1 }
  0xff   :  { %480 = vst [vmem:[%s793_s4 + $0x20] sm:$0xff] %v540_v5  ;;  %488 = vst [vmem:[%s793_s4 + $0x60] sm:$0xff] %v548_v6  ;;  %v541_v15 = vpack.c.bf16 %v359_v7, %v358_v3  ;;  %v285_v17 = vmul.f32 %v671_v24, %v213_v13  ;;  %v301_v18 = vmul.f32 %v671_v24, %v253_v14  ;;  %v215_v19 = vpop.f32.mrb[14].mxu0  ;;  %v255_v20 = vpop.f32.mrb[14].mxu1 }
 0x100   :  { %v549_v16 = vpack.c.bf16 %v375_v8, %v374_v4  ;;  %v328_v21 = vadd.f32 %v673_v25, %v284_v11  ;;  %v344_v22 = vadd.f32 %v673_v25, %v300_v12  ;;  %v286_v26 = vmul.f32 %v669_v23, %v215_v19  ;;  %v217_v29 = vpop.f32.mrb[15].mxu0  ;;  %v257_v30 = vpop.f32.mrb[15].mxu1 }
 0x101   :  { %v302_v27 = vmul.f32 %v669_v23, %v255_v20  ;;  %481 = vst [vmem:[%s793_s4 + $0x28] sm:$0xff] %v541_v15  ;;  %v329_v31 = vadd.f32 %v675_v28, %v285_v17  ;;  %v345_v32 = vadd.f32 %v675_v28, %v301_v18  ;;  %v287_v33 = vmul.f32 %v671_v24, %v217_v29 }
 0x102   :  { %489 = vst [vmem:[%s793_s4 + $0x68] sm:$0xff] %v549_v16  ;;  %v303_v34 = vmul.f32 %v671_v24, %v257_v30  ;;  %v360_v35 = vmax.f32 %v328_v21, 0.0  ;;  %v376_v23 = vmax.f32 %v344_v22, 0.0  ;;  %v330_v36 = vadd.f32 %v673_v25, %v286_v26 }
 0x103   :  { %v346_v37 = vadd.f32 %v673_v25, %v302_v27  ;;  %v361_v38 = vmax.f32 %v329_v31, 0.0  ;;  %v377_v39 = vmax.f32 %v345_v32, 0.0  ;;  %v331_v40 = vadd.f32 %v675_v28, %v287_v33 }
 0x104   :  { %v347_v41 = vadd.f32 %v675_v28, %v303_v34  ;;  %v362_v42 = vmax.f32 %v330_v36, 0.0 }
 0x105   :  { %v378_v43 = vmax.f32 %v346_v37, 0.0  ;;  %v542_v44 = vpack.c.bf16 %v361_v38, %v360_v35  ;;  %v550_v45 = vpack.c.bf16 %v377_v39, %v376_v23  ;;  %v363_v46 = vmax.f32 %v331_v40, 0.0 }
 0x106   :  { %v379_v47 = vmax.f32 %v347_v41, 0.0 }
 0x107   :  { %482 = vst [vmem:[%s793_s4 + $0x30] sm:$0xff] %v542_v44  ;;  %490 = vst [vmem:[%s793_s4 + $0x70] sm:$0xff] %v550_v45  ;;  %v543_v24 = vpack.c.bf16 %v363_v46, %v362_v42 }
 0x108   :  { %v551_v25 = vpack.c.bf16 %v379_v47, %v378_v43 }
 0x109   :  { %483 = vst [vmem:[%s793_s4 + $0x38] sm:$0xff] %v543_v24 }
 0x10a   :  { %491 = vst [vmem:[%s793_s4 + $0x78] sm:$0xff] %v551_v25 }

// kernel: unet_block_wide_forward.3
= control target key start
LH: loop header
LB: loop body
LE: loop exit
PB: predicated region body
PF: predicated region fallthrough
CT: control target
= control target key end

     0   :  { %s11938_s15 = smov 0   ;;  %s16274_s0 = inlined_call_operand.<no memory space> [shape: f32[1], index: 0, kind: input, shape index: {}]   ;;  %s16275_s1 = inlined_call_operand.vmem [shape: bf16[2,16,16,64], index: 1, kind: input, shape index: {}]   ;;  %s16276_s2 = inlined_call_operand.vmem [shape: bf16[2,16,16,32], index: 2, kind: input, shape index: {}]   ;;  %s16277_s3 = inlined_call_operand.vmem [shape: f32[1,1,32], index: 3, kind: input, shape index: {}]   ;;  %s16278_s4 = inlined_call_operand.vmem [shape: f32[1,1,32], index: 4, kind: input, shape index: {}]   ;;  %s16279_s5 = inlined_call_operand.vmem [shape: bf16[9,128,64], index: 5, kind: input, shape index: {}]   ;;  %s16280_s6 = inlined_call_operand.vmem [shape: f32[1,64], index: 6, kind: input, shape index: {}]   ;;  %s16281_s7 = inlined_call_operand.vmem [shape: f32[1,64], index: 7, kind: input, shape index: {}]   ;;  %s16282_s8 = inlined_call_operand.vmem [shape: bf16[64,16], index: 8, kind: input, shape index: {}]   ;;  %s16283_s9 = inlined_call_operand.vmem [shape: bf16[64,64], index: 9, kind: input, shape index: {}]   ;;  %s16284_s10 = inlined_call_operand.vmem [shape: bf16[2,256,64], index: 10, kind: output, shape index: {}]  }
   0x1   :  { %15 = sst [smem:[#allocation4]] %s16274_s0 }
   0x2 LB: > { %s9420_s16 = sadd.s32 4294967295, %s11874_s15   ;;  %p9424_p0 = scmp.ge.s32.totalorder %s11874_s15, 1  ;;  %s11874_s15 = sphi %s11938_s15, %s21_s15  }
   0x3   : > { %p323_p1 = scmp.lt.s32.totalorder %s11874_s15, 3 }
   0x5   : > { %p324_p2 = pnand %p9424_p0, %p323_p1 }
   0x7   : > { %327 = sbr.rel (%p324_p2) target bundleno = 2146 (0x862), region = 60 }
   0xe   : > { %p366_p3 = scmp.lt.s32.totalorder %s9420_s16, 1  ;;  %v11527_v0 = vld [vmem:[%s16279_s5] sm:$0xff]   ;;  %v11959_v2 = vld [vmem:[%s16279_s5 + $0x8] sm:$0xff]   ;;  %v11970_v3 = vld [vmem:[%s16279_s5 + $0x10] sm:$0xff]   ;;  %v11876_v7 = vmov 0   ;;  %s11877_s19 = smov 64  }
   0xf   : > { %10683 = vmatprep.subr.bf16.mxu0 %v11527_v0  ;;  %v11954_v1 = vld [vmem:[%s16277_s3] ss:$0 sm:$0xff]  ;;  %1573 = vst [vmem:[#allocation3 + $0x18] sm:$0xf] %v11876_v7  ;;  %1567 = vst [vmem:[#allocation3] sm:$0xf] %v11876_v7 }
  0x10   : > { %s16691_s16 = smov (!%p366_p3, %s9420_s16), 1  ;;  %10684 = vmatpush3.bf16.msra.mxu0 %v11527_v0  ;;  %1568 = vst [vmem:[#allocation3 + $0x4] sm:$0xf] %v11876_v7  ;;  %1569 = vst [vmem:[#allocation3 + $0x8] sm:$0xf] %v11876_v7  ;;  %v11530_v30 = vld [vmem:[%s16279_s5 + $0x18] sm:$0xff]  }
  0x11   : > { %s11949_s0 = sshll.u32 %s16691_s16, 7  ;;  %10685 = vmatprep.subr.bf16.mxu0 %v11959_v2  ;;  %1570 = vst [vmem:[#allocation3 + $0xc] sm:$0xf] %v11876_v7  ;;  %1571 = vst [vmem:[#allocation3 + $0x10] sm:$0xf] %v11876_v7  ;;  %v11531_v39 = vld [vmem:[%s16279_s5 + $0x20] sm:$0xff]  }
  0x12   : > { %s11965_s25 = scalar_lea.vmem %s16276_s2, %s11949_s0  ;;  %1572 = vst [vmem:[#allocation3 + $0x14] sm:$0xf] %v11876_v7  ;;  %1574 = vst [vmem:[#allocation3 + $0x1c] sm:$0xf] %v11876_v7  ;;  %v11990_v13 = vld [vmem:[%s16278_s4] ss:$0 sm:$0xff]  ;;  %s12226_s23 = scalar_lea.vmem %s16275_s1, %s11949_s0 }
  0x13   : > { %v11973_v4 = vld [vmem:[%s11965_s25 + $0x8] sm:$0xff]   ;;  %v11976_v5 = vld [vmem:[%s11965_s25] sm:$0xff]   ;;  %v11979_v6 = vld [vmem:[%s11965_s25 + $0x10] sm:$0xff]   ;;  %1575 = vst [vmem:[#allocation3 + $0x20] sm:$0xf] %v11876_v7  ;;  %vm738_vm3 = vcmask 519168   ;;  %s16143_s17 = scalar_lea.vmem %s16284_s10, %s11949_s0 }
  0x14   : > { %1576 = vst [vmem:[#allocation3 + $0x24] sm:$0xf] %v11876_v7  ;;  %1577 = vst [vmem:[#allocation3 + $0x28] sm:$0xf] %v11876_v7  ;;  %v10202_v8 = vunpack.c.l.bf16 %v11973_v4  ;;  %v10203_v9 = vunpack.c.h.bf16 %v11973_v4  ;;  %v10198_v10 = vunpack.c.l.bf16 %v11976_v5  ;;  %v10199_v11 = vunpack.c.h.bf16 %v11976_v5  ;;  %v10270_v12 = vld [vmem:[%s11965_s25 + $0x18] sm:$0xff]   ;;  %10686 = vmatpush3.bf16.msra.mxu0 %v11959_v2  ;;  %v11532_v0 = vld [vmem:[%s16279_s5 + $0x28] sm:$0xff]  }
  0x15   : > { %1578 = vst [vmem:[#allocation3 + $0x2c] sm:$0xf] %v11876_v7  ;;  %1579 = vst [vmem:[#allocation3 + $0x30] sm:$0xf] %v11876_v7  ;;  %v10206_v14 = vunpack.c.l.bf16 %v11979_v6  ;;  %v10207_v15 = vunpack.c.h.bf16 %v11979_v6  ;;  %v10210_v16 = vunpack.c.l.bf16 %v10270_v12  ;;  %v10211_v17 = vunpack.c.h.bf16 %v10270_v12  ;;  %10687 = vmatprep.subr.bf16.mxu0 %v11970_v3  ;;  %s9127_s13 = sld [smem:[#allocation4]] }
  0x16   : > { %1580 = vst [vmem:[#allocation3 + $0x34] sm:$0xf] %v11876_v7  ;;  %1581 = vst [vmem:[#allocation3 + $0x38] sm:$0xf] %v11876_v7  ;;  %v1466_v18 = vmul.f32 %v10202_v8, %v11954_v1  ;;  %v1464_v19 = vmul.f32 %v10198_v10, %v11954_v1  ;;  %v1467_v20 = vmul.f32 %v10203_v9, %v11954_v1  ;;  %vm414_vm0 = vsmask.f32 256 }
  0x17   : > { %1582 = vst [vmem:[#allocation3 + $0x3c] sm:$0xf] %v11876_v7  ;;  %1583 = vst [vmem:[#allocation3 + $0x40] sm:$0xf] %v11876_v7  ;;  %v1465_v21 = vmul.f32 %v10199_v11, %v11954_v1  ;;  %vm415_vm1 = vsmask.f32 4368  ;;  %v1468_v22 = vmul.f32 %v10206_v14, %v11954_v1  ;;  %v1469_v23 = vmul.f32 %v10207_v15, %v11954_v1 }
  0x18   : > { %1584 = vst [vmem:[#allocation3 + $0x44] sm:$0xf] %v11876_v7  ;;  %1585 = vst [vmem:[#allocation3 + $0x48] sm:$0xf] %v11876_v7  ;;  %v1470_v24 = vmul.f32 %v10210_v16, %v11954_v1  ;;  %v1471_v25 = vmul.f32 %v10211_v17, %v11954_v1  ;;  %v1505_v26 = vadd.f32 %v11990_v13, %v1466_v18  ;;  %10688 = vmatpush3.bf16.msra.mxu0 %v11970_v3  ;;  %v11533_v11 = vld [vmem:[%s16279_s5 + $0x30] sm:$0xff]   ;;  %v10271_v17 = vld [vmem:[%s11965_s25 + $0x20] sm:$0xff]  }
  0x19   : > { %1586 = vst [vmem:[#allocation3 + $0x4c] sm:$0xf] %v11876_v7  ;;  %1587 = vst [vmem:[#allocation3 + $0x50] sm:$0xf] %v11876_v7  ;;  %v1503_v27 = vadd.f32 %v11990_v13, %v1464_v19  ;;  %v1506_v28 = vadd.f32 %v11990_v13, %v1467_v20  ;;  %v1504_v29 = vadd.f32 %v11990_v13, %v1465_v21  ;;  %10689 = vmatprep.subr.bf16.mxu0 %v11530_v30  ;;  %vm739_vm4 = vsmask.f32 7938 }
  0x1a   : > { %1588 = vst [vmem:[#allocation3 + $0x54] sm:$0xf] %v11876_v7  ;;  %1589 = vst [vmem:[#allocation3 + $0x58] sm:$0xf] %v11876_v7  ;;  %v1507_v31 = vadd.f32 %v11990_v13, %v1468_v22  ;;  %v1508_v32 = vadd.f32 %v11990_v13, %v1469_v23  ;;  %v1509_v33 = vadd.f32 %v11990_v13, %v1470_v24  ;;  %v1537_v35 = vmax.f32 %v1505_v26, 0.0  ;;  %v10272_v22 = vld [vmem:[%s11965_s25 + $0x28] sm:$0xff]  }
  0x1b   : > { %1590 = vst [vmem:[#allocation3 + $0x5c] sm:$0xf] %v11876_v7  ;;  %1591 = vst [vmem:[#allocation3 + $0x60] sm:$0xf] %v11876_v7  ;;  %v1510_v34 = vadd.f32 %v11990_v13, %v1471_v25  ;;  %v1535_v36 = vmax.f32 %v1503_v27, 0.0  ;;  %v1538_v37 = vmax.f32 %v1506_v28, 0.0 }
  0x1c   : > { %1592 = vst [vmem:[#allocation3 + $0x64] sm:$0xf] %v11876_v7  ;;  %1593 = vst [vmem:[#allocation3 + $0x68] sm:$0xf] %v11876_v7  ;;  %v1536_v38 = vmax.f32 %v1504_v29, 0.0  ;;  %v1539_v40 = vmax.f32 %v1507_v31, 0.0  ;;  %v10098_v44 = vpack.c.bf16 %v1537_v35, %v1537_v35  ;;  %10690 = vmatpush3.bf16.msra.mxu0 %v11530_v30  ;;  %v10214_v31 = vunpack.c.l.bf16 %v10271_v17 }
  0x1d   : > { %1594 = vst [vmem:[#allocation3 + $0x6c] sm:$0xf] %v11876_v7  ;;  %1595 = vst [vmem:[#allocation3 + $0x70] sm:$0xf] %v11876_v7  ;;  %v1540_v41 = vmax.f32 %v1508_v32, 0.0  ;;  %v1541_v42 = vmax.f32 %v1509_v33, 0.0  ;;  %v10096_v45 = vpack.c.bf16 %v1535_v36, %v1535_v36  ;;  %v10099_v46 = vpack.c.bf16 %v1538_v37, %v1538_v37  ;;  %10691 = vmatprep.subr.bf16.mxu0 %v11531_v39 }
  0x1e   : > { %1596 = vst [vmem:[#allocation3 + $0x74] sm:$0xf] %v11876_v7  ;;  %1597 = vst [vmem:[#allocation3 + $0x78] sm:$0xf] %v11876_v7  ;;  %v1542_v43 = vmax.f32 %v1510_v34, 0.0  ;;  %v10097_v47 = vpack.c.bf16 %v1536_v38, %v1536_v38  ;;  %v10100_v48 = vpack.c.bf16 %v1539_v40, %v1539_v40  ;;  %v2056_v52 = vshrl.u32 %v10098_v44, 16 }
  0x1f   : > { %1598 = vst [vmem:[#allocation3 + $0x7c] sm:$0xf] %v11876_v7  ;;  %1599 = vst [vmem:[#allocation3 + $0x80] sm:$0xf] %v11876_v7  ;;  %v10101_v49 = vpack.c.bf16 %v1540_v41, %v1540_v41  ;;  %v12019_v50 = vpack.c.bf16 %v1541_v42, %v1541_v42  ;;  %v2059_v53 = vshll.u32 %v10098_v44, 16  ;;  %v2039_v54 = vshrl.u32 %v10096_v45, 16 }
  0x20   : > { %1600 = vst [vmem:[#allocation3 + $0x84] sm:$0xf] %v11876_v7  ;;  %1601 = vst [vmem:[#allocation3 + $0x88] sm:$0xf] %v11876_v7  ;;  %v10103_v51 = vpack.c.bf16 %v1542_v43, %v1542_v43  ;;  %v2042_v55 = vshll.u32 %v10096_v45, 16  ;;  %v2064_v56 = vshrl.u32 %v10099_v46, 16  ;;  %10692 = vmatpush3.bf16.msra.mxu0 %v11531_v39  ;;  %v10215_v33 = vunpack.c.h.bf16 %v10271_v17 }
  0x21   : > { %1602 = vst [vmem:[#allocation3 + $0x8c] sm:$0xf] %v11876_v7  ;;  %1603 = vst [vmem:[#allocation3 + $0x90] sm:$0xf] %v11876_v7  ;;  %v2067_v57 = vshll.u32 %v10099_v46, 16  ;;  %v2047_v58 = vshrl.u32 %v10097_v47, 16  ;;  %10693 = vmatprep.subr.bf16.mxu0 %v11532_v0  ;;  %v10218_v34 = vunpack.c.l.bf16 %v10272_v22  ;;  %v10219_v35 = vunpack.c.h.bf16 %v10272_v22 }
  0x22   : > { %1604 = vst [vmem:[#allocation3 + $0x94] sm:$0xf] %v11876_v7  ;;  %1605 = vst [vmem:[#allocation3 + $0x98] sm:$0xf] %v11876_v7  ;;  %v2050_v59 = vshll.u32 %v10097_v47, 16  ;;  %v2058_v60 = vrot.slane %v2056_v52, 7  ;;  %v1472_v39 = vmul.f32 %v10214_v31, %v11954_v1  ;;  %v1473_v41 = vmul.f32 %v10215_v33, %v11954_v1 }
  0x23   : > { %1606 = vst [vmem:[#allocation3 + $0x9c] sm:$0xf] %v11876_v7  ;;  %1607 = vst [vmem:[#allocation3 + $0xa0] sm:$0xf] %v11876_v7  ;;  %v2041_v61 = vrot.slane %v2039_v54, 7  ;;  %v2073_v62 = vshrl.u32 %v10100_v48, 16  ;;  %v1474_v42 = vmul.f32 %v10218_v34, %v11954_v1  ;;  %v1475_v43 = vmul.f32 %v10219_v35, %v11954_v1 }
  0x24   : > { %1608 = vst [vmem:[#allocation3 + $0xa4] sm:$0xf] %v11876_v7  ;;  %1609 = vst [vmem:[#allocation3 + $0xa8] sm:$0xf] %v11876_v7  ;;  %v2081_v63 = vshrl.u32 %v10101_v49, 16  ;;  %v12024_v2 = vrot.slane %v2064_v56, 7  ;;  %v2061_v6 = vor.u32 %v2059_v53, %v2058_v60  ;;  %10694 = vmatpush3.bf16.msra.mxu0 %v11532_v0  ;;  %v1511_v46 = vadd.f32 %v11990_v13, %v1472_v39 }
  0x25   : > { %1610 = vst [vmem:[#allocation3 + $0xac] sm:$0xf] %v11876_v7  ;;  %1611 = vst [vmem:[#allocation3 + $0xb0] sm:$0xf] %v11876_v7  ;;  %v12026_v3 = vrot.slane %v2047_v58, 7  ;;  %v2084_v4 = vshll.u32 %v10101_v49, 16  ;;  %v2044_v8 = vor.u32 %v2042_v55, %v2041_v61  ;;  %10695 = vmatprep.subr.bf16.mxu0 %v11533_v11  ;;  %v1512_v49 = vadd.f32 %v11990_v13, %v1473_v41 }
  0x26   : > { %1612 = vst [vmem:[#allocation3 + $0xb4] sm:$0xf] %v11876_v7  ;;  %1613 = vst [vmem:[#allocation3 + $0xb8] sm:$0xf] %v11876_v7  ;;  %v2076_v5 = vshll.u32 %v10100_v48, 16  ;;  %v2045_v9 = vrot.slane %v2041_v61, 4  ;;  %v2069_v12 = vor.u32 %v2067_v57, %v12024_v2  ;;  %2316 = vrot.lane.b32.xlu1 %v2061_v6, %s11877_s19 }
  0x27   : > { %1614 = vst [vmem:[#allocation3 + $0xbc] sm:$0xf] %v11876_v7  ;;  %1615 = vst [vmem:[#allocation3 + $0xc0] sm:$0xf] %v11876_v7  ;;  %v2052_v14 = vor.u32 %v2050_v59, %v12026_v3  ;;  %v2075_v15 = vrot.slane %v2073_v62, 7  ;;  %v12039_v16 = vrot.slane %v2081_v63, 7  ;;  %2310 = vrot.lane.b32.xlu0 %v2044_v8, %s11877_s19 }
  0x28   : > { %1616 = vst [vmem:[#allocation3 + $0xc4] sm:$0xf] %v11876_v7  ;;  %1617 = vst [vmem:[#allocation3 + $0xc8] sm:$0xf] %v11876_v7  ;;  %v2090_v18 = vshrl.u32 %v12019_v50, 16  ;;  %v2098_v19 = vshrl.u32 %v10103_v51, 16  ;;  %10696 = vmatpush3.bf16.msra.mxu0 %v11533_v11 }
  0x29   : > { %1618 = vst [vmem:[#allocation3 + $0xcc] sm:$0xf] %v11876_v7  ;;  %1619 = vst [vmem:[#allocation3 + $0xd0] sm:$0xf] %v11876_v7  ;;  %v2101_v20 = vshll.u32 %v10103_v51, 16  ;;  %v2093_v21 = vshll.u32 %v12019_v50, 16  ;;  %v2086_v26 = vor.u32 %v2084_v4, %v12039_v16  ;;  %v2078_v32 = vor.u32 %v2076_v5, %v2075_v15 }
  0x2a   : > { %1620 = vst [vmem:[#allocation3 + $0xd4] sm:$0xf] %v11876_v7  ;;  %v2062_v7 = vrot.slane %v2058_v60, 4  ;;  %vm12030_vm2 = vmor %vm414_vm0, %vm415_vm1  ;;  %v2079_v25 = vrot.slane %v2075_v15, 4  ;;  %v10273_v27 = vld [vmem:[%s11965_s25 + $0x30] sm:$0xff]   ;;  %v11534_v28 = vld [vmem:[%s16279_s5 + $0x38] sm:$0xff]   ;;  %v1513_v50 = vadd.f32 %v11990_v13, %v1474_v42  ;;  %v1514_v51 = vadd.f32 %v11990_v13, %v1475_v43 }
  0x2b   : > { %v2053_v24 = vsel %vm12030_vm2, %v2045_v9, %v2052_v14  ;;  %v2092_v29 = vrot.slane %v2090_v18, 7  ;;  %v12056_v30 = vrot.slane %v2098_v19, 7  ;;  %v11535_v40 = vld [vmem:[%s16279_s5 + $0x40] sm:$0xff]   ;;  %v10222_v44 = vunpack.c.l.bf16 %v10273_v27  ;;  %10697 = vmatprep.subr.bf16.mxu0 %v11534_v28  ;;  %v11540_v57 = vld [vmem:[%s16279_s5 + $0x48] sm:$0xff]   ;;  %v10274_v62 = vld [vmem:[%s11965_s25 + $0x38] sm:$0xff]  }
  0x2c   : > { %v2070_v23 = vsel %vm12030_vm2, %v2062_v7, %v2069_v12  ;;  %2312 = vrot.lane.b32.xlu0 %v2053_v24, %s11877_s19  ;;  %v2087_v36 = vsel %vm12030_vm2, %v2079_v25, %v2086_v26  ;;  %v10223_v47 = vunpack.c.h.bf16 %v10273_v27  ;;  %10635 = vmatprep.subr.bf16.mxu1 %v11535_v40  ;;  %v11537_v48 = vld [vmem:[%s16279_s5 + $0x80] sm:$0xff]   ;;  %v1543_v54 = vmax.f32 %v1511_v46, 0.0  ;;  %v10276_v43 = vld [vmem:[%s11965_s25 + $0x48] sm:$0xff]   ;;  %vm12286_vm6 = vmand %vm738_vm3, %vm739_vm4 }
  0x2d   : > { %2318 = vrot.lane.b32.xlu1 %v2070_v23, %s11877_s19  ;;  %v2096_v37 = vrot.slane %v2092_v29, 4  ;;  %v2103_v38 = vor.u32 %v2101_v20, %v12056_v30  ;;  %v2095_v45 = vor.u32 %v2093_v21, %v2092_v29  ;;  %v1476_v52 = vmul.f32 %v10222_v44, %v11954_v1  ;;  %10636 = vmatpush3.bf16.msra.mxu1 %v11535_v40  ;;  %v10275_v42 = vld [vmem:[%s11965_s25 + $0x40] sm:$0xff]   ;;  %v11542_v44 = vld [vmem:[%s16279_s5 + $0x50] sm:$0xff]  }
  0x2e   : > { %v1477_v55 = vmul.f32 %v10223_v47, %v11954_v1  ;;  %v2071_v56 = vrot.slane %v12024_v2, 4  ;;  %v1544_v58 = vmax.f32 %v1512_v49, 0.0  ;;  %v1545_v59 = vmax.f32 %v1513_v50, 0.0  ;;  %10698 = vmatpush3.bf16.msra.mxu0 %v11534_v28  ;;  %10637 = vmatprep.subr.bf16.mxu1 %v11540_v57 }
  0x2f   : > { %v2104_v53 = vsel %vm12030_vm2, %v2096_v37, %v2103_v38  ;;  %v1546_v60 = vmax.f32 %v1514_v51, 0.0  ;;  %v1515_v61 = vadd.f32 %v11990_v13, %v1476_v52  ;;  %v10104_v63 = vpack.c.bf16 %v1543_v54, %v1543_v54  ;;  %10731 = vmatprep.subr.bf16.mxu0 %v11537_v48 }
  0x30   : > { %2322 = vrot.lane.b32.xlu0 %v2078_v32, %s11877_s19  ;;  %v1516_v0 = vadd.f32 %v11990_v13, %v1477_v55  ;;  %v2054_v4 = vrot.slane %v12026_v3, 4  ;;  %v2105_v5 = vrot.slane %v12056_v30, 4  ;;  %v10105_v6 = vpack.c.bf16 %v1544_v58, %v1544_v58  ;;  %v10277_v58 = vld [vmem:[%s11965_s25 + $0x50] sm:$0xff]  }
  0x31   : > { %2324 = vrot.lane.b32.xlu1 %v2087_v36, %s11877_s19  ;;  %v10106_v7 = vpack.c.bf16 %v1545_v59, %v1545_v59  ;;  %v10107_v8 = vpack.c.bf16 %v1546_v60, %v1546_v60  ;;  %v1547_v9 = vmax.f32 %v1515_v61, 0.0  ;;  %10638 = vmatpush3.bf16.msra.mxu1 %v11540_v57  ;;  %v2107_v11 = vshrl.u32 %v10104_v63, 16 }
  0x32   : > { %v2110_v12 = vshll.u32 %v10104_v63, 16  ;;  %v1548_v14 = vmax.f32 %v1516_v0, 0.0  ;;  %v10226_v15 = vunpack.c.l.bf16 %v10274_v62  ;;  %v2115_v17 = vshrl.u32 %v10105_v6, 16  ;;  %10639 = vmatprep.subr.bf16.mxu1 %v11542_v44  ;;  %v11546_v63 = vld [vmem:[%s16279_s5 + $0x58] sm:$0xff]  }
  0x33   : > { %v2118_v18 = vshll.u32 %v10105_v6, 16  ;;  %v2124_v19 = vshrl.u32 %v10106_v7, 16  ;;  %v2132_v20 = vshrl.u32 %v10107_v8, 16  ;;  %v2109_v21 = vrot.slane %v2107_v11, 7 }
  0x34   : > { %2328 = vrot.lane.b32.xlu0 %v2095_v45, %s11877_s19  ;;  %v2135_v22 = vshll.u32 %v10107_v8, 16  ;;  %v2127_v23 = vshll.u32 %v10106_v7, 16  ;;  %v10108_v24 = vpack.c.bf16 %v1547_v9, %v1547_v9  ;;  %v12094_v25 = vrot.slane %v2115_v17, 7 }
  0x35   : > { %2330 = vrot.lane.b32.xlu1 %v2104_v53, %s11877_s19  ;;  %v2126_v26 = vrot.slane %v2124_v19, 7  ;;  %v12096_v27 = vrot.slane %v2132_v20, 7  ;;  %v10109_v28 = vpack.c.bf16 %v1548_v14, %v1548_v14  ;;  %v2113_v29 = vrot.slane %v2109_v21, 4  ;;  %10640 = vmatpush3.bf16.msra.mxu1 %v11542_v44  ;;  %v11548_v20 = vld [vmem:[%s16279_s5 + $0x60] sm:$0xff]   ;;  %v11552_v44 = vld [vmem:[%s16279_s5 + $0x68] sm:$0xff]  }
  0x36   : > { %v2112_v31 = vor.u32 %v2110_v12, %v2109_v21  ;;  %v2141_v32 = vshrl.u32 %v10108_v24, 16  ;;  %v10227_v33 = vunpack.c.h.bf16 %v10274_v62  ;;  %v2120_v34 = vor.u32 %v2118_v18, %v12094_v25  ;;  %10641 = vmatprep.subr.bf16.mxu1 %v11546_v63 }
  0x37   : > { %v2130_v35 = vrot.slane %v2126_v26, 4  ;;  %v2137_v36 = vor.u32 %v2135_v22, %v12096_v27  ;;  %v2144_v37 = vshll.u32 %v10108_v24, 16  ;;  %v2129_v38 = vor.u32 %v2127_v23, %v2126_v26 }
  0x38   : > { %2334 = vrot.lane.b32.xlu0 %v2112_v31, %s11877_s19  ;;  %v2143_v39 = vrot.slane %v2141_v32, 7  ;;  %v2149_v40 = vshrl.u32 %v10109_v28, 16  ;;  %v2152_v41 = vshll.u32 %v10109_v28, 16  ;;  %v2121_v45 = vsel %vm12030_vm2, %v2113_v29, %v2120_v34 }
  0x39   : > { %v2088_v46 = vrot.slane %v12039_v16, 4  ;;  %v2139_v47 = vrot.slane %v12096_v27, 4  ;;  %v1478_v48 = vmul.f32 %v10226_v15, %v11954_v1  ;;  %2336 = vrot.lane.b32.xlu1 %v2121_v45, %s11877_s19  ;;  %v2138_v49 = vsel %vm12030_vm2, %v2130_v35, %v2137_v36  ;;  %10642 = vmatpush3.bf16.msra.mxu1 %v11546_v63  ;;  %v10279_v16 = vld [vmem:[%s11965_s25 + $0x60] sm:$0xff]  }
  0x3a   : > { %v2147_v50 = vrot.slane %v2143_v39, 4  ;;  %v12114_v51 = vrot.slane %v2149_v40, 7  ;;  %v1479_v52 = vmul.f32 %v10227_v33, %v11954_v1  ;;  %v10230_v54 = vunpack.c.l.bf16 %v10275_v42  ;;  %10643 = vmatprep.subr.bf16.mxu1 %v11548_v20 }
  0x3b   : > { %v1517_v53 = vadd.f32 %v11990_v13, %v1478_v48  ;;  %v10231_v55 = vunpack.c.h.bf16 %v10275_v42  ;;  %v10234_v57 = vunpack.c.l.bf16 %v10276_v43  ;;  %v2146_v60 = vor.u32 %v2144_v37, %v2143_v39 }
  0x3c   : > { %2340 = vrot.lane.b32.xlu0 %v2129_v38, %s11877_s19  ;;  %v2154_v59 = vor.u32 %v2152_v41, %v12114_v51  ;;  %v1518_v61 = vadd.f32 %v11990_v13, %v1479_v52  ;;  %v10235_v62 = vunpack.c.h.bf16 %v10276_v43  ;;  %v1480_v6 = vmul.f32 %v10230_v54, %v11954_v1 }
  0x3d   : > { %v1549_v0 = vmax.f32 %v1517_v53, 0.0  ;;  %v1481_v7 = vmul.f32 %v10231_v55, %v11954_v1  ;;  %v1482_v8 = vmul.f32 %v10234_v57, %v11954_v1  ;;  %2342 = vrot.lane.b32.xlu1 %v2138_v49, %s11877_s19  ;;  %v10238_v14 = vunpack.c.l.bf16 %v10277_v58  ;;  %10644 = vmatpush3.bf16.msra.mxu1 %v11548_v20 }
  0x3e   : > { %v2155_v9 = vsel %vm12030_vm2, %v2147_v50, %v2154_v59  ;;  %v1550_v11 = vmax.f32 %v1518_v61, 0.0  ;;  %v1483_v12 = vmul.f32 %v10235_v62, %v11954_v1  ;;  %v1519_v17 = vadd.f32 %v11990_v13, %v1480_v6  ;;  %10645 = vmatprep.subr.bf16.mxu1 %v11552_v44  ;;  %v10278_v6 = vld [vmem:[%s11965_s25 + $0x58] sm:$0xff]  }
  0x3f   : > { %v10110_v15 = vpack.c.bf16 %v1549_v0, %v1549_v0  ;;  %v1520_v18 = vadd.f32 %v11990_v13, %v1481_v7  ;;  %v1521_v19 = vadd.f32 %v11990_v13, %v1482_v8  ;;  %v2122_v21 = vrot.slane %v12094_v25, 4 }
  0x40   : > { %2346 = vrot.lane.b32.xlu0 %v2146_v60, %s11877_s19  ;;  %v10111_v22 = vpack.c.bf16 %v1550_v11, %v1550_v11  ;;  %v1522_v23 = vadd.f32 %v11990_v13, %v1483_v12  ;;  %v1484_v24 = vmul.f32 %v10238_v14, %v11954_v1  ;;  %v1551_v28 = vmax.f32 %v1519_v17, 0.0  ;;  %v11554_v60 = vld [vmem:[%s16279_s5 + $0x70] sm:$0xff]   ;;  %v10280_v11 = vld [vmem:[%s11965_s25 + $0x68] sm:$0xff]  }
  0x41   : > { %v2158_v26 = vshrl.u32 %v10110_v15, 16  ;;  %v1552_v29 = vmax.f32 %v1520_v18, 0.0  ;;  %v10239_v31 = vunpack.c.h.bf16 %v10277_v58  ;;  %2348 = vrot.lane.b32.xlu1 %v2155_v9, %s11877_s19  ;;  %v1553_v34 = vmax.f32 %v1521_v19, 0.0  ;;  %10646 = vmatpush3.bf16.msra.mxu1 %v11552_v44 }
  0x42   : > { %v2166_v32 = vshrl.u32 %v10111_v22, 16  ;;  %v2169_v33 = vshll.u32 %v10111_v22, 16  ;;  %v1554_v35 = vmax.f32 %v1522_v23, 0.0  ;;  %v2161_v37 = vshll.u32 %v10110_v15, 16  ;;  %10647 = vmatprep.subr.bf16.mxu1 %v11554_v60 }
  0x43   : > { %v2160_v36 = vrot.slane %v2158_v26, 7  ;;  %v10112_v38 = vpack.c.bf16 %v1551_v28, %v1551_v28  ;;  %v10113_v39 = vpack.c.bf16 %v1552_v29, %v1552_v29  ;;  %v10114_v41 = vpack.c.bf16 %v1553_v34, %v1553_v34 }
  0x44   : > { %2314 = vrot.lane.b32.xlu0 %v2054_v4, %s11877_s19  ;;  %v12146_v40 = vrot.slane %v2166_v32, 7  ;;  %v10115_v42 = vpack.c.bf16 %v1554_v35, %v1554_v35  ;;  %v1523_v43 = vadd.f32 %v11990_v13, %v1484_v24  ;;  %v2156_v48 = vrot.slane %v12114_v51, 4 }
  0x45   : > { %v2164_v45 = vrot.slane %v2160_v36, 4  ;;  %v2175_v49 = vshrl.u32 %v10112_v38, 16  ;;  %v1485_v50 = vmul.f32 %v10239_v31, %v11954_v1  ;;  %2320 = vrot.lane.b32.xlu1 %v2071_v56, %s11877_s19  ;;  %v2178_v4 = vshll.u32 %v10112_v38, 16  ;;  %10648 = vmatpush3.bf16.msra.mxu1 %v11554_v60 }
  0x46   : > { %v2171_v3 = vor.u32 %v2169_v33, %v12146_v40  ;;  %v2183_v52 = vshrl.u32 %v10113_v39, 16  ;;  %v2186_v53 = vshll.u32 %v10113_v39, 16  ;;  %v2192_v55 = vshrl.u32 %v10114_v41, 16 }
  0x47   : > { %v2177_v54 = vrot.slane %v2175_v49, 7  ;;  %v2200_v57 = vshrl.u32 %v10115_v42, 16  ;;  %v2203_v58 = vshll.u32 %v10115_v42, 16  ;;  %v2163_v51 = vor.u32 %v2161_v37, %v2160_v36 }
  0x48   : > { %2326 = vrot.lane.b32.xlu0 %v2088_v46, %s11877_s19  ;;  %v12161_v2 = vrot.slane %v2183_v52, 7  ;;  %v2195_v56 = vshll.u32 %v10114_v41, 16  ;;  %v1555_v59 = vmax.f32 %v1523_v43, 0.0  ;;  %v2172_v61 = vsel %vm12030_vm2, %v2164_v45, %v2171_v3 }
  0x49   : > { %v2181_v62 = vrot.slane %v2177_v54, 4  ;;  %v2194_v63 = vrot.slane %v2192_v55, 7  ;;  %v12168_v0 = vrot.slane %v2200_v57, 7  ;;  %2332 = vrot.lane.b32.xlu1 %v2105_v5, %s11877_s19  ;;  %v2173_v46 = vrot.slane %v12146_v40, 4 }
  0x4a   : > { %v2188_v7 = vor.u32 %v2186_v53, %v12161_v2  ;;  %v10116_v8 = vpack.c.bf16 %v1555_v59, %v1555_v59  ;;  %v1524_v9 = vadd.f32 %v11990_v13, %v1485_v50  ;;  %v12179_v12 = vor.u32 %v2178_v4, %v2177_v54  ;;  %v10281_v50 = vld [vmem:[%s11965_s25 + $0x70] sm:$0xff]  }
  0x4b   : > { %v2198_v14 = vrot.slane %v2194_v63, 4  ;;  %v2205_v15 = vor.u32 %v2203_v58, %v12168_v0  ;;  %v2190_v17 = vrot.slane %v12161_v2, 4  ;;  %v2207_v30 = vrot.slane %v12168_v0, 4 }
  0x4c   : > { %2338 = vrot.lane.b32.xlu0 %v2122_v21, %s11877_s19  ;;  %v12187_v5 = vor.u32 %v2195_v56, %v2194_v63  ;;  %v2209_v18 = vshrl.u32 %v10116_v8, 16  ;;  %v1556_v19 = vmax.f32 %v1524_v9, 0.0  ;;  %v2189_v20 = vsel %vm12030_vm2, %v2181_v62, %v2188_v7 }
  0x4d   : > { %v10242_v22 = vunpack.c.l.bf16 %v10278_v6  ;;  %v10243_v23 = vunpack.c.h.bf16 %v10278_v6  ;;  %v10246_v24 = vunpack.c.l.bf16 %v10279_v16  ;;  %2344 = vrot.lane.b32.xlu1 %v2139_v47, %s11877_s19  ;;  %v10247_v25 = vunpack.c.h.bf16 %v10279_v16 }
  0x4e   : > { %v2211_v26 = vrot.slane %v2209_v18, 7  ;;  %v10117_v28 = vpack.c.bf16 %v1556_v19, %v1556_v19  ;;  %v10250_v21 = vunpack.c.l.bf16 %v10280_v11  ;;  %v10251_v33 = vunpack.c.h.bf16 %v10280_v11 }
  0x4f   : > { %v1486_v29 = vmul.f32 %v10242_v22, %v11954_v1  ;;  %v1487_v31 = vmul.f32 %v10243_v23, %v11954_v1  ;;  %v1488_v32 = vmul.f32 %v10246_v24, %v11954_v1  ;;  %v12200_v34 = vsel %vm12030_vm2, %v2198_v14, %v2205_v15 }
  0x50   : > { %2350 = vrot.lane.b32.xlu0 %v2156_v48, %s11877_s19  ;;  %v2212_v35 = vshll.u32 %v10116_v8, 16  ;;  %v2217_v27 = vshrl.u32 %v10117_v28, 16  ;;  %v2220_v47 = vshll.u32 %v10117_v28, 16  ;;  %v1489_v39 = vmul.f32 %v10247_v25, %v11954_v1  ;;  %v12237_v25 = vld [vmem:[%s12226_s23] sm:$0xf] }
  0x51   : > { %v1525_v36 = vadd.f32 %v11990_v13, %v1486_v29  ;;  %v1526_v37 = vadd.f32 %v11990_v13, %v1487_v31  ;;  %v1527_v38 = vadd.f32 %v11990_v13, %v1488_v32  ;;  %2354 = vrot.lane.b32.xlu1 %v2172_v61, %s11877_s19  ;;  %v2215_v40 = vrot.slane %v2211_v26, 4  ;;  %v12248_v32 = vld [vmem:[%s12226_s23 + $0x8] sm:$0xf] }
  0x52   : > { %v12207_v41 = vrot.slane %v2217_v27, 7  ;;  %v1490_v42 = vmul.f32 %v10250_v21, %v11954_v1  ;;  %v1491_v43 = vmul.f32 %v10251_v33, %v11954_v1  ;;  %v1528_v49 = vadd.f32 %v11990_v13, %v1489_v39  ;;  %v11557_v39 = vld [vmem:[%s16279_s5 + $0x78] sm:$0xff]  }
  0x53   : > { %v1557_v44 = vmax.f32 %v1525_v36, 0.0  ;;  %v1558_v45 = vmax.f32 %v1526_v37, 0.0  ;;  %v1559_v48 = vmax.f32 %v1527_v38, 0.0  ;;  %v12219_v56 = vor.u32 %v2212_v35, %v2211_v26  ;;  %v385_v38 = vld [vmem:[%s12226_s23 + $0xc] sm:$0xf]  ;;  %10649 = vmatprep.subr.bf16.mxu1 %v11557_v39 }
  0x54   : > { %2352 = vrot.lane.b32.xlu0 %v2163_v51, %s11877_s19  ;;  %v2222_v3 = vor.u32 %v2220_v47, %v12207_v41  ;;  %v2224_v4 = vrot.slane %v12207_v41, 4  ;;  %v1529_v52 = vadd.f32 %v11990_v13, %v1490_v42  ;;  %v1530_v53 = vadd.f32 %v11990_v13, %v1491_v43  ;;  %10650 = vmatpush3.bf16.msra.mxu1 %v11557_v39 }
  0x55   : > { %v10118_v54 = vpack.c.bf16 %v1557_v44, %v1557_v44  ;;  %v10119_v55 = vpack.c.bf16 %v1558_v45, %v1558_v45  ;;  %v10120_v57 = vpack.c.bf16 %v1559_v48, %v1559_v48  ;;  %v1560_v58 = vmax.f32 %v1528_v49, 0.0  ;;  %2356 = vrot.lane.b32.xlu1 %v2173_v46, %s11877_s19  ;;  %v741_v48 = vld [vmem:[#allocation2 + $0xc] sm:$0xf] }
  0x56   : > { %v1561_v59 = vmax.f32 %v1529_v52, 0.0  ;;  %v1562_v60 = vmax.f32 %v1530_v53, 0.0  ;;  %v10254_v51 = vunpack.c.l.bf16 %v10281_v50  ;;  %v2223_v46 = vsel %vm12030_vm2, %v2215_v40, %v2222_v3 }
  0x57   : > { %v2226_v61 = vshrl.u32 %v10118_v54, 16  ;;  %v2234_v62 = vshrl.u32 %v10119_v55, 16  ;;  %v2237_v63 = vshll.u32 %v10119_v55, 16  ;;  %v2229_v6 = vshll.u32 %v10118_v54, 16  ;;  %v751_v55 = vld [vmem:[#allocation2 + $0x18] sm:$0xf] }
  0x58   : > { %2360 = vrot.lane.b32.xlu0 %v2189_v20, %s11877_s19  ;;  %v2243_v16 = vshrl.u32 %v10120_v57, 16  ;;  %v2246_v7 = vshll.u32 %v10120_v57, 16  ;;  %v10121_v8 = vpack.c.bf16 %v1560_v58, %v1560_v58  ;;  %v10122_v9 = vpack.c.bf16 %v1561_v59, %v1561_v59  ;;  %v11844_v59 = vld [vmem:[%s16279_s5] sm:$0xff]  }
  0x59   : > { %v2228_v11 = vrot.slane %v2226_v61, 7  ;;  %v12230_v14 = vrot.slane %v2234_v62, 7  ;;  %v10123_v15 = vpack.c.bf16 %v1562_v60, %v1562_v60  ;;  %2358 = vrot.lane.b32.xlu1 %v12179_v12, %s11877_s19  ;;  %v1492_v22 = vmul.f32 %v10254_v51, %v11954_v1  ;;  %11243 = vmatprep.subr.bf16.mxu1 %v11844_v59  ;;  %v383_v61 = vld [vmem:[%s12226_s23 + $0x4] sm:$0xf]  ;;  %v2571_v59 = vld [vmem:[#allocation3] sm:$0xf] }
  0x5a   : > { %v2245_v18 = vrot.slane %v2243_v16, 7  ;;  %v2251_v19 = vshrl.u32 %v10121_v8, 16  ;;  %v2260_v20 = vshrl.u32 %v10122_v9, 16  ;;  %v2254_v26 = vshll.u32 %v10121_v8, 16 }
  0x5b   : > { %v2232_v23 = vrot.slane %v2228_v11, 4  ;;  %v2239_v24 = vor.u32 %v2237_v63, %v12230_v14  ;;  %v10255_v28 = vunpack.c.h.bf16 %v10281_v50  ;;  %v2241_v21 = vrot.slane %v12230_v14, 4 }
  0x5c   : > { %2362 = vrot.lane.b32.xlu0 %v2190_v17, %s11877_s19  ;;  %v12243_v12 = vor.u32 %v2229_v6, %v2228_v11  ;;  %v12245_v29 = vrot.slane %v2251_v19, 7  ;;  %v2262_v31 = vrot.slane %v2260_v20, 7  ;;  %v12250_v33 = vor.u32 %v2246_v7, %v2245_v18  ;;  %v856_v7 = vld [vmem:[#allocation2] sm:$0xf] }
  0x5d   : > { %v2268_v35 = vshrl.u32 %v10123_v15, 16  ;;  %v2271_v27 = vshll.u32 %v10123_v15, 16  ;;  %v2263_v47 = vshll.u32 %v10122_v9, 16  ;;  %2366 = vrot.lane.b32.xlu1 %v12200_v34, %s11877_s19  ;;  %v12256_v2 = vsel %vm12030_vm2, %v2232_v23, %v2239_v24  ;;  %v387_v23 = vld [vmem:[%s12226_s23 + $0x14] sm:$0xf] }
  0x5e   : > { %v2249_v17 = vrot.slane %v2245_v18, 4  ;;  %v2266_v36 = vrot.slane %v2262_v31, 4  ;;  %v1531_v37 = vadd.f32 %v11990_v13, %v1492_v22  ;;  %v2256_v40 = vor.u32 %v2254_v26, %v12245_v29  ;;  %v12312_v18 = vld [vmem:[%s12226_s23 + $0x10] sm:$0xf] }
  0x5f   : > { %v12264_v42 = vrot.slane %v2268_v35, 7  ;;  %v1493_v43 = vmul.f32 %v10255_v28, %v11954_v1  ;;  %v418_v34 = vshrl.u32 %v12237_v25, 16  ;;  %vm746_vm5 = vcmask 516096   ;;  %v748_v35 = vld [vmem:[#allocation2 + $0x14] sm:$0x1] }
  0x60   : > { %2364 = vrot.lane.b32.xlu0 %v12187_v5, %s11877_s19  ;;  %v2258_v44 = vrot.slane %v12245_v29, 4  ;;  %v1563_v45 = vmax.f32 %v1531_v37, 0.0  ;;  %v421_v49 = vshll.u32 %v12237_v25, 16  ;;  %v435_v50 = vshrl.u32 %v12248_v32, 16  ;;  %v12331_v37 = vld [vmem:[%s12226_s23 + $0x18] sm:$0xf]  ;;  %vm12344_vm7 = vmand %vm746_vm5, %vm414_vm0 }
  0x61   : > { %v2273_v3 = vor.u32 %v2271_v27, %v12264_v42  ;;  %v12274_v52 = vor.u32 %v2263_v47, %v2262_v31  ;;  %v1532_v1 = vadd.f32 %v11990_v13, %v1493_v43  ;;  %v12277_v53 = vrot.slane %v418_v34, 7  ;;  %2368 = vrot.lane.b32.xlu1 %v2207_v30, %s11877_s19 }
  0x62   : > { %v12282_v5 = vpack.c.bf16 %v1563_v45, %v1563_v45  ;;  %v437_v57 = vrot.slane %v435_v50, 7  ;;  %v438_v13 = vshll.u32 %v12248_v32, 16  ;;  %v443_v58 = vshrl.u32 %v385_v38, 16  ;;  %v11588_v50 = vld [vmem:[%s16279_s5 + $0x128] sm:$0xff]  }
  0x63   : > { %v12296_v0 = vsel %vm12030_vm2, %v2249_v17, %v2256_v40  ;;  %v1564_v30 = vmax.f32 %v1532_v1, 0.0  ;;  %v423_v60 = vor.u32 %v421_v49, %v12277_v53  ;;  %v446_v51 = vshll.u32 %v385_v38, 16  ;;  %v758_v40 = vld [vmem:[#allocation2 + $0x24] sm:$0xf]  ;;  %v389_v49 = vld [vmem:[%s12226_s23 + $0x1c] sm:$0xf] }
  0x64   : > { %2372 = vrot.lane.b32.xlu0 %v2223_v46, %s11877_s19  ;;  %v12303_v62 = vsel %vm12030_vm2, %v2266_v36, %v2273_v3  ;;  %v2275_v63 = vrot.slane %v12264_v42, 4  ;;  %v2277_v6 = vshrl.u32 %v12282_v5, 16  ;;  %v440_v16 = vor.u32 %v438_v13, %v437_v57 }
  0x65   : > { %v10125_v8 = vpack.c.bf16 %v1564_v30, %v1564_v30  ;;  %v441_v9 = vrot.slane %v437_v57, 4  ;;  %v12307_v11 = vrot.slane %v443_v58, 7  ;;  %v742_v15 = vsel %vm12286_vm6, %v423_v60, %v741_v48  ;;  %2370 = vrot.lane.b32.xlu1 %v12219_v56, %s11877_s19  ;;  %v860_v56 = vld [vmem:[#allocation2 + $0x8] sm:$0x1]  ;;  %v12363_v30 = vld [vmem:[#allocation3 + $0x4] sm:$0xf] }
  0x66   : > { %v12316_v46 = vrot.slane %v2277_v6, 7  ;;  %743 = vst [vmem:[#allocation2 + $0xc] sm:$0xf] %v742_v15  ;;  %v752_v19 = vsel %vm12286_vm6, %v440_v16, %v751_v55  ;;  %v426_v20 = vshrl.u32 %v383_v61, 16  ;;  %v429_v22 = vshll.u32 %v383_v61, 16 }
  0x67   : > { %v2285_v24 = vshrl.u32 %v10125_v8, 16  ;;  %v2288_v26 = vshll.u32 %v10125_v8, 16  ;;  %v448_v28 = vor.u32 %v446_v51, %v12307_v11  ;;  %753 = vst [vmem:[#allocation2 + $0x18] sm:$0xf] %v752_v19  ;;  %v857_v31 = vsel %vm12286_vm6, %v423_v60, %v856_v7  ;;  %v765_v16 = vld [vmem:[#allocation2 + $0x30] sm:$0xf] }
  0x68   : > { %2374 = vrot.lane.b32.xlu0 %v2224_v4, %s11877_s19  ;;  %v2280_v27 = vshll.u32 %v12282_v5, 16  ;;  %v424_v47 = vrot.slane %v12277_v53, 4  ;;  %v428_v17 = vrot.slane %v426_v20, 7  ;;  %858 = vst [vmem:[#allocation2] sm:$0xf] %v857_v31  ;;  %v452_v36 = vshrl.u32 %v12312_v18, 16 }
  0x69   : > { %v12333_v38 = vrot.slane %v2285_v24, 7  ;;  %v449_v39 = vsel %vm12030_vm2, %v441_v9, %v448_v28  ;;  %v455_v41 = vshll.u32 %v12312_v18, 16  ;;  %v460_v4 = vshrl.u32 %v387_v23, 16  ;;  %2378 = vrot.lane.b32.xlu1 %v12256_v2, %s11877_s19  ;;  %v12371_v7 = vld [vmem:[%s12226_s23 + $0x20] sm:$0xf] }
  0x6a   : > { %754 = vst.msk [vmem:[#allocation2 + $0x1c] sm:$0xf] %vm738_vm3, %v449_v39  ;;  %v431_v43 = vor.u32 %v429_v22, %v428_v17  ;;  %v433_v34 = vrot.slane %v428_v17, 4  ;;  %v454_v45 = vrot.slane %v452_v36, 7  ;;  %v463_v48 = vshll.u32 %v387_v23, 16 }
  0x6b   : > { %v2283_v3 = vrot.slane %v12316_v46, 4  ;;  %v12350_v1 = vor.u32 %v2288_v26, %v12333_v38  ;;  %v12352_v53 = vrot.slane %v460_v4, 7  ;;  %v469_v2 = vshrl.u32 %v12331_v37, 16  ;;  %v762_v26 = vld [vmem:[#allocation2 + $0x2c] sm:$0x1] }
  0x6c   : > { %2376 = vrot.lane.b32.xlu0 %v12243_v12, %s11877_s19  ;;  %v432_v55 = vsel %vm12030_vm2, %v424_v47, %v431_v43  ;;  %v749_v57 = vsel %vm12344_vm7, %v433_v34, %v748_v35  ;;  %v861_v13 = vsel %vm12344_vm7, %v433_v34, %v860_v56  ;;  %v457_v58 = vor.u32 %v455_v41, %v454_v45  ;;  %v12396_v39 = vld [vmem:[%s12226_s23 + $0x24] sm:$0xf] }
  0x6d   : > { %v2292_v60 = vrot.slane %v12333_v38, 4  ;;  %v863_v51 = vld [vmem:[#allocation2 + $0xc] sm:$0x1]  ;;  %859 = vst.msk [vmem:[#allocation2 + $0x4] sm:$0xf] %vm738_vm3, %v432_v55  ;;  %v458_v12 = vrot.slane %v454_v45, 4  ;;  %v465_v61 = vor.u32 %v463_v48, %v12352_v53  ;;  %2380 = vrot.lane.b32.xlu1 %v2241_v21, %s11877_s19  ;;  %v9553_v36 = vcombine.low %v2571_v59, %v12363_v30 }
  0x6e   : > { %745 = vst.msk [vmem:[#allocation2 + $0x10] sm:$0xf] %vm738_vm3, %v432_v55  ;;  %750 = vst [vmem:[#allocation2 + $0x14] sm:$0x1] %v749_v57  ;;  %v467_v6 = vrot.slane %v12352_v53, 4  ;;  %v864_v8 = vsel %vm12344_vm7, %v12237_v25, %v863_v51  ;;  %v759_v15 = vsel %vm12286_vm6, %v457_v58, %v758_v40  ;;  %v471_v19 = vrot.slane %v469_v2, 7 }
  0x6f   : > { %862 = vst [vmem:[#allocation2 + $0x8] sm:$0x1] %v861_v13  ;;  %v866_v9 = vld [vmem:[#allocation2 + $0x18] sm:$0x1]  ;;  %v472_v20 = vshll.u32 %v12331_v37, 16  ;;  %v466_v14 = vsel %vm12030_vm2, %v458_v12, %v465_v61  ;;  %v477_v21 = vshrl.u32 %v389_v49, 16  ;;  %10699 = vmatprep.mubr.bf16.mxu0 %v9553_v36  ;;  %v2291_v53 = vsel %vm12030_vm2, %v2283_v3, %v12350_v1 }
  0x70   : > { %865 = vst [vmem:[#allocation2 + $0xc] sm:$0x1] %v864_v8  ;;  %v867_v22 = vsel %vm12344_vm7, %v12248_v32, %v866_v9  ;;  %v911_v23 = vld [vmem:[#allocation2] sm:$0x1]  ;;  %760 = vst [vmem:[#allocation2 + $0x24] sm:$0xf] %v759_v15  ;;  %2384 = vrot.lane.b32.xlu0 %v12296_v0, %s11877_s19  ;;  %v763_v13 = vsel %vm12344_vm7, %v467_v6, %v762_v26 }
  0x71   : > { %v480_v24 = vshll.u32 %v389_v49, 16  ;;  %868 = vst [vmem:[#allocation2 + $0x18] sm:$0x1] %v867_v22  ;;  %v912_v28 = vsel %vm12344_vm7, %v12237_v25, %v911_v23  ;;  %vm1096_vm8 = vcmask 1040384   ;;  %761 = vst.msk [vmem:[#allocation2 + $0x28] sm:$0xf] %vm738_vm3, %v466_v14  ;;  %v474_v32 = vor.u32 %v472_v20, %v471_v19  ;;  %2382 = vrot.lane.b32.xlu1 %v12250_v33, %s11877_s19 }
  0x72   : > { %v475_v31 = vrot.slane %v471_v19, 4  ;;  %v2639_v35 = vshrl.u32 %v2571_v59, 16  ;;  %913 = vst [vmem:[#allocation2] sm:$0x1] %v912_v28  ;;  %v479_v56 = vrot.slane %v477_v21, 7  ;;  %v2642_v47 = vshll.u32 %v2571_v59, 16 }
  0x73   : > { %v769_v0 = vld [vmem:[#allocation2 + $0x38] sm:$0x1]  ;;  %v766_v25 = vsel %vm12286_vm6, %v474_v32, %v765_v16  ;;  %v486_v43 = vshrl.u32 %v12371_v7, 16  ;;  %v489_v49 = vshll.u32 %v12371_v7, 16  ;;  %v2282_v33 = vor.u32 %v2280_v27, %v12316_v46  ;;  %764 = vst [vmem:[#allocation2 + $0x2c] sm:$0x1] %v763_v13 }
  0x74   : > { %v12399_v40 = vld [vmem:[%s11965_s25 + $0x78] sm:$0xff]   ;;  %v12405_v41 = vrot.slane %v2639_v35, 4  ;;  %v482_v34 = vor.u32 %v480_v24, %v479_v56  ;;  %v484_v45 = vrot.slane %v479_v56, 4  ;;  %767 = vst [vmem:[#allocation2 + $0x30] sm:$0xf] %v766_v25  ;;  %v12409_v48 = vrot.slane %v2642_v47, 5  ;;  %2386 = vrot.lane.b32.xlu0 %v2258_v44, %s11877_s19 }
  0x75   : > { %v918_v2 = vld [vmem:[#allocation2 + $0x10] sm:$0xf]  ;;  %v12423_v57 = vld [vmem:[#allocation2 + $0x14] sm:$0x1]  ;;  %v10258_v29 = vunpack.c.l.bf16 %v12399_v40  ;;  %2390 = vrot.lane.b32.xlu1 %v12303_v62, %s11877_s19  ;;  %v12434_v1 = vrot.slane %v486_v43, 7  ;;  %v494_v59 = vshrl.u32 %v12396_v39, 16  ;;  %v10259_v12 = vunpack.c.h.bf16 %v12399_v40 }
  0x76   : > { %v916_v55 = vld [vmem:[#allocation2 + $0x8] sm:$0x1]  ;;  %v969_v44 = vunpack.c.l.bf16 %v918_v2  ;;  %v970_v5 = vunpack.c.l.bf16 %v12423_v57  ;;  %v483_v27 = vsel %vm12030_vm2, %v475_v31, %v482_v34  ;;  %v770_v51 = vsel %vm12344_vm7, %v484_v45, %v769_v0  ;;  %v12453_v22 = vld [vmem:[%s16277_s3] ss:$0 sm:$0xff]  ;;  %v1837_v38 = vld [vmem:[#allocation3 + $0x18] sm:$0xf] }
  0x77   : > { %v967_v58 = vunpack.c.l.bf16 %v916_v55  ;;  %v917_v46 = vld [vmem:[#allocation2 + $0xc] sm:$0xf]  ;;  %v869_v3 = vld [vmem:[#allocation2 + $0x24] sm:$0x1]  ;;  %768 = vst.msk [vmem:[#allocation2 + $0x34] sm:$0xf] %vm738_vm3, %v483_v27  ;;  %v491_v20 = vor.u32 %v489_v49, %v12434_v1  ;;  %v12456_v23 = vmul.f32 %v12453_v22, %v10258_v29 }
  0x78   : > { %v10260_v61 = vld [vmem:[#allocation2 + $0x18] sm:$0xff]   ;;  %v968_v6 = vunpack.c.l.bf16 %v917_v46  ;;  %v12440_v16 = vrot.slane %v969_v44, 7  ;;  %v870_v8 = vsel %vm12344_vm7, %v12312_v18, %v869_v3  ;;  %771 = vst [vmem:[#allocation2 + $0x38] sm:$0x1] %v770_v51  ;;  %2388 = vrot.lane.b32.xlu0 %v12274_v52, %s11877_s19  ;;  %v12476_v49 = vrot.slane %v494_v59, 7 }
  0x79   : > { %v1018_v62 = vadd.f32 %v970_v5, %v967_v58  ;;  %v10166_v9 = vunpack.c.l.bf16 %v10260_v61  ;;  %v10161_v15 = vld [vmem:[#allocation2] sm:$0xff]   ;;  %v10167_v19 = vunpack.c.h.bf16 %v10260_v61  ;;  %871 = vst [vmem:[#allocation2 + $0x24] sm:$0x1] %v870_v8  ;;  %2392 = vrot.lane.b32.xlu1 %v2275_v63, %s11877_s19  ;;  %v772_v55 = vld [vmem:[#allocation2 + $0x3c] sm:$0xf]  ;;  %v492_v13 = vrot.slane %v12434_v1, 4 }
  0x7a   : > { %v1097_v14 = vrot.slane %v968_v6, 7  ;;  %v10162_v18 = vunpack.c.l.bf16 %v10161_v15  ;;  %v10163_v21 = vunpack.c.h.bf16 %v10161_v15  ;;  %v497_v29 = vshll.u32 %v12396_v39, 16  ;;  %v12489_v61 = vld [vmem:[%s12226_s23 + $0x28] sm:$0xf] }
  0x7b   : > { %v1195_v24 = vadd.f32 %v12440_v16, %v1018_v62  ;;  %v1019_v52 = vadd.f32 %v10166_v9, %v968_v6  ;;  %v12462_v26 = vrot.slane %v10166_v9, 7  ;;  %v1020_v28 = vadd.f32 %v10167_v19, %v969_v44  ;;  %v872_v31 = vld [vmem:[#allocation2 + $0x30] sm:$0x1] }
  0x7c   : > { %v12464_v32 = vrot.slane %v10167_v19, 7  ;;  %v1016_v35 = vadd.f32 %v10162_v18, %v968_v6  ;;  %v1243_v56 = vrot.slane %v10162_v18, 7  ;;  %v1099_v47 = vsel %vm1096_vm8, %v1097_v14, %v12440_v16  ;;  %2396 = vrot.lane.b32.xlu0 %v2291_v53, %s11877_s19 }
  0x7d   : > { %v1017_v36 = vadd.f32 %v10163_v21, %v969_v44  ;;  %v1196_v0 = vadd.f32 %v12462_v26, %v1019_v52  ;;  %v1244_v63 = vrot.slane %v10163_v21, 7  ;;  %v873_v25 = vsel %vm12344_vm7, %v12331_v37, %v872_v31  ;;  %2394 = vrot.lane.b32.xlu1 %v2282_v33, %s11877_s19  ;;  %v1830_v31 = vld [vmem:[#allocation3 + $0xc] sm:$0xf] }
  0x7e   : > { %v1102_v42 = vsel %vm1096_vm8, %v12462_v26, %v12464_v32  ;;  %v1193_v43 = vadd.f32 %v1097_v14, %v1016_v35  ;;  %874 = vst [vmem:[#allocation2 + $0x30] sm:$0x1] %v873_v25  ;;  %v499_v51 = vor.u32 %v497_v29, %v12476_v49  ;;  %v773_v62 = vsel %vm12286_vm6, %v491_v20, %v772_v55  ;;  %v393_v55 = vld [vmem:[%s12226_s23 + $0x2c] sm:$0xf] }
  0x7f   : > { %v1197_v34 = vadd.f32 %v1102_v42, %v1020_v28  ;;  %v1194_v45 = vadd.f32 %v1099_v47, %v1017_v36  ;;  %v1252_v53 = vadd.f32 %v1196_v0, %v1097_v14  ;;  %v1245_v2 = vsel %vm1096_vm8, %v1243_v56, %v1244_v63  ;;  %774 = vst [vmem:[#allocation2 + $0x3c] sm:$0xf] %v773_v62 }
  0x80   : > { %v1249_v44 = vadd.f32 %v1243_v56, %v1193_v43  ;;  %v12482_v27 = vadd.f32 %v1244_v63, %v1195_v24  ;;  %v923_v46 = vld [vmem:[#allocation2 + $0x24] sm:$0xff]   ;;  %2398 = vrot.lane.b32.xlu0 %v2292_v60, %s11877_s19  ;;  %v500_v20 = vsel %vm12030_vm2, %v492_v13, %v499_v51  ;;  %v506_v29 = vshll.u32 %v12489_v61, 16 }
  0x81   : > { %v1253_v58 = vadd.f32 %v1197_v34, %v1099_v47  ;;  %v1250_v37 = vadd.f32 %v1245_v2, %v1194_v45  ;;  %v1300_v33 = vmul.f32 0.25, %v1252_v53  ;;  %v974_v3 = vunpack.c.l.bf16 %v923_v46  ;;  %775 = vst.msk [vmem:[#allocation2 + $0x40] sm:$0xf] %vm738_vm3, %v500_v20  ;;  %v779_v2 = vld [vmem:[#allocation2 + $0x48] sm:$0xf] }
  0x82   : > { %v975_v59 = vunpack.c.h.bf16 %v923_v46  ;;  %v1297_v1 = vmul.f32 0.25, %v1249_v44  ;;  %vm2454_vm9 = vcmask 781824   ;;  %v1844_v20 = vld [vmem:[#allocation3 + $0x24] sm:$0xf]  ;;  %vm2461_vm11 = vcmask 778752  }
  0x83   : > { %v1301_v6 = vmul.f32 0.25, %v1253_v58  ;;  %v1298_v39 = vmul.f32 0.25, %v1250_v37  ;;  %v1348_v8 = vmax.f32 %v1300_v33, 0.0  ;;  %v1103_v14 = vrot.slane %v974_v3, 7  ;;  %v12522_v33 = vld [vmem:[%s12226_s23 + $0x30] sm:$0xf]  ;;  %vm12572_vm10 = vmand %vm2454_vm9, %vm739_vm4 }
  0x84   : > { %v1023_v15 = vadd.f32 %v10167_v19, %v975_v59  ;;  %v12493_v18 = vrot.slane %v975_v59, 7  ;;  %v1345_v60 = vmax.f32 %v1297_v1, 0.0  ;;  %v1022_v52 = vadd.f32 %v10166_v9, %v974_v3  ;;  %vm12798_vm12 = vmand %vm2461_vm11, %vm414_vm0 }
  0x85   : > { %v1349_v21 = vmax.f32 %v1301_v6, 0.0  ;;  %v1346_v24 = vmax.f32 %v1298_v39, 0.0  ;;  %v10051_v28 = vpack.c.bf16 %v1348_v8, %v1348_v8  ;;  %v10261_v56 = vld [vmem:[#allocation2 + $0x30] sm:$0xff]   ;;  %v503_v19 = vshrl.u32 %v12489_v61, 16 }
  0x86   : > { %v1105_v35 = vsel %vm1096_vm8, %v1103_v14, %v12493_v18  ;;  %v10048_v47 = vpack.c.bf16 %v1345_v60, %v1345_v60  ;;  %v1199_v25 = vadd.f32 %v1103_v14, %v1022_v52  ;;  %v12503_v43 = vunpack.c.l.bf16 %v10261_v56  ;;  %v875_v1 = vld [vmem:[#allocation2 + $0x3c] sm:$0x1] }
  0x87   : > { %v10052_v36 = vpack.c.bf16 %v1349_v21, %v1349_v21  ;;  %v10049_v0 = vpack.c.bf16 %v1346_v24, %v1346_v24  ;;  %v1200_v63 = vadd.f32 %v1105_v35, %v1023_v15  ;;  %v1838_v9 = vsel %vm12286_vm6, %v10051_v28, %v1837_v38  ;;  %v395_v28 = vld [vmem:[%s12226_s23 + $0x34] sm:$0xf] }
  0x88   : > { %v12505_v34 = vunpack.c.h.bf16 %v10261_v56  ;;  %1839 = vst [vmem:[#allocation3 + $0x18] sm:$0xf] %v1838_v9  ;;  %v1831_v45 = vsel %vm12286_vm6, %v10048_v47, %v1830_v31  ;;  %v505_v13 = vrot.slane %v503_v19, 7  ;;  %v1255_v44 = vadd.f32 %v1199_v25, %v12462_v26  ;;  %v786_v9 = vld [vmem:[#allocation2 + $0x54] sm:$0xf] }
  0x89   : > { %1840 = vst.msk [vmem:[#allocation3 + $0x1c] sm:$0xf] %vm738_vm3, %v10052_v36  ;;  %1833 = vst.msk [vmem:[#allocation3 + $0x10] sm:$0xf] %vm738_vm3, %v10049_v0  ;;  %v1256_v53 = vadd.f32 %v1200_v63, %v1102_v42  ;;  %v12516_v37 = vrot.slane %v12503_v43, 7  ;;  %v1025_v42 = vadd.f32 %v12503_v43, %v974_v3  ;;  %v511_v8 = vshrl.u32 %v393_v55, 16 }
  0x8a   : > { %1832 = vst [vmem:[#allocation3 + $0xc] sm:$0xf] %v1831_v45  ;;  %v1026_v58 = vadd.f32 %v12505_v34, %v975_v59  ;;  %v12519_v46 = vrot.slane %v12505_v34, 7  ;;  %v508_v6 = vor.u32 %v506_v29, %v505_v13  ;;  %v509_v39 = vrot.slane %v505_v13, 4  ;;  %v12546_v13 = vld [vmem:[#allocation2 + $0x2c] sm:$0x1] }
  0x8b   : > { %v1304_v51 = vmul.f32 0.25, %v1256_v53  ;;  %v1303_v62 = vmul.f32 0.25, %v1255_v44  ;;  %v876_v59 = vsel %vm12344_vm7, %v12371_v7, %v875_v1  ;;  %v1202_v3 = vadd.f32 %v12516_v37, %v1025_v42 }
  0x8c   : > { %v12528_v26 = vsel %vm1096_vm8, %v12516_v37, %v12519_v46  ;;  %877 = vst [vmem:[#allocation2 + $0x3c] sm:$0x1] %v876_v59  ;;  %v514_v60 = vshll.u32 %v393_v55, 16  ;;  %v12535_v24 = vrot.slane %v511_v8, 7  ;;  %v780_v52 = vsel %vm12286_vm6, %v508_v6, %v779_v2  ;;  %v755_v6 = vld [vmem:[#allocation2 + $0x20] sm:$0x1] }
  0x8d   : > { %v1352_v15 = vmax.f32 %v1304_v51, 0.0  ;;  %v1203_v38 = vadd.f32 %v12528_v26, %v1026_v58  ;;  %v1351_v21 = vmax.f32 %v1303_v62, 0.0  ;;  %v520_v31 = vshrl.u32 %v12522_v33, 16  ;;  %781 = vst [vmem:[#allocation2 + $0x48] sm:$0xf] %v780_v52 }
  0x8e   : > { %v1258_v19 = vadd.f32 %v1202_v3, %v1103_v14  ;;  %v523_v47 = vshll.u32 %v12522_v33, 16  ;;  %v501_v0 = vrot.slane %v12476_v49, 4  ;;  %v516_v63 = vor.u32 %v514_v60, %v12535_v24  ;;  %v776_v3 = vld [vmem:[#allocation2 + $0x44] sm:$0x1]  ;;  %v783_v60 = vld [vmem:[#allocation2 + $0x50] sm:$0x1] }
  0x8f   : > { %v10055_v56 = vpack.c.bf16 %v1352_v15, %v1352_v15  ;;  %v1259_v7 = vadd.f32 %v1203_v38, %v1105_v35  ;;  %v10054_v36 = vpack.c.bf16 %v1351_v21, %v1351_v21  ;;  %v522_v25 = vrot.slane %v520_v31, 7  ;;  %v1851_v35 = vld [vmem:[#allocation3 + $0x30] sm:$0xf]  ;;  %v1834_v31 = vld [vmem:[#allocation3 + $0x14] sm:$0x1] }
  0x90   : > { %v1306_v53 = vmul.f32 0.25, %v1258_v19  ;;  %v518_v2 = vrot.slane %v12535_v24, 4  ;;  %v528_v55 = vshrl.u32 %v395_v28, 16  ;;  %v517_v49 = vsel %vm12030_vm2, %v509_v39, %v516_v63  ;;  %v12559_v39 = vld [vmem:[#allocation2 + $0x38] sm:$0x1] }
  0x91   : > { %1847 = vst.msk [vmem:[#allocation3 + $0x28] sm:$0xf] %vm738_vm3, %v10055_v56  ;;  %v1307_v45 = vmul.f32 0.25, %v1259_v7  ;;  %v1845_v14 = vsel %vm12286_vm6, %v10054_v36, %v1844_v20  ;;  %v525_v29 = vor.u32 %v523_v47, %v522_v25  ;;  %v531_v44 = vshll.u32 %v395_v28, 16  ;;  %782 = vst.msk [vmem:[#allocation2 + $0x4c] sm:$0xf] %vm738_vm3, %v517_v49 }
  0x92   : > { %1846 = vst [vmem:[#allocation3 + $0x24] sm:$0xf] %v1845_v14  ;;  %v1354_v51 = vmax.f32 %v1306_v53, 0.0  ;;  %v526_v42 = vrot.slane %v522_v25, 4  ;;  %v12553_v1 = vrot.slane %v528_v55, 7  ;;  %v450_v8 = vrot.slane %v12307_v11, 4 }
  0x93   : > { %v1355_v58 = vmax.f32 %v1307_v45, 0.0  ;;  %v929_v62 = vld [vmem:[#allocation2 + $0x3c] sm:$0xff]   ;;  %v787_v59 = vsel %vm12286_vm6, %v525_v29, %v786_v9  ;;  %v1299_v15 = vmul.f32 0.25, %v12482_v27  ;;  %v976_v38 = vunpack.c.l.bf16 %v12546_v13  ;;  %v2466_v56 = vld [vmem:[#allocation3 + $0x18] sm:$0xf] }
  0x94   : > { %v10057_v24 = vpack.c.bf16 %v1354_v51, %v1354_v51  ;;  %v12562_v52 = vunpack.c.l.bf16 %v929_v62  ;;  %v12564_v28 = vunpack.c.h.bf16 %v929_v62  ;;  %788 = vst [vmem:[#allocation2 + $0x54] sm:$0xf] %v787_v59  ;;  %v2456_v20 = vld [vmem:[#allocation3 + $0xc] sm:$0xf]  ;;  %v878_v11 = vld [vmem:[#allocation2 + $0x48] sm:$0x1]  ;;  %v533_v27 = vor.u32 %v531_v44, %v12553_v1 }
  0x95   : > { %v10058_v21 = vpack.c.bf16 %v1355_v58, %v1355_v58  ;;  %v756_v19 = vsel %vm12344_vm7, %v450_v8, %v755_v6  ;;  %v1347_v47 = vmax.f32 %v1299_v15, 0.0  ;;  %v12588_v53 = vld [vmem:[%s12226_s23 + $0x38] sm:$0xf]  ;;  %v879_v14 = vsel %vm12344_vm7, %v12489_v61, %v878_v11  ;;  %v11846_v62 = vld [vmem:[%s16278_s4] ss:$0 sm:$0xff] }
  0x96   : > { %v1852_v63 = vsel %vm12286_vm6, %v10057_v24, %v1851_v35  ;;  %v1029_v9 = vadd.f32 %v12505_v34, %v12564_v28  ;;  %v12582_v25 = vrot.slane %v12562_v52, 7  ;;  %v12585_v45 = vrot.slane %v12564_v28, 7  ;;  %757 = vst [vmem:[#allocation2 + $0x20] sm:$0x1] %v756_v19  ;;  %880 = vst [vmem:[#allocation2 + $0x48] sm:$0x1] %v879_v14 }
  0x97   : > { %1854 = vst.msk [vmem:[#allocation3 + $0x34] sm:$0xf] %vm738_vm3, %v10058_v21  ;;  %1853 = vst [vmem:[#allocation3 + $0x30] sm:$0xf] %v1852_v63  ;;  %v1028_v55 = vadd.f32 %v12503_v43, %v12562_v52  ;;  %v534_v34 = vsel %vm12030_vm2, %v526_v42, %v533_v27  ;;  %v10050_v35 = vpack.c.bf16 %v1347_v47, %v1347_v47  ;;  %v979_v29 = vunpack.c.l.bf16 %v12559_v39  ;;  %v12617_v59 = vld [vmem:[%s12226_s23 + $0x3c] sm:$0xf] }
  0x98   : > { %v12600_v49 = vsel %vm1096_vm8, %v12582_v25, %v12585_v45  ;;  %789 = vst.msk [vmem:[#allocation2 + $0x58] sm:$0xf] %vm738_vm3, %v534_v34  ;;  %v777_v43 = vsel %vm12344_vm7, %v501_v0, %v776_v3  ;;  %v784_v61 = vsel %vm12344_vm7, %v518_v2, %v783_v60  ;;  %v2317_v44 = vpop.permute.xlu1 %2316  ;;  %v1533_v0 = vadd.f32 %v11846_v62, %v12456_v23  ;;  %v11594_v36 = vld [vmem:[%s16279_s5 + $0x138] sm:$0xff]  }
  0x99   : > { %v2311_v58 = vpop.permute.xlu0 %2310  ;;  %v1206_v51 = vadd.f32 %v12600_v49, %v1029_v9  ;;  %v1205_v42 = vadd.f32 %v12582_v25, %v1028_v55  ;;  %v1835_v6 = vsel %vm12344_vm7, %v10050_v35, %v1834_v31  ;;  %778 = vst [vmem:[#allocation2 + $0x44] sm:$0x1] %v777_v43  ;;  %785 = vst [vmem:[#allocation2 + $0x50] sm:$0x1] %v784_v61  ;;  %v537_v31 = vshrl.u32 %v12588_v53, 16 }
  0x9a   : > { %v2467_v2 = vsel %vm12572_vm10, %v2317_v44, %v2466_v56  ;;  %v2457_v8 = vsel %vm12572_vm10, %v2311_v58, %v2456_v20  ;;  %1836 = vst [vmem:[#allocation3 + $0x14] sm:$0x1] %v1835_v6  ;;  %v1027_v15 = vadd.f32 %v979_v29, %v976_v38  ;;  %v1495_v3 = vmul.f32 %v12453_v22, %v10259_v12  ;;  %v1858_v58 = vld [vmem:[#allocation3 + $0x3c] sm:$0xf] }
  0x9b   : > { %2468 = vst [vmem:[#allocation3 + $0x18] sm:$0xf] %v2467_v2  ;;  %2458 = vst [vmem:[#allocation3 + $0xc] sm:$0xf] %v2457_v8  ;;  %v1262_v23 = vadd.f32 %v1206_v51, %v12528_v26  ;;  %v1261_v60 = vadd.f32 %v1205_v42, %v12516_v37  ;;  %v881_v21 = vld [vmem:[#allocation2 + $0x54] sm:$0x1] }
  0x9c   : > { %v1565_v24 = vmax.f32 %v1533_v0, 0.0  ;;  %v882_v56 = vsel %vm12344_vm7, %v12522_v33, %v881_v21  ;;  %v1204_v20 = vadd.f32 %v12519_v46, %v1027_v15  ;;  %v12637_v11 = vadd.f32 %v11846_v62, %v1495_v3  ;;  %v2473_v33 = vld [vmem:[#allocation3 + $0x24] sm:$0xf] }
  0x9d   : > { %v1310_v27 = vmul.f32 0.25, %v1262_v23  ;;  %v1309_v26 = vmul.f32 0.25, %v1261_v60  ;;  %883 = vst [vmem:[#allocation2 + $0x54] sm:$0x1] %v882_v56  ;;  %v922_v37 = vld [vmem:[#allocation2 + $0x20] sm:$0x1] }
  0x9e   : > { %v2313_v22 = vpop.permute.xlu0 %2312  ;;  %v12640_v19 = vpack.c.bf16 %v1565_v24, %v1565_v24  ;;  %v12642_v47 = vrot.slane %v537_v31, 7  ;;  %v973_v63 = vunpack.c.l.bf16 %v922_v37  ;;  %v1260_v9 = vadd.f32 %v1204_v20, %v12493_v18  ;;  %v10262_v43 = vld [vmem:[#allocation2 + $0x48] sm:$0xff]   ;;  %v2480_v13 = vld [vmem:[#allocation3 + $0x30] sm:$0xf] }
  0x9f   : > { %v2319_v12 = vpop.permute.xlu1 %2318  ;;  %2460 = vst.msk [vmem:[#allocation3 + $0x10] sm:$0xf] %vm2454_vm9, %v2313_v22  ;;  %v1358_v34 = vmax.f32 %v1310_v27, 0.0  ;;  %v1357_v35 = vmax.f32 %v1309_v26, 0.0  ;;  %v10174_v51 = vunpack.c.l.bf16 %v10262_v43  ;;  %v12651_v42 = vunpack.c.h.bf16 %v10262_v43 }
  0xa0   : > { %2469 = vst.msk [vmem:[#allocation3 + $0x1c] sm:$0xf] %vm2454_vm9, %v2319_v12  ;;  %v1021_v6 = vadd.f32 %v973_v63, %v970_v5  ;;  %v12655_v62 = vmul.f32 0.25, %v1260_v9  ;;  %v12657_v0 = vld [vmem:[#allocation2 + $0x44] sm:$0x1]  ;;  %v12661_v23 = vadd.f32 %v976_v38, %v973_v63  ;;  %vm3665_vm0 = vcmask 1042432  }
  0xa1   : > { %v10061_v15 = vpack.c.bf16 %v1358_v34, %v1358_v34  ;;  %v10060_v3 = vpack.c.bf16 %v1357_v35, %v1357_v35  ;;  %v1032_v24 = vadd.f32 %v12651_v42, %v12564_v28  ;;  %v12669_v31 = vrot.slane %v10174_v51, 7  ;;  %v12766_v55 = vld [vmem:[#allocation2 + $0x50] sm:$0x1] }
  0xa2   : > { %v2323_v8 = vpop.permute.xlu0 %2322  ;;  %v2573_v5 = vld [vmem:[#allocation3 + $0xc] sm:$0xf]  ;;  %v2575_v21 = vld [vmem:[#allocation3 + $0x18] sm:$0xf]  ;;  %v12672_v56 = vrot.slane %v12651_v42, 7  ;;  %v1031_v26 = vadd.f32 %v10174_v51, %v12562_v52  ;;  %vm3666_vm1 = vcmask 1046532  }
  0xa3   : > { %v2325_v2 = vpop.permute.xlu1 %2324  ;;  %v2474_v57 = vsel %vm12572_vm10, %v2323_v8, %v2473_v33  ;;  %v2663_v38 = vshrl.u32 %v2573_v5, 16  ;;  %v2666_v20 = vshll.u32 %v2573_v5, 16  ;;  %1861 = vst.msk [vmem:[#allocation3 + $0x40] sm:$0xf] %vm738_vm3, %v10061_v15  ;;  %v1859_v12 = vsel %vm12286_vm6, %v10060_v3, %v1858_v58  ;;  %vm12993_vm4 = vmor %vm3665_vm0, %vm3666_vm1 }
  0xa4   : > { %2476 = vst.msk [vmem:[#allocation3 + $0x28] sm:$0xf] %vm2454_vm9, %v2325_v2  ;;  %2475 = vst [vmem:[#allocation3 + $0x24] sm:$0xf] %v2474_v57  ;;  %v2687_v22 = vshrl.u32 %v2575_v21, 16  ;;  %v2690_v27 = vshll.u32 %v2575_v21, 16  ;;  %v12680_v28 = vsel %vm1096_vm8, %v12669_v31, %v12672_v56  ;;  %v1198_v33 = vadd.f32 %v12464_v32, %v1021_v6 }
  0xa5   : > { %1860 = vst [vmem:[#allocation3 + $0x3c] sm:$0xf] %v1859_v12  ;;  %v935_v37 = vld [vmem:[#allocation2 + $0x54] sm:$0xff]   ;;  %v12686_v35 = vrot.slane %v2663_v38, 4  ;;  %v12688_v43 = vrot.slane %v2666_v20, 5  ;;  %v1209_v2 = vadd.f32 %v12680_v28, %v1032_v24  ;;  %v11541_v57 = vld [vmem:[%s16279_s5 + $0x88] sm:$0xff]  }
  0xa6   : > { %v2329_v9 = vpop.permute.xlu0 %2328  ;;  %v12684_v34 = vld [vmem:[#allocation3 + $0x10] sm:$0xf]  ;;  %v12693_v8 = vunpack.c.l.bf16 %v935_v37  ;;  %v12704_v38 = vrot.slane %v2687_v22, 4  ;;  %v12706_v24 = vrot.slane %v2690_v27, 5  ;;  %v11847_v22 = vld [vmem:[%s16279_s5 + $0x80] sm:$0xff]   ;;  %vm8036_vm5 = vcmask 64512  }
  0xa7   : > { %v2331_v63 = vpop.permute.xlu1 %2330  ;;  %v12690_v58 = vld [vmem:[#allocation3 + $0x1c] sm:$0xf]  ;;  %v2481_v52 = vsel %vm12572_vm10, %v2329_v9, %v2480_v13  ;;  %v9554_v15 = vcombine.low %v2573_v5, %v12684_v34  ;;  %v16285_v3 = vrot.slane %v12684_v34, 5  ;;  %v1265_v5 = vadd.f32 %v1209_v2, %v12600_v49  ;;  %v11543_v2 = vld [vmem:[%s16279_s5 + $0x90] sm:$0xff]  }
  0xa8   : > { %2483 = vst.msk [vmem:[#allocation3 + $0x34] sm:$0xf] %vm2454_vm9, %v2331_v63  ;;  %2482 = vst [vmem:[#allocation3 + $0x30] sm:$0xf] %v2481_v52  ;;  %v9555_v12 = vcombine.low %v2575_v21, %v12690_v58  ;;  %v1208_v63 = vadd.f32 %v12669_v31, %v1031_v26  ;;  %v12716_v9 = vunpack.c.h.bf16 %v935_v37  ;;  %v12724_v21 = vrot.slane %v12693_v8, 7 }
  0xa9   : > { %10700 = vmatmul.mubr.bf16.vlgmr.msra.gmra.mrb[0].mxu0 %v9554_v15  ;;  %v12712_v13 = vrot.slane %v16285_v3, 4  ;;  %v1034_v52 = vadd.f32 %v10174_v51, %v12693_v8  ;;  %v1254_v15 = vadd.f32 %v1198_v33, %v12440_v16  ;;  %v1356_v49 = vmax.f32 %v12655_v62, 0.0 }
  0xaa   : > { %10732 = vmatpush3.bf16.msra.mxu0 %v11847_v22  ;;  %10703 = vmatprep.mubr.bf16.mxu0 %v9555_v12  ;;  %v1313_v26 = vmul.f32 0.25, %v1265_v5  ;;  %v1264_v37 = vadd.f32 %v1208_v63, %v12582_v25  ;;  %v1035_v3 = vadd.f32 %v12651_v42, %v12716_v9  ;;  %v2335_v51 = vpop.permute.xlu0 %2334  ;;  %v12738_v5 = vrot.slane %v12716_v9, 7 }
  0xab   : > { %v12721_v27 = vld [vmem:[#allocation3 + $0x28] sm:$0xf]  ;;  %10733 = vmatprep.subr.bf16.mxu0 %v11541_v57  ;;  %v2577_v12 = vld [vmem:[#allocation3 + $0x24] sm:$0xf]  ;;  %v1211_v22 = vadd.f32 %v12724_v21, %v1034_v52  ;;  %v2337_v6 = vpop.permute.xlu1 %2336  ;;  %v1302_v14 = vmul.f32 0.25, %v1254_v15 }
  0xac   : > { %v2487_v4 = vld [vmem:[#allocation3 + $0x3c] sm:$0xf]  ;;  %v2711_v16 = vshrl.u32 %v2577_v12, 16  ;;  %v2714_v33 = vshll.u32 %v2577_v12, 16  ;;  %v9556_v62 = vcombine.low %v2577_v12, %v12721_v27  ;;  %v1361_v63 = vmax.f32 %v1313_v26, 0.0 }
  0xad   : > { %v2488_v25 = vsel %vm12572_vm10, %v2335_v51, %v2487_v4  ;;  %v1312_v20 = vmul.f32 0.25, %v1264_v37  ;;  %v12750_v12 = vsel %vm1096_vm8, %v12724_v21, %v12738_v5  ;;  %2490 = vst.msk [vmem:[#allocation3 + $0x40] sm:$0xf] %vm2454_vm9, %v2337_v6  ;;  %v1865_v26 = vld [vmem:[#allocation3 + $0x48] sm:$0xf]  ;;  %v1267_v37 = vadd.f32 %v1211_v22, %v12669_v31 }
  0xae   : > { %2489 = vst [vmem:[#allocation3 + $0x3c] sm:$0xf] %v2488_v25  ;;  %10734 = vmatpush3.bf16.msra.mxu0 %v11541_v57  ;;  %v12743_v42 = vrot.slane %v2711_v16, 4  ;;  %v12745_v17 = vrot.slane %v2714_v33, 5  ;;  %v10064_v4 = vpack.c.bf16 %v1361_v63, %v1361_v63  ;;  %v1212_v57 = vadd.f32 %v12750_v12, %v1035_v3  ;;  %v11547_v16 = vld [vmem:[%s16279_s5 + $0x98] sm:$0xff]   ;;  %v12760_v33 = vpop.permute.xlu0 %2340 }
  0xaf   : > { %v12752_v7 = vld [vmem:[#allocation3 + $0x34] sm:$0xf]  ;;  %v1360_v52 = vmax.f32 %v1312_v20, 0.0  ;;  %10735 = vmatprep.subr.bf16.mxu0 %v11543_v2  ;;  %v2579_v51 = vld [vmem:[#allocation3 + $0x30] sm:$0xf]  ;;  %v1315_v3 = vmul.f32 0.25, %v1267_v37  ;;  %v2343_v44 = vpop.permute.xlu1 %2342 }
  0xb0   : > { %v2735_v25 = vshrl.u32 %v2579_v51, 16  ;;  %v2738_v40 = vshll.u32 %v2579_v51, 16  ;;  %v9557_v6 = vcombine.low %v2579_v51, %v12752_v7  ;;  %v1855_v63 = vld [vmem:[#allocation3 + $0x38] sm:$0x1]  ;;  %1868 = vst.msk [vmem:[#allocation3 + $0x4c] sm:$0xf] %vm738_vm3, %v10064_v4  ;;  %v1268_v31 = vadd.f32 %v1212_v57, %v12680_v28 }
  0xb1   : > { %v10063_v20 = vpack.c.bf16 %v1360_v52, %v1360_v52  ;;  %10704 = vmatmul.mubr.bf16.gmra.mrb[4].mxu0 %v9556_v62  ;;  %v1350_v22 = vmax.f32 %v1302_v14, 0.0  ;;  %v1841_v15 = vld [vmem:[#allocation3 + $0x20] sm:$0x1]  ;;  %v11549_v4 = vld [vmem:[%s16279_s5 + $0xa0] sm:$0xff]   ;;  %v10059_v52 = vpack.c.bf16 %v1356_v49, %v1356_v49  ;;  %v1201_v28 = vadd.f32 %v12493_v18, %v12661_v23  ;;  %2497 = vst.msk [vmem:[#allocation3 + $0x4c] sm:$0xf] %vm2454_vm9, %v2343_v44 }
  0xb2   : > { %10736 = vmatpush3.bf16.msra.mxu0 %v11543_v2  ;;  %v12768_v61 = vrot.slane %v2735_v25, 4  ;;  %v12770_v60 = vrot.slane %v2738_v40, 5  ;;  %10707 = vmatprep.mubr.bf16.mxu0 %v9557_v6  ;;  %v1316_v2 = vmul.f32 0.25, %v1268_v31  ;;  %v1363_v62 = vmax.f32 %v1315_v3, 0.0  ;;  %v1872_v57 = vld [vmem:[#allocation3 + $0x54] sm:$0xf]  ;;  %v12780_v37 = vpop.permute.xlu0 %2346 }
  0xb3   : > { %v1866_v14 = vsel %vm12286_vm6, %v10063_v20, %v1865_v26  ;;  %10737 = vmatprep.subr.bf16.mxu0 %v11547_v16  ;;  %v10053_v40 = vpack.c.bf16 %v1350_v22, %v1350_v22  ;;  %v1856_v51 = vsel %vm12344_vm7, %v10059_v52, %v1855_v63  ;;  %v1257_v49 = vadd.f32 %v1201_v28, %v12464_v32  ;;  %v2463_v20 = vld [vmem:[#allocation3 + $0x14] sm:$0x1]  ;;  %v2349_v32 = vpop.permute.xlu1 %2348 }
  0xb4   : > { %1867 = vst [vmem:[#allocation3 + $0x48] sm:$0xf] %v1866_v14  ;;  %v16286_v18 = vunpack.c.l.bf16 %v12766_v55  ;;  %v16382_v44 = vunpack.c.l.bf16 %v12657_v0  ;;  %v1364_v26 = vmax.f32 %v1316_v2, 0.0  ;;  %v10066_v25 = vpack.c.bf16 %v1363_v62, %v1363_v62  ;;  %1857 = vst [vmem:[#allocation3 + $0x38] sm:$0x1] %v1856_v51 }
  0xb5   : > { %v1842_v6 = vsel %vm12344_vm7, %v10053_v40, %v1841_v15  ;;  %v2581_v31 = vld [vmem:[#allocation3 + $0x3c] sm:$0xf]  ;;  %v16383_v3 = vshrl.u32 %v12640_v19, 16  ;;  %v1305_v52 = vmul.f32 0.25, %v1257_v49  ;;  %v1848_v51 = vld [vmem:[#allocation3 + $0x2c] sm:$0x1] }
  0xb6   : > { %v1030_v23 = vadd.f32 %v16382_v44, %v979_v29  ;;  %10738 = vmatpush3.bf16.msra.mxu0 %v11547_v16  ;;  %1843 = vst [vmem:[#allocation3 + $0x20] sm:$0x1] %v1842_v6  ;;  %v12802_v29 = vld [vmem:[#allocation3 + $0x40] sm:$0xf]  ;;  %v2759_v22 = vshrl.u32 %v2581_v31, 16  ;;  %v2762_v15 = vshll.u32 %v2581_v31, 16  ;;  %v16386_v28 = vmov %v16382_v44  ;;  %v2315_v49 = vpop.permute.xlu0 %2314 }
  0xb7   : > { %v12794_v63 = vrot.slane %v16383_v3, 7  ;;  %v1033_v14 = vadd.f32 %v16286_v18, %v16386_v28  ;;  %v10067_v2 = vpack.c.bf16 %v1364_v26, %v1364_v26  ;;  %v1873_v16 = vsel %vm12286_vm6, %v10066_v25, %v1872_v57  ;;  %10739 = vmatprep.subr.bf16.mxu0 %v11549_v4  ;;  %v11553_v44 = vld [vmem:[%s16279_s5 + $0xa8] sm:$0xff]  }
  0xb8   : > { %v9558_v40 = vcombine.low %v2581_v31, %v12802_v29  ;;  %1874 = vst [vmem:[#allocation3 + $0x54] sm:$0xf] %v1873_v16  ;;  %v12815_v0 = vrot.slane %v2759_v22, 4  ;;  %v12817_v6 = vrot.slane %v2762_v15, 5  ;;  %v1353_v26 = vmax.f32 %v1305_v52, 0.0 }
  0xb9   : > { %v1210_v3 = vadd.f32 %v12672_v56, %v1033_v14  ;;  %1875 = vst.msk [vmem:[#allocation3 + $0x58] sm:$0xf] %vm738_vm3, %v10067_v2  ;;  %v2464_v57 = vsel %vm12798_vm12, %v2315_v49, %v2463_v20  ;;  %v1207_v25 = vadd.f32 %v12585_v45, %v1030_v23  ;;  %v16387_v31 = vshll.u32 %v12640_v19, 16  ;;  %v793_v16 = vld [vmem:[#allocation2 + $0x60] sm:$0xf]  ;;  %v2321_v14 = vpop.permute.xlu1 %2320 }
  0xba   : > { %10708 = vmatmul.mubr.bf16.gmra.mrb[8].mxu0 %v9558_v40  ;;  %v16388_v22 = vmax.f32 %v12637_v11, 0.0  ;;  %v790_v52 = vld [vmem:[#allocation2 + $0x5c] sm:$0x1]  ;;  %2504 = vst.msk [vmem:[#allocation3 + $0x58] sm:$0xf] %vm2454_vm9, %v2349_v32  ;;  %v10056_v2 = vpack.c.bf16 %v1353_v26, %v1353_v26  ;;  %v2300_v40 = vrot.slane %v12794_v63, 4 }
  0xbb   : > { %v2299_v28 = vor.u32 %v16387_v31, %v12794_v63  ;;  %2465 = vst [vmem:[#allocation3 + $0x14] sm:$0x1] %v2464_v57  ;;  %10740 = vmatpush3.bf16.msra.mxu0 %v11549_v4  ;;  %v12831_v20 = vld [vmem:[#allocation3 + $0x4c] sm:$0xf]  ;;  %v1266_v23 = vadd.f32 %v1210_v3, %v12585_v45  ;;  %v16389_v19 = vshll.u32 %v12588_v53, 16  ;;  %v1263_v32 = vadd.f32 %v1207_v25, %v12519_v46  ;;  %v11555_v45 = vld [vmem:[%s16279_s5 + $0xb0] sm:$0xff]  }
  0xbc   : > { %v10127_v15 = vpack.c.bf16 %v16388_v22, %v16388_v22  ;;  %v2494_v49 = vld [vmem:[#allocation3 + $0x48] sm:$0xf]  ;;  %10741 = vmatprep.subr.bf16.mxu0 %v11553_v44  ;;  %v2484_v3 = vld [vmem:[#allocation3 + $0x38] sm:$0x1]  ;;  %v1849_v57 = vsel %vm12344_vm7, %v10056_v2, %v1848_v51  ;;  %v1869_v25 = vld [vmem:[#allocation3 + $0x50] sm:$0x1] }
  0xbd   : > { %v542_v11 = vor.u32 %v16389_v19, %v12642_v47  ;;  %2400 = vrot.lane.b32.xlu1 %v2299_v28, %s11877_s19  ;;  %v2495_v63 = vsel %vm12572_vm10, %v12760_v33, %v2494_v49  ;;  %v1314_v22 = vmul.f32 0.25, %v1266_v23  ;;  %v543_v19 = vrot.slane %v12642_v47, 4  ;;  %v2470_v46 = vld [vmem:[#allocation3 + $0x20] sm:$0x1]  ;;  %1850 = vst [vmem:[#allocation3 + $0x2c] sm:$0x1] %v1849_v57  ;;  %v2333_v49 = vpop.permute.xlu1 %2332 }
  0xbe   : > { %v2302_v4 = vshrl.u32 %v10127_v15, 16  ;;  %v2305_v26 = vshll.u32 %v10127_v15, 16  ;;  %2496 = vst [vmem:[#allocation3 + $0x48] sm:$0xf] %v2495_v63  ;;  %v1311_v28 = vmul.f32 0.25, %v1263_v32  ;;  %v16390_v31 = vshrl.u32 %v12617_v59, 16 }
  0xbf   : > { %v548_v18 = vshll.u32 %v12617_v59, 16  ;;  %v2471_v33 = vsel %vm12798_vm12, %v2321_v14, %v2470_v46  ;;  %10742 = vmatpush3.bf16.msra.mxu0 %v11553_v44  ;;  %v1362_v51 = vmax.f32 %v1314_v22, 0.0  ;;  %v1862_v2 = vld [vmem:[#allocation3 + $0x44] sm:$0x1]  ;;  %v794_v47 = vsel %vm12286_vm6, %v542_v11, %v793_v16  ;;  %v797_v46 = vld [vmem:[#allocation2 + $0x68] sm:$0x1] }
  0xc0   : > { %v2304_v15 = vrot.slane %v2302_v4, 7  ;;  %v547_v62 = vrot.slane %v16390_v31, 7  ;;  %v16391_v23 = vrot.slane %v12553_v1, 4  ;;  %v12861_v4 = vld [vmem:[#allocation3 + $0x8] sm:$0x1]  ;;  %v2485_v59 = vsel %vm12798_vm12, %v2333_v49, %v2484_v3  ;;  %10743 = vmatprep.subr.bf16.mxu0 %v11555_v45  ;;  %v11558_v1 = vld [vmem:[%s16279_s5 + $0xb8] sm:$0xff]  }
  0xc1   : > { %v2501_v31 = vld [vmem:[#allocation3 + $0x54] sm:$0xf]  ;;  %2472 = vst [vmem:[#allocation3 + $0x20] sm:$0x1] %v2471_v33  ;;  %v1359_v14 = vmax.f32 %v1311_v28, 0.0  ;;  %v2327_v28 = vpop.permute.xlu0 %2326  ;;  %v16392_v33 = vshrl.u32 %v12363_v30, 16 }
  0xc2   : > { %v791_v32 = vsel %vm12344_vm7, %v16391_v23, %v790_v52  ;;  %v2307_v63 = vor.u32 %v2305_v26, %v2304_v15  ;;  %v550_v44 = vor.u32 %v548_v18, %v547_v62  ;;  %795 = vst [vmem:[#allocation2 + $0x60] sm:$0xf] %v794_v47  ;;  %v2502_v16 = vsel %vm12572_vm10, %v12780_v37, %v2501_v31  ;;  %v12873_v18 = vld [vmem:[#allocation3 + $0x58] sm:$0xf] }
  0xc3   : > { %792 = vst [vmem:[#allocation2 + $0x5c] sm:$0x1] %v791_v32  ;;  %2486 = vst [vmem:[#allocation3 + $0x38] sm:$0x1] %v2485_v59  ;;  %v10065_v52 = vpack.c.bf16 %v1362_v51, %v1362_v51  ;;  %v552_v11 = vrot.slane %v547_v62, 4  ;;  %v2309_v57 = vrot.slane %v2304_v15, 4  ;;  %v10062_v3 = vpack.c.bf16 %v1359_v14, %v1359_v14  ;;  %10744 = vmatpush3.bf16.msra.mxu0 %v11555_v45 }
  0xc4   : > { %2503 = vst [vmem:[#allocation3 + $0x54] sm:$0xf] %v2502_v16  ;;  %v2308_v26 = vsel %vm12030_vm2, %v2300_v40, %v2307_v63  ;;  %v551_v22 = vsel %vm12030_vm2, %v543_v19, %v550_v44  ;;  %vm2635_vm13 = vsmask.f32 3328  ;;  %v2820_v62 = vshrl.u32 %v12873_v18, 16  ;;  %10745 = vmatprep.subr.bf16.mxu0 %v11558_v1  ;;  %v12893_v51 = vld [vmem:[%s16279_s5 + $0xc0] sm:$0xff]  }
  0xc5   : > { %v1870_v37 = vsel %vm12344_vm7, %v10065_v52, %v1869_v25  ;;  %2402 = vrot.lane.b32.xlu0 %v2308_v26, %s11877_s19  ;;  %796 = vst.msk [vmem:[#allocation2 + $0x64] sm:$0xf] %vm738_vm3, %v551_v22  ;;  %vm2636_vm14 = vsmask.f32 7440  ;;  %v2645_v40 = vor.u32 %v12409_v48, %v12405_v41  ;;  %v1863_v19 = vsel %vm12344_vm7, %v10062_v3, %v1862_v2  ;;  %v11848_v15 = vld [vmem:[#allocation3 + $0x4] sm:$0xf] }
  0xc6   : > { %1871 = vst [vmem:[#allocation3 + $0x50] sm:$0x1] %v1870_v37  ;;  %2404 = vrot.lane.b32.xlu1 %v2309_v57, %s11877_s19  ;;  %v2648_v25 = vshll.u32 %v11848_v15, 16  ;;  %v2654_v49 = vrot.slane %v16392_v33, 4  ;;  %v2658_v45 = vshll.u32 %v12861_v4, 16  ;;  %v3673_v2 = vrot.slane %v12861_v4, 5  ;;  %vm12916_vm15 = vmor %vm2635_vm13, %vm2636_vm14 }
  0xc7   : > { %v2477_v41 = vld [vmem:[#allocation3 + $0x2c] sm:$0x1]  ;;  %v2583_v48 = vld [vmem:[#allocation3 + $0x48] sm:$0xf]  ;;  %1864 = vst [vmem:[#allocation3 + $0x44] sm:$0x1] %v1863_v19  ;;  %v798_v23 = vsel %vm12344_vm7, %v552_v11, %v797_v46  ;;  %v2669_v32 = vor.u32 %v12688_v43, %v12686_v35  ;;  %10746 = vmatpush3.bf16.msra.mxu0 %v11558_v1  ;;  %v2693_v11 = vor.u32 %v12706_v24, %v12704_v38  ;;  %v2345_v24 = vpop.permute.xlu1 %2344  ;;  %v2339_v19 = vpop.permute.xlu0 %2338 }
  0xc8   : > { %v2646_v47 = vrot.slane %v2645_v40, 4  ;;  %v2478_v31 = vsel %vm12798_vm12, %v2327_v28, %v2477_v41  ;;  %v2783_v59 = vshrl.u32 %v2583_v48, 16  ;;  %v2786_v14 = vshll.u32 %v2583_v48, 16  ;;  %799 = vst [vmem:[#allocation2 + $0x68] sm:$0x1] %v798_v23  ;;  %10779 = vmatprep.subr.bf16.mxu0 %v12893_v51  ;;  %v11577_v54 = vld [vmem:[#allocation3 + $0x48] sm:$0xff]  }
  0xc9   : > { %v9559_v63 = vcombine.low %v2583_v48, %v12831_v20  ;;  %2479 = vst [vmem:[#allocation3 + $0x2c] sm:$0x1] %v2478_v31  ;;  %v884_v44 = vld [vmem:[#allocation2 + $0x60] sm:$0x1]  ;;  %v2650_v52 = vrot.slane %v2648_v25, 5  ;;  %v2660_v57 = vrot.slane %v2658_v45, 5  ;;  %v2717_v35 = vor.u32 %v12745_v17, %v12743_v42 }
  0xca   : > { %v937_v16 = vld [vmem:[#allocation2 + $0x5c] sm:$0x1]  ;;  %v12907_v43 = vrot.slane %v2783_v59, 4  ;;  %v12909_v3 = vrot.slane %v2786_v14, 5  ;;  %v885_v26 = vsel %vm12344_vm7, %v12588_v53, %v884_v44  ;;  %v12920_v38 = vld [vmem:[#allocation3 + $0x14] sm:$0x1]  ;;  %v16395_v45 = vunpack.c.l.bf16 %v12766_v55 }
  0xcb   : > { %10711 = vmatprep.mubr.bf16.mxu0 %v9559_v63  ;;  %v988_v22 = vunpack.c.l.bf16 %v937_v16  ;;  %v2585_v46 = vld [vmem:[#allocation3 + $0x54] sm:$0xf]  ;;  %886 = vst [vmem:[#allocation2 + $0x60] sm:$0x1] %v885_v26  ;;  %v2651_v28 = vsel %vm12916_vm15, %v2646_v47, %v2650_v52  ;;  %v2655_v37 = vor.u32 %v2654_v49, %v2650_v52  ;;  %v2670_v40 = vrot.slane %v2669_v32, 4  ;;  %v11562_v17 = vld [vmem:[%s16279_s5 + $0xd8] sm:$0xff]  }
  0xcc   : > { %v2672_v53 = vshll.u32 %v12684_v34, 16  ;;  %v2807_v15 = vshrl.u32 %v2585_v46, 16  ;;  %v2810_v25 = vshll.u32 %v2585_v46, 16  ;;  %v9560_v33 = vcombine.low %v2585_v46, %v12873_v18  ;;  %s11878_s19 = smov 120  }
  0xcd   : > { %v1036_v41 = vadd.f32 %v988_v22, %v16395_v45  ;;  %v2498_v48 = vld [vmem:[#allocation3 + $0x50] sm:$0x1]  ;;  %v2656_v23 = vrot.slane %v2655_v37, 4  ;;  %v16396_v59 = vshrl.u32 %v12684_v34, 16  ;;  %v2682_v47 = vshll.u32 %v12920_v38, 16 }
  0xce   : > { %v2674_v31 = vrot.slane %v2672_v53, 5  ;;  %v2499_v49 = vsel %vm12798_vm12, %v2345_v24, %v2498_v48  ;;  %v2491_v32 = vld [vmem:[#allocation3 + $0x44] sm:$0x1]  ;;  %v12934_v63 = vrot.slane %v2807_v15, 4  ;;  %v12936_v44 = vrot.slane %v2810_v25, 5  ;;  %10712 = vmatmul.mubr.bf16.gmra.mrb[12].mxu0 %v9560_v33 }
  0xcf   : > { %v2678_v14 = vrot.slane %v16396_v59, 4  ;;  %v1213_v55 = vadd.f32 %v12738_v5, %v1036_v41  ;;  %2500 = vst [vmem:[#allocation3 + $0x50] sm:$0x1] %v2499_v49  ;;  %v2492_v16 = vsel %vm12798_vm12, %v2339_v19, %v2491_v32  ;;  %v2661_v52 = vsel %vm12916_vm15, %v2656_v23, %v2660_v57  ;;  %v12943_v26 = vld [vmem:[#allocation2 + $0x68] sm:$0x1] }
  0xd0   : > { %v2675_v24 = vsel %vm12916_vm15, %v2670_v40, %v2674_v31  ;;  %v12947_v37 = vld [vmem:[#allocation3 + $0x20] sm:$0x1]  ;;  %2493 = vst [vmem:[#allocation3 + $0x44] sm:$0x1] %v2492_v16  ;;  %v9529_v15 = vcombine.low %v2651_v28, %v2661_v52  ;;  %v991_v25 = vunpack.c.l.bf16 %v12943_v26  ;;  %v2684_v33 = vrot.slane %v2682_v47, 5  ;;  %v11856_v26 = vld [vmem:[%s16279_s5 + $0x38] sm:$0xff]  }
  0xd1   : > { %v2679_v46 = vor.u32 %v2678_v14, %v2674_v31  ;;  %v1269_v53 = vadd.f32 %v1213_v55, %v12672_v56  ;;  %v3680_v19 = vrot.slane %v12920_v38, 5  ;;  %v2694_v41 = vrot.slane %v2693_v11, 4  ;;  %v3617_v28 = vld [vmem:[#allocation3] sm:$0xe] }
  0xd2   : > { %v2696_v57 = vshll.u32 %v12690_v58, 16  ;;  %v10263_v48 = vld [vmem:[#allocation2 + $0x60] sm:$0xff]   ;;  %10651 = vmatprep.mubr.bf16.mxu1 %v9529_v15  ;;  %v1039_v40 = vadd.f32 %v991_v25, %v988_v22  ;;  %v16397_v31 = vshrl.u32 %v12690_v58, 16  ;;  %v2706_v56 = vshll.u32 %v12947_v37, 16 }
  0xd3   : > { %v2680_v45 = vrot.slane %v2679_v46, 4  ;;  %v1317_v23 = vmul.f32 0.25, %v1269_v53  ;;  %v12958_v14 = vunpack.c.l.bf16 %v10263_v48  ;;  %v12960_v47 = vunpack.c.h.bf16 %v10263_v48  ;;  %v1876_v46 = vld [vmem:[#allocation3 + $0x5c] sm:$0x1] }
  0xd4   : > { %v2702_v59 = vrot.slane %v16397_v31, 4  ;;  %v2698_v38 = vrot.slane %v2696_v57, 5  ;;  %v2708_v55 = vrot.slane %v2706_v56, 5  ;;  %v16403_v42 = vshrl.u32 %v12721_v27, 16 }
  0xd5   : > { %v2685_v11 = vsel %vm12916_vm15, %v2680_v45, %v2684_v33  ;;  %v1365_v49 = vmax.f32 %v1317_v23, 0.0  ;;  %v1038_v22 = vadd.f32 %v12960_v47, %v12716_v9  ;;  %v12967_v16 = vrot.slane %v12958_v14, 7  ;;  %v3618_v45 = vld [vmem:[#allocation3 + $0xc] sm:$0xe] }
  0xd6   : > { %v9530_v32 = vcombine.low %v2675_v24, %v2685_v11  ;;  %v12970_v52 = vrot.slane %v12960_v47, 7  ;;  %v1037_v53 = vadd.f32 %v12958_v14, %v12693_v8  ;;  %v2699_v24 = vsel %vm12916_vm15, %v2694_v41, %v2698_v38  ;;  %v12984_v8 = vld [vmem:[%s12226_s23 + $0x40] sm:$0xf] }
  0xd7   : > { %v10068_v15 = vpack.c.bf16 %v1365_v49, %v1365_v49  ;;  %v2703_v33 = vor.u32 %v2702_v59, %v2698_v38  ;;  %v9577_v23 = vrot.slane %v3617_v28, 9  ;;  %v11849_v41 = vld [vmem:[%s16279_s5] sm:$0xff]   ;;  %v11850_v49 = vld [vmem:[%s16279_s5 + $0x8] sm:$0xff]  }
  0xd8   : > { %10652 = vmatmul.mubr.bf16.vlgmr.msra.gmra.mrb[0].mxu1 %v9530_v32  ;;  %v12979_v9 = vsel %vm1096_vm8, %v12967_v16, %v12970_v52  ;;  %v1216_v57 = vadd.f32 %v12970_v52, %v1039_v40  ;;  %v1214_v48 = vadd.f32 %v12967_v16, %v1037_v53  ;;  %v16400_v40 = vrot.slane %v12363_v30, 5  ;;  %v399_v38 = vld [vmem:[%s12226_s23 + $0x44] sm:$0xf] }
  0xd9   : > { %11251 = vmatpush3.bf16.msra.mxu1 %v11849_v41  ;;  %v1215_v31 = vadd.f32 %v12979_v9, %v1038_v22  ;;  %v1877_v59 = vsel %vm12344_vm7, %v10068_v15, %v1876_v46  ;;  %v2704_v56 = vrot.slane %v2703_v33, 4  ;;  %v9578_v15 = vrot.slane %v3618_v45, 9  ;;  %v13009_v33 = vld [vmem:[#allocation3 + $0x18] sm:$0xe] }
  0xda   : > { %v3672_v28 = vrot.slane %v16400_v40, 4  ;;  %11244 = vmatprep.subr.bf16.mxu1 %v11850_v49  ;;  %1878 = vst [vmem:[#allocation3 + $0x5c] sm:$0x1] %v1877_v59  ;;  %v1272_v32 = vadd.f32 %v1216_v57, %v12738_v5  ;;  %v1270_v22 = vadd.f32 %v1214_v48, %v12724_v21  ;;  %v16401_v46 = vmov %v16400_v40  ;;  %v1883_v59 = vld [vmem:[#allocation3 + $0x68] sm:$0x1] }
  0xdb   : > { %v3671_v53 = vsel %vm12993_vm4, %v9577_v23, %v16401_v46  ;;  %v1271_v41 = vadd.f32 %v1215_v31, %v12750_v12  ;;  %v2709_v40 = vsel %vm12916_vm15, %v2704_v56, %v2708_v55  ;;  %v3681_v30 = vsel %vm12993_vm4, %v12712_v13, %v3680_v19  ;;  %v1879_v12 = vld [vmem:[#allocation3 + $0x60] sm:$0xf]  ;;  %v11851_v13 = vld [vmem:[%s16279_s5 + $0x10] sm:$0xff]  }
  0xdc   : > { %v3674_v5 = vsel %vm12993_vm4, %v3672_v28, %v3673_v2  ;;  %v1320_v21 = vmul.f32 0.25, %v1272_v32  ;;  %v1318_v57 = vmul.f32 0.25, %v1270_v22  ;;  %v9531_v48 = vcombine.low %v2699_v24, %v2709_v40  ;;  %v2351_v22 = vpop.permute.xlu0 %2350  ;;  %v13038_v40 = vld [vmem:[%s12226_s23 + $0x4c] sm:$0xf] }
  0xdd   : > { %v9609_v45 = vcombine.low %v3671_v53, %v3674_v5  ;;  %11252 = vmatpush3.bf16.msra.mxu1 %v11850_v49  ;;  %v1319_v23 = vmul.f32 0.25, %v1271_v41  ;;  %v16402_v31 = vrot.slane %v12684_v34, 5  ;;  %v554_v55 = vshrl.u32 %v12984_v8, 16  ;;  %v800_v34 = vld [vmem:[#allocation2 + $0x6c] sm:$0xf] }
  0xde   : > { %v557_v2 = vshll.u32 %v12984_v8, 16  ;;  %11245 = vmatprep.subr.bf16.mxu1 %v11851_v13  ;;  %v1368_v19 = vmax.f32 %v1320_v21, 0.0  ;;  %v1366_v24 = vmax.f32 %v1318_v57, 0.0  ;;  %10655 = vmatprep.mubr.bf16.mxu1 %v9531_v48  ;;  %v562_v28 = vshrl.u32 %v399_v38, 16  ;;  %v11560_v49 = vld [vmem:[%s16279_s5 + $0xc8] sm:$0xff]  }
  0xdf   : > { %v3678_v4 = vsel %vm12993_vm4, %v9578_v15, %v16402_v31  ;;  %10747 = vmatprep.mubr.bf16.mxu0 %v9609_v45  ;;  %v1367_v32 = vmax.f32 %v1319_v23, 0.0  ;;  %v556_v46 = vrot.slane %v554_v55, 7  ;;  %v565_v53 = vshll.u32 %v399_v38, 16  ;;  %v13035_v41 = vld [vmem:[%s12226_s23 + $0x48] sm:$0xf]  ;;  %v13044_v45 = vld [vmem:[%s16279_s5 + $0xd0] sm:$0xff]  }
  0xe0   : > { %v9610_v56 = vcombine.low %v3678_v4, %v3681_v30  ;;  %v9579_v15 = vrot.slane %v13009_v33, 9  ;;  %v10071_v5 = vpack.c.bf16 %v1368_v19, %v1368_v19  ;;  %v10069_v21 = vpack.c.bf16 %v1366_v24, %v1366_v24  ;;  %v804_v48 = vld [vmem:[#allocation2 + $0x74] sm:$0x1]  ;;  %v11852_v55 = vld [vmem:[%s16279_s5 + $0x18] sm:$0xff]  }
  0xe1   : > { %v564_v30 = vrot.slane %v562_v28, 7  ;;  %v3684_v57 = vrot.slane %v12690_v58, 5  ;;  %11253 = vmatpush3.bf16.msra.mxu1 %v11851_v13  ;;  %v10070_v38 = vpack.c.bf16 %v1367_v32, %v1367_v32  ;;  %v2505_v23 = vld [vmem:[#allocation3 + $0x5c] sm:$0x1]  ;;  %v559_v33 = vor.u32 %v557_v2, %v556_v46  ;;  %v2355_v58 = vpop.permute.xlu1 %2354 }
  0xe2   : > { %10748 = vmatmul.mubr.bf16.vlgmr.msra.gmra.mrb[0].mxu0 %v9610_v56  ;;  %v560_v31 = vrot.slane %v556_v46, 4  ;;  %v3687_v4 = vrot.slane %v12947_v37, 5  ;;  %11246 = vmatprep.subr.bf16.mxu1 %v11852_v55  ;;  %v2506_v19 = vsel %vm12798_vm12, %v2351_v22, %v2505_v23  ;;  %v1884_v13 = vsel %vm12344_vm7, %v10071_v5, %v1883_v59  ;;  %v13068_v46 = vld [vmem:[#allocation3 + $0x2c] sm:$0x1] }
  0xe3   : > { %10780 = vmatpush3.bf16.msra.mxu0 %v12893_v51  ;;  %v1880_v24 = vsel %vm12286_vm6, %v10069_v21, %v1879_v12  ;;  %v567_v51 = vor.u32 %v565_v53, %v564_v30  ;;  %1882 = vst.msk [vmem:[#allocation3 + $0x64] sm:$0xf] %vm738_vm3, %v10070_v38  ;;  %2507 = vst [vmem:[#allocation3 + $0x5c] sm:$0x1] %v2506_v19  ;;  %v801_v37 = vsel %vm12286_vm6, %v559_v33, %v800_v34  ;;  %v11853_v21 = vld [vmem:[%s16279_s5 + $0x20] sm:$0xff]  }
  0xe4   : > { %10781 = vmatprep.subr.bf16.mxu0 %v11560_v49  ;;  %1885 = vst [vmem:[#allocation3 + $0x68] sm:$0x1] %v1884_v13  ;;  %1881 = vst [vmem:[#allocation3 + $0x60] sm:$0xf] %v1880_v24  ;;  %v569_v2 = vrot.slane %v564_v30, 4  ;;  %v3685_v56 = vsel %vm12993_vm4, %v9579_v15, %v3684_v57  ;;  %v3686_v28 = vrot.slane %v3684_v57, 4  ;;  %v2741_v33 = vor.u32 %v12770_v60, %v12768_v61 }
  0xe5   : > { %2511 = vst.msk [vmem:[#allocation3 + $0x64] sm:$0xf] %vm2454_vm9, %v2355_v58  ;;  %802 = vst [vmem:[#allocation2 + $0x6c] sm:$0xf] %v801_v37  ;;  %v568_v59 = vsel %vm12030_vm2, %v560_v31, %v567_v51  ;;  %v571_v12 = vshrl.u32 %v13035_v41, 16  ;;  %v574_v32 = vshll.u32 %v13035_v41, 16  ;;  %11254 = vmatpush3.bf16.msra.mxu1 %v11852_v55  ;;  %v2353_v55 = vpop.permute.xlu0 %2352 }
  0xe6   : > { %v579_v22 = vshrl.u32 %v13038_v40, 16  ;;  %803 = vst.msk [vmem:[#allocation2 + $0x70] sm:$0xf] %vm738_vm3, %v568_v59  ;;  %v3688_v34 = vsel %vm12993_vm4, %v3686_v28, %v3687_v4  ;;  %v582_v53 = vshll.u32 %v13038_v40, 16  ;;  %v805_v15 = vsel %vm12344_vm7, %v569_v2, %v804_v48  ;;  %11247 = vmatprep.subr.bf16.mxu1 %v11853_v21  ;;  %v807_v57 = vld [vmem:[#allocation2 + $0x78] sm:$0xf]  ;;  %v2357_v4 = vpop.permute.xlu1 %2356 }
  0xe7   : > { %v13079_v5 = vrot.slane %v2717_v35, 4  ;;  %10782 = vmatpush3.bf16.msra.mxu0 %v11560_v49  ;;  %v9611_v30 = vcombine.low %v3685_v56, %v3688_v34  ;;  %v573_v38 = vrot.slane %v571_v12, 7  ;;  %806 = vst [vmem:[#allocation2 + $0x74] sm:$0x1] %v805_v15  ;;  %v2720_v40 = vshll.u32 %v12721_v27, 16  ;;  %v11563_v61 = vld [vmem:[%s16279_s5 + $0xe0] sm:$0xff]  }
  0xe8   : > { %v13084_v23 = vrot.slane %v579_v22, 7  ;;  %10783 = vmatprep.subr.bf16.mxu0 %v13044_v45  ;;  %v2726_v35 = vrot.slane %v16403_v42, 4  ;;  %v2730_v49 = vshll.u32 %v13068_v46, 16  ;;  %v13094_v48 = vld [vmem:[#allocation3 + $0x38] sm:$0x1]  ;;  %v2744_v31 = vshll.u32 %v12752_v7, 16 }
  0xe9   : > { %10751 = vmatprep.mubr.bf16.mxu0 %v9611_v30  ;;  %v576_v58 = vor.u32 %v574_v32, %v573_v38  ;;  %v577_v19 = vrot.slane %v573_v38, 4  ;;  %v3620_v51 = vld [vmem:[#allocation3 + $0x24] sm:$0xe]  ;;  %11255 = vmatpush3.bf16.msra.mxu1 %v11853_v21  ;;  %v2722_v37 = vrot.slane %v2720_v40, 5  ;;  %v2742_v56 = vrot.slane %v2741_v33, 4  ;;  %v11854_v60 = vld [vmem:[%s16279_s5 + $0x28] sm:$0xff]  }
  0xea   : > { %v584_v13 = vor.u32 %v582_v53, %v13084_v23  ;;  %v586_v24 = vrot.slane %v13084_v23, 4  ;;  %v2732_v2 = vrot.slane %v2730_v49, 5  ;;  %v2746_v28 = vrot.slane %v2744_v31, 5  ;;  %11248 = vmatprep.subr.bf16.mxu1 %v11854_v60  ;;  %v811_v23 = vld [vmem:[#allocation2 + $0x80] sm:$0x1] }
  0xeb   : > { %10784 = vmatpush3.bf16.msra.mxu0 %v13044_v45  ;;  %v2512_v59 = vld [vmem:[#allocation3 + $0x68] sm:$0x1]  ;;  %v2508_v12 = vld [vmem:[#allocation3 + $0x60] sm:$0xf]  ;;  %v808_v22 = vsel %vm12286_vm6, %v576_v58, %v807_v57  ;;  %v16404_v34 = vshrl.u32 %v12752_v7, 16  ;;  %v2754_v53 = vshll.u32 %v13094_v48, 16  ;;  %v2723_v57 = vsel %vm12916_vm15, %v13079_v5, %v2722_v37 }
  0xec   : > { %v585_v32 = vsel %vm12030_vm2, %v577_v19, %v584_v13  ;;  %10785 = vmatprep.subr.bf16.mxu0 %v11562_v17  ;;  %v2513_v15 = vsel %vm12798_vm12, %v2357_v4, %v2512_v59  ;;  %v2509_v21 = vsel %vm12572_vm10, %v2353_v55, %v2508_v12  ;;  %v887_v30 = vld [vmem:[#allocation2 + $0x6c] sm:$0x1]  ;;  %809 = vst [vmem:[#allocation2 + $0x78] sm:$0xf] %v808_v22  ;;  %v3691_v58 = vrot.slane %v12721_v27, 5 }
  0xed   : > { %v2750_v45 = vrot.slane %v16404_v34, 4  ;;  %810 = vst.msk [vmem:[#allocation2 + $0x7c] sm:$0xf] %vm738_vm3, %v585_v32  ;;  %v2727_v38 = vor.u32 %v2726_v35, %v2722_v37  ;;  %2514 = vst [vmem:[#allocation3 + $0x68] sm:$0x1] %v2513_v15  ;;  %v888_v40 = vsel %vm12344_vm7, %v12984_v8, %v887_v30  ;;  %v2747_v49 = vsel %vm12916_vm15, %v2742_v56, %v2746_v28  ;;  %v11855_v8 = vld [vmem:[%s16279_s5 + $0x30] sm:$0xff]  }
  0xee   : > { %2510 = vst [vmem:[#allocation3 + $0x60] sm:$0xf] %v2509_v21  ;;  %v942_v42 = vld [vmem:[#allocation2 + $0x70] sm:$0xf]  ;;  %v2756_v31 = vrot.slane %v2754_v53, 5  ;;  %11256 = vmatpush3.bf16.msra.mxu1 %v11854_v60  ;;  %v9580_v35 = vrot.slane %v3620_v51, 9  ;;  %v812_v56 = vsel %vm12344_vm7, %v586_v24, %v811_v23 }
  0xef   : > { %v2751_v33 = vor.u32 %v2750_v45, %v2746_v28  ;;  %889 = vst [vmem:[#allocation2 + $0x6c] sm:$0x1] %v888_v40  ;;  %v13128_v4 = vunpack.c.l.bf16 %v942_v42  ;;  %v13130_v55 = vld [vmem:[#allocation2 + $0x74] sm:$0x1]  ;;  %v2728_v5 = vrot.slane %v2727_v38, 4  ;;  %10786 = vmatpush3.bf16.msra.mxu0 %v11562_v17  ;;  %11249 = vmatprep.subr.bf16.mxu1 %v11855_v8  ;;  %v3694_v37 = vrot.slane %v13068_v46, 5 }
  0xf0   : > { %v994_v19 = vunpack.c.l.bf16 %v13130_v55  ;;  %v3621_v28 = vld [vmem:[#allocation3 + $0x30] sm:$0xe]  ;;  %10787 = vmatprep.subr.bf16.mxu0 %v11563_v61  ;;  %v3692_v60 = vsel %vm12993_vm4, %v9580_v35, %v3691_v58  ;;  %813 = vst [vmem:[#allocation2 + $0x80] sm:$0x1] %v812_v56  ;;  %v13152_v46 = vld [vmem:[%s12226_s23 + $0x50] sm:$0xf]  ;;  %v2765_v35 = vor.u32 %v12817_v6, %v12815_v0 }
  0xf1   : > { %v2752_v13 = vrot.slane %v2751_v33, 4  ;;  %v13142_v27 = vadd.f32 %v12960_v47, %v13128_v4  ;;  %v13145_v17 = vrot.slane %v13128_v4, 7  ;;  %v2733_v51 = vsel %vm12916_vm15, %v2728_v5, %v2732_v2  ;;  %v403_v45 = vld [vmem:[%s12226_s23 + $0x54] sm:$0xf]  ;;  %v11564_v33 = vld [vmem:[%s16279_s5 + $0xe8] sm:$0xff]  }
  0xf2   : > { %v1042_v24 = vadd.f32 %v994_v19, %v991_v25  ;;  %v9532_v59 = vcombine.low %v2723_v57, %v2733_v51  ;;  %v3693_v12 = vrot.slane %v3691_v58, 4  ;;  %11257 = vmatpush3.bf16.msra.mxu1 %v11855_v8  ;;  %v9581_v22 = vrot.slane %v3621_v28, 9  ;;  %v814_v5 = vld [vmem:[#allocation2 + $0x84] sm:$0xf]  ;;  %v13196_v6 = vld [vmem:[#allocation3 + $0x44] sm:$0x1] }
  0xf3   : > { %v2757_v47 = vsel %vm12916_vm15, %v2752_v13, %v2756_v31  ;;  %v3698_v2 = vrot.slane %v12752_v7, 5  ;;  %v3701_v34 = vrot.slane %v13094_v48, 5  ;;  %10788 = vmatpush3.bf16.msra.mxu0 %v11563_v61  ;;  %11250 = vmatprep.subr.bf16.mxu1 %v11856_v26  ;;  %v890_v25 = vld [vmem:[#allocation2 + $0x78] sm:$0x1]  ;;  %v588_v21 = vshrl.u32 %v13152_v46, 16 }
  0xf4   : > { %v9533_v32 = vcombine.low %v2747_v49, %v2757_v47  ;;  %v1219_v53 = vadd.f32 %v13145_v17, %v1042_v24  ;;  %10656 = vmatmul.mubr.bf16.gmra.mrb[4].mxu1 %v9532_v59  ;;  %v3695_v15 = vsel %vm12993_vm4, %v3693_v12, %v3694_v37  ;;  %v591_v7 = vshll.u32 %v13152_v46, 16  ;;  %10789 = vmatprep.subr.bf16.mxu0 %v11564_v33 }
  0xf5   : > { %v891_v48 = vsel %vm12344_vm7, %v13035_v41, %v890_v25  ;;  %v9612_v61 = vcombine.low %v3692_v60, %v3695_v15  ;;  %v3699_v30 = vsel %vm12993_vm4, %v9581_v22, %v3698_v2  ;;  %v3700_v57 = vrot.slane %v3698_v2, 4 }
  0xf6   : > { %10659 = vmatprep.mubr.bf16.mxu1 %v9533_v32  ;;  %v941_v38 = vld [vmem:[#allocation2 + $0x6c] sm:$0xf]  ;;  %892 = vst [vmem:[#allocation2 + $0x78] sm:$0x1] %v891_v48  ;;  %v1275_v23 = vadd.f32 %v1219_v53, %v12970_v52  ;;  %v590_v40 = vrot.slane %v588_v21, 7  ;;  %v596_v42 = vshrl.u32 %v403_v45, 16  ;;  %11258 = vmatpush3.bf16.msra.mxu1 %v11856_v26 }
  0xf7   : > { %v599_v49 = vshll.u32 %v403_v45, 16  ;;  %v992_v31 = vunpack.c.l.bf16 %v941_v38  ;;  %10752 = vmatmul.mubr.bf16.gmra.mrb[4].mxu0 %v9612_v61  ;;  %v3702_v41 = vsel %vm12993_vm4, %v3700_v57, %v3701_v34  ;;  %v2768_v58 = vshll.u32 %v12802_v29, 16  ;;  %v11565_v52 = vld [vmem:[%s16279_s5 + $0xf0] sm:$0xff]   ;;  %v13188_v13 = vld [vmem:[#allocation2 + $0x80] sm:$0x1] }
  0xf8   : > { %v1323_v8 = vmul.f32 0.25, %v1275_v23  ;;  %v9613_v37 = vcombine.low %v3699_v30, %v3702_v41  ;;  %v593_v56 = vor.u32 %v591_v7, %v590_v40  ;;  %v594_v28 = vrot.slane %v590_v40, 4  ;;  %10790 = vmatpush3.bf16.msra.mxu0 %v11564_v33  ;;  %v1890_v34 = vld [vmem:[#allocation3 + $0x74] sm:$0x1] }
  0xf9   : > { %v1040_v51 = vadd.f32 %v12958_v14, %v992_v31  ;;  %v13191_v60 = vrot.slane %v992_v31, 7  ;;  %v997_v24 = vunpack.c.l.bf16 %v13188_v13  ;;  %v13194_v0 = vrot.slane %v596_v42, 7  ;;  %10791 = vmatprep.subr.bf16.mxu0 %v11565_v52  ;;  %v11566_v14 = vld [vmem:[%s16279_s5 + $0xf8] sm:$0xff]  }
  0xfa   : > { %v1371_v59 = vmax.f32 %v1323_v8, 0.0  ;;  %10755 = vmatprep.mubr.bf16.mxu0 %v9613_v37  ;;  %v815_v47 = vsel %vm12286_vm6, %v593_v56, %v814_v5  ;;  %v13200_v12 = vrot.slane %v2765_v35, 4  ;;  %v2770_v32 = vrot.slane %v2768_v58, 5  ;;  %v1886_v37 = vld [vmem:[#allocation3 + $0x6c] sm:$0xf] }
  0xfb   : > { %v1217_v22 = vadd.f32 %v13191_v60, %v1040_v51  ;;  %v1123_v2 = vsel %vm1096_vm8, %v13191_v60, %v13145_v17  ;;  %v1045_v45 = vadd.f32 %v997_v24, %v994_v19  ;;  %816 = vst [vmem:[#allocation2 + $0x84] sm:$0xf] %v815_v47  ;;  %v601_v26 = vor.u32 %v599_v49, %v13194_v0 }
  0xfc   : > { %v1218_v25 = vadd.f32 %v1123_v2, %v13142_v27  ;;  %v10074_v53 = vpack.c.bf16 %v1371_v59, %v1371_v59  ;;  %v603_v15 = vrot.slane %v13194_v0, 4  ;;  %v2771_v21 = vsel %vm12916_vm15, %v13200_v12, %v2770_v32  ;;  %10792 = vmatpush3.bf16.msra.mxu0 %v11565_v52  ;;  %v2361_v27 = vpop.permute.xlu0 %2360 }
  0xfd   : > { %v1273_v7 = vadd.f32 %v1217_v22, %v12967_v16  ;;  %v10264_v48 = vld [vmem:[#allocation2 + $0x78] sm:$0xff]   ;;  %v602_v55 = vsel %vm12030_vm2, %v594_v28, %v601_v26  ;;  %v16405_v19 = vshrl.u32 %v12802_v29, 16  ;;  %v2778_v30 = vshll.u32 %v13196_v6, 16  ;;  %10793 = vmatprep.subr.bf16.mxu0 %v11566_v14 }
  0xfe   : > { %v1274_v57 = vadd.f32 %v1218_v25, %v12979_v9  ;;  %v13226_v38 = vunpack.c.l.bf16 %v10264_v48  ;;  %v10183_v23 = vunpack.c.h.bf16 %v10264_v48  ;;  %v1891_v40 = vsel %vm12344_vm7, %v10074_v53, %v1890_v34  ;;  %817 = vst.msk [vmem:[#allocation2 + $0x88] sm:$0xf] %vm738_vm3, %v602_v55  ;;  %v13257_v34 = vld [vmem:[#allocation3 + $0x50] sm:$0x1] }
  0xff   : > { %v2774_v61 = vrot.slane %v16405_v19, 4  ;;  %v1321_v16 = vmul.f32 0.25, %v1273_v7  ;;  %1892 = vst [vmem:[#allocation3 + $0x74] sm:$0x1] %v1891_v40  ;;  %v2780_v29 = vrot.slane %v2778_v30, 5  ;;  %v2789_v49 = vor.u32 %v12909_v3, %v12907_v43 }
 0x100   : > { %v1322_v33 = vmul.f32 0.25, %v1274_v57  ;;  %v1044_v41 = vadd.f32 %v10183_v23, %v13128_v4  ;;  %v13235_v9 = vrot.slane %v13226_v38, 7  ;;  %v13237_v5 = vrot.slane %v10183_v23, 7  ;;  %10794 = vmatpush3.bf16.msra.mxu0 %v11566_v14  ;;  %v3622_v57 = vld [vmem:[#allocation3 + $0x3c] sm:$0xe] }
 0x101   : > { %v2775_v42 = vor.u32 %v2774_v61, %v2770_v32  ;;  %v1369_v35 = vmax.f32 %v1321_v16, 0.0  ;;  %v1043_v58 = vadd.f32 %v13226_v38, %v992_v31  ;;  %v13240_v8 = vrot.slane %v2789_v49, 4  ;;  %v2363_v32 = vpop.permute.xlu0 %2362 }
 0x102   : > { %v1370_v56 = vmax.f32 %v1322_v33, 0.0  ;;  %v13245_v43 = vsel %vm1096_vm8, %v13235_v9, %v13237_v5  ;;  %v1222_v3 = vadd.f32 %v13237_v5, %v1045_v45  ;;  %v893_v4 = vld [vmem:[#allocation2 + $0x84] sm:$0x1]  ;;  %v2792_v28 = vshll.u32 %v12831_v20, 16  ;;  %v13279_v33 = vld [vmem:[%s12226_s23 + $0x58] sm:$0xf] }
 0x103   : > { %v2776_v52 = vrot.slane %v2775_v42, 4  ;;  %v10072_v51 = vpack.c.bf16 %v1369_v35, %v1369_v35  ;;  %v1221_v59 = vadd.f32 %v13245_v43, %v1044_v41  ;;  %v1220_v31 = vadd.f32 %v13235_v9, %v1043_v58  ;;  %v1897_v41 = vld [vmem:[#allocation3 + $0x80] sm:$0x1] }
 0x104   : > { %v894_v47 = vsel %vm12344_vm7, %v13152_v46, %v893_v4  ;;  %v10073_v12 = vpack.c.bf16 %v1370_v56, %v1370_v56  ;;  %v1278_v14 = vadd.f32 %v1222_v3, %v13145_v17  ;;  %v2794_v45 = vrot.slane %v2792_v28, 5  ;;  %v2359_v46 = vpop.permute.xlu1 %2358  ;;  %v11857_v3 = vld [vmem:[#allocation3 + $0x40] sm:$0xf] }
 0x105   : > { %895 = vst [vmem:[#allocation2 + $0x84] sm:$0x1] %v894_v47  ;;  %v2781_v22 = vsel %vm12916_vm15, %v2776_v52, %v2780_v29  ;;  %v1887_v26 = vsel %vm12286_vm6, %v10072_v51, %v1886_v37  ;;  %v1277_v25 = vadd.f32 %v1221_v59, %v1123_v2  ;;  %v1276_v53 = vadd.f32 %v1220_v31, %v13191_v60  ;;  %v948_v7 = vld [vmem:[#allocation2 + $0x88] sm:$0xf]  ;;  %v1893_v37 = vld [vmem:[#allocation3 + $0x78] sm:$0xf] }
 0x106   : > { %v9534_v48 = vcombine.low %v2771_v21, %v2781_v22  ;;  %1888 = vst [vmem:[#allocation3 + $0x6c] sm:$0xf] %v1887_v26  ;;  %1889 = vst.msk [vmem:[#allocation3 + $0x70] sm:$0xf] %vm738_vm3, %v10073_v12  ;;  %v2519_v17 = vld [vmem:[#allocation3 + $0x74] sm:$0x1]  ;;  %v13263_v19 = vunpack.c.l.bf16 %v948_v7  ;;  %v2795_v61 = vsel %vm12916_vm15, %v13240_v8, %v2794_v45 }
 0x107   : > { %v1326_v55 = vmul.f32 0.25, %v1278_v14  ;;  %v16406_v30 = vshrl.u32 %v12831_v20, 16  ;;  %2518 = vst.msk [vmem:[#allocation3 + $0x70] sm:$0xf] %vm2454_vm9, %v2361_v27  ;;  %v1325_v60 = vmul.f32 0.25, %v1277_v25  ;;  %v2520_v21 = vsel %vm12798_vm12, %v2363_v32, %v2519_v17 }
 0x108   : > { %v1324_v40 = vmul.f32 0.25, %v1276_v53  ;;  %10660 = vmatmul.mubr.bf16.gmra.mrb[8].mxu1 %v9534_v48  ;;  %v2802_v16 = vshll.u32 %v13257_v34, 16  ;;  %2521 = vst [vmem:[#allocation3 + $0x74] sm:$0x1] %v2520_v21  ;;  %v1047_v29 = vadd.f32 %v10183_v23, %v13263_v19  ;;  %v13276_v49 = vrot.slane %v13263_v19, 7  ;;  %v11568_v23 = vld [vmem:[%s16279_s5 + $0x100] sm:$0xff]   ;;  %v2367_v14 = vpop.permute.xlu1 %2366 }
 0x109   : > { %v2798_v2 = vrot.slane %v16406_v30, 4  ;;  %v1374_v42 = vmax.f32 %v1326_v55, 0.0  ;;  %v1373_v27 = vmax.f32 %v1325_v60, 0.0  ;;  %v9582_v52 = vrot.slane %v3622_v57, 9  ;;  %v405_v47 = vld [vmem:[%s12226_s23 + $0x5c] sm:$0xf]  ;;  %10827 = vmatprep.subr.bf16.mxu0 %v11568_v23 }
 0x10a   : > { %v1372_v35 = vmax.f32 %v1324_v40, 0.0  ;;  %v2804_v58 = vrot.slane %v2802_v16, 5  ;;  %v3705_v4 = vrot.slane %v11857_v3, 5  ;;  %v3708_v28 = vrot.slane %v13196_v6, 5  ;;  %v821_v25 = vld [vmem:[#allocation2 + $0x90] sm:$0xf] }
 0x10b   : > { %v2799_v20 = vor.u32 %v2798_v2, %v2794_v45  ;;  %v10077_v8 = vpack.c.bf16 %v1374_v42, %v1374_v42  ;;  %v10076_v51 = vpack.c.bf16 %v1373_v27, %v1373_v27  ;;  %v605_v12 = vshrl.u32 %v13279_v33, 16  ;;  %v818_v30 = vld [vmem:[#allocation2 + $0x8c] sm:$0x1]  ;;  %v3623_v40 = vld [vmem:[#allocation3 + $0x48] sm:$0xe] }
 0x10c   : > { %v10075_v59 = vpack.c.bf16 %v1372_v35, %v1372_v35  ;;  %v947_v31 = vld [vmem:[#allocation2 + $0x84] sm:$0xf]  ;;  %v608_v32 = vshll.u32 %v13279_v33, 16  ;;  %v3706_v26 = vsel %vm12993_vm4, %v9582_v52, %v3705_v4  ;;  %v3707_v17 = vrot.slane %v3705_v4, 4 }
 0x10d   : > { %v2800_v56 = vrot.slane %v2799_v20, 4  ;;  %v1898_v22 = vsel %vm12344_vm7, %v10077_v8, %v1897_v41  ;;  %v13290_v45 = vunpack.c.l.bf16 %v947_v31  ;;  %v2515_v53 = vld [vmem:[#allocation3 + $0x6c] sm:$0xf]  ;;  %1896 = vst.msk [vmem:[#allocation3 + $0x7c] sm:$0xf] %vm738_vm3, %v10076_v51  ;;  %v607_v55 = vrot.slane %v605_v12, 7  ;;  %v2365_v51 = vpop.permute.xlu0 %2364 }
 0x10e   : > { %1899 = vst [vmem:[#allocation3 + $0x80] sm:$0x1] %v1898_v22  ;;  %v1894_v7 = vsel %vm12286_vm6, %v10075_v59, %v1893_v37  ;;  %v2516_v2 = vsel %vm12572_vm10, %v2359_v46, %v2515_v53  ;;  %2525 = vst.msk [vmem:[#allocation3 + $0x7c] sm:$0xf] %vm2454_vm9, %v2367_v14  ;;  %v613_v21 = vshrl.u32 %v405_v47, 16  ;;  %v616_v20 = vshll.u32 %v405_v47, 16  ;;  %v2369_v37 = vpop.permute.xlu1 %2368 }
 0x10f   : > { %v2805_v6 = vsel %vm12916_vm15, %v2800_v56, %v2804_v58  ;;  %1895 = vst [vmem:[#allocation3 + $0x78] sm:$0xf] %v1894_v7  ;;  %v1046_v57 = vadd.f32 %v13226_v38, %v13290_v45  ;;  %v13305_v60 = vrot.slane %v13290_v45, 7  ;;  %2517 = vst [vmem:[#allocation3 + $0x6c] sm:$0xf] %v2516_v2  ;;  %v610_v16 = vor.u32 %v608_v32, %v607_v55 }
 0x110   : > { %v9535_v48 = vcombine.low %v2795_v61, %v2805_v6  ;;  %v3709_v61 = vsel %vm12993_vm4, %v3707_v17, %v3708_v28  ;;  %v611_v42 = vrot.slane %v607_v55, 4  ;;  %v615_v41 = vrot.slane %v613_v21, 7  ;;  %v11858_v28 = vld [vmem:[#allocation3 + $0x4c] sm:$0xf]  ;;  %v13327_v31 = vld [vmem:[#allocation3 + $0x58] sm:$0xf] }
 0x111   : > { %v1223_v46 = vadd.f32 %v13305_v60, %v1046_v57  ;;  %v13313_v27 = vsel %vm1096_vm8, %v13305_v60, %v13276_v49  ;;  %v9614_v38 = vcombine.low %v3706_v26, %v3709_v61  ;;  %v822_v58 = vsel %vm12286_vm6, %v610_v16, %v821_v25  ;;  %v13334_v6 = vld [vmem:[#allocation3 + $0x5c] sm:$0x1]  ;;  %v2587_v25 = vld [vmem:[#allocation3 + $0x60] sm:$0xf]  ;;  %v1900_v7 = vld [vmem:[#allocation3 + $0x84] sm:$0xf] }
 0x112   : > { %10663 = vmatprep.mubr.bf16.mxu1 %v9535_v48  ;;  %v1224_v35 = vadd.f32 %v13313_v27, %v1047_v29  ;;  %v819_v52 = vsel %vm12344_vm7, %v603_v15, %v818_v30  ;;  %v9583_v8 = vrot.slane %v3623_v40, 9  ;;  %v618_v3 = vor.u32 %v616_v20, %v615_v41  ;;  %823 = vst [vmem:[#allocation2 + $0x90] sm:$0xf] %v822_v58  ;;  %v825_v29 = vld [vmem:[#allocation2 + $0x98] sm:$0x1] }
 0x113   : > { %v1279_v56 = vadd.f32 %v1223_v46, %v13235_v9  ;;  %10756 = vmatmul.mubr.bf16.gmra.mrb[8].mxu0 %v9614_v38  ;;  %v620_v4 = vrot.slane %v615_v41, 4  ;;  %820 = vst [vmem:[#allocation2 + $0x8c] sm:$0x1] %v819_v52  ;;  %v3712_v23 = vrot.slane %v11858_v28, 5  ;;  %v3715_v0 = vrot.slane %v13257_v34, 5  ;;  %v2373_v38 = vpop.permute.xlu0 %2372 }
 0x114   : > { %v1280_v59 = vadd.f32 %v1224_v35, %v13245_v43  ;;  %v2813_v15 = vor.u32 %v12936_v44, %v12934_v63  ;;  %v2816_v9 = vshll.u32 %v13327_v31, 16  ;;  %v619_v32 = vsel %vm12030_vm2, %v611_v42, %v618_v3  ;;  %v13345_v30 = vld [vmem:[#allocation3 + $0x64] sm:$0xf]  ;;  %v3624_v46 = vld [vmem:[#allocation3 + $0x54] sm:$0xe] }
 0x115   : > { %v2526_v47 = vld [vmem:[#allocation3 + $0x80] sm:$0x1]  ;;  %v1327_v12 = vmul.f32 0.25, %v1279_v56  ;;  %v3713_v14 = vsel %vm12993_vm4, %v9583_v8, %v3712_v23  ;;  %v3714_v22 = vrot.slane %v3712_v23, 4  ;;  %824 = vst.msk [vmem:[#allocation2 + $0x94] sm:$0xf] %vm738_vm3, %v619_v32  ;;  %v826_v44 = vsel %vm12344_vm7, %v620_v4, %v825_v29 }
 0x116   : > { %v2527_v43 = vsel %vm12798_vm12, %v2369_v37, %v2526_v47  ;;  %v2522_v34 = vld [vmem:[#allocation3 + $0x78] sm:$0xf]  ;;  %v1328_v63 = vmul.f32 0.25, %v1280_v59  ;;  %v2814_v26 = vrot.slane %v2813_v15, 4  ;;  %827 = vst [vmem:[#allocation2 + $0x98] sm:$0x1] %v826_v44 }
 0x117   : > { %2528 = vst [vmem:[#allocation3 + $0x80] sm:$0x1] %v2527_v43  ;;  %v2523_v53 = vsel %vm12572_vm10, %v2365_v51, %v2522_v34  ;;  %v1375_v48 = vmax.f32 %v1327_v12, 0.0  ;;  %v3716_v17 = vsel %vm12993_vm4, %v3714_v22, %v3715_v0  ;;  %v2818_v55 = vrot.slane %v2816_v9, 5  ;;  %v13359_v28 = vld [vmem:[#allocation3 + $0x68] sm:$0x1] }
 0x118   : > { %2524 = vst [vmem:[#allocation3 + $0x78] sm:$0xf] %v2523_v53  ;;  %v1376_v2 = vmax.f32 %v1328_v63, 0.0  ;;  %v9615_v57 = vcombine.low %v3713_v14, %v3716_v17  ;;  %v2822_v21 = vrot.slane %v2820_v62, 4  ;;  %v2826_v40 = vshll.u32 %v13334_v6, 16  ;;  %v2371_v53 = vpop.permute.xlu1 %2370 }
 0x119   : > { %v10078_v61 = vpack.c.bf16 %v1375_v48, %v1375_v48  ;;  %v2819_v16 = vsel %vm12916_vm15, %v2814_v26, %v2818_v55  ;;  %v2831_v42 = vshrl.u32 %v2587_v25, 16  ;;  %v2834_v20 = vshll.u32 %v2587_v25, 16  ;;  %v896_v35 = vld [vmem:[#allocation2 + $0x90] sm:$0x1]  ;;  %v13373_v22 = vld [vmem:[%s12226_s23 + $0x60] sm:$0xf] }
 0x11a   : > { %v10079_v41 = vpack.c.bf16 %v1376_v2, %v1376_v2  ;;  %v949_v58 = vld [vmem:[#allocation2 + $0x8c] sm:$0x1]  ;;  %10759 = vmatprep.mubr.bf16.mxu0 %v9615_v57  ;;  %v2823_v52 = vor.u32 %v2822_v21, %v2818_v55  ;;  %v2828_v8 = vrot.slane %v2826_v40, 5  ;;  %v2840_v37 = vshll.u32 %v13345_v30, 16  ;;  %v407_v63 = vld [vmem:[%s12226_s23 + $0x64] sm:$0xf] }
 0x11b   : > { %v1901_v18 = vsel %vm12286_vm6, %v10078_v61, %v1900_v7  ;;  %v897_v62 = vsel %vm12344_vm7, %v13279_v33, %v896_v35  ;;  %v1000_v56 = vunpack.c.l.bf16 %v949_v58  ;;  %v2833_v3 = vrot.slane %v2831_v42, 4  ;;  %v828_v58 = vld [vmem:[#allocation2 + $0x9c] sm:$0xf] }
 0x11c   : > { %1902 = vst [vmem:[#allocation3 + $0x84] sm:$0xf] %v1901_v18  ;;  %1903 = vst.msk [vmem:[#allocation3 + $0x88] sm:$0xf] %vm738_vm3, %v10079_v41  ;;  %v2824_v4 = vrot.slane %v2823_v52, 4  ;;  %v2836_v23 = vrot.slane %v2834_v20, 5 }
 0x11d   : > { %898 = vst [vmem:[#allocation2 + $0x90] sm:$0x1] %v897_v62  ;;  %v2842_v29 = vrot.slane %v2840_v37, 5  ;;  %v2844_v51 = vshrl.u32 %v13345_v30, 16  ;;  %2532 = vst.msk [vmem:[#allocation3 + $0x88] sm:$0xf] %vm2454_vm9, %v2373_v38  ;;  %v1048_v33 = vadd.f32 %v1000_v56, %v997_v24 }
 0x11e   : > { %v2850_v59 = vshll.u32 %v13359_v28, 16  ;;  %v9584_v0 = vrot.slane %v3624_v46, 9  ;;  %v3719_v15 = vrot.slane %v13327_v31, 5  ;;  %v13367_v9 = vld [vmem:[#allocation2 + $0x98] sm:$0x1]  ;;  %v2829_v47 = vsel %vm12916_vm15, %v2824_v4, %v2828_v8 }
 0x11f   : > { %v2837_v12 = vor.u32 %v2836_v23, %v2833_v3  ;;  %v2846_v32 = vrot.slane %v2844_v51, 4  ;;  %v3722_v14 = vrot.slane %v13334_v6, 5  ;;  %v1225_v43 = vadd.f32 %v13276_v49, %v1048_v33  ;;  %v3625_v52 = vld [vmem:[#allocation3 + $0x60] sm:$0xe]  ;;  %v1904_v23 = vld [vmem:[#allocation3 + $0x8c] sm:$0x1] }
 0x120   : > { %v1003_v13 = vunpack.c.l.bf16 %v13367_v9  ;;  %v9536_v24 = vcombine.low %v2819_v16, %v2829_v47  ;;  %v2852_v34 = vrot.slane %v2850_v59, 5  ;;  %v3720_v26 = vsel %vm12993_vm4, %v9584_v0, %v3719_v15 }
 0x121   : > { %v2838_v44 = vrot.slane %v2837_v12, 4  ;;  %v2847_v31 = vor.u32 %v2846_v32, %v2842_v29  ;;  %v3721_v25 = vrot.slane %v3719_v15, 4  ;;  %v1281_v7 = vadd.f32 %v1225_v43, %v13237_v5  ;;  %v13418_v12 = vld [vmem:[%s12226_s23 + $0x68] sm:$0xf] }
 0x122   : > { %v1051_v6 = vadd.f32 %v1003_v13, %v1000_v56  ;;  %10664 = vmatmul.mubr.bf16.gmra.mrb[12].mxu1 %v9536_v24  ;;  %v622_v48 = vshrl.u32 %v13373_v22, 16  ;;  %v625_v17 = vshll.u32 %v13373_v22, 16  ;;  %v630_v21 = vshrl.u32 %v407_v63, 16 }
 0x123   : > { %v2843_v55 = vsel %vm12916_vm15, %v2838_v44, %v2842_v29  ;;  %v2848_v2 = vrot.slane %v2847_v31, 4  ;;  %v3723_v57 = vsel %vm12993_vm4, %v3721_v25, %v3722_v14  ;;  %v2529_v40 = vld [vmem:[#allocation3 + $0x84] sm:$0xf]  ;;  %v1329_v16 = vmul.f32 0.25, %v1281_v7 }
 0x124   : > { %v10265_v61 = vld [vmem:[#allocation2 + $0x90] sm:$0xff]   ;;  %v9616_v5 = vcombine.low %v3720_v26, %v3723_v57  ;;  %v624_v42 = vrot.slane %v622_v48, 7  ;;  %v633_v20 = vshll.u32 %v407_v63, 16  ;;  %v2530_v46 = vsel %vm12572_vm10, %v2371_v53, %v2529_v40  ;;  %v1911_v57 = vld [vmem:[#allocation3 + $0x98] sm:$0x1] }
 0x125   : > { %v13391_v38 = vunpack.c.l.bf16 %v10265_v61  ;;  %v13393_v41 = vunpack.c.h.bf16 %v10265_v61  ;;  %v2853_v35 = vsel %vm12916_vm15, %v2848_v2, %v2852_v34  ;;  %2531 = vst [vmem:[#allocation3 + $0x84] sm:$0xf] %v2530_v46  ;;  %v1377_v8 = vmax.f32 %v1329_v16, 0.0  ;;  %v409_v34 = vld [vmem:[%s12226_s23 + $0x6c] sm:$0xf]  ;;  %v2375_v46 = vpop.permute.xlu0 %2374 }
 0x126   : > { %v9537_v37 = vcombine.low %v2843_v55, %v2853_v35  ;;  %10760 = vmatmul.mubr.bf16.gmra.mrb[12].mxu0 %v9616_v5  ;;  %v627_v18 = vor.u32 %v625_v17, %v624_v42  ;;  %v628_v62 = vrot.slane %v624_v42, 4  ;;  %v632_v59 = vrot.slane %v630_v21, 7  ;;  %v832_v55 = vld [vmem:[#allocation2 + $0xa4] sm:$0x1]  ;;  %v13437_v61 = vld [vmem:[#allocation3 + $0x6c] sm:$0xf] }
 0x127   : > { %v1050_v56 = vadd.f32 %v13393_v41, %v13263_v19  ;;  %v13400_v3 = vrot.slane %v13391_v38, 7  ;;  %v13403_v4 = vrot.slane %v13393_v41, 7  ;;  %v1049_v29 = vadd.f32 %v13391_v38, %v13290_v45  ;;  %v1907_v35 = vld [vmem:[#allocation3 + $0x90] sm:$0xf] }
 0x128   : > { %v10080_v51 = vpack.c.bf16 %v1377_v8, %v1377_v8  ;;  %10667 = vmatprep.mubr.bf16.mxu1 %v9537_v37  ;;  %v829_v33 = vsel %vm12286_vm6, %v627_v18, %v828_v58  ;;  %v9585_v0 = vrot.slane %v3625_v52, 9  ;;  %v3726_v45 = vrot.slane %v13345_v30, 5 }
 0x129   : > { %v13412_v19 = vsel %vm1096_vm8, %v13400_v3, %v13403_v4  ;;  %v1228_v15 = vadd.f32 %v13403_v4, %v1051_v6  ;;  %v1226_v47 = vadd.f32 %v13400_v3, %v1049_v29  ;;  %830 = vst [vmem:[#allocation2 + $0x9c] sm:$0xf] %v829_v33  ;;  %v635_v43 = vor.u32 %v633_v20, %v632_v59  ;;  %v13447_v29 = vld [vmem:[#allocation3 + $0x70] sm:$0xf] }
 0x12a   : > { %v1227_v32 = vadd.f32 %v13412_v19, %v1050_v56  ;;  %v1905_v14 = vsel %vm12344_vm7, %v10080_v51, %v1904_v23  ;;  %v637_v24 = vrot.slane %v632_v59, 4  ;;  %v3727_v31 = vsel %vm12993_vm4, %v9585_v0, %v3726_v45  ;;  %v13449_v51 = vld [vmem:[#allocation3 + $0x74] sm:$0x1] }
 0x12b   : > { %1906 = vst [vmem:[#allocation3 + $0x8c] sm:$0x1] %v1905_v14  ;;  %v1284_v63 = vadd.f32 %v1228_v15, %v13276_v49  ;;  %v1282_v44 = vadd.f32 %v1226_v47, %v13305_v60  ;;  %v3728_v26 = vrot.slane %v3726_v45, 4  ;;  %v636_v25 = vsel %vm12030_vm2, %v628_v62, %v635_v43  ;;  %v835_v49 = vld [vmem:[#allocation2 + $0xa8] sm:$0xf] }
 0x12c   : > { %v1283_v30 = vadd.f32 %v1227_v32, %v13313_v27  ;;  %v3729_v53 = vrot.slane %v13359_v28, 5  ;;  %v639_v7 = vshrl.u32 %v13418_v12, 16  ;;  %831 = vst.msk [vmem:[#allocation2 + $0xa0] sm:$0xf] %vm738_vm3, %v636_v25  ;;  %v642_v60 = vshll.u32 %v13418_v12, 16 }
 0x12d   : > { %v1332_v6 = vmul.f32 0.25, %v1284_v63  ;;  %v1330_v48 = vmul.f32 0.25, %v1282_v44  ;;  %v647_v17 = vshrl.u32 %v409_v34, 16  ;;  %v650_v40 = vshll.u32 %v409_v34, 16  ;;  %v13455_v45 = vld [vmem:[#allocation3 + $0x78] sm:$0xf] }
 0x12e   : > { %v1331_v2 = vmul.f32 0.25, %v1283_v30  ;;  %v3730_v27 = vsel %vm12993_vm4, %v3728_v26, %v3729_v53  ;;  %v641_v21 = vrot.slane %v639_v7, 7  ;;  %v833_v37 = vsel %vm12344_vm7, %v637_v24, %v832_v55  ;;  %v13465_v34 = vld [vmem:[#allocation3 + $0x7c] sm:$0xf]  ;;  %v3626_v55 = vld [vmem:[#allocation3 + $0x6c] sm:$0xe] }
 0x12f   : > { %v1380_v28 = vmax.f32 %v1332_v6, 0.0  ;;  %v1378_v16 = vmax.f32 %v1330_v48, 0.0  ;;  %v9617_v5 = vcombine.low %v3727_v31, %v3730_v27  ;;  %v13439_v42 = vrot.slane %v647_v17, 7  ;;  %834 = vst [vmem:[#allocation2 + $0xa4] sm:$0x1] %v833_v37 }
 0x130   : > { %v1379_v20 = vmax.f32 %v1331_v2, 0.0  ;;  %v899_v58 = vld [vmem:[#allocation2 + $0x9c] sm:$0x1]  ;;  %v644_v52 = vor.u32 %v642_v60, %v641_v21  ;;  %v645_v8 = vrot.slane %v641_v21, 4  ;;  %v2855_v47 = vshrl.u32 %v13437_v61, 16 }
 0x131   : > { %v10083_v18 = vpack.c.bf16 %v1380_v28, %v1380_v28  ;;  %v10081_v62 = vpack.c.bf16 %v1378_v16, %v1378_v16  ;;  %v900_v56 = vsel %vm12344_vm7, %v13373_v22, %v899_v58  ;;  %10763 = vmatprep.mubr.bf16.mxu0 %v9617_v5  ;;  %v652_v23 = vor.u32 %v650_v40, %v13439_v42  ;;  %v2379_v22 = vpop.permute.xlu1 %2378  ;;  %v13486_v5 = vld [vmem:[#allocation3 + $0x80] sm:$0x1]  ;;  %v2377_v58 = vpop.permute.xlu0 %2376 }
 0x132   : > { %v10082_v33 = vpack.c.bf16 %v1379_v20, %v1379_v20  ;;  %v2533_v59 = vld [vmem:[#allocation3 + $0x8c] sm:$0x1]  ;;  %901 = vst [vmem:[#allocation2 + $0x9c] sm:$0x1] %v900_v56  ;;  %v654_v0 = vrot.slane %v13439_v42, 4  ;;  %v836_v15 = vsel %vm12286_vm6, %v644_v52, %v835_v49  ;;  %v2857_v44 = vrot.slane %v2855_v47, 4 }
 0x133   : > { %v2534_v32 = vsel %vm12798_vm12, %v2375_v46, %v2533_v59  ;;  %v1912_v14 = vsel %vm12344_vm7, %v10083_v18, %v1911_v57  ;;  %v1908_v43 = vsel %vm12286_vm6, %v10081_v62, %v1907_v35  ;;  %v653_v24 = vsel %vm12030_vm2, %v645_v8, %v652_v23  ;;  %837 = vst [vmem:[#allocation2 + $0xa8] sm:$0xf] %v836_v15  ;;  %v954_v63 = vld [vmem:[#allocation2 + $0xa0] sm:$0xf] }
 0x134   : > { %1910 = vst.msk [vmem:[#allocation3 + $0x94] sm:$0xf] %vm738_vm3, %v10082_v33  ;;  %2535 = vst [vmem:[#allocation3 + $0x8c] sm:$0x1] %v2534_v32  ;;  %v2858_v31 = vshll.u32 %v13437_v61, 16  ;;  %v2864_v26 = vshll.u32 %v13447_v29, 16  ;;  %v13473_v25 = vunpack.c.l.bf16 %v954_v63 }
 0x135   : > { %1913 = vst [vmem:[#allocation3 + $0x98] sm:$0x1] %v1912_v14  ;;  %1909 = vst [vmem:[#allocation3 + $0x90] sm:$0xf] %v1908_v43  ;;  %v2868_v30 = vshrl.u32 %v13447_v29, 16  ;;  %v2874_v53 = vshll.u32 %v13449_v51, 16  ;;  %v2381_v35 = vpop.permute.xlu1 %2380 }
 0x136   : > { %838 = vst.msk [vmem:[#allocation2 + $0xac] sm:$0xf] %vm738_vm3, %v653_v24  ;;  %v2879_v7 = vshrl.u32 %v13455_v45, 16  ;;  %v2882_v6 = vshll.u32 %v13455_v45, 16  ;;  %v2860_v48 = vrot.slane %v2858_v31, 5  ;;  %v2866_v49 = vrot.slane %v2864_v26, 5 }
 0x137   : > { %2539 = vst.msk [vmem:[#allocation3 + $0x94] sm:$0xf] %vm2454_vm9, %v2379_v22  ;;  %v2870_v60 = vrot.slane %v2868_v30, 4  ;;  %v2888_v17 = vshll.u32 %v13465_v34, 16  ;;  %v1053_v2 = vadd.f32 %v13393_v41, %v13473_v25  ;;  %v13482_v57 = vrot.slane %v13473_v25, 7 }
 0x138   : > { %v2876_v27 = vrot.slane %v2874_v53, 5  ;;  %v2881_v21 = vrot.slane %v2879_v7, 4  ;;  %v13484_v40 = vld [vmem:[#allocation2 + $0xa4] sm:$0x1]  ;;  %v2861_v28 = vor.u32 %v2860_v48, %v2857_v44  ;;  %v2884_v20 = vrot.slane %v2882_v6, 5 }
 0x139   : > { %v2871_v16 = vor.u32 %v2870_v60, %v2866_v49  ;;  %v2890_v46 = vrot.slane %v2888_v17, 5  ;;  %v953_v52 = vld [vmem:[#allocation2 + $0x9c] sm:$0xf]  ;;  %v1006_v8 = vunpack.c.l.bf16 %v13484_v40  ;;  %v2892_v41 = vshrl.u32 %v13465_v34, 16  ;;  %v839_v30 = vld [vmem:[#allocation2 + $0xb0] sm:$0x1] }
 0x13a   : > { %v2898_v37 = vshll.u32 %v13486_v5, 16  ;;  %v9586_v18 = vrot.slane %v3626_v55, 9  ;;  %v13491_v62 = vunpack.c.l.bf16 %v953_v52  ;;  %v902_v56 = vld [vmem:[#allocation2 + $0xa8] sm:$0x1]  ;;  %v2862_v23 = vrot.slane %v2861_v28, 4 }
 0x13b   : > { %v2872_v33 = vrot.slane %v2871_v16, 4  ;;  %v2885_v59 = vor.u32 %v2884_v20, %v2881_v21  ;;  %v903_v22 = vsel %vm12344_vm7, %v13418_v12, %v902_v56  ;;  %v1054_v32 = vadd.f32 %v1006_v8, %v1003_v13  ;;  %v3627_v55 = vld [vmem:[#allocation3 + $0x78] sm:$0xe] }
 0x13c   : > { %v2540_v15 = vld [vmem:[#allocation3 + $0x98] sm:$0x1]  ;;  %v2536_v47 = vld [vmem:[#allocation3 + $0x90] sm:$0xf]  ;;  %v2894_v14 = vrot.slane %v2892_v41, 4  ;;  %v2900_v43 = vrot.slane %v2898_v37, 5  ;;  %v1052_v44 = vadd.f32 %v13391_v38, %v13491_v62  ;;  %v2867_v13 = vsel %vm12916_vm15, %v2862_v23, %v2866_v49 }
 0x13d   : > { %v2541_v24 = vsel %vm12798_vm12, %v2381_v35, %v2540_v15  ;;  %v2537_v63 = vsel %vm12572_vm10, %v2377_v58, %v2536_v47  ;;  %v13507_v31 = vrot.slane %v13491_v62, 7  ;;  %904 = vst [vmem:[#allocation2 + $0xa8] sm:$0x1] %v903_v22  ;;  %v1231_v9 = vadd.f32 %v13482_v57, %v1054_v32  ;;  %v1918_v23 = vld [vmem:[#allocation3 + $0xa4] sm:$0x1] }
 0x13e   : > { %2542 = vst [vmem:[#allocation3 + $0x98] sm:$0x1] %v2541_v24  ;;  %2538 = vst [vmem:[#allocation3 + $0x90] sm:$0xf] %v2537_v63  ;;  %v2877_v12 = vsel %vm12916_vm15, %v2872_v33, %v2876_v27  ;;  %v2886_v26 = vrot.slane %v2885_v59, 4  ;;  %v2895_v6 = vor.u32 %v2894_v14, %v2890_v46  ;;  %v3733_v17 = vrot.slane %v13447_v29, 5 }
 0x13f   : > { %v1229_v53 = vadd.f32 %v13507_v31, %v1052_v44  ;;  %v13518_v38 = vsel %vm1096_vm8, %v13507_v31, %v13482_v57  ;;  %v9538_v7 = vcombine.low %v2867_v13, %v2877_v12  ;;  %v1287_v60 = vadd.f32 %v1231_v9, %v13403_v4  ;;  %v13544_v59 = vld [vmem:[%s12226_s23 + $0x70] sm:$0xf]  ;;  %v1914_v15 = vld [vmem:[#allocation3 + $0x9c] sm:$0xf]  ;;  %v2385_v9 = vpop.permute.xlu0 %2384 }
 0x140   : > { %v1230_v48 = vadd.f32 %v13518_v38, %v1053_v2  ;;  %v2891_v49 = vsel %vm12916_vm15, %v2886_v26, %v2890_v46  ;;  %v2896_v21 = vrot.slane %v2895_v6, 4  ;;  %v3736_v28 = vrot.slane %v13449_v51, 5 }
 0x141   : > { %v1285_v27 = vadd.f32 %v1229_v53, %v13400_v3  ;;  %10668 = vmatmul.mubr.bf16.gmra.mrb[16].mxu1 %v9538_v7  ;;  %v840_v16 = vsel %vm12344_vm7, %v654_v0, %v839_v30  ;;  %v1335_v4 = vmul.f32 0.25, %v1287_v60  ;;  %v3734_v20 = vsel %vm12993_vm4, %v9586_v18, %v3733_v17  ;;  %v411_v53 = vld [vmem:[%s12226_s23 + $0x74] sm:$0xf]  ;;  %v13562_v7 = vld [vmem:[#allocation3 + $0x84] sm:$0xf] }
 0x142   : > { %v1286_v2 = vadd.f32 %v1230_v48, %v13412_v19  ;;  %v3735_v46 = vrot.slane %v3733_v17, 4  ;;  %841 = vst [vmem:[#allocation2 + $0xb0] sm:$0x1] %v840_v16  ;;  %v2901_v3 = vsel %vm12916_vm15, %v2896_v21, %v2900_v43  ;;  %v9587_v58 = vrot.slane %v3627_v55, 9 }
 0x143   : > { %v1333_v35 = vmul.f32 0.25, %v1285_v27  ;;  %v3740_v51 = vrot.slane %v13465_v34, 5  ;;  %v1383_v41 = vmax.f32 %v1335_v4, 0.0  ;;  %v9539_v0 = vcombine.low %v2891_v49, %v2901_v3 }
 0x144   : > { %v1334_v42 = vmul.f32 0.25, %v1286_v2  ;;  %v10266_v52 = vld [vmem:[#allocation2 + $0xa8] sm:$0xff]   ;;  %v3737_v19 = vsel %vm12993_vm4, %v3735_v46, %v3736_v28  ;;  %v3743_v30 = vrot.slane %v13486_v5, 5  ;;  %v656_v60 = vshrl.u32 %v13544_v59, 16  ;;  %v842_v46 = vld [vmem:[#allocation2 + $0xb4] sm:$0xf] }
 0x145   : > { %v1381_v37 = vmax.f32 %v1333_v35, 0.0  ;;  %v13539_v56 = vunpack.c.l.bf16 %v10266_v52  ;;  %v13541_v18 = vunpack.c.h.bf16 %v10266_v52  ;;  %v9618_v33 = vcombine.low %v3734_v20, %v3737_v19  ;;  %10671 = vmatprep.mubr.bf16.mxu1 %v9539_v0  ;;  %v2387_v0 = vpop.permute.xlu0 %2386 }
 0x146   : > { %v1382_v47 = vmax.f32 %v1334_v42, 0.0  ;;  %v10086_v22 = vpack.c.bf16 %v1383_v41, %v1383_v41  ;;  %v3741_v32 = vsel %vm12993_vm4, %v9587_v58, %v3740_v51  ;;  %v3742_v14 = vrot.slane %v3740_v51, 4  ;;  %v13589_v42 = vld [vmem:[#allocation3 + $0x88] sm:$0xf]  ;;  %v2383_v41 = vpop.permute.xlu1 %2382 }
 0x147   : > { %v10084_v43 = vpack.c.bf16 %v1381_v37, %v1381_v37  ;;  %v1056_v24 = vadd.f32 %v13541_v18, %v13473_v25  ;;  %v13551_v63 = vrot.slane %v13539_v56, 7  ;;  %v13554_v44 = vrot.slane %v13541_v18, 7  ;;  %10764 = vmatmul.mubr.bf16.gmra.mrb[16].mxu0 %v9618_v33  ;;  %v1921_v37 = vld [vmem:[#allocation3 + $0xa8] sm:$0xf] }
 0x148   : > { %v10085_v13 = vpack.c.bf16 %v1382_v47, %v1382_v47  ;;  %v1919_v12 = vsel %vm12344_vm7, %v10086_v22, %v1918_v23  ;;  %v1055_v26 = vadd.f32 %v13539_v56, %v13491_v62  ;;  %v659_v62 = vshll.u32 %v13544_v59, 16 }
 0x149   : > { %v1915_v25 = vsel %vm12286_vm6, %v10084_v43, %v1914_v15  ;;  %v13569_v6 = vsel %vm1096_vm8, %v13551_v63, %v13554_v44  ;;  %1920 = vst [vmem:[#allocation3 + $0xa4] sm:$0x1] %v1919_v12  ;;  %v13571_v48 = vld [vmem:[#allocation2 + $0xb0] sm:$0x1]  ;;  %v3744_v55 = vsel %vm12993_vm4, %v3742_v14, %v3743_v30  ;;  %v658_v21 = vrot.slane %v656_v60, 7 }
 0x14a   : > { %1916 = vst [vmem:[#allocation3 + $0x9c] sm:$0xf] %v1915_v25  ;;  %1917 = vst.msk [vmem:[#allocation3 + $0xa0] sm:$0xf] %vm738_vm3, %v10085_v13  ;;  %v1233_v5 = vadd.f32 %v13569_v6, %v1056_v24  ;;  %v1009_v49 = vunpack.c.l.bf16 %v13571_v48  ;;  %v1232_v17 = vadd.f32 %v13551_v63, %v1055_v26  ;;  %v9619_v27 = vcombine.low %v3741_v32, %v3744_v55  ;;  %v2630_v15 = vld [vmem:[#allocation3 + $0x8c] sm:$0x1] }
 0x14b   : > { %2546 = vst.msk [vmem:[#allocation3 + $0xa0] sm:$0xf] %vm2454_vm9, %v2385_v9  ;;  %v664_v28 = vshrl.u32 %v411_v53, 16  ;;  %v667_v16 = vshll.u32 %v411_v53, 16  ;;  %v2903_v35 = vshrl.u32 %v13562_v7, 16  ;;  %v661_v3 = vor.u32 %v659_v62, %v658_v21 }
 0x14c   : > { %v1289_v2 = vadd.f32 %v1233_v5, %v13518_v38  ;;  %v1057_v4 = vadd.f32 %v1009_v49, %v1006_v8  ;;  %v1288_v20 = vadd.f32 %v1232_v17, %v13507_v31  ;;  %10767 = vmatprep.mubr.bf16.mxu0 %v9619_v27  ;;  %v662_v58 = vrot.slane %v658_v21, 4  ;;  %v3628_v53 = vld [vmem:[#allocation3 + $0x84] sm:$0xe]  ;;  %v846_v25 = vld [vmem:[#allocation2 + $0xbc] sm:$0x1] }
 0x14d   : > { %v666_v51 = vrot.slane %v664_v28, 7  ;;  %v2906_v52 = vshll.u32 %v13562_v7, 16  ;;  %v2905_v8 = vrot.slane %v2903_v35, 4  ;;  %v843_v31 = vsel %vm12286_vm6, %v661_v3, %v842_v46  ;;  %v13605_v17 = vld [vmem:[#allocation3 + $0x94] sm:$0xf] }
 0x14e   : > { %v1337_v38 = vmul.f32 0.25, %v1289_v2  ;;  %v1234_v40 = vadd.f32 %v13554_v44, %v1057_v4  ;;  %v1336_v19 = vmul.f32 0.25, %v1288_v20  ;;  %844 = vst [vmem:[#allocation2 + $0xb4] sm:$0xf] %v843_v31  ;;  %v2912_v24 = vshll.u32 %v13589_v42, 16  ;;  %v2391_v4 = vpop.permute.xlu1 %2390 }
 0x14f   : > { %v669_v23 = vor.u32 %v667_v16, %v666_v51  ;;  %v671_v33 = vrot.slane %v666_v51, 4  ;;  %v2908_v47 = vrot.slane %v2906_v52, 5  ;;  %v2916_v30 = vshrl.u32 %v13589_v42, 16  ;;  %v1925_v55 = vld [vmem:[#allocation3 + $0xb0] sm:$0x1] }
 0x150   : > { %v1385_v22 = vmax.f32 %v1337_v38, 0.0  ;;  %v2547_v32 = vld [vmem:[#allocation3 + $0xa4] sm:$0x1]  ;;  %v1290_v14 = vadd.f32 %v1234_v40, %v13482_v57  ;;  %v1384_v43 = vmax.f32 %v1336_v19, 0.0  ;;  %v2914_v21 = vrot.slane %v2912_v24, 5 }
 0x151   : > { %v2543_v9 = vld [vmem:[#allocation3 + $0x9c] sm:$0xf]  ;;  %v2548_v13 = vsel %vm12798_vm12, %v2387_v0, %v2547_v32  ;;  %v670_v12 = vsel %vm12030_vm2, %v662_v58, %v669_v23  ;;  %v2909_v26 = vor.u32 %v2908_v47, %v2905_v8  ;;  %v2918_v28 = vrot.slane %v2916_v30, 4  ;;  %v2631_v2 = vld [vmem:[#allocation3 + $0x98] sm:$0x1]  ;;  %v2389_v30 = vpop.permute.xlu0 %2388 }
 0x152   : > { %v2544_v60 = vsel %vm12572_vm10, %v2383_v41, %v2543_v9  ;;  %v10088_v57 = vpack.c.bf16 %v1385_v22, %v1385_v22  ;;  %2549 = vst [vmem:[#allocation3 + $0xa4] sm:$0x1] %v2548_v13  ;;  %v1338_v62 = vmul.f32 0.25, %v1290_v14  ;;  %v10087_v5 = vpack.c.bf16 %v1384_v43, %v1384_v43  ;;  %845 = vst.msk [vmem:[#allocation2 + $0xb8] sm:$0xf] %vm738_vm3, %v670_v12 }
 0x153   : > { %2545 = vst [vmem:[#allocation3 + $0x9c] sm:$0xf] %v2544_v60  ;;  %v2910_v27 = vrot.slane %v2909_v26, 4  ;;  %v2922_v16 = vshll.u32 %v2630_v15, 16  ;;  %v9588_v35 = vrot.slane %v3628_v53, 9  ;;  %v3747_v3 = vrot.slane %v13589_v42, 5 }
 0x154   : > { %1924 = vst.msk [vmem:[#allocation3 + $0xac] sm:$0xf] %vm738_vm3, %v10088_v57  ;;  %v1386_v20 = vmax.f32 %v1338_v62, 0.0  ;;  %v1922_v46 = vsel %vm12286_vm6, %v10087_v5, %v1921_v37  ;;  %v3629_v58 = vld [vmem:[#allocation3 + $0x90] sm:$0xe]  ;;  %v2919_v52 = vor.u32 %v2918_v28, %v2914_v21  ;;  %v3750_v38 = vrot.slane %v2630_v15, 5 }
 0x155   : > { %2553 = vst.msk [vmem:[#allocation3 + $0xac] sm:$0xf] %vm2454_vm9, %v2391_v4  ;;  %1923 = vst [vmem:[#allocation3 + $0xa8] sm:$0xf] %v1922_v46  ;;  %v2915_v51 = vsel %vm12916_vm15, %v2910_v27, %v2914_v21  ;;  %v2924_v41 = vrot.slane %v2922_v16, 5  ;;  %v3748_v19 = vsel %vm12993_vm4, %v9588_v35, %v3747_v3  ;;  %v3749_v8 = vrot.slane %v3747_v3, 4 }
 0x156   : > { %v13614_v0 = vld [vmem:[#allocation3 + $0x90] sm:$0xf]  ;;  %v10089_v40 = vpack.c.bf16 %v1386_v20, %v1386_v20  ;;  %v847_v37 = vsel %vm12344_vm7, %v671_v33, %v846_v25  ;;  %v905_v31 = vld [vmem:[#allocation2 + $0xb4] sm:$0x1]  ;;  %v2920_v23 = vrot.slane %v2919_v52, 4  ;;  %v9589_v47 = vrot.slane %v3629_v58, 9  ;;  %v2393_v52 = vpop.permute.xlu1 %2392 }
 0x157   : > { %848 = vst [vmem:[#allocation2 + $0xbc] sm:$0x1] %v847_v37  ;;  %v3754_v22 = vrot.slane %v13605_v17, 5  ;;  %v3757_v32 = vrot.slane %v2631_v2, 5  ;;  %v906_v14 = vsel %vm12344_vm7, %v13544_v59, %v905_v31  ;;  %v3751_v43 = vsel %vm12993_vm4, %v3749_v8, %v3750_v38  ;;  %v13638_v62 = vld [vmem:[#allocation3 + $0xa0] sm:$0xf] }
 0x158   : > { %v1926_v15 = vsel %vm12344_vm7, %v10089_v40, %v1925_v55  ;;  %v2927_v24 = vshrl.u32 %v13614_v0, 16  ;;  %907 = vst [vmem:[#allocation2 + $0xb4] sm:$0x1] %v906_v14  ;;  %v2925_v9 = vsel %vm12916_vm15, %v2920_v23, %v2924_v41  ;;  %v9620_v13 = vcombine.low %v3748_v19, %v3751_v43 }
 0x159   : > { %1927 = vst [vmem:[#allocation3 + $0xb0] sm:$0x1] %v1926_v15  ;;  %v960_v33 = vld [vmem:[#allocation2 + $0xb8] sm:$0xf]  ;;  %v3755_v12 = vsel %vm12993_vm4, %v9589_v47, %v3754_v22  ;;  %v3756_v26 = vrot.slane %v3754_v22, 4  ;;  %v9540_v59 = vcombine.low %v2915_v51, %v2925_v9  ;;  %v2930_v60 = vshll.u32 %v13614_v0, 16 }
 0x15a   : > { %v13633_v53 = vunpack.c.l.bf16 %v960_v33  ;;  %v2929_v25 = vrot.slane %v2927_v24, 4  ;;  %v13636_v57 = vld [vmem:[#allocation3 + $0x9c] sm:$0xf]  ;;  %10768 = vmatmul.mubr.bf16.gmra.mrb[20].mxu0 %v9620_v13  ;;  %v2936_v55 = vshll.u32 %v13605_v17, 16  ;;  %v2940_v27 = vshrl.u32 %v13605_v17, 16 }
 0x15b   : > { %v3758_v5 = vsel %vm12993_vm4, %v3756_v26, %v3757_v32  ;;  %v2946_v21 = vshll.u32 %v2631_v2, 16  ;;  %10672 = vmatmul.mubr.bf16.gmra.mrb[20].mxu1 %v9540_v59  ;;  %v2932_v20 = vrot.slane %v2930_v60, 5  ;;  %v13647_v46 = vld [vmem:[#allocation3 + $0xa4] sm:$0x1]  ;;  %v2951_v38 = vshrl.u32 %v13636_v57, 16 }
 0x15c   : > { %v2550_v28 = vld [vmem:[#allocation3 + $0xa8] sm:$0xf]  ;;  %v13645_v16 = vrot.slane %v13633_v53, 7  ;;  %v9621_v4 = vcombine.low %v3755_v12, %v3758_v5  ;;  %v2938_v3 = vrot.slane %v2936_v55, 5  ;;  %v2942_v58 = vrot.slane %v2940_v27, 4 }
 0x15d   : > { %v2551_v35 = vsel %vm12572_vm10, %v2389_v30, %v2550_v28  ;;  %v2948_v51 = vrot.slane %v2946_v21, 5  ;;  %v2933_v2 = vor.u32 %v2932_v20, %v2929_v25  ;;  %v2954_v40 = vshll.u32 %v13636_v57, 16  ;;  %v3630_v59 = vld [vmem:[#allocation3 + $0x9c] sm:$0xe] }
 0x15e   : > { %2552 = vst [vmem:[#allocation3 + $0xa8] sm:$0xf] %v2551_v35  ;;  %v13651_v41 = vld [vmem:[#allocation2 + $0xbc] sm:$0x1]  ;;  %10771 = vmatprep.mubr.bf16.mxu0 %v9621_v4  ;;  %v2960_v19 = vshll.u32 %v13638_v62, 16  ;;  %v2943_v37 = vor.u32 %v2942_v58, %v2938_v3  ;;  %v2964_v31 = vshrl.u32 %v13638_v62, 16  ;;  %v1059_v32 = vadd.f32 %v13541_v18, %v13633_v53 }
 0x15f   : > { %v1012_v8 = vunpack.c.l.bf16 %v13651_v41  ;;  %v2970_v23 = vshll.u32 %v13647_v46, 16  ;;  %v959_v22 = vld [vmem:[#allocation2 + $0xb4] sm:$0xf]  ;;  %v2934_v15 = vrot.slane %v2933_v2, 4  ;;  %v2953_v14 = vrot.slane %v2951_v38, 4  ;;  %v11862_v41 = vld [vmem:[%s16279_s5 + $0x100] sm:$0xff]  }
 0x160   : > { %v2554_v47 = vld [vmem:[#allocation3 + $0xb0] sm:$0x1]  ;;  %v9562_v43 = vcombine.low %v13437_v61, %v13447_v29  ;;  %v13665_v33 = vunpack.c.l.bf16 %v959_v22  ;;  %v2944_v13 = vrot.slane %v2943_v37, 4  ;;  %v2956_v12 = vrot.slane %v2954_v40, 5  ;;  %v13688_v35 = vld [vmem:[#allocation3 + $0xac] sm:$0xf] }
 0x161   : > { %v2555_v24 = vsel %vm12798_vm12, %v2393_v52, %v2554_v47  ;;  %v1060_v9 = vadd.f32 %v1012_v8, %v1009_v49  ;;  %v2939_v18 = vsel %vm12916_vm15, %v2934_v15, %v2938_v3  ;;  %v2962_v26 = vrot.slane %v2960_v19, 5 }
 0x162   : > { %2556 = vst [vmem:[#allocation3 + $0xb0] sm:$0x1] %v2555_v24  ;;  %v2966_v30 = vrot.slane %v2964_v31, 4  ;;  %v1058_v25 = vadd.f32 %v13539_v56, %v13665_v33  ;;  %v13676_v60 = vrot.slane %v13665_v33, 7  ;;  %v2949_v49 = vsel %vm12916_vm15, %v2944_v13, %v2948_v51 }
 0x163   : > { %v1237_v48 = vadd.f32 %v13645_v16, %v1060_v9  ;;  %v9541_v5 = vcombine.low %v2939_v18, %v2949_v49  ;;  %v2957_v55 = vor.u32 %v2956_v12, %v2953_v14  ;;  %v2972_v21 = vrot.slane %v2970_v23, 5  ;;  %v1932_v9 = vld [vmem:[#allocation3 + $0xbc] sm:$0x1] }
 0x164   : > { %v2967_v27 = vor.u32 %v2966_v30, %v2962_v26  ;;  %v1235_v28 = vadd.f32 %v13676_v60, %v1058_v25  ;;  %v13685_v4 = vsel %vm1096_vm8, %v13676_v60, %v13645_v16  ;;  %v9590_v20 = vrot.slane %v3630_v59, 9  ;;  %v1928_v25 = vld [vmem:[#allocation3 + $0xb4] sm:$0xf] }
 0x165   : > { %v1293_v56 = vadd.f32 %v1237_v48, %v13554_v44  ;;  %v3631_v3 = vld [vmem:[#allocation3 + $0xa8] sm:$0xe]  ;;  %v1236_v58 = vadd.f32 %v13685_v4, %v1059_v32  ;;  %10675 = vmatprep.mubr.bf16.mxu1 %v9541_v5  ;;  %v2958_v51 = vrot.slane %v2957_v55, 4  ;;  %v3761_v2 = vrot.slane %v13638_v62, 5 }
 0x166   : > { %v2968_v52 = vrot.slane %v2967_v27, 4  ;;  %v1291_v38 = vadd.f32 %v1235_v28, %v13551_v63  ;;  %v3764_v19 = vrot.slane %v13647_v46, 5  ;;  %v9591_v37 = vrot.slane %v3631_v3, 9  ;;  %v13694_v31 = vld [vmem:[#allocation3 + $0xa8] sm:$0xf] }
 0x167   : > { %v1341_v40 = vmul.f32 0.25, %v1293_v56  ;;  %v1292_v44 = vadd.f32 %v1236_v58, %v13569_v6  ;;  %v2963_v23 = vsel %vm12916_vm15, %v2958_v51, %v2962_v26  ;;  %v3762_v22 = vsel %vm12993_vm4, %v9590_v20, %v3761_v2 }
 0x168   : > { %v2973_v47 = vsel %vm12916_vm15, %v2968_v52, %v2972_v21  ;;  %v1339_v32 = vmul.f32 0.25, %v1291_v38  ;;  %v3763_v14 = vrot.slane %v3761_v2, 4  ;;  %v3768_v13 = vrot.slane %v13688_v35, 5  ;;  %v2397_v21 = vpop.permute.xlu0 %2396 }
 0x169   : > { %v1389_v15 = vmax.f32 %v1341_v40, 0.0  ;;  %v9542_v63 = vcombine.low %v2963_v23, %v2973_v47  ;;  %v2633_v24 = vld [vmem:[#allocation3 + $0xb0] sm:$0x1]  ;;  %v1340_v46 = vmul.f32 0.25, %v1292_v44  ;;  %v2975_v6 = vshrl.u32 %v13694_v31, 16 }
 0x16a   : > { %v3771_v18 = vrot.slane %v2633_v24, 5  ;;  %v1387_v12 = vmax.f32 %v1339_v32, 0.0  ;;  %v3765_v30 = vsel %vm12993_vm4, %v3763_v14, %v3764_v19  ;;  %v2978_v59 = vshll.u32 %v13694_v31, 16  ;;  %v413_v32 = vld [vmem:[%s12226_s23 + $0x7c] sm:$0xf] }
 0x16b   : > { %v10092_v26 = vpack.c.bf16 %v1389_v15, %v1389_v15  ;;  %10676 = vmatmul.mubr.bf16.gmra.mrb[24].mxu1 %v9542_v63  ;;  %v1388_v48 = vmax.f32 %v1340_v46, 0.0  ;;  %v9622_v49 = vcombine.low %v3762_v22, %v3765_v30  ;;  %v3769_v5 = vsel %vm12993_vm4, %v9591_v37, %v3768_v13  ;;  %v13719_v37 = vld [vmem:[%s12226_s23 + $0x78] sm:$0xf] }
 0x16c   : > { %v3770_v55 = vrot.slane %v3768_v13, 4  ;;  %v10090_v27 = vpack.c.bf16 %v1387_v12, %v1387_v12  ;;  %v2977_v56 = vrot.slane %v2975_v6, 4  ;;  %v2980_v20 = vrot.slane %v2978_v59, 5 }
 0x16d   : > { %v1933_v28 = vsel %vm12344_vm7, %v10092_v26, %v1932_v9  ;;  %v10091_v3 = vpack.c.bf16 %v1388_v48, %v1388_v48  ;;  %10772 = vmatmul.mubr.bf16.gmra.mrb[24].mxu0 %v9622_v49  ;;  %v2984_v51 = vshll.u32 %v13688_v35, 16  ;;  %v2988_v52 = vshrl.u32 %v13688_v35, 16  ;;  %v849_v49 = vld [vmem:[#allocation2 + $0xc0] sm:$0xf] }
 0x16e   : > { %1934 = vst [vmem:[#allocation3 + $0xbc] sm:$0x1] %v1933_v28  ;;  %v3772_v58 = vsel %vm12993_vm4, %v3770_v55, %v3771_v18  ;;  %v1929_v2 = vsel %vm12286_vm6, %v10090_v27, %v1928_v25  ;;  %v2981_v40 = vor.u32 %v2980_v20, %v2977_v56  ;;  %v2994_v19 = vshll.u32 %v2633_v24, 16  ;;  %v2399_v18 = vpop.permute.xlu0 %2398  ;;  %v2395_v25 = vpop.permute.xlu1 %2394 }
 0x16f   : > { %v9623_v38 = vcombine.low %v3769_v5, %v3772_v58  ;;  %1930 = vst [vmem:[#allocation3 + $0xb4] sm:$0xf] %v1929_v2  ;;  %1931 = vst.msk [vmem:[#allocation3 + $0xb8] sm:$0xf] %vm738_vm3, %v10091_v3  ;;  %v2986_v44 = vrot.slane %v2984_v51, 5  ;;  %v2990_v23 = vrot.slane %v2988_v52, 4  ;;  %v9563_v47 = vcombine.low %v13455_v45, %v13465_v34 }
 0x170   : > { %v9564_v22 = vcombine.low %v13562_v7, %v13589_v42  ;;  %2560 = vst.msk [vmem:[#allocation3 + $0xb8] sm:$0xf] %vm2454_vm9, %v2397_v21  ;;  %v2982_v15 = vrot.slane %v2981_v40, 4  ;;  %v9565_v63 = vcombine.low %v13614_v0, %v13605_v17  ;;  %v9566_v14 = vcombine.low %v13636_v57, %v13638_v62  ;;  %v853_v58 = vld [vmem:[#allocation2 + $0xc8] sm:$0x1] }
 0x171   : > { %10775 = vmatprep.mubr.bf16.mxu0 %v9623_v38  ;;  %v2991_v24 = vor.u32 %v2990_v23, %v2986_v44  ;;  %v2996_v46 = vrot.slane %v2994_v19, 5  ;;  %v673_v9 = vshrl.u32 %v13719_v37, 16  ;;  %v676_v13 = vshll.u32 %v13719_v37, 16  ;;  %v13798_v45 = vld [vmem:[#allocation3 + $0xc] sm:$0xf] }
 0x172   : > { %v681_v6 = vshrl.u32 %v413_v32, 16  ;;  %v684_v12 = vshll.u32 %v413_v32, 16  ;;  %v2987_v26 = vsel %vm12916_vm15, %v2982_v15, %v2986_v44  ;;  %v4489_v34 = vld [vmem:[#allocation3 + $0x10] sm:$0xf]  ;;  %v4494_v7 = vld [vmem:[#allocation3 + $0x24] sm:$0xf] }
 0x173   : > { %v2992_v30 = vrot.slane %v2991_v24, 4  ;;  %v675_v59 = vrot.slane %v673_v9, 7  ;;  %v4495_v42 = vld [vmem:[#allocation3 + $0x28] sm:$0xf]  ;;  %v4498_v0 = vld [vmem:[#allocation3 + $0x34] sm:$0xf] }
 0x174   : > { %v683_v5 = vrot.slane %v681_v6, 7 }
 0x175   : > { %v2561_v48 = vld [vmem:[#allocation3 + $0xbc] sm:$0x1]  ;;  %v2997_v27 = vsel %vm12916_vm15, %v2992_v30, %v2996_v46  ;;  %v678_v21 = vor.u32 %v676_v13, %v675_v59  ;;  %v679_v28 = vrot.slane %v675_v59, 4 }
 0x176   : > { %v2562_v55 = vsel %vm12798_vm12, %v2399_v18, %v2561_v48  ;;  %v2557_v56 = vld [vmem:[#allocation3 + $0xb4] sm:$0xf]  ;;  %v9543_v20 = vcombine.low %v2987_v26, %v2997_v27  ;;  %v686_v3 = vor.u32 %v684_v12, %v683_v5  ;;  %v688_v51 = vrot.slane %v683_v5, 4 }
 0x177   : > { %2563 = vst [vmem:[#allocation3 + $0xbc] sm:$0x1] %v2562_v55  ;;  %v2558_v52 = vsel %vm12572_vm10, %v2395_v25, %v2557_v56  ;;  %v13742_v2 = vld [vmem:[#allocation3 + $0xb8] sm:$0xf]  ;;  %v850_v38 = vsel %vm12286_vm6, %v678_v21, %v849_v49 }
 0x178   : > { %2559 = vst [vmem:[#allocation3 + $0xb4] sm:$0xf] %v2558_v52  ;;  %10679 = vmatprep.mubr.bf16.mxu1 %v9543_v20  ;;  %v3008_v40 = vshll.u32 %v13742_v2, 16  ;;  %v3012_v19 = vshrl.u32 %v13742_v2, 16  ;;  %v687_v44 = vsel %vm12030_vm2, %v679_v28, %v686_v3  ;;  %851 = vst [vmem:[#allocation2 + $0xc0] sm:$0xf] %v850_v38  ;;  %v854_v23 = vsel %vm12344_vm7, %v688_v51, %v853_v58 }
 0x179   : > { %852 = vst.msk [vmem:[#allocation2 + $0xc4] sm:$0xf] %vm738_vm3, %v687_v44  ;;  %v3775_v32 = vrot.slane %v13742_v2, 5  ;;  %855 = vst [vmem:[#allocation2 + $0xc8] sm:$0x1] %v854_v23  ;;  %v11567_v3 = vld [vmem:[#allocation3 + $0xc] sm:$0xff]  }
 0x17a   : > { %v3010_v15 = vrot.slane %v3008_v40, 5  ;;  %v3014_v24 = vrot.slane %v3012_v19, 4  ;;  %v11860_v44 = vld [vmem:[#allocation3 + $0x60] sm:$0xf]  ;;  %v11861_v23 = vld [vmem:[#allocation3 + $0x64] sm:$0xf] }
 0x17b   : > { %v3777_v13 = vrot.slane %v3775_v32, 4  ;;  %vm7537_vm2 = vcmask 523264  }
 0x17c   : > { %v3015_v9 = vor.u32 %v3014_v24, %v3010_v15 }
 0x17e   : > { %v2634_v46 = vld [vmem:[#allocation3 + $0xbc] sm:$0x1]  ;;  %v3016_v49 = vrot.slane %v3015_v9, 4 }
 0x17f   : > { %v3778_v18 = vrot.slane %v2634_v46, 5  ;;  %v3018_v6 = vshll.u32 %v2634_v46, 16  ;;  %v3632_v12 = vld [vmem:[#allocation3 + $0xb4] sm:$0xe]  ;;  %v908_v10 = vld [vmem:[#allocation2 + $0xc0] sm:$0x1] }
 0x180   : > { %v13754_v26 = vld [vmem:[#allocation3 + $0xb4] sm:$0xf]  ;;  %v9592_v30 = vrot.slane %v3632_v12, 9  ;;  %v909_v5 = vsel %vm12344_vm7, %v13719_v37, %v908_v10  ;;  %v964_v20 = vld [vmem:[#allocation2 + $0xc8] sm:$0x1] }
 0x181   : > { %v3779_v59 = vsel %vm12993_vm4, %v3777_v13, %v3778_v18  ;;  %v2999_v25 = vshrl.u32 %v13754_v26, 16  ;;  %v3002_v48 = vshll.u32 %v13754_v26, 16  ;;  %v3020_v28 = vrot.slane %v3018_v6, 5  ;;  %910 = vst [vmem:[#allocation2 + $0xc0] sm:$0x1] %v909_v5  ;;  %v11569_v13 = vld [vmem:[#allocation3 + $0x18] sm:$0xff]  }
 0x182   : > { %v3776_v55 = vsel %vm12993_vm4, %v9592_v30, %v3775_v32  ;;  %v1015_v38 = vunpack.c.l.bf16 %v964_v20  ;;  %v9561_v32 = vcombine.low %v11860_v44, %v11861_v23  ;;  %v11571_v18 = vld [vmem:[%s16279_s5 + $0x108] sm:$0xff]   ;;  %v11570_v6 = vld [vmem:[#allocation3 + $0x24] sm:$0xff]   ;;  %v4550_v44 = vshrl.u32 %v4489_v34, 16  ;;  %v13813_v23 = vld [vmem:[#allocation3 + $0x14] sm:$0x1] }
 0x183   : > { %v3001_v27 = vrot.slane %v2999_v25, 4  ;;  %v3004_v21 = vrot.slane %v3002_v48, 5  ;;  %v9624_v56 = vcombine.low %v3776_v55, %v3779_v59  ;;  %v3021_v52 = vsel %vm12916_vm15, %v3016_v49, %v3020_v28  ;;  %v11581_v28 = vld [vmem:[%s16279_s5 + $0x118] sm:$0xff]   ;;  %v1935_v20 = vld [vmem:[#allocation3 + $0xc0] sm:$0xf] }
 0x184   : > { %v1063_v9 = vadd.f32 %v1015_v38, %v1012_v8  ;;  %v4556_v17 = vshll.u32 %v13813_v23, 16 }
 0x185   : > { %v3005_v58 = vor.u32 %v3004_v21, %v3001_v27  ;;  %10776 = vmatmul.mubr.bf16.gmra.mrb[28].mxu0 %v9624_v56  ;;  %v11572_v21 = vld [vmem:[#allocation3 + $0x30] sm:$0xff]  }
 0x186   : > { %10795 = vmatprep.mubr.bf16.mxu0 %v11567_v3 }
 0x187   : > { %v3006_v51 = vrot.slane %v3005_v58, 4  ;;  %v1939_v58 = vld [vmem:[#allocation3 + $0xc8] sm:$0x1] }
 0x188   : > { %v10267_v19 = vld [vmem:[#allocation2 + $0xc0] sm:$0xff]  }
 0x189   : > { %v3011_v37 = vsel %vm12916_vm15, %v3006_v51, %v3010_v15  ;;  %v10194_v24 = vunpack.c.l.bf16 %v10267_v19  ;;  %v10195_v46 = vunpack.c.h.bf16 %v10267_v19  ;;  %v2403_v51 = vpop.permute.xlu0 %2402  ;;  %v4546_v19 = vshll.u32 %v4489_v34, 16 }
 0x18a   : > { %v9544_v40 = vcombine.low %v3011_v37, %v3021_v52 }
 0x18b   : > { %v1061_v15 = vadd.f32 %v10194_v24, %v13665_v33  ;;  %v1142_v12 = vrot.slane %v10194_v24, 7  ;;  %v1062_v10 = vadd.f32 %v10195_v46, %v13633_v53  ;;  %v1143_v30 = vrot.slane %v10195_v46, 7  ;;  %v11576_v33 = vld [vmem:[%s16279_s5 + $0x110] sm:$0xff]   ;;  %v4491_v24 = vld [vmem:[#allocation3 + $0x18] sm:$0xf] }
 0x18c   : > { %10680 = vmatmul.mubr.bf16.gmra.mrb[28].mxu1 %v9544_v40  ;;  %v4537_v40 = vshrl.u32 %v13798_v45, 16  ;;  %v4492_v46 = vld [vmem:[#allocation3 + $0x1c] sm:$0xf] }
 0x18d   : > { %10715 = vmatprep.mubr.bf16.mxu1 %v9561_v32  ;;  %10796 = vmatmul.mubr.bf16.vlgmr.msra.gmra.mrb[0].mxu0 %v11569_v13  ;;  %v1238_v8 = vadd.f32 %v1142_v12, %v1061_v15  ;;  %v1144_v59 = vsel %vm1096_vm8, %v1142_v12, %v1143_v30  ;;  %v1240_v25 = vadd.f32 %v1143_v30, %v1063_v9  ;;  %v11578_v32 = vld [vmem:[#allocation3 + $0x54] sm:$0xff]   ;;  %v4540_v9 = vshll.u32 %v13798_v45, 16 }
 0x18e   : > { %10828 = vmatpush3.bf16.msra.mxu0 %v11862_v41  ;;  %10799 = vmatprep.mubr.bf16.mxu0 %v11570_v6  ;;  %v1239_v48 = vadd.f32 %v1144_v59, %v1062_v10  ;;  %v13821_v6 = vrot.slane %v4546_v19, 5  ;;  %v13823_v15 = vrot.slane %v4550_v44, 4  ;;  %v4561_v12 = vshrl.u32 %v4491_v24, 16 }
 0x18f   : > { %10829 = vmatprep.subr.bf16.mxu0 %v11571_v18  ;;  %v1294_v53 = vadd.f32 %v1238_v8, %v13676_v60  ;;  %v1296_v49 = vadd.f32 %v1240_v25, %v13645_v16  ;;  %v11573_v16 = vld [vmem:[#allocation3 + $0x3c] sm:$0xff]   ;;  %v4564_v10 = vshll.u32 %v4491_v24, 16  ;;  %v4570_v30 = vshll.u32 %v4492_v46, 16 }
 0x190   : > { %v1295_v5 = vadd.f32 %v1239_v48, %v13685_v4  ;;  %v4574_v41 = vshrl.u32 %v4492_v46, 16  ;;  %v9567_v8 = vcombine.low %v13694_v31, %v13688_v35  ;;  %v4598_v48 = vshrl.u32 %v4495_v42, 16 }
 0x191   : > { %v1342_v55 = vmul.f32 0.25, %v1294_v53  ;;  %v1344_v27 = vmul.f32 0.25, %v1296_v49  ;;  %v11582_v53 = vld [vmem:[#allocation3 + $0x60] sm:$0xff]   ;;  %v4585_v35 = vshrl.u32 %v4494_v7, 16  ;;  %v4588_v31 = vshll.u32 %v4494_v7, 16 }
 0x192   : > { %10830 = vmatpush3.bf16.msra.mxu0 %v11571_v18  ;;  %v1343_v56 = vmul.f32 0.25, %v1295_v5  ;;  %v13819_v18 = vrot.slane %v4537_v40, 4  ;;  %v4542_v39 = vrot.slane %v4540_v9, 5  ;;  %v13858_v40 = vld [vmem:[%s16279_s5 + $0x140] sm:$0xff]  }
 0x193   : > { %10831 = vmatprep.subr.bf16.mxu0 %v11576_v33  ;;  %v1390_v60 = vmax.f32 %v1342_v55, 0.0  ;;  %v1392_v4 = vmax.f32 %v1344_v27, 0.0  ;;  %v4618_v55 = vshll.u32 %v4498_v0, 16  ;;  %v4622_v27 = vshrl.u32 %v4498_v0, 16 }
 0x194   : > { %10716 = vmatmul.mubr.bf16.vlgmr.msra.gmra.mrb[16].mxu1 %v9562_v43  ;;  %v1391_v3 = vmax.f32 %v1343_v56, 0.0  ;;  %v11585_v43 = vld [vmem:[%s16279_s5 + $0x120] sm:$0xff]   ;;  %v13835_v56 = vld [vmem:[#allocation3 + $0x20] sm:$0x1]  ;;  %v4587_v34 = vrot.slane %v4585_v35, 4  ;;  %v4558_v0 = vrot.slane %v4556_v17, 5 }
 0x195   : > { %10719 = vmatprep.mubr.bf16.mxu1 %v9563_v47  ;;  %10800 = vmatmul.mubr.bf16.gmra.mrb[4].mxu0 %v11572_v21  ;;  %v10093_v61 = vpack.c.bf16 %v1390_v60, %v1390_v60  ;;  %v10095_v29 = vpack.c.bf16 %v1392_v4, %v1392_v4  ;;  %v2401_v47 = vpop.permute.xlu1 %2400  ;;  %v4500_v21 = vld [vmem:[#allocation3 + $0x3c] sm:$0xf]  ;;  %v4553_v4 = vor.u32 %v13823_v15, %v13821_v6  ;;  %v4624_v45 = vrot.slane %v4622_v27, 4 }
 0x196   : > { %10803 = vmatprep.mubr.bf16.mxu0 %v11573_v16  ;;  %10832 = vmatpush3.bf16.msra.mxu0 %v11576_v33  ;;  %v10094_v52 = vpack.c.bf16 %v1391_v3, %v1391_v3  ;;  %v4594_v33 = vshll.u32 %v4495_v42, 16  ;;  %v4576_v3 = vrot.slane %v4574_v41, 4  ;;  %v4633_v57 = vshrl.u32 %v4500_v21, 16  ;;  %v11586_v41 = vld [vmem:[#allocation3 + $0x78] sm:$0xff]  }
 0x197   : > { %10833 = vmatprep.subr.bf16.mxu0 %v11581_v28  ;;  %v1936_v38 = vsel %vm12286_vm6, %v10093_v61, %v1935_v20  ;;  %v1940_v37 = vsel %vm12344_vm7, %v10095_v29, %v1939_v58  ;;  %v13845_v20 = vrot.slane %v4570_v30, 5  ;;  %v13847_v58 = vld [vmem:[#allocation3 + $0x2c] sm:$0x1]  ;;  %v4563_v61 = vrot.slane %v4561_v12, 4  ;;  %v4503_v30 = vld [vmem:[#allocation3 + $0x48] sm:$0xf]  ;;  %vm15366_vm6 = vmpackc.low %vm8036_vm5, %vm8036_vm5 }
 0x198   : > { %1937 = vst [vmem:[#allocation3 + $0xc0] sm:$0xf] %v1936_v38  ;;  %1938 = vst.msk [vmem:[#allocation3 + $0xc4] sm:$0xf] %vm738_vm3, %v10094_v52  ;;  %v4566_v29 = vrot.slane %v4564_v10, 5  ;;  %v4636_v62 = vshll.u32 %v4500_v21, 16  ;;  %v9568_v42 = vcombine.low %v13754_v26, %v13742_v2 }
 0x199   : > { %1941 = vst [vmem:[#allocation3 + $0xc8] sm:$0x1] %v1940_v37  ;;  %2567 = vst.msk [vmem:[#allocation3 + $0xc4] sm:$0xf] %vm2454_vm9, %v2403_v51  ;;  %v2405_v13 = vpop.permute.xlu1 %2404  ;;  %v4600_v51 = vrot.slane %v4598_v48, 4  ;;  %v13853_v52 = vrot.slane %v4618_v55, 5  ;;  %v4577_v19 = vor.u32 %v4576_v3, %v13845_v20 }
 0x19a   : > { %10834 = vmatpush3.bf16.msra.mxu0 %v11581_v28  ;;  %v11583_v28 = vld [vmem:[#allocation3 + $0x6c] sm:$0xff]   ;;  %v4580_v44 = vshll.u32 %v13835_v56, 16  ;;  %v4635_v24 = vrot.slane %v4633_v57, 4  ;;  %v4638_v46 = vrot.slane %v4636_v62, 5  ;;  %v4660_v55 = vshll.u32 %v4503_v30, 16 }
 0x19b   : > { %10835 = vmatprep.subr.bf16.mxu0 %v11585_v43  ;;  %v4625_v15 = vor.u32 %v4624_v45, %v13853_v52 }
 0x19c   : > { %10720 = vmatmul.mubr.bf16.gmra.mrb[20].mxu1 %v9564_v22  ;;  %v4497_v22 = vld [vmem:[#allocation3 + $0x30] sm:$0xf]  ;;  %v4582_v2 = vrot.slane %v4580_v44, 5 }
 0x19d   : > { %10723 = vmatprep.mubr.bf16.mxu1 %v9565_v63  ;;  %10804 = vmatmul.mubr.bf16.gmra.mrb[8].mxu0 %v11577_v54  ;;  %v11591_v63 = vld [vmem:[%s16279_s5 + $0x130] sm:$0xff]   ;;  %v4609_v16 = vshrl.u32 %v4497_v22, 16  ;;  %v4612_v60 = vshll.u32 %v4497_v22, 16  ;;  %v4604_v54 = vshll.u32 %v13847_v58, 16  ;;  %v4543_v22 = vor.u32 %v4542_v39, %v13819_v18 }
 0x19e   : > { %10807 = vmatprep.mubr.bf16.mxu0 %v11578_v32  ;;  %10836 = vmatpush3.bf16.msra.mxu0 %v11585_v43  ;;  %v13849_v43 = vld [vmem:[#allocation3 + $0x38] sm:$0x1]  ;;  %v13864_v32 = vld [vmem:[#allocation3 + $0x40] sm:$0xf]  ;;  %v4626_v17 = vrot.slane %v4625_v15, 4 }
 0x19f   : > { %10837 = vmatprep.subr.bf16.mxu0 %v11588_v50  ;;  %v2564_v59 = vld [vmem:[#allocation3 + $0xc0] sm:$0xf]  ;;  %v4611_v38 = vrot.slane %v4609_v16, 4  ;;  %v4614_v37 = vrot.slane %v4612_v60, 5  ;;  %v4642_v9 = vshll.u32 %v13864_v32, 16  ;;  %v4646_v7 = vshrl.u32 %v13864_v32, 16 }
 0x1a0   : > { %v2568_v25 = vld [vmem:[#allocation3 + $0xc8] sm:$0x1]  ;;  %v2565_v49 = vsel %vm12572_vm10, %v2401_v47, %v2564_v59  ;;  %v4590_v47 = vrot.slane %v4588_v31, 5  ;;  %v4606_v26 = vrot.slane %v4604_v54, 5  ;;  %v4544_v27 = vrot.slane %v4543_v22, 4 }
 0x1a1   : > { %v2569_v5 = vsel %vm12798_vm12, %v2405_v13, %v2568_v25  ;;  %2566 = vst [vmem:[#allocation3 + $0xc0] sm:$0xf] %v2565_v49  ;;  %v4615_v10 = vor.u32 %v4614_v37, %v4611_v38  ;;  %v11587_v59 = vld [vmem:[#allocation3 + $0x84] sm:$0xff]   ;;  %v4578_v25 = vrot.slane %v4577_v19, 4  ;;  %v13876_v48 = vrot.slane %v4642_v9, 5 }
 0x1a2   : > { %10838 = vmatpush3.bf16.msra.mxu0 %v11588_v50  ;;  %2570 = vst [vmem:[#allocation3 + $0xc8] sm:$0x1] %v2569_v5  ;;  %v4628_v50 = vshll.u32 %v13849_v43, 16  ;;  %v4591_v12 = vor.u32 %v4590_v47, %v4587_v34  ;;  %v13878_v49 = vld [vmem:[#allocation3 + $0x44] sm:$0x1]  ;;  %v4657_v5 = vshrl.u32 %v4503_v30, 16  ;;  %v4549_v37 = vsel %vm12916_vm15, %v4544_v27, %v13821_v6 }
 0x1a3   : > { %10839 = vmatprep.subr.bf16.mxu0 %v11591_v63  ;;  %v4616_v35 = vrot.slane %v4615_v10, 4  ;;  %v4583_v60 = vsel %vm12916_vm15, %v4578_v25, %v4582_v2  ;;  %v4652_v57 = vshll.u32 %v13878_v49, 16  ;;  %v4662_v34 = vrot.slane %v4660_v55, 5  ;;  %v4509_v22 = vld [vmem:[#allocation3 + $0x60] sm:$0xf] }
 0x1a4   : > { %10724 = vmatmul.mubr.bf16.gmra.mrb[24].mxu1 %v9566_v14  ;;  %v13851_v14 = vrot.slane %v4594_v33, 5  ;;  %v4630_v18 = vrot.slane %v4628_v50, 5  ;;  %v4639_v33 = vor.u32 %v4638_v46, %v4635_v24  ;;  %v4659_v45 = vrot.slane %v4657_v5, 4  ;;  %v13916_v50 = vld [vmem:[#allocation3 + $0x50] sm:$0x1] }
 0x1a5   : > { %10727 = vmatprep.mubr.bf16.mxu1 %v9567_v8  ;;  %10808 = vmatmul.mubr.bf16.gmra.mrb[12].mxu0 %v11582_v53  ;;  %v4554_v8 = vrot.slane %v4553_v4, 4  ;;  %v4648_v53 = vrot.slane %v4646_v7, 4  ;;  %v13890_v4 = vld [vmem:[#allocation3 + $0x4c] sm:$0xf]  ;;  %v4621_v54 = vsel %vm12916_vm15, %v4616_v35, %v13853_v52  ;;  %v4506_v24 = vld [vmem:[#allocation3 + $0x54] sm:$0xf] }
 0x1a6   : > { %10811 = vmatprep.mubr.bf16.mxu0 %v11583_v28  ;;  %10840 = vmatpush3.bf16.msra.mxu0 %v11591_v63  ;;  %v4601_v13 = vor.u32 %v4600_v51, %v13851_v14  ;;  %v4567_v63 = vor.u32 %v4566_v29, %v4563_v61  ;;  %v4592_v28 = vrot.slane %v4591_v12, 4  ;;  %v4631_v39 = vsel %vm12916_vm15, %v4626_v17, %v4630_v18  ;;  %v11589_v46 = vld [vmem:[#allocation3 + $0x90] sm:$0xff]   ;;  %v4512_v12 = vld [vmem:[#allocation3 + $0x6c] sm:$0xf]  ;;  %v13945_v5 = vld [vmem:[#allocation3 + $0x5c] sm:$0x1] }
 0x1a7   : > { %10841 = vmatprep.subr.bf16.mxu0 %v11594_v36  ;;  %v4559_v16 = vsel %vm12916_vm15, %v4554_v8, %v4558_v0  ;;  %v13894_v61 = vrot.slane %v4639_v33, 4  ;;  %v4649_v29 = vor.u32 %v4648_v53, %v13876_v48  ;;  %v4666_v62 = vshll.u32 %v13890_v4, 16  ;;  %v13937_v2 = vld [vmem:[#allocation3 + $0x70] sm:$0xf] }
 0x1a8   : > { %v4602_v23 = vrot.slane %v4601_v13, 4  ;;  %v4568_v21 = vrot.slane %v4567_v63, 4  ;;  %v4670_v47 = vshrl.u32 %v13890_v4, 16  ;;  %v4597_v44 = vsel %vm12916_vm15, %v4592_v28, %v13851_v14  ;;  %v13928_v14 = vld [vmem:[#allocation3 + $0x64] sm:$0xf]  ;;  %v11590_v13 = vld [vmem:[#allocation3 + $0x9c] sm:$0xff]  }
 0x1a9   : > { %v13918_v9 = vcombine.low %v4549_v37, %v4559_v16  ;;  %v4645_v52 = vsel %vm12916_vm15, %v13894_v61, %v13876_v48  ;;  %v4650_v15 = vrot.slane %v4649_v29, 4  ;;  %v4654_v0 = vrot.slane %v4652_v57, 5 }
 0x1aa   : > { %10842 = vmatpush3.bf16.msra.mxu0 %v11594_v36  ;;  %v4607_v36 = vsel %vm12916_vm15, %v4602_v23, %v4606_v26  ;;  %v4573_v19 = vsel %vm12916_vm15, %v4568_v21, %v13845_v20  ;;  %v13926_v20 = vld [vmem:[#allocation3 + $0x58] sm:$0xf]  ;;  %v13934_v63 = vrot.slane %v4666_v62, 5  ;;  %v4663_v10 = vor.u32 %v4662_v34, %v4659_v45  ;;  %v13956_v62 = vld [vmem:[#allocation3 + $0x7c] sm:$0xf]  ;;  %v11592_v45 = vld [vmem:[#allocation3 + $0xa8] sm:$0xff]  }
 0x1ab   : > { %10875 = vmatprep.subr.bf16.mxu0 %v13858_v40  ;;  %v13880_v31 = vpop.f32.mrb[0].mxu1  ;;  %v13920_v7 = vcombine.low %v4573_v19, %v4583_v60  ;;  %v13922_v6 = vcombine.low %v4597_v44, %v4607_v36  ;;  %v4672_v30 = vrot.slane %v4670_v47, 4  ;;  %v4681_v8 = vshrl.u32 %v4506_v24, 16  ;;  %v4515_v36 = vld [vmem:[#allocation3 + $0x78] sm:$0xf] }
 0x1ac   : > { %10728 = vmatmul.mubr.bf16.gmra.mrb[28].mxu1 %v9568_v42  ;;  %16407 = vst [vmem:[#allocation5_spill] sm:$0xff] %v13880_v31  ;;  %v13892_v3 = vpop.f32.mrb[1].mxu1  ;;  %v13924_v42 = vcombine.low %v4621_v54, %v4631_v39  ;;  %v4690_v26 = vshll.u32 %v13926_v20, 16  ;;  %v4694_v18 = vshrl.u32 %v13926_v20, 16  ;;  %v4708_v25 = vshll.u32 %v4509_v22, 16  ;;  %v11593_v54 = vld [vmem:[#allocation3 + $0xb4] sm:$0xff]  }
 0x1ad   : > { %10812 = vmatmul.mubr.bf16.gmra.mrb[16].mxu0 %v11586_v41  ;;  %16408 = vst [vmem:[#allocation6_spill] sm:$0xff] %v13892_v3  ;;  %v13899_v51 = vpop.f32.mrb[2].mxu1  ;;  %v4676_v41 = vshll.u32 %v13916_v50, 16  ;;  %v4714_v33 = vshll.u32 %v13928_v14, 16  ;;  %v4718_v48 = vshrl.u32 %v13928_v14, 16  ;;  %v4729_v53 = vshrl.u32 %v4512_v12, 16 }
 0x1ae   : > { %10815 = vmatprep.mubr.bf16.mxu0 %v11587_v59  ;;  %16409 = vst [vmem:[#allocation7_spill] sm:$0xff] %v13899_v51  ;;  %v13902_v38 = vpop.f32.mrb[3].mxu1  ;;  %v4705_v59 = vshrl.u32 %v4509_v22, 16  ;;  %v4732_v23 = vshll.u32 %v4512_v12, 16  ;;  %v4655_v17 = vsel %vm12916_vm15, %v4650_v15, %v4654_v0  ;;  %v4684_v55 = vshll.u32 %v4506_v24, 16 }
 0x1af   : > { %16410 = vst [vmem:[#allocation8_spill] sm:$0xff] %v13902_v38  ;;  %v4738_v27 = vshll.u32 %v13937_v2, 16  ;;  %v4742_v21 = vshrl.u32 %v13937_v2, 16  ;;  %v13949_v28 = vrot.slane %v4663_v10, 4  ;;  %v4673_v35 = vor.u32 %v4672_v30, %v13934_v63  ;;  %v13958_v34 = vld [vmem:[#allocation3 + $0x68] sm:$0x1] }
 0x1b0   : > { %v13952_v16 = vrot.slane %v4676_v41, 5  ;;  %v4683_v60 = vrot.slane %v4681_v8, 4  ;;  %v13954_v39 = vrot.slane %v4690_v26, 5  ;;  %v4696_v61 = vrot.slane %v4694_v18, 4  ;;  %v13965_v12 = vld [vmem:[#allocation3 + $0x74] sm:$0x1] }
 0x1b1   : > { %v4707_v29 = vrot.slane %v4705_v59, 4  ;;  %v4710_v57 = vrot.slane %v4708_v25, 5  ;;  %v13960_v47 = vrot.slane %v4714_v33, 5  ;;  %v4720_v37 = vrot.slane %v4718_v48, 4  ;;  %v5256_v38 = vld [vmem:[#allocation3 + $0xb4] sm:$0xe] }
 0x1b2   : > { %v4731_v19 = vrot.slane %v4729_v53, 4  ;;  %v4734_v44 = vrot.slane %v4732_v23, 5  ;;  %v13962_v24 = vrot.slane %v4738_v27, 5  ;;  %v4753_v22 = vshrl.u32 %v4515_v36, 16  ;;  %v4518_v53 = vld [vmem:[#allocation3 + $0x84] sm:$0xf] }
 0x1b3   : > { %v4686_v15 = vrot.slane %v4684_v55, 5  ;;  %v4700_v0 = vshll.u32 %v13945_v5, 16  ;;  %v4762_v10 = vshll.u32 %v13956_v62, 16  ;;  %v4766_v30 = vshrl.u32 %v13956_v62, 16  ;;  %v11595_v27 = vld [vmem:[#allocation3 + $0xc0] sm:$0xff]  }
 0x1b4   : > { %v13969_v41 = vcombine.low %v4645_v52, %v4655_v17  ;;  %v4669_v8 = vsel %vm12916_vm15, %v13949_v28, %v13934_v63  ;;  %v4674_v26 = vrot.slane %v4673_v35, 4  ;;  %v4724_v18 = vshll.u32 %v13958_v34, 16  ;;  %v13980_v63 = vld [vmem:[#allocation3 + $0x80] sm:$0x1] }
 0x1b5   : > { %10816 = vmatmul.mubr.bf16.gmra.mrb[20].mxu0 %v11589_v46  ;;  %v4744_v46 = vrot.slane %v4742_v21, 4  ;;  %v4697_v59 = vor.u32 %v4696_v61, %v13954_v39  ;;  %v4711_v25 = vor.u32 %v4710_v57, %v4707_v29  ;;  %v4721_v33 = vor.u32 %v4720_v37, %v13960_v47  ;;  %v13987_v57 = vld [vmem:[#allocation3 + $0x88] sm:$0xf] }
 0x1b6   : > { %10819 = vmatprep.mubr.bf16.mxu0 %v11590_v13  ;;  %v4756_v13 = vshll.u32 %v4515_v36, 16  ;;  %v4735_v48 = vor.u32 %v4734_v44, %v4731_v19  ;;  %v4748_v52 = vshll.u32 %v13965_v12, 16  ;;  %v4755_v17 = vrot.slane %v4753_v22, 4 }
 0x1b7   : > { %v4745_v23 = vor.u32 %v4744_v46, %v13962_v24  ;;  %v4687_v21 = vor.u32 %v4686_v15, %v4683_v60  ;;  %v4702_v36 = vrot.slane %v4700_v0, 5  ;;  %v13982_v28 = vrot.slane %v4762_v10, 5  ;;  %v13990_v0 = vld [vmem:[#allocation3 + $0x8c] sm:$0x1] }
 0x1b8   : > { %v4758_v55 = vrot.slane %v4756_v13, 5  ;;  %v4768_v35 = vrot.slane %v4766_v30, 4  ;;  %v4679_v61 = vsel %vm12916_vm15, %v4674_v26, %v13952_v16  ;;  %v4726_v29 = vrot.slane %v4724_v18, 5  ;;  %v4521_v18 = vld [vmem:[#allocation3 + $0x90] sm:$0xf] }
 0x1b9   : > { %v4780_v37 = vshll.u32 %v4518_v53, 16  ;;  %v4712_v19 = vrot.slane %v4711_v25, 4  ;;  %v4722_v44 = vrot.slane %v4721_v33, 4  ;;  %v4772_v60 = vshll.u32 %v13980_v63, 16 }
 0x1ba   : > { %v4698_v46 = vrot.slane %v4697_v59, 4  ;;  %v4746_v22 = vrot.slane %v4745_v23, 4  ;;  %v4750_v13 = vrot.slane %v4748_v52, 5  ;;  %v4759_v15 = vor.u32 %v4758_v55, %v4755_v17 }
 0x1bb   : > { %v4688_v10 = vrot.slane %v4687_v21, 4  ;;  %v4769_v16 = vor.u32 %v4768_v35, %v13982_v28  ;;  %v4786_v30 = vshll.u32 %v13987_v57, 16  ;;  %v4790_v26 = vshrl.u32 %v13987_v57, 16 }
 0x1bc   : > { %v13996_v25 = vcombine.low %v4669_v8, %v4679_v61  ;;  %v4703_v59 = vsel %vm12916_vm15, %v4698_v46, %v4702_v36  ;;  %v4727_v23 = vsel %vm12916_vm15, %v4722_v44, %v4726_v29  ;;  %v14008_v17 = vrot.slane %v4772_v60, 5  ;;  %v11597_v46 = vld [vmem:[%s16279_s5 + $0x148] sm:$0xff]  }
 0x1bd   : > { %10820 = vmatmul.mubr.bf16.gmra.mrb[24].mxu0 %v11592_v45  ;;  %v4777_v45 = vshrl.u32 %v4518_v53, 16  ;;  %v4717_v53 = vsel %vm12916_vm15, %v4712_v19, %v13960_v47  ;;  %v4751_v8 = vsel %vm12916_vm15, %v4746_v22, %v4750_v13  ;;  %v14014_v55 = vrot.slane %v4759_v15, 4  ;;  %v4524_v47 = vld [vmem:[#allocation3 + $0x9c] sm:$0xf] }
 0x1be   : > { %10823 = vmatprep.mubr.bf16.mxu0 %v11593_v54  ;;  %v4736_v54 = vrot.slane %v4735_v48, 4  ;;  %v4782_v48 = vrot.slane %v4780_v37, 5  ;;  %v4801_v21 = vshrl.u32 %v4521_v18, 16  ;;  %v14017_v36 = vrot.slane %v4769_v16, 4 }
 0x1bf   : > { %v4779_v33 = vrot.slane %v4777_v45, 4  ;;  %v14019_v35 = vrot.slane %v4786_v30, 5  ;;  %v14021_v61 = vrot.slane %v4790_v26, 4  ;;  %v4693_v45 = vsel %vm12916_vm15, %v4688_v10, %v13954_v39 }
 0x1c0   : > { %v4741_v52 = vsel %vm12916_vm15, %v4736_v54, %v13962_v24  ;;  %v4804_v24 = vshll.u32 %v4521_v18, 16  ;;  %v14030_v54 = vld [vmem:[#allocation3 + $0xa0] sm:$0xf]  ;;  %v14037_v22 = vcombine.low %v4693_v45, %v4703_v59  ;;  %v14039_v13 = vcombine.low %v4717_v53, %v4727_v23  ;;  %v14062_v23 = vld [vmem:[#allocation3 + $0x98] sm:$0x1] }
 0x1c1   : > { %v4783_v37 = vor.u32 %v4782_v48, %v4779_v33  ;;  %v14041_v15 = vcombine.low %v4741_v52, %v4751_v8  ;;  %v4825_v39 = vshrl.u32 %v4524_v47, 16  ;;  %v14051_v26 = vrot.slane %v4801_v21, 4  ;;  %v5246_v33 = vld [vmem:[#allocation3 + $0x3c] sm:$0xe]  ;;  %v5248_v53 = vld [vmem:[#allocation3 + $0x54] sm:$0xe] }
 0x1c2   : > { %v4828_v18 = vshll.u32 %v4524_v47, 16  ;;  %v14064_v52 = vrot.slane %v4804_v24, 5  ;;  %v4834_v8 = vshll.u32 %v14030_v54, 16  ;;  %v9717_v48 = vrot.slane %v5246_v33, 9 }
 0x1c3   : > { %v14072_v21 = vrot.slane %v4783_v37, 4  ;;  %v14079_v16 = vrot.slane %v4825_v39, 4  ;;  %v9719_v24 = vrot.slane %v5248_v53, 9  ;;  %v14159_v53 = vld [vmem:[#allocation3 + $0xb0] sm:$0x1]  ;;  %v9727_v31 = vrot.slane %v5256_v38, 9 }
 0x1c4   : > { %v5254_v37 = vld [vmem:[#allocation3 + $0x9c] sm:$0xe] }
 0x1c5   : > { %10824 = vmatmul.mubr.bf16.gmra.mrb[28].mxu0 %v11595_v27  ;;  %v4796_v27 = vshll.u32 %v13990_v0, 16 }
 0x1c6   : > { %10843 = vmatprep.mubr.bf16.mxu0 %v13918_v9  ;;  %v14010_v9 = vld [vmem:[#allocation3 + $0x94] sm:$0xf] }
 0x1c7   : > { %v14023_v29 = vpop.f32.mrb[4].mxu1  ;;  %v4810_v19 = vshll.u32 %v14010_v9, 16  ;;  %v4814_v44 = vshrl.u32 %v14010_v9, 16  ;;  %v14049_v30 = vrot.slane %v4796_v27, 5  ;;  %v5247_v27 = vld [vmem:[#allocation3 + $0x48] sm:$0xe] }
 0x1c8   : > { %16411 = vst [vmem:[#allocation9_spill] sm:$0xff] %v14023_v29  ;;  %v14032_v60 = vpop.f32.mrb[5].mxu1 }
 0x1c9   : > { %16412 = vst [vmem:[#allocation10_spill] sm:$0xff] %v14032_v60  ;;  %v14043_v10 = vpop.f32.mrb[6].mxu1  ;;  %v14074_v47 = vrot.slane %v4810_v19, 5  ;;  %v14076_v45 = vrot.slane %v4814_v44, 4  ;;  %v5343_v19 = vrot.slane %v13890_v4, 5  ;;  %v14087_v60 = vrot.slane %v4834_v8, 5 }
 0x1ca   : > { %16413 = vst [vmem:[#allocation11_spill] sm:$0xff] %v14043_v10  ;;  %v14053_v59 = vpop.f32.mrb[7].mxu1  ;;  %v9718_v10 = vrot.slane %v5247_v27, 9  ;;  %v5249_v44 = vld [vmem:[#allocation3 + $0x60] sm:$0xe]  ;;  %v5350_v27 = vrot.slane %v13926_v20, 5 }
 0x1cb   : > { %16414 = vst [vmem:[#allocation12_spill] sm:$0xff] %v14053_v59  ;;  %v14083_v59 = vrot.slane %v4828_v18, 5  ;;  %v5345_v18 = vrot.slane %v5343_v19, 4  ;;  %v11599_v4 = vld [vmem:[%s16279_s5 + $0x158] sm:$0xff]   ;;  %v5357_v8 = vrot.slane %v13928_v14, 5 }
 0x1cd   : > { %10844 = vmatmul.mubr.bf16.vlgmr.msra.gmra.mrb[0].mxu0 %v13920_v7  ;;  %v11598_v7 = vld [vmem:[%s16279_s5 + $0x150] sm:$0xff]  }
 0x1ce   : > { %10876 = vmatpush3.bf16.msra.mxu0 %v13858_v40  ;;  %10847 = vmatprep.mubr.bf16.mxu0 %v13922_v6  ;;  %v5336_v40 = vrot.slane %v13864_v32, 5  ;;  %v5339_v6 = vrot.slane %v13878_v49, 5  ;;  %v5346_v32 = vrot.slane %v13916_v50, 5  ;;  %v14096_v49 = vsel %vm12993_vm4, %v9718_v10, %v5343_v19  ;;  %v5250_v10 = vld [vmem:[#allocation3 + $0x6c] sm:$0xe] }
 0x1cf   : > { %10877 = vmatprep.subr.bf16.mxu0 %v11597_v46  ;;  %v5353_v50 = vrot.slane %v13945_v5, 5  ;;  %v5352_v19 = vrot.slane %v5350_v27, 4  ;;  %v14152_v5 = vld [vmem:[#allocation3 + $0xac] sm:$0xf] }
 0x1d0   : > { %v14091_v39 = vsel %vm12993_vm4, %v9717_v48, %v5336_v40  ;;  %v5338_v33 = vrot.slane %v5336_v40, 4  ;;  %v14112_v20 = vsel %vm12993_vm4, %v5345_v18, %v5346_v32  ;;  %v14116_v40 = vsel %vm12993_vm4, %v9719_v24, %v5350_v27  ;;  %v5252_v27 = vld [vmem:[#allocation3 + $0x84] sm:$0xe] }
 0x1d1   : > { %v14129_v24 = vsel %vm12993_vm4, %v5352_v19, %v5353_v50  ;;  %v9721_v32 = vrot.slane %v5250_v10, 9  ;;  %v5367_v18 = vrot.slane %v13965_v12, 5  ;;  %v5371_v50 = vrot.slane %v13956_v62, 5 }
 0x1d2   : > { %10878 = vmatpush3.bf16.msra.mxu0 %v11597_v46  ;;  %v14104_v48 = vsel %vm12993_vm4, %v5338_v33, %v5339_v6  ;;  %v9720_v46 = vrot.slane %v5249_v44, 9  ;;  %v5251_v6 = vld [vmem:[#allocation3 + $0x78] sm:$0xe]  ;;  %v5359_v44 = vrot.slane %v5357_v8, 4  ;;  %v5360_v33 = vrot.slane %v13958_v34, 5 }
 0x1d3   : > { %10879 = vmatprep.subr.bf16.mxu0 %v11598_v7  ;;  %v5374_v34 = vrot.slane %v13980_v63, 5  ;;  %v5373_v62 = vrot.slane %v5371_v50, 4  ;;  %v5385_v12 = vrot.slane %v14010_v9, 5 }
 0x1d4   : > { %v14123_v14 = vsel %vm12993_vm4, %v9720_v46, %v5357_v8  ;;  %v11600_v46 = vld [vmem:[%s16279_s5 + $0x160] sm:$0xff]   ;;  %v5253_v8 = vld [vmem:[#allocation3 + $0x90] sm:$0xe] }
 0x1d5   : > { %10848 = vmatmul.mubr.bf16.gmra.mrb[4].mxu0 %v13924_v42  ;;  %v5364_v42 = vrot.slane %v13937_v2, 5  ;;  %v14143_v2 = vld [vmem:[#allocation3 + $0xa4] sm:$0x1]  ;;  %v9724_v63 = vrot.slane %v5253_v8, 9  ;;  %v5387_v29 = vrot.slane %v5385_v12, 4  ;;  %v5392_v8 = vrot.slane %v14030_v54, 5 }
 0x1d6   : > { %10851 = vmatprep.mubr.bf16.mxu0 %v13969_v41  ;;  %10880 = vmatpush3.bf16.msra.mxu0 %v11598_v7  ;;  %v14140_v41 = vsel %vm12993_vm4, %v5359_v44, %v5360_v33  ;;  %v9722_v7 = vrot.slane %v5251_v6, 9  ;;  %v9723_v44 = vrot.slane %v5252_v27, 9  ;;  %v5378_v33 = vrot.slane %v13987_v57, 5  ;;  %v11601_v27 = vld [vmem:[%s16279_s5 + $0x168] sm:$0xff]  }
 0x1d7   : > { %10881 = vmatprep.subr.bf16.mxu0 %v11599_v4  ;;  %v14149_v10 = vsel %vm12993_vm4, %v9721_v32, %v5364_v42  ;;  %v5366_v19 = vrot.slane %v5364_v42, 4  ;;  %v5381_v42 = vrot.slane %v13990_v0, 5  ;;  %v14190_v57 = vsel %vm12993_vm4, %v9724_v63, %v5385_v12 }
 0x1d8   : > { %v14156_v6 = vsel %vm12993_vm4, %v9722_v7, %v5371_v50  ;;  %v14170_v7 = vld [vmem:[#allocation3 + $0xb8] sm:$0xf]  ;;  %v14180_v0 = vsel %vm12993_vm4, %v9723_v44, %v5378_v33  ;;  %v5380_v9 = vrot.slane %v5378_v33, 4  ;;  %v14182_v50 = vld [vmem:[#allocation3 + $0xbc] sm:$0x1]  ;;  %16416 = vst [vmem:[#allocation14_spill] sm:$0xff] %v14190_v57 }
 0x1d9   : > { %v14163_v32 = vsel %vm12993_vm4, %v5366_v19, %v5367_v18  ;;  %v5255_v18 = vld [vmem:[#allocation3 + $0xa8] sm:$0xe]  ;;  %v9725_v33 = vrot.slane %v5254_v37, 9  ;;  %v5399_v37 = vrot.slane %v14152_v5, 5  ;;  %v16423_v57 = vshrl.u32 %v14030_v54, 16 }
 0x1da   : > { %10882 = vmatpush3.bf16.msra.mxu0 %v11599_v4  ;;  %v14176_v4 = vsel %vm12993_vm4, %v5373_v62, %v5374_v34  ;;  %v5388_v34 = vrot.slane %v14062_v23, 5  ;;  %v14196_v62 = vsel %vm12993_vm4, %v5380_v9, %v5381_v42  ;;  %v9726_v42 = vrot.slane %v5255_v18, 9  ;;  %v5257_v9 = vld [vmem:[#allocation3 + $0xc0] sm:$0xe] }
 0x1db   : > { %10883 = vmatprep.subr.bf16.mxu0 %v11600_v46  ;;  %v14186_v19 = vpop.f32.mrb[8].mxu1  ;;  %16417 = vst [vmem:[#allocation15_spill] sm:$0xff] %v14196_v62  ;;  %v5394_v18 = vrot.slane %v5392_v8, 4  ;;  %v5401_v3 = vrot.slane %v5399_v37, 4  ;;  %v4840_v62 = vrot.slane %v16423_v57, 4 }
 0x1dc   : > { %16415 = vst [vmem:[#allocation13_spill] sm:$0xff] %v14186_v19  ;;  %v14198_v44 = vpop.f32.mrb[9].mxu1  ;;  %v5395_v19 = vrot.slane %v14143_v2, 5  ;;  %v14230_v51 = vsel %vm12993_vm4, %v9726_v42, %v5399_v37  ;;  %v4807_v42 = vor.u32 %v14064_v52, %v14051_v26 }
 0x1dd   : > { %10852 = vmatmul.mubr.bf16.gmra.mrb[8].mxu0 %v13996_v25  ;;  %16418 = vst [vmem:[#allocation16_spill] sm:$0xff] %v14198_v44  ;;  %v14205_v63 = vpop.f32.mrb[10].mxu1  ;;  %v14209_v25 = vsel %vm12993_vm4, %v5387_v29, %v5388_v34  ;;  %v11602_v44 = vld [vmem:[%s16279_s5 + $0x170] sm:$0xff]   ;;  %v14223_v29 = vsel %vm12993_vm4, %v9725_v33, %v5392_v8  ;;  %v5402_v34 = vrot.slane %v14159_v53, 5  ;;  %v5409_v33 = vrot.slane %v14182_v50, 5 }
 0x1de   : > { %10855 = vmatprep.mubr.bf16.mxu0 %v14037_v22  ;;  %10884 = vmatpush3.bf16.msra.mxu0 %v11600_v46  ;;  %16419 = vst [vmem:[#allocation17_spill] sm:$0xff] %v14205_v63  ;;  %16420 = vst [vmem:[#allocation18_spill] sm:$0xff] %v14209_v25  ;;  %v14215_v22 = vld [vmem:[#allocation3 + $0xc4] sm:$0xf]  ;;  %v14217_v46 = vpop.f32.mrb[11].mxu1  ;;  %v14235_v12 = vsel %vm12993_vm4, %v5394_v18, %v5395_v19  ;;  %v9728_v25 = vrot.slane %v5257_v9, 9 }
 0x1df   : > { %10885 = vmatprep.subr.bf16.mxu0 %v11601_v27  ;;  %16421 = vst [vmem:[#allocation19_spill] sm:$0xff] %v14217_v46  ;;  %v14226_v63 = vld [vmem:[#allocation3 + $0xc8] sm:$0x1]  ;;  %v5406_v46 = vrot.slane %v14170_v7, 5  ;;  %16422 = vst [vmem:[#allocation20_spill] sm:$0xff] %v14235_v12  ;;  %v5413_v8 = vrot.slane %v14215_v22, 5  ;;  %v14245_v38 = vsel %vm12993_vm4, %v5401_v3, %v5402_v34  ;;  %v16424_v3 = vor.u32 %v14021_v61, %v14019_v35 }
 0x1e0   : > { %v4527_v19 = vld [vmem:[#allocation3 + $0xa8] sm:$0xf]  ;;  %v11603_v9 = vld [vmem:[%s16279_s5 + $0x178] sm:$0xff]   ;;  %v5416_v18 = vrot.slane %v14226_v63, 5  ;;  %v16426_v61 = vsel %vm12916_vm15, %v14014_v55, %v13982_v28  ;;  %v4530_v28 = vld [vmem:[#allocation3 + $0xb4] sm:$0xf] }
 0x1e1   : > { %v5408_v37 = vrot.slane %v5406_v46, 4  ;;  %v14254_v54 = vsel %vm12993_vm4, %v9728_v25, %v5413_v8  ;;  %v5415_v57 = vrot.slane %v5413_v8, 4  ;;  %v4794_v34 = vrot.slane %v16424_v3, 4 }
 0x1e2   : > { %10886 = vmatpush3.bf16.msra.mxu0 %v11601_v27  ;;  %v14264_v12 = vsel %vm12993_vm4, %v9727_v31, %v5406_v46  ;;  %v16425_v25 = vsel %vm12916_vm15, %v14017_v36, %v14008_v17  ;;  %v4817_v31 = vor.u32 %v14076_v45, %v14074_v47  ;;  %v4831_v17 = vor.u32 %v14083_v59, %v14079_v16 }
 0x1e3   : > { %10887 = vmatprep.subr.bf16.mxu0 %v11602_v44  ;;  %v14268_v27 = vsel %vm12993_vm4, %v5408_v37, %v5409_v33  ;;  %v9698_v26 = vcombine.low %v16426_v61, %v16425_v25  ;;  %v4844_v36 = vshll.u32 %v14143_v2, 16  ;;  %v4849_v46 = vshrl.u32 %v4527_v19, 16 }
 0x1e4   : > { %v4841_v45 = vor.u32 %v4840_v62, %v14087_v60  ;;  %v4852_v33 = vshll.u32 %v4527_v19, 16  ;;  %v4858_v8 = vshll.u32 %v14152_v5, 16  ;;  %v4862_v37 = vshrl.u32 %v14152_v5, 16 }
 0x1e5   : > { %10856 = vmatmul.mubr.bf16.gmra.mrb[12].mxu0 %v14039_v13  ;;  %v14287_v13 = vsel %vm12993_vm4, %v5415_v57, %v5416_v18  ;;  %v4789_v16 = vsel %vm12916_vm15, %v14072_v21, %v14019_v35  ;;  %v4799_v59 = vsel %vm12916_vm15, %v4794_v34, %v14049_v30  ;;  %v4808_v2 = vrot.slane %v4807_v42, 4 }
 0x1e6   : > { %16427 = vst [vmem:[#allocation21_spill] sm:$0xff] %v14287_v13  ;;  %10859 = vmatprep.mubr.bf16.mxu0 %v14041_v15  ;;  %10888 = vmatpush3.bf16.msra.mxu0 %v11602_v44  ;;  %v14301_v15 = vld [vmem:[%s16279_s5 + $0x180] sm:$0xff]   ;;  %v16428_v62 = vshll.u32 %v14062_v23, 16  ;;  %v4873_v5 = vshrl.u32 %v4530_v28, 16  ;;  %v4876_v19 = vshll.u32 %v4530_v28, 16  ;;  %v4882_v57 = vshll.u32 %v14170_v7, 16 }
 0x1e7   : > { %10889 = vmatprep.subr.bf16.mxu0 %v11603_v9  ;;  %v4886_v18 = vshrl.u32 %v14170_v7, 16  ;;  %v4818_v3 = vrot.slane %v4817_v31, 4  ;;  %v4832_v25 = vrot.slane %v4831_v17, 4  ;;  %v4846_v61 = vrot.slane %v4844_v36, 5 }
 0x1e8   : > { %v4822_v44 = vrot.slane %v16428_v62, 5  ;;  %v4851_v55 = vrot.slane %v4849_v46, 4  ;;  %v4842_v35 = vrot.slane %v4841_v45, 4  ;;  %v4854_v21 = vrot.slane %v4852_v33, 5  ;;  %v4533_v62 = vld [vmem:[#allocation3 + $0xc0] sm:$0xf] }
 0x1e9   : > { %v4860_v52 = vrot.slane %v4858_v8, 5  ;;  %v4864_v13 = vrot.slane %v4862_v37, 4  ;;  %v9699_v30 = vcombine.low %v4789_v16, %v4799_v59  ;;  %v4875_v23 = vrot.slane %v4873_v5, 4 }
 0x1ea   : > { %10890 = vmatpush3.bf16.msra.mxu0 %v11603_v9  ;;  %v4878_v42 = vrot.slane %v4876_v19, 5  ;;  %v4884_v34 = vrot.slane %v4882_v57, 5  ;;  %v4888_v28 = vrot.slane %v4886_v18, 4  ;;  %v4813_v7 = vsel %vm12916_vm15, %v4808_v2, %v14074_v47 }
 0x1eb   : > { %10923 = vmatprep.subr.bf16.mxu0 %v14301_v15  ;;  %v4823_v9 = vsel %vm12916_vm15, %v4818_v3, %v4822_v44  ;;  %v4868_v31 = vshll.u32 %v14159_v53, 16  ;;  %v4837_v17 = vsel %vm12916_vm15, %v4832_v25, %v14087_v60  ;;  %v4855_v36 = vor.u32 %v4854_v21, %v4851_v55 }
 0x1ec   : > { %v4865_v46 = vor.u32 %v4864_v13, %v4860_v52  ;;  %v4897_v45 = vshrl.u32 %v4533_v62, 16  ;;  %v4900_v33 = vshll.u32 %v4533_v62, 16  ;;  %v4906_v8 = vshll.u32 %v14215_v22, 16 }
 0x1ed   : > { %10860 = vmatmul.mubr.bf16.gmra.mrb[16].mxu0 %v9698_v26  ;;  %v4847_v26 = vsel %vm12916_vm15, %v4842_v35, %v4846_v61  ;;  %v4910_v47 = vshrl.u32 %v14215_v22, 16  ;;  %v4879_v37 = vor.u32 %v4878_v42, %v4875_v23  ;;  %v4889_v16 = vor.u32 %v4888_v28, %v4884_v34 }
 0x1ee   : > { %10863 = vmatprep.mubr.bf16.mxu0 %v9699_v30  ;;  %v4892_v59 = vshll.u32 %v14182_v50, 16  ;;  %v9700_v53 = vcombine.low %v4813_v7, %v4823_v9  ;;  %v9701_v2 = vcombine.low %v4837_v17, %v4847_v26  ;;  %v4856_v44 = vrot.slane %v4855_v36, 4 }
 0x1ef   : > { %v4866_v5 = vrot.slane %v4865_v46, 4  ;;  %v4870_v60 = vrot.slane %v4868_v31, 5  ;;  %v4899_v19 = vrot.slane %v4897_v45, 4  ;;  %v4902_v57 = vrot.slane %v4900_v33, 5  ;;  %v11863_v31 = vld [vmem:[#allocation3 + $0x10] sm:$0xf] }
 0x1f0   : > { %v4908_v18 = vrot.slane %v4906_v8, 5  ;;  %v4912_v55 = vrot.slane %v4910_v47, 4  ;;  %v4880_v13 = vrot.slane %v4879_v37, 4  ;;  %v4890_v3 = vrot.slane %v4889_v16, 4  ;;  %v11864_v45 = vld [vmem:[#allocation3 + $0x14] sm:$0x1] }
 0x1f1   : > { %v4894_v25 = vrot.slane %v4892_v59, 5  ;;  %v4861_v50 = vsel %vm12916_vm15, %v4856_v44, %v4860_v52  ;;  %v4871_v21 = vsel %vm12916_vm15, %v4866_v5, %v4870_v60  ;;  %v4903_v30 = vor.u32 %v4902_v57, %v4899_v19  ;;  %v11865_v5 = vld [vmem:[#allocation3 + $0x1c] sm:$0xf]  ;;  %v5244_v57 = vld [vmem:[#allocation3 + $0x24] sm:$0xe] }
 0x1f2   : > { %v4913_v23 = vor.u32 %v4912_v55, %v4908_v18  ;;  %v4916_v42 = vshll.u32 %v14226_v63, 16  ;;  %v4885_v62 = vsel %vm12916_vm15, %v4880_v13, %v4884_v34  ;;  %v9702_v9 = vcombine.low %v4861_v50, %v4871_v21  ;;  %v5242_v63 = vld [vmem:[#allocation3 + $0xc] sm:$0xe] }
 0x1f3   : > { %v4895_v7 = vsel %vm12916_vm15, %v4890_v3, %v4894_v25  ;;  %v5308_v52 = vrot.slane %v11863_v31, 5  ;;  %v4904_v26 = vrot.slane %v4903_v30, 4  ;;  %v5311_v33 = vrot.slane %v11864_v45, 5  ;;  %v11867_v31 = vld [vmem:[#allocation3 + $0x34] sm:$0xf] }
 0x1f4   : > { %v9703_v17 = vcombine.low %v4885_v62, %v4895_v7  ;;  %v4914_v36 = vrot.slane %v4913_v23, 4  ;;  %v4918_v46 = vrot.slane %v4916_v42, 5  ;;  %v9713_v37 = vrot.slane %v5242_v63, 9  ;;  %v5245_v7 = vld [vmem:[#allocation3 + $0x30] sm:$0xe] }
 0x1f5   : > { %10864 = vmatmul.mubr.bf16.gmra.mrb[20].mxu0 %v9700_v53  ;;  %v14329_v61 = vpop.f32.mrb[12].mxu1  ;;  %v5310_v8 = vrot.slane %v5308_v52, 4  ;;  %v4909_v47 = vsel %vm12916_vm15, %v4904_v26, %v4908_v18  ;;  %v5315_v60 = vrot.slane %v11865_v5, 5  ;;  %v5318_v19 = vrot.slane %v13835_v56, 5  ;;  %v11866_v18 = vld [vmem:[#allocation3 + $0x28] sm:$0xf] }
 0x1f6   : > { %16429 = vst [vmem:[#allocation22_spill] sm:$0xff] %v14329_v61  ;;  %10867 = vmatprep.mubr.bf16.mxu0 %v9701_v2  ;;  %v14331_v22 = vpop.f32.mrb[13].mxu1  ;;  %v4919_v34 = vsel %vm12916_vm15, %v4914_v36, %v4918_v46  ;;  %v5309_v53 = vsel %vm12993_vm4, %v9713_v37, %v5308_v52  ;;  %v5243_v2 = vld [vmem:[#allocation3 + $0x18] sm:$0xe]  ;;  %v5322_v55 = vrot.slane %v11866_v18, 5  ;;  %v5325_v13 = vrot.slane %v13847_v58, 5 }
 0x1f7   : > { %16430 = vst [vmem:[#allocation23_spill] sm:$0xff] %v14331_v22  ;;  %v14335_v35 = vpop.f32.mrb[14].mxu1  ;;  %v5312_v16 = vsel %vm12993_vm4, %v5310_v8, %v5311_v33  ;;  %v9704_v59 = vcombine.low %v4909_v47, %v4919_v34  ;;  %v9714_v3 = vrot.slane %v5243_v2, 9  ;;  %v5317_v25 = vrot.slane %v5315_v60, 4  ;;  %v11605_v58 = vld [vmem:[%s16279_s5 + $0x188] sm:$0xff]   ;;  %v11606_v46 = vld [vmem:[%s16279_s5 + $0x190] sm:$0xff]  }
 0x1f8   : > { %16431 = vst [vmem:[#allocation24_spill] sm:$0xff] %v14335_v35  ;;  %v14340_v28 = vpop.f32.mrb[15].mxu1  ;;  %v9745_v44 = vcombine.low %v5309_v53, %v5312_v16  ;;  %v9715_v50 = vrot.slane %v5244_v57, 9  ;;  %v5324_v21 = vrot.slane %v5322_v55, 4  ;;  %v5329_v52 = vrot.slane %v11867_v31, 5  ;;  %v11608_v8 = vld [vmem:[%s16279_s5 + $0x1a0] sm:$0xff]  }
 0x1f9   : > { %16432 = vst [vmem:[#allocation25_spill] sm:$0xff] %v14340_v28  ;;  %v5319_v30 = vsel %vm12993_vm4, %v5317_v25, %v5318_v19  ;;  %v5316_v56 = vsel %vm12993_vm4, %v9714_v3, %v5315_v60  ;;  %v9716_v26 = vrot.slane %v5245_v7, 9  ;;  %v11609_v47 = vld [vmem:[%s16279_s5 + $0x1a8] sm:$0xff]   ;;  %v16434_v34 = vcombine.low %v14096_v49, %v14112_v20  ;;  %v11610_v37 = vld [vmem:[%s16279_s5 + $0x1b0] sm:$0xff]   ;;  %v14403_v49 = vld [vmem:[#allocation3 + $0x2c] sm:$0x1] }
 0x1fa   : > { %v5326_v23 = vsel %vm12993_vm4, %v5324_v21, %v5325_v13  ;;  %v9746_v42 = vcombine.low %v5316_v56, %v5319_v30  ;;  %v5323_v62 = vsel %vm12993_vm4, %v9715_v50, %v5322_v55  ;;  %v5331_v36 = vrot.slane %v5329_v52, 4  ;;  %v14399_v16 = vld [vmem:[#allocation3 + $0x20] sm:$0x1]  ;;  %v6882_v53 = vld [vmem:[#allocation3 + $0x24] sm:$0xe] }
 0x1fb   : > { %v5330_v33 = vsel %vm12993_vm4, %v9716_v26, %v5329_v52  ;;  %v14401_v2 = vld [vmem:[#allocation3 + $0x28] sm:$0xf]  ;;  %v14410_v5 = vld [vmem:[#allocation3 + $0x34] sm:$0xf]  ;;  %v9850_v60 = vrot.slane %v6882_v53, 9  ;;  %v16436_v3 = vcombine.low %v14123_v14, %v14140_v41  ;;  %v6957_v50 = vrot.slane %v14403_v49, 5 }
 0x1fc   : > { %v6883_v19 = vld [vmem:[#allocation3 + $0x30] sm:$0xe]  ;;  %v14412_v57 = vld [vmem:[#allocation3 + $0x38] sm:$0x1]  ;;  %v14414_v18 = vld [vmem:[#allocation3 + $0x40] sm:$0xf]  ;;  %v16437_v30 = vcombine.low %v14149_v10, %v14163_v32 }
 0x1fd   : > { %10868 = vmatmul.mubr.bf16.gmra.mrb[24].mxu0 %v9702_v9  ;;  %v9747_v9 = vcombine.low %v5323_v62, %v5326_v23  ;;  %v6954_v13 = vrot.slane %v14401_v2, 5  ;;  %v14420_v25 = vld [vmem:[#allocation3 + $0x44] sm:$0x1]  ;;  %v6884_v21 = vld [vmem:[#allocation3 + $0x3c] sm:$0xe]  ;;  %v9851_v62 = vrot.slane %v6883_v19, 9 }
 0x1fe   : > { %10871 = vmatprep.mubr.bf16.mxu0 %v9703_v17  ;;  %v5332_v17 = vrot.slane %v13849_v43, 5  ;;  %v11607_v43 = vld [vmem:[%s16279_s5 + $0x198] sm:$0xff]   ;;  %v14441_v10 = vld [vmem:[%s16279_s5 + $0x1c0] sm:$0xff]   ;;  %v6964_v31 = vrot.slane %v14412_v57, 5  ;;  %v6885_v52 = vld [vmem:[#allocation3 + $0x48] sm:$0xe] }
 0x1ff   : > { %v14426_v23 = vld [vmem:[#allocation3 + $0x4c] sm:$0xf]  ;;  %v14428_v56 = vld [vmem:[#allocation3 + $0x50] sm:$0x1]  ;;  %v6956_v41 = vrot.slane %v6954_v13, 4  ;;  %v14449_v7 = vsel %vm12993_vm4, %v9850_v60, %v6954_v13  ;;  %v9852_v26 = vrot.slane %v6884_v21, 9  ;;  %v16441_v21 = vcombine.low %v14156_v6, %v14176_v4 }
 0x200   : > { %v5333_v45 = vsel %vm12993_vm4, %v5331_v36, %v5332_v17  ;;  %v14443_v32 = vld [vmem:[#allocation3 + $0x58] sm:$0xf]  ;;  %v6968_v36 = vrot.slane %v14414_v18, 5  ;;  %v14476_v53 = vld [vmem:[#allocation3 + $0x70] sm:$0xf] }
 0x201   : > { %v9748_v63 = vcombine.low %v5330_v33, %v5333_v45  ;;  %v14455_v17 = vsel %vm12993_vm4, %v6956_v41, %v6957_v50  ;;  %v6886_v45 = vld [vmem:[#allocation3 + $0x54] sm:$0xe]  ;;  %v14459_v33 = vld [vmem:[#allocation3 + $0x5c] sm:$0x1]  ;;  %v14484_v60 = vld [vmem:[#allocation3 + $0x74] sm:$0x1] }
 0x202   : > { %v6982_v13 = vrot.slane %v14443_v32, 5  ;;  %v6888_v50 = vld [vmem:[#allocation3 + $0x6c] sm:$0xe]  ;;  %v14499_v41 = vld [vmem:[#allocation3 + $0x80] sm:$0x1] }
 0x203   : > { %v14546_v28 = vld [vmem:[#allocation3 + $0xa0] sm:$0xf]  ;;  %v14554_v35 = vld [vmem:[#allocation3 + $0xa4] sm:$0x1]  ;;  %v14566_v22 = vld [vmem:[#allocation3 + $0xb0] sm:$0x1] }
 0x204   : > { %v6984_v4 = vrot.slane %v6982_v13, 4 }
 0x205   : > { %10872 = vmatmul.mubr.bf16.gmra.mrb[28].mxu0 %v9704_v59  ;;  %v6881_v59 = vld [vmem:[#allocation3 + $0x18] sm:$0xe] }
 0x206   : > { %10891 = vmatprep.mubr.bf16.mxu0 %v9745_v44  ;;  %v9849_v20 = vrot.slane %v6881_v59, 9  ;;  %v11611_v44 = vld [vmem:[%s16279_s5 + $0x1b8] sm:$0xff]   ;;  %v6887_v59 = vld [vmem:[#allocation3 + $0x60] sm:$0xe] }
 0x20d   : > { %10892 = vmatmul.mubr.bf16.vlgmr.msra.gmra.mrb[0].mxu0 %v9746_v42 }
 0x20e   : > { %10924 = vmatpush3.bf16.msra.mxu0 %v14301_v15  ;;  %10895 = vmatprep.mubr.bf16.mxu0 %v9747_v9  ;;  %v16433_v15 = vcombine.low %v14091_v39, %v14104_v48  ;;  %v16435_v39 = vcombine.low %v14116_v40, %v14129_v24  ;;  %v14394_v48 = vld [vmem:[#allocation3 + $0x1c] sm:$0xf]  ;;  %v6950_v24 = vrot.slane %v14399_v16, 5  ;;  %v6961_v9 = vrot.slane %v14410_v5, 5 }
 0x20f   : > { %10925 = vmatprep.subr.bf16.mxu0 %v11605_v58  ;;  %v6947_v40 = vrot.slane %v14394_v48, 5 }
 0x211   : > { %v6949_v55 = vrot.slane %v6947_v40, 4  ;;  %v14432_v42 = vsel %vm12993_vm4, %v9849_v20, %v6947_v40  ;;  %v6975_v40 = vrot.slane %v14426_v23, 5 }
 0x212   : > { %10926 = vmatpush3.bf16.msra.mxu0 %v11605_v58  ;;  %v6891_v58 = vld [vmem:[#allocation3 + $0x90] sm:$0xe] }
 0x213   : > { %10927 = vmatprep.subr.bf16.mxu0 %v11606_v46  ;;  %v14436_v14 = vsel %vm12993_vm4, %v6949_v55, %v6950_v24  ;;  %v6978_v24 = vrot.slane %v14428_v56, 5 }
 0x215   : > { %10896 = vmatmul.mubr.bf16.gmra.mrb[4].mxu0 %v9748_v63  ;;  %v14461_v63 = vld [vmem:[#allocation3 + $0x64] sm:$0xf] }
 0x216   : > { %10899 = vmatprep.mubr.bf16.mxu0 %v16433_v15  ;;  %10928 = vmatpush3.bf16.msra.mxu0 %v11606_v46  ;;  %v6971_v46 = vrot.slane %v14420_v25, 5  ;;  %v6963_v15 = vrot.slane %v6961_v9, 4 }
 0x217   : > { %10929 = vmatprep.subr.bf16.mxu0 %v11607_v43 }
 0x218   : > { %v14480_v20 = vsel %vm12993_vm4, %v6963_v15, %v6964_v31  ;;  %v6977_v31 = vrot.slane %v6975_v40, 4 }
 0x219   : > { %16439 = vst [vmem:[#allocation27_spill] sm:$0xff] %v14480_v20 }
 0x21a   : > { %10930 = vmatpush3.bf16.msra.mxu0 %v11607_v43 }
 0x21b   : > { %10931 = vmatprep.subr.bf16.mxu0 %v11608_v8 }
 0x21d   : > { %10900 = vmatmul.mubr.bf16.gmra.mrb[8].mxu0 %v16434_v34  ;;  %v14473_v34 = vsel %vm12993_vm4, %v9852_v26, %v6968_v36  ;;  %v16443_v26 = vld [vmem:[#allocation15_spill] sm:$0xff] }
 0x21e   : > { %10903 = vmatprep.mubr.bf16.mxu0 %v16435_v39  ;;  %10932 = vmatpush3.bf16.msra.mxu0 %v11608_v8  ;;  %v14465_v8 = vld [vmem:[#allocation3 + $0x68] sm:$0x1]  ;;  %16438 = vst [vmem:[#allocation26_spill] sm:$0xff] %v14473_v34  ;;  %v6970_v39 = vrot.slane %v6968_v36, 4  ;;  %v16444_v36 = vcombine.low %v14180_v0, %v16443_v26  ;;  %v6996_v0 = vrot.slane %v14476_v53, 5 }
 0x21f   : > { %10933 = vmatprep.subr.bf16.mxu0 %v11609_v47  ;;  %v6992_v15 = vrot.slane %v14465_v8, 5  ;;  %v14524_v26 = vld [vmem:[#allocation3 + $0x8c] sm:$0x1] }
 0x220   : > { %v14490_v55 = vsel %vm12993_vm4, %v6970_v39, %v6971_v46  ;;  %v14510_v46 = vld [vmem:[#allocation3 + $0x88] sm:$0xf]  ;;  %v6889_v39 = vld [vmem:[#allocation3 + $0x78] sm:$0xe]  ;;  %v6998_v43 = vrot.slane %v6996_v0, 4 }
 0x221   : > { %16440 = vst [vmem:[#allocation28_spill] sm:$0xff] %v14490_v55 }
 0x222   : > { %10934 = vmatpush3.bf16.msra.mxu0 %v11609_v47  ;;  %v14469_v47 = vsel %vm12993_vm4, %v9851_v62, %v6961_v9  ;;  %v7013_v62 = vrot.slane %v14524_v26, 5 }
 0x223   : > { %10935 = vmatprep.subr.bf16.mxu0 %v11610_v37 }
 0x225   : > { %10904 = vmatmul.mubr.bf16.gmra.mrb[12].mxu0 %v16436_v3  ;;  %v6985_v3 = vrot.slane %v14459_v33, 5 }
 0x226   : > { %10907 = vmatprep.mubr.bf16.mxu0 %v16437_v30  ;;  %10936 = vmatpush3.bf16.msra.mxu0 %v11610_v37  ;;  %v9853_v37 = vrot.slane %v6885_v52, 9  ;;  %v14497_v30 = vld [vmem:[#allocation3 + $0x7c] sm:$0xf]  ;;  %v9855_v52 = vrot.slane %v6887_v59, 9  ;;  %v9856_v59 = vrot.slane %v6888_v50, 9 }
 0x227   : > { %10937 = vmatprep.subr.bf16.mxu0 %v11611_v44 }
 0x228   : > { %v14505_v9 = vsel %vm12993_vm4, %v9853_v37, %v6975_v40  ;;  %v14520_v37 = vsel %vm12993_vm4, %v6977_v31, %v6978_v24  ;;  %v6999_v40 = vrot.slane %v14484_v60, 5  ;;  %v14538_v31 = vld [vmem:[#allocation3 + $0x98] sm:$0x1]  ;;  %v14544_v19 = vsel %vm12993_vm4, %v9856_v59, %v6996_v0 }
 0x229   : > { %16442 = vst [vmem:[#allocation29_spill] sm:$0xff] %v14505_v9  ;;  %16446 = vst [vmem:[#allocation30_spill] sm:$0xff] %v14520_v37  ;;  %v7010_v0 = vrot.slane %v14510_v46, 5  ;;  %v7020_v9 = vrot.slane %v14538_v31, 5 }
 0x22a   : > { %10938 = vmatpush3.bf16.msra.mxu0 %v11611_v44  ;;  %v9854_v44 = vrot.slane %v6886_v45, 9  ;;  %v6989_v45 = vrot.slane %v14461_v63, 5  ;;  %16449 = vst [vmem:[#allocation33_spill] sm:$0xff] %v14544_v19 }
 0x22b   : > { %10971 = vmatprep.subr.bf16.mxu0 %v14441_v10 }
 0x22c   : > { %v14514_v6 = vsel %vm12993_vm4, %v9854_v44, %v6982_v13  ;;  %v14526_v44 = vld [vmem:[#allocation3 + $0x94] sm:$0xf]  ;;  %v14536_v24 = vsel %vm12993_vm4, %v9855_v52, %v6989_v45  ;;  %v6991_v50 = vrot.slane %v6989_v45, 4  ;;  %v9857_v13 = vrot.slane %v6889_v39, 9 }
 0x22d   : > { %10908 = vmatmul.mubr.bf16.gmra.mrb[16].mxu0 %v16441_v21  ;;  %16445 = vst [vmem:[#allocation15_spill] sm:$0xff] %v14514_v6  ;;  %v6890_v21 = vld [vmem:[#allocation3 + $0x84] sm:$0xe]  ;;  %16448 = vst [vmem:[#allocation32_spill] sm:$0xff] %v14536_v24  ;;  %v7003_v52 = vrot.slane %v14497_v30, 5  ;;  %v14560_v39 = vsel %vm12993_vm4, %v6998_v43, %v6999_v40  ;;  %v7012_v6 = vrot.slane %v7010_v0, 4 }
 0x22e   : > { %10911 = vmatprep.mubr.bf16.mxu0 %v16444_v36  ;;  %v14532_v36 = vsel %vm12993_vm4, %v6984_v4, %v6985_v3  ;;  %v14550_v3 = vsel %vm12993_vm4, %v6991_v50, %v6992_v15  ;;  %v7006_v4 = vrot.slane %v14499_v41, 5  ;;  %v9858_v45 = vrot.slane %v6890_v21, 9  ;;  %16451 = vst [vmem:[#allocation35_spill] sm:$0xff] %v14560_v39  ;;  %v6892_v15 = vld [vmem:[#allocation3 + $0x9c] sm:$0xe]  ;;  %v16453_v43 = vld [vmem:[#allocation14_spill] sm:$0xff] }
 0x22f   : > { %16447 = vst [vmem:[#allocation31_spill] sm:$0xff] %v14532_v36  ;;  %16450 = vst [vmem:[#allocation34_spill] sm:$0xff] %v14550_v3  ;;  %v14564_v50 = vld [vmem:[#allocation3 + $0xac] sm:$0xf]  ;;  %v14572_v61 = vsel %vm12993_vm4, %v9857_v13, %v7003_v52  ;;  %v7005_v59 = vrot.slane %v7003_v52, 4  ;;  %v9859_v3 = vrot.slane %v6891_v58, 9 }
 0x230   : > { %16452 = vst [vmem:[#allocation36_spill] sm:$0xff] %v14572_v61  ;;  %v16454_v40 = vld [vmem:[#allocation18_spill] sm:$0xff]  ;;  %v14579_v36 = vsel %vm12993_vm4, %v9858_v45, %v7010_v0  ;;  %v7017_v37 = vrot.slane %v14526_v44, 5  ;;  %v6893_v21 = vld [vmem:[#allocation3 + $0xa8] sm:$0xe]  ;;  %v16457_v39 = vld [vmem:[#allocation20_spill] sm:$0xff] }
 0x231   : > { %v16455_v24 = vcombine.low %v16453_v43, %v16454_v40  ;;  %16456 = vst [vmem:[#allocation14_spill] sm:$0xff] %v14579_v36  ;;  %v16458_v13 = vcombine.low %v14223_v29, %v16457_v39  ;;  %v14588_v58 = vsel %vm12993_vm4, %v7005_v59, %v7006_v4  ;;  %v9860_v52 = vrot.slane %v6892_v15, 9  ;;  %v6894_v43 = vld [vmem:[#allocation3 + $0xb4] sm:$0xe]  ;;  %v14592_v0 = vld [vmem:[#allocation3 + $0xb8] sm:$0xf] }
 0x232   : > { %16459 = vst [vmem:[#allocation18_spill] sm:$0xff] %v14588_v58  ;;  %v7027_v45 = vrot.slane %v14554_v35, 5  ;;  %v14594_v40 = vld [vmem:[#allocation3 + $0xbc] sm:$0x1]  ;;  %v14600_v29 = vsel %vm12993_vm4, %v7012_v6, %v7013_v62  ;;  %v14604_v4 = vsel %vm12993_vm4, %v9859_v3, %v7017_v37  ;;  %v7019_v59 = vrot.slane %v7017_v37, 4  ;;  %v11635_v36 = vld [vmem:[#allocation3 + $0xcc] sm:$0xff]  }
 0x233   : > { %16460 = vst [vmem:[#allocation20_spill] sm:$0xff] %v14600_v29  ;;  %16461 = vst [vmem:[#allocation37_spill] sm:$0xff] %v14604_v4  ;;  %v14606_v39 = vld [vmem:[#allocation3 + $0xc8] sm:$0x1]  ;;  %v9861_v19 = vrot.slane %v6893_v21, 9  ;;  %v7031_v6 = vrot.slane %v14564_v50, 5 }
 0x234   : > { %v14616_v62 = vsel %vm12993_vm4, %v7019_v59, %v7020_v9  ;;  %v7034_v3 = vrot.slane %v14566_v22, 5  ;;  %v9862_v37 = vrot.slane %v6894_v43, 9  ;;  %v6895_v58 = vld [vmem:[#allocation3 + $0xc0] sm:$0xe]  ;;  %v7041_v21 = vrot.slane %v14594_v40, 5  ;;  %v16499_v1 = vld [vmem:[#allocation29_spill] sm:$0xff] }
 0x235   : > { %10912 = vmatmul.mubr.bf16.gmra.mrb[20].mxu0 %v16455_v24  ;;  %v7024_v24 = vrot.slane %v14546_v28, 5  ;;  %16463 = vst [vmem:[#allocation39_spill] sm:$0xff] %v14616_v62  ;;  %v14634_v43 = vsel %vm12993_vm4, %v9861_v19, %v7031_v6  ;;  %v7033_v59 = vrot.slane %v7031_v6, 4  ;;  %v9863_v29 = vrot.slane %v6895_v58, 9 }
 0x236   : > { %10915 = vmatprep.mubr.bf16.mxu0 %v16458_v13  ;;  %16465 = vst [vmem:[#allocation41_spill] sm:$0xff] %v14634_v43  ;;  %v16468_v9 = vcombine.low %v14264_v12, %v14268_v27  ;;  %v6133_v12 = vld [vmem:[#allocation3 + $0x30] sm:$0xf] }
 0x237   : > { %v14612_v13 = vsel %vm12993_vm4, %v9860_v52, %v7024_v24  ;;  %v7026_v55 = vrot.slane %v7024_v24, 4  ;;  %v7038_v52 = vrot.slane %v14592_v0, 5  ;;  %v14628_v24 = vld [vmem:[#allocation3 + $0xc4] sm:$0xf]  ;;  %v14643_v4 = vsel %vm12993_vm4, %v7033_v59, %v7034_v3  ;;  %v11612_v3 = vld [vmem:[#allocation3 + $0x18] sm:$0xff]  }
 0x238   : > { %16462 = vst [vmem:[#allocation38_spill] sm:$0xff] %v14612_v13  ;;  %v7045_v62 = vrot.slane %v14628_v24, 5  ;;  %16467 = vst [vmem:[#allocation42_spill] sm:$0xff] %v14643_v4  ;;  %v11617_v59 = vld [vmem:[#allocation3 + $0x3c] sm:$0xff]  }
 0x239   : > { %v14624_v15 = vsel %vm12993_vm4, %v7026_v55, %v7027_v45  ;;  %v7040_v61 = vrot.slane %v7038_v52, 4  ;;  %v7048_v55 = vrot.slane %v14606_v39, 5  ;;  %v16466_v45 = vcombine.low %v14230_v51, %v14245_v38 }
 0x23a   : > { %16464 = vst [vmem:[#allocation40_spill] sm:$0xff] %v14624_v15  ;;  %v7047_v6 = vrot.slane %v7045_v62, 4  ;;  %v14656_v51 = vsel %vm12993_vm4, %v9862_v37, %v7038_v52  ;;  %v14660_v38 = vsel %vm12993_vm4, %v9863_v29, %v7045_v62  ;;  %v11614_v37 = vld [vmem:[#allocation3 + $0x24] sm:$0xff]   ;;  %v11616_v29 = vld [vmem:[%s16279_s5 + $0x1c8] sm:$0xff]   ;;  %v11615_v62 = vld [vmem:[#allocation3 + $0x30] sm:$0xff]  }
 0x23b   : > { %v14652_v58 = vsel %vm12993_vm4, %v7040_v61, %v7041_v21  ;;  %16470 = vst [vmem:[#allocation44_spill] sm:$0xff] %v14656_v51  ;;  %16471 = vst [vmem:[#allocation45_spill] sm:$0xff] %v14660_v38  ;;  %v16473_v21 = vld [vmem:[#allocation21_spill] sm:$0xff]  ;;  %v11619_v52 = vld [vmem:[%s16279_s5 + $0x1d0] sm:$0xff]  }
 0x23c   : > { %16469 = vst [vmem:[#allocation43_spill] sm:$0xff] %v14652_v58  ;;  %v14666_v27 = vsel %vm12993_vm4, %v7047_v6, %v7048_v55  ;;  %v11618_v55 = vld [vmem:[#allocation3 + $0x48] sm:$0xff]   ;;  %v11628_v6 = vld [vmem:[%s16279_s5 + $0x1e8] sm:$0xff]  }
 0x23d   : > { %10916 = vmatmul.mubr.bf16.gmra.mrb[24].mxu0 %v16466_v45  ;;  %16472 = vst [vmem:[#allocation46_spill] sm:$0xff] %v14666_v27  ;;  %v11620_v45 = vld [vmem:[#allocation3 + $0x54] sm:$0xff]   ;;  %v6213_v27 = vshrl.u32 %v14401_v2, 16  ;;  %v11630_v15 = vld [vmem:[#allocation3 + $0xa8] sm:$0xff]  }
 0x23e   : > { %10919 = vmatprep.mubr.bf16.mxu0 %v16468_v9  ;;  %v16474_v9 = vcombine.low %v14254_v54, %v16473_v21  ;;  %v11622_v54 = vld [vmem:[%s16279_s5 + $0x1d8] sm:$0xff]   ;;  %v11631_v21 = vld [vmem:[%s16279_s5 + $0x1f0] sm:$0xff]  }
 0x245   : > { %10920 = vmatmul.mubr.bf16.gmra.mrb[28].mxu0 %v16474_v9  ;;  %v11623_v9 = vld [vmem:[#allocation3 + $0x6c] sm:$0xff]  }
 0x246   : > { %10939 = vmatprep.mubr.bf16.mxu0 %v11612_v3  ;;  %v11621_v3 = vld [vmem:[#allocation3 + $0x60] sm:$0xff]  }
 0x24d   : > { %10940 = vmatmul.mubr.bf16.vlgmr.msra.gmra.mrb[0].mxu0 %v11614_v37  ;;  %v11634_v37 = vld [vmem:[%s16279_s5 + $0x1f8] sm:$0xff]  }
 0x24e   : > { %10972 = vmatpush3.bf16.msra.mxu0 %v14441_v10  ;;  %10943 = vmatprep.mubr.bf16.mxu0 %v11615_v62  ;;  %v11625_v10 = vld [vmem:[%s16279_s5 + $0x1e0] sm:$0xff]  }
 0x24f   : > { %10973 = vmatprep.subr.bf16.mxu0 %v11616_v29 }
 0x252   : > { %10974 = vmatpush3.bf16.msra.mxu0 %v11616_v29  ;;  %v11624_v29 = vld [vmem:[#allocation3 + $0x78] sm:$0xff]  }
 0x253   : > { %10975 = vmatprep.subr.bf16.mxu0 %v11619_v52 }
 0x255   : > { %10944 = vmatmul.mubr.bf16.gmra.mrb[4].mxu0 %v11617_v59  ;;  %v14702_v59 = vld [vmem:[%s16279_s5 + $0x200] sm:$0xff]  }
 0x256   : > { %10947 = vmatprep.mubr.bf16.mxu0 %v11618_v55  ;;  %10976 = vmatpush3.bf16.msra.mxu0 %v11619_v52  ;;  %v6127_v55 = vld [vmem:[#allocation3 + $0x18] sm:$0xf] }
 0x257   : > { %10977 = vmatprep.subr.bf16.mxu0 %v11622_v54 }
 0x25a   : > { %10978 = vmatpush3.bf16.msra.mxu0 %v11622_v54 }
 0x25b   : > { %10979 = vmatprep.subr.bf16.mxu0 %v11625_v10 }
 0x25d   : > { %10948 = vmatmul.mubr.bf16.gmra.mrb[8].mxu0 %v11620_v45  ;;  %v6130_v45 = vld [vmem:[#allocation3 + $0x24] sm:$0xf] }
 0x25e   : > { %10951 = vmatprep.mubr.bf16.mxu0 %v11621_v3  ;;  %10980 = vmatpush3.bf16.msra.mxu0 %v11625_v10  ;;  %v6176_v3 = vshrl.u32 %v6127_v55, 16  ;;  %v6203_v61 = vshll.u32 %v6130_v45, 16 }
 0x25f   : > { %10981 = vmatprep.subr.bf16.mxu0 %v11628_v6 }
 0x262   : > { %10982 = vmatpush3.bf16.msra.mxu0 %v11628_v6  ;;  %v11626_v6 = vld [vmem:[#allocation3 + $0x84] sm:$0xff]  }
 0x263   : > { %10983 = vmatprep.subr.bf16.mxu0 %v11631_v21 }
 0x265   : > { %10952 = vmatmul.mubr.bf16.gmra.mrb[12].mxu0 %v11623_v9  ;;  %v6179_v9 = vshll.u32 %v6127_v55, 16  ;;  %v6209_v55 = vshll.u32 %v14401_v2, 16 }
 0x266   : > { %10955 = vmatprep.mubr.bf16.mxu0 %v11624_v29  ;;  %10984 = vmatpush3.bf16.msra.mxu0 %v11631_v21  ;;  %v11627_v21 = vld [vmem:[#allocation3 + $0x90] sm:$0xff]   ;;  %v6200_v29 = vshrl.u32 %v6130_v45, 16  ;;  %v6227_v45 = vshll.u32 %v6133_v12, 16 }
 0x267   : > { %v14695_v62 = vpop.f32.mrb[16].mxu1  ;;  %10985 = vmatprep.subr.bf16.mxu0 %v11634_v37 }
 0x268   : > { %16475 = vst [vmem:[#allocation21_spill] sm:$0xff] %v14695_v62  ;;  %v14697_v52 = vpop.f32.mrb[17].mxu1  ;;  %v6181_v62 = vrot.slane %v6179_v9, 5  ;;  %v6233_v9 = vshll.u32 %v14410_v5, 16  ;;  %v6229_v13 = vrot.slane %v6227_v45, 5 }
 0x269   : > { %16476 = vst [vmem:[#allocation47_spill] sm:$0xff] %v14697_v52  ;;  %v14704_v54 = vpop.f32.mrb[18].mxu1  ;;  %v6189_v52 = vshrl.u32 %v14394_v48, 16 }
 0x26a   : > { %16477 = vst [vmem:[#allocation48_spill] sm:$0xff] %v14704_v54  ;;  %v14706_v10 = vpop.f32.mrb[19].mxu1  ;;  %10986 = vmatpush3.bf16.msra.mxu0 %v11634_v37  ;;  %v6185_v54 = vshll.u32 %v14394_v48, 16  ;;  %v6178_v37 = vrot.slane %v6176_v3, 4  ;;  %v11629_v48 = vld [vmem:[#allocation3 + $0x9c] sm:$0xff]   ;;  %v6215_v3 = vrot.slane %v6213_v27, 4 }
 0x26b   : > { %16478 = vst [vmem:[#allocation49_spill] sm:$0xff] %v14706_v10  ;;  %11019 = vmatprep.subr.bf16.mxu0 %v14702_v59  ;;  %v6191_v4 = vrot.slane %v6189_v52, 4  ;;  %v6219_v52 = vshll.u32 %v14403_v49, 16  ;;  %v6257_v49 = vshll.u32 %v14414_v18, 16 }
 0x26c   : > { %v14721_v51 = vrot.slane %v6185_v54, 5  ;;  %v6182_v43 = vor.u32 %v6181_v62, %v6178_v37 }
 0x26d   : > { %10956 = vmatmul.mubr.bf16.gmra.mrb[16].mxu0 %v11626_v6  ;;  %v6224_v6 = vshrl.u32 %v6133_v12, 16  ;;  %v6195_v12 = vshll.u32 %v14399_v16, 16 }
 0x26e   : > { %10959 = vmatprep.mubr.bf16.mxu0 %v11627_v21  ;;  %v6205_v21 = vrot.slane %v6203_v61, 5  ;;  %v6136_v61 = vld [vmem:[#allocation3 + $0x3c] sm:$0xf]  ;;  %v6192_v62 = vor.u32 %v6191_v4, %v14721_v51  ;;  %v6183_v37 = vrot.slane %v6182_v43, 4  ;;  %v6261_v43 = vshrl.u32 %v14414_v18, 16 }
 0x26f   : > { %v14709_v19 = vpop.f32.mrb[20].mxu1  ;;  %v6226_v2 = vrot.slane %v6224_v6, 4  ;;  %v14735_v6 = vrot.slane %v6233_v9, 5  ;;  %v6197_v4 = vrot.slane %v6195_v12, 5 }
 0x270   : > { %16479 = vst [vmem:[#allocation50_spill] sm:$0xff] %v14709_v19  ;;  %v14713_v10 = vpop.f32.mrb[21].mxu1  ;;  %v6202_v19 = vrot.slane %v6200_v29, 4  ;;  %v6193_v9 = vrot.slane %v6192_v62, 4  ;;  %v14757_v62 = vrot.slane %v6257_v49, 5  ;;  %v6281_v49 = vshll.u32 %v14426_v23, 16 }
 0x271   : > { %16480 = vst [vmem:[#allocation51_spill] sm:$0xff] %v14713_v10  ;;  %v14717_v38 = vpop.f32.mrb[22].mxu1  ;;  %v14723_v10 = vrot.slane %v6209_v55, 5  ;;  %v6230_v16 = vor.u32 %v6229_v13, %v6226_v2  ;;  %v11633_v2 = vld [vmem:[#allocation3 + $0xc0] sm:$0xff]  }
 0x272   : > { %16481 = vst [vmem:[#allocation52_spill] sm:$0xff] %v14717_v38  ;;  %v14719_v58 = vpop.f32.mrb[23].mxu1  ;;  %v6237_v38 = vshrl.u32 %v14410_v5, 16  ;;  %v6206_v29 = vor.u32 %v6205_v21, %v6202_v19  ;;  %v6243_v5 = vshll.u32 %v14412_v57, 16  ;;  %v6248_v21 = vshrl.u32 %v6136_v61, 16 }
 0x273   : > { %16482 = vst [vmem:[#allocation53_spill] sm:$0xff] %v14719_v58  ;;  %v6216_v55 = vor.u32 %v6215_v3, %v14723_v10  ;;  %v11632_v3 = vld [vmem:[#allocation3 + $0xb4] sm:$0xff]   ;;  %v6188_v57 = vsel %vm12916_vm15, %v6183_v37, %v14721_v51  ;;  %v6198_v18 = vsel %vm12916_vm15, %v6193_v9, %v6197_v4  ;;  %v14759_v37 = vld [vmem:[#allocation3 + $0xd0] sm:$0xf] }
 0x274   : > { %v6239_v19 = vrot.slane %v6237_v38, 4  ;;  %v14747_v13 = vrot.slane %v6243_v5, 5  ;;  %v6139_v38 = vld [vmem:[#allocation3 + $0x48] sm:$0xf]  ;;  %v9825_v34 = vcombine.low %v6188_v57, %v6198_v18  ;;  %v14794_v18 = vrot.slane %v6281_v49, 5  ;;  %v11644_v49 = vld [vmem:[%s16282_s8] sm:$0xff]  }
 0x275   : > { %10960 = vmatmul.mubr.bf16.gmra.mrb[20].mxu0 %v11629_v48  ;;  %v6251_v48 = vshll.u32 %v6136_v61, 16  ;;  %v14749_v61 = vrot.slane %v6230_v16, 4  ;;  %11067 = vmatprep.subr.bf16.mxu1 %v11644_v49 }
 0x276   : > { %10963 = vmatprep.mubr.bf16.mxu0 %v11630_v15  ;;  %v6240_v12 = vor.u32 %v6239_v19, %v14735_v6  ;;  %v6272_v19 = vshrl.u32 %v6139_v38, 16  ;;  %11068 = vmatpush3.bf16.msra.mxu1 %v11644_v49 }
 0x277   : > { %v14728_v54 = vpop.f32.mrb[24].mxu1 }
 0x278   : > { %16483 = vst [vmem:[#allocation54_spill] sm:$0xff] %v14728_v54  ;;  %v14732_v27 = vpop.f32.mrb[25].mxu1  ;;  %v6207_v54 = vrot.slane %v6206_v29, 4  ;;  %v6250_v29 = vrot.slane %v6248_v21, 4  ;;  %v6896_v21 = vld [vmem:[#allocation3 + $0xcc] sm:$0xe] }
 0x279   : > { %16484 = vst [vmem:[#allocation55_spill] sm:$0xff] %v14732_v27  ;;  %v14738_v45 = vpop.f32.mrb[26].mxu1  ;;  %v6221_v27 = vrot.slane %v6219_v52, 5  ;;  %v6263_v52 = vrot.slane %v6261_v43, 4  ;;  %v6285_v43 = vshrl.u32 %v14426_v23, 16  ;;  %v6236_v23 = vsel %vm12916_vm15, %v14749_v61, %v14735_v6 }
 0x27a   : > { %16485 = vst [vmem:[#allocation56_spill] sm:$0xff] %v14738_v45  ;;  %v14740_v15 = vpop.f32.mrb[27].mxu1  ;;  %v6217_v45 = vrot.slane %v6216_v55, 4  ;;  %v6212_v51 = vsel %vm12916_vm15, %v6207_v54, %v14723_v10  ;;  %v14761_v55 = vld [vmem:[#allocation3 + $0xd4] sm:$0x1]  ;;  %v6275_v54 = vshll.u32 %v6139_v38, 16 }
 0x27b   : > { %16486 = vst [vmem:[#allocation57_spill] sm:$0xff] %v14740_v15  ;;  %v6253_v15 = vrot.slane %v6251_v48, 5  ;;  %v7052_v48 = vrot.slane %v14759_v37, 5  ;;  %v7055_v4 = vrot.slane %v14761_v55, 5  ;;  %v6142_v61 = vld [vmem:[#allocation3 + $0x54] sm:$0xf] }
 0x27c   : > { %v6222_v16 = vsel %vm12916_vm15, %v6217_v45, %v6221_v27  ;;  %v6267_v27 = vshll.u32 %v14420_v25, 16 }
 0x27d   : > { %10964 = vmatmul.mubr.bf16.gmra.mrb[24].mxu0 %v11632_v3  ;;  %v9864_v3 = vrot.slane %v6896_v21, 9  ;;  %v7054_v45 = vrot.slane %v7052_v48, 4  ;;  %v9826_v20 = vcombine.low %v6212_v51, %v6222_v16  ;;  %v6287_v51 = vrot.slane %v6285_v43, 4 }
 0x27e   : > { %10967 = vmatprep.mubr.bf16.mxu0 %v11633_v2  ;;  %v6241_v2 = vrot.slane %v6240_v12, 4  ;;  %v6145_v12 = vld [vmem:[#allocation3 + $0x60] sm:$0xf]  ;;  %v14800_v6 = vrot.slane %v6267_v27, 5  ;;  %v6329_v43 = vshll.u32 %v14461_v63, 16  ;;  %v6357_v27 = vshrl.u32 %v14476_v53, 16 }
 0x27f   : > { %v14763_v5 = vpop.f32.mrb[28].mxu1  ;;  %v14781_v38 = vsel %vm12993_vm4, %v9864_v3, %v7052_v48  ;;  %v14792_v57 = vsel %vm12993_vm4, %v7054_v45, %v7055_v4  ;;  %v6291_v48 = vshll.u32 %v14428_v56, 16  ;;  %v6320_v4 = vshrl.u32 %v6145_v12, 16 }
 0x280   : > { %16487 = vst [vmem:[#allocation58_spill] sm:$0xff] %v14763_v5  ;;  %v14769_v10 = vpop.f32.mrb[29].mxu1  ;;  %v6254_v5 = vor.u32 %v6253_v15, %v6250_v29  ;;  %v6246_v25 = vsel %vm12916_vm15, %v6241_v2, %v14747_v13  ;;  %v6274_v15 = vrot.slane %v6272_v19, 4  ;;  %16491 = vst [vmem:[#allocation62_spill] sm:$0xff] %v14792_v57  ;;  %v6277_v29 = vrot.slane %v6275_v54, 5 }
 0x281   : > { %16488 = vst [vmem:[#allocation59_spill] sm:$0xff] %v14769_v10  ;;  %v14773_v9 = vpop.f32.mrb[30].mxu1  ;;  %v6264_v10 = vor.u32 %v6263_v52, %v14757_v62  ;;  %v6148_v52 = vld [vmem:[#allocation3 + $0x6c] sm:$0xf]  ;;  %v6305_v13 = vshll.u32 %v14443_v32, 16  ;;  %v6309_v19 = vshrl.u32 %v14443_v32, 16  ;;  %v6288_v56 = vor.u32 %v6287_v51, %v14794_v18 }
 0x282   : > { %16489 = vst [vmem:[#allocation60_spill] sm:$0xff] %v14773_v9  ;;  %v14776_v58 = vpop.f32.mrb[31].mxu1  ;;  %v14798_v21 = vrot.slane %v6254_v5, 4  ;;  %v6323_v54 = vshll.u32 %v6145_v12, 16  ;;  %v11645_v5 = vld [vmem:[%s16282_s8 + $0x8] sm:$0xff]   ;;  %v6333_v32 = vshrl.u32 %v14461_v63, 16  ;;  %v6278_v3 = vor.u32 %v6277_v29, %v6274_v15 }
 0x283   : > { %16490 = vst [vmem:[#allocation61_spill] sm:$0xff] %v14776_v58  ;;  %v14804_v11 = vrot.slane %v6264_v10, 4  ;;  %v6347_v10 = vshll.u32 %v6148_v52, 16  ;;  %v6353_v2 = vshll.u32 %v14476_v53, 16  ;;  %v6296_v45 = vshrl.u32 %v6142_v61, 16  ;;  %11069 = vmatprep.subr.bf16.mxu1 %v11645_v5  ;;  %v11646_v15 = vld [vmem:[%s16282_s8 + $0x10] sm:$0xff]  }
 0x284   : > { %v6299_v12 = vshll.u32 %v6142_v61, 16  ;;  %v14818_v16 = vrot.slane %v6305_v13, 5  ;;  %v6311_v58 = vrot.slane %v6309_v19, 4  ;;  %v6315_v9 = vshll.u32 %v14459_v33, 16  ;;  %v11637_v13 = vld [vmem:[%s16279_s5 + $0x208] sm:$0xff]   ;;  %11070 = vmatpush3.bf16.msra.mxu1 %v11645_v5 }
 0x285   : > { %10968 = vmatmul.mubr.bf16.gmra.mrb[28].mxu0 %v11635_v36  ;;  %v6344_v36 = vshrl.u32 %v6148_v52, 16  ;;  %v6322_v63 = vrot.slane %v6320_v4, 4  ;;  %v6325_v57 = vrot.slane %v6323_v54, 5  ;;  %v14824_v29 = vrot.slane %v6329_v43, 5  ;;  %11071 = vmatprep.subr.bf16.mxu1 %v11646_v15 }
 0x286   : > { %10987 = vmatprep.mubr.bf16.mxu0 %v9825_v34  ;;  %v6293_v34 = vrot.slane %v6291_v48, 5  ;;  %v6335_v53 = vrot.slane %v6333_v32, 4  ;;  %v6349_v52 = vrot.slane %v6347_v10, 5  ;;  %v9827_v61 = vcombine.low %v6236_v23, %v6246_v25  ;;  %v6151_v25 = vld [vmem:[#allocation3 + $0x78] sm:$0xf] }
 0x287   : > { %v6346_v51 = vrot.slane %v6344_v36, 4  ;;  %v6289_v19 = vrot.slane %v6288_v56, 4  ;;  %v14829_v48 = vrot.slane %v6353_v2, 5  ;;  %v6359_v33 = vrot.slane %v6357_v27, 4 }
 0x288   : > { %v6260_v4 = vsel %vm12916_vm15, %v14798_v21, %v14757_v62  ;;  %v6270_v54 = vsel %vm12916_vm15, %v14804_v11, %v14800_v6  ;;  %v6279_v49 = vrot.slane %v6278_v3, 4  ;;  %v6312_v23 = vor.u32 %v6311_v58, %v14818_v16  ;;  %11072 = vmatpush3.bf16.msra.mxu1 %v11646_v15 }
 0x289   : > { %v6294_v43 = vsel %vm12916_vm15, %v6289_v19, %v6293_v34  ;;  %v6298_v32 = vrot.slane %v6296_v45, 4  ;;  %v6301_v36 = vrot.slane %v6299_v12, 5  ;;  %v6339_v10 = vshll.u32 %v14465_v8, 16  ;;  %v6154_v34 = vld [vmem:[#allocation3 + $0x84] sm:$0xf] }
 0x28a   : > { %v14844_v62 = vrot.slane %v6315_v9, 5  ;;  %v6326_v21 = vor.u32 %v6325_v57, %v6322_v63  ;;  %v6336_v6 = vor.u32 %v6335_v53, %v14824_v29  ;;  %v6350_v58 = vor.u32 %v6349_v52, %v6346_v51 }
 0x28b   : > { %v6360_v11 = vor.u32 %v6359_v33, %v14829_v48  ;;  %v6363_v5 = vshll.u32 %v14484_v60, 16  ;;  %v6368_v8 = vshrl.u32 %v6151_v25, 16  ;;  %v6371_v3 = vshll.u32 %v6151_v25, 16 }
 0x28c   : > { %v6313_v9 = vrot.slane %v6312_v23, 4  ;;  %v6377_v57 = vshll.u32 %v14497_v30, 16  ;;  %v6381_v56 = vshrl.u32 %v14497_v30, 16  ;;  %v9828_v2 = vcombine.low %v6260_v4, %v6270_v54  ;;  %v11639_v30 = vld [vmem:[%s16279_s5 + $0x218] sm:$0xff]  }
 0x28d   : > { %10988 = vmatmul.mubr.bf16.vlgmr.msra.gmra.mrb[0].mxu0 %v9826_v20  ;;  %v11638_v20 = vld [vmem:[%s16279_s5 + $0x210] sm:$0xff]   ;;  %v6302_v45 = vor.u32 %v6301_v36, %v6298_v32  ;;  %v6341_v12 = vrot.slane %v6339_v10, 5  ;;  %v6327_v63 = vrot.slane %v6326_v21, 4  ;;  %v6337_v53 = vrot.slane %v6336_v6, 4  ;;  %v11640_v6 = vld [vmem:[%s16279_s5 + $0x220] sm:$0xff]  }
 0x28e   : > { %11020 = vmatpush3.bf16.msra.mxu0 %v14702_v59  ;;  %10991 = vmatprep.mubr.bf16.mxu0 %v9827_v61  ;;  %v6284_v59 = vsel %vm12916_vm15, %v6279_v49, %v14794_v18  ;;  %v6318_v60 = vsel %vm12916_vm15, %v6313_v9, %v14844_v62  ;;  %v6351_v51 = vrot.slane %v6350_v58, 4  ;;  %v6157_v18 = vld [vmem:[#allocation3 + $0x90] sm:$0xf]  ;;  %v6361_v15 = vrot.slane %v6360_v11, 4 }
 0x28f   : > { %11021 = vmatprep.subr.bf16.mxu0 %v11637_v13  ;;  %v9829_v27 = vcombine.low %v6284_v59, %v6294_v43  ;;  %v6365_v52 = vrot.slane %v6363_v5, 5  ;;  %v6370_v61 = vrot.slane %v6368_v8, 4  ;;  %v6373_v19 = vrot.slane %v6371_v3, 5 }
 0x290   : > { %v14863_v33 = vrot.slane %v6377_v57, 5  ;;  %v6392_v4 = vshrl.u32 %v6154_v34, 16  ;;  %v6395_v54 = vshll.u32 %v6154_v34, 16  ;;  %v6401_v49 = vshll.u32 %v14510_v46, 16 }
 0x291   : > { %v6405_v23 = vshrl.u32 %v14510_v46, 16  ;;  %v6416_v25 = vshrl.u32 %v6157_v18, 16  ;;  %v6419_v43 = vshll.u32 %v6157_v18, 16  ;;  %v6303_v32 = vrot.slane %v6302_v45, 4  ;;  %v6160_v45 = vld [vmem:[#allocation3 + $0x9c] sm:$0xf] }
 0x292   : > { %11022 = vmatpush3.bf16.msra.mxu0 %v11637_v13  ;;  %v6383_v13 = vrot.slane %v6381_v56, 4  ;;  %v6332_v36 = vsel %vm12916_vm15, %v6327_v63, %v14824_v29  ;;  %v6342_v10 = vsel %vm12916_vm15, %v6337_v53, %v6341_v12  ;;  %v6356_v62 = vsel %vm12916_vm15, %v6351_v51, %v14829_v48  ;;  %v6163_v51 = vld [vmem:[#allocation3 + $0xa8] sm:$0xf] }
 0x293   : > { %11023 = vmatprep.subr.bf16.mxu0 %v11638_v20  ;;  %v6366_v46 = vsel %vm12916_vm15, %v6361_v15, %v6365_v52  ;;  %v6387_v21 = vshll.u32 %v14499_v41, 16  ;;  %v6425_v58 = vshll.u32 %v14526_v44, 16  ;;  %v6429_v29 = vshrl.u32 %v14526_v44, 16 }
 0x294   : > { %v6384_v11 = vor.u32 %v6383_v13, %v14863_v33  ;;  %v6394_v5 = vrot.slane %v6392_v4, 4  ;;  %v6397_v8 = vrot.slane %v6395_v54, 5  ;;  %v14884_v48 = vrot.slane %v6401_v49, 5 }
 0x295   : > { %10992 = vmatmul.mubr.bf16.gmra.mrb[4].mxu0 %v9828_v2  ;;  %v6407_v3 = vrot.slane %v6405_v23, 4  ;;  %v6418_v59 = vrot.slane %v6416_v25, 4  ;;  %v6421_v9 = vrot.slane %v6419_v43, 5  ;;  %v6308_v41 = vsel %vm12916_vm15, %v6303_v32, %v14818_v16 }
 0x296   : > { %10995 = vmatprep.mubr.bf16.mxu0 %v9829_v27  ;;  %11024 = vmatpush3.bf16.msra.mxu0 %v11638_v20  ;;  %v6374_v20 = vor.u32 %v6373_v19, %v6370_v61  ;;  %v9830_v57 = vcombine.low %v6308_v41, %v6318_v60  ;;  %v9831_v56 = vcombine.low %v6332_v36, %v6342_v10  ;;  %v14889_v2 = vrot.slane %v6425_v58, 5  ;;  %v11641_v27 = vld [vmem:[%s16279_s5 + $0x228] sm:$0xff]  }
 0x297   : > { %11025 = vmatprep.subr.bf16.mxu0 %v11639_v30  ;;  %v6431_v44 = vrot.slane %v6429_v29, 4  ;;  %v9832_v12 = vcombine.low %v6356_v62, %v6366_v46  ;;  %v6389_v63 = vrot.slane %v6387_v21, 5  ;;  %v6398_v53 = vor.u32 %v6397_v8, %v6394_v5 }
 0x298   : > { %v6375_v34 = vrot.slane %v6374_v20, 4  ;;  %v6385_v18 = vrot.slane %v6384_v11, 4  ;;  %v6408_v16 = vor.u32 %v6407_v3, %v14884_v48  ;;  %v6411_v60 = vshll.u32 %v14524_v26, 16  ;;  %v11642_v26 = vld [vmem:[%s16279_s5 + $0x230] sm:$0xff]   ;;  %v6166_v3 = vld [vmem:[#allocation3 + $0xb4] sm:$0xf] }
 0x299   : > { %v6440_v15 = vshrl.u32 %v6160_v45, 16  ;;  %v6443_v52 = vshll.u32 %v6160_v45, 16  ;;  %v6449_v61 = vshll.u32 %v14546_v28, 16  ;;  %v6453_v19 = vshrl.u32 %v14546_v28, 16 }
 0x29a   : > { %11026 = vmatpush3.bf16.msra.mxu0 %v11639_v30  ;;  %v6422_v30 = vor.u32 %v6421_v9, %v6418_v59  ;;  %v6432_v13 = vor.u32 %v6431_v44, %v14889_v2  ;;  %v6435_v4 = vshll.u32 %v14538_v31, 16  ;;  %v6464_v54 = vshrl.u32 %v6163_v51, 16 }
 0x29b   : > { %11027 = vmatprep.subr.bf16.mxu0 %v11640_v6  ;;  %v6467_v49 = vshll.u32 %v6163_v51, 16  ;;  %v6380_v23 = vsel %vm12916_vm15, %v6375_v34, %v14863_v33  ;;  %v6399_v25 = vrot.slane %v6398_v53, 4  ;;  %v6473_v43 = vshll.u32 %v14564_v50, 16 }
 0x29c   : > { %v6477_v28 = vshrl.u32 %v14564_v50, 16  ;;  %v6390_v32 = vsel %vm12916_vm15, %v6385_v18, %v6389_v63  ;;  %v6409_v31 = vrot.slane %v6408_v16, 4  ;;  %v6413_v36 = vrot.slane %v6411_v60, 5  ;;  %v11643_v50 = vld [vmem:[%s16279_s5 + $0x238] sm:$0xff]  }
 0x29d   : > { %10996 = vmatmul.mubr.bf16.gmra.mrb[8].mxu0 %v9830_v57  ;;  %v6423_v10 = vrot.slane %v6422_v30, 4  ;;  %v6442_v62 = vrot.slane %v6440_v15, 4  ;;  %v6445_v46 = vrot.slane %v6443_v52, 5  ;;  %v14910_v21 = vrot.slane %v6449_v61, 5 }
 0x29e   : > { %10999 = vmatprep.mubr.bf16.mxu0 %v9831_v56  ;;  %11028 = vmatpush3.bf16.msra.mxu0 %v11640_v6  ;;  %v6455_v6 = vrot.slane %v6453_v19, 4  ;;  %v6433_v58 = vrot.slane %v6432_v13, 4  ;;  %v6437_v29 = vrot.slane %v6435_v4, 5  ;;  %v6466_v33 = vrot.slane %v6464_v54, 4  ;;  %v6172_v54 = vld [vmem:[#allocation3 + $0xcc] sm:$0xf] }
 0x29f   : > { %11029 = vmatprep.subr.bf16.mxu0 %v11641_v27  ;;  %v6469_v20 = vrot.slane %v6467_v49, 5  ;;  %v9833_v11 = vcombine.low %v6380_v23, %v6390_v32  ;;  %v14915_v5 = vrot.slane %v6473_v43, 5  ;;  %v6479_v8 = vrot.slane %v6477_v28, 4 }
 0x2a0   : > { %v6404_v59 = vsel %vm12916_vm15, %v6399_v25, %v14884_v48  ;;  %v6414_v9 = vsel %vm12916_vm15, %v6409_v31, %v6413_v36  ;;  %v6428_v41 = vsel %vm12916_vm15, %v6423_v10, %v14889_v2  ;;  %v6446_v57 = vor.u32 %v6445_v46, %v6442_v62 }
 0x2a1   : > { %v6456_v56 = vor.u32 %v6455_v6, %v14910_v21  ;;  %v6459_v44 = vshll.u32 %v14554_v35, 16  ;;  %v6438_v45 = vsel %vm12916_vm15, %v6433_v58, %v6437_v29  ;;  %v6483_v48 = vshll.u32 %v14566_v22, 16 }
 0x2a2   : > { %11030 = vmatpush3.bf16.msra.mxu0 %v11641_v27  ;;  %v6169_v27 = vld [vmem:[#allocation3 + $0xc0] sm:$0xf]  ;;  %v6488_v34 = vshrl.u32 %v6166_v3, 16  ;;  %v6480_v63 = vor.u32 %v6479_v8, %v14915_v5  ;;  %v6491_v53 = vshll.u32 %v6166_v3, 16  ;;  %v6497_v2 = vshll.u32 %v14592_v0, 16 }
 0x2a3   : > { %11031 = vmatprep.subr.bf16.mxu0 %v11642_v26  ;;  %v6501_v51 = vshrl.u32 %v14592_v0, 16  ;;  %v6512_v18 = vshrl.u32 %v6169_v27, 16  ;;  %v6515_v16 = vshll.u32 %v6169_v27, 16  ;;  %v6521_v35 = vshll.u32 %v14628_v24, 16 }
 0x2a4   : > { %v6525_v60 = vshrl.u32 %v14628_v24, 16  ;;  %v9834_v30 = vcombine.low %v6404_v59, %v6414_v9  ;;  %v9835_v15 = vcombine.low %v6428_v41, %v6438_v45  ;;  %v6447_v52 = vrot.slane %v6446_v57, 4 }
 0x2a5   : > { %11000 = vmatmul.mubr.bf16.gmra.mrb[12].mxu0 %v9832_v12  ;;  %v6470_v12 = vor.u32 %v6469_v20, %v6466_v33  ;;  %v6461_v61 = vrot.slane %v6459_v44, 5  ;;  %v6457_v22 = vrot.slane %v6456_v56, 4  ;;  %v6485_v13 = vrot.slane %v6483_v48, 5 }
 0x2a6   : > { %11003 = vmatprep.mubr.bf16.mxu0 %v9833_v11  ;;  %11032 = vmatpush3.bf16.msra.mxu0 %v11642_v26  ;;  %v6490_v4 = vrot.slane %v6488_v34, 4  ;;  %v6481_v49 = vrot.slane %v6480_v63, 4  ;;  %v6493_v26 = vrot.slane %v6491_v53, 5  ;;  %v6499_v23 = vrot.slane %v6497_v2, 5 }
 0x2a7   : > { %11033 = vmatprep.subr.bf16.mxu0 %v11643_v50  ;;  %v6471_v19 = vrot.slane %v6470_v12, 4  ;;  %v6503_v0 = vrot.slane %v6501_v51, 4  ;;  %v6514_v25 = vrot.slane %v6512_v18, 4  ;;  %v6517_v43 = vrot.slane %v6515_v16, 5 }
 0x2a8   : > { %v6523_v28 = vrot.slane %v6521_v35, 5  ;;  %v6527_v32 = vrot.slane %v6525_v60, 4  ;;  %v6536_v24 = vshrl.u32 %v6172_v54, 16  ;;  %v6539_v31 = vshll.u32 %v6172_v54, 16  ;;  %v16500_v54 = vld [vmem:[#allocation30_spill] sm:$0xff] }
 0x2a9   : > { %v6545_v36 = vshll.u32 %v14759_v37, 16  ;;  %v6549_v10 = vshrl.u32 %v14759_v37, 16  ;;  %v6452_v62 = vsel %vm12916_vm15, %v6447_v52, %v14910_v21  ;;  %v6462_v46 = vsel %vm12916_vm15, %v6457_v22, %v6461_v61  ;;  %v16494_v61 = vld [vmem:[#allocation27_spill] sm:$0xff] }
 0x2aa   : > { %11034 = vmatpush3.bf16.msra.mxu0 %v11643_v50  ;;  %v6476_v6 = vsel %vm12916_vm15, %v6471_v19, %v14915_v5  ;;  %v6494_v58 = vor.u32 %v6493_v26, %v6490_v4  ;;  %v6504_v29 = vor.u32 %v6503_v0, %v6499_v23  ;;  %v6507_v33 = vshll.u32 %v14594_v40, 16  ;;  %v16496_v19 = vld [vmem:[#allocation26_spill] sm:$0xff]  ;;  %v16502_v26 = vld [vmem:[#allocation15_spill] sm:$0xff] }
 0x2ab   : > { %v6486_v20 = vsel %vm12916_vm15, %v6481_v49, %v6485_v13  ;;  %v6518_v50 = vor.u32 %v6517_v43, %v6514_v25  ;;  %v6528_v37 = vor.u32 %v6527_v32, %v6523_v28  ;;  %v6531_v11 = vshll.u32 %v14606_v39, 16  ;;  %v16497_v13 = vld [vmem:[#allocation28_spill] sm:$0xff]  ;;  %v16506_v0 = vld [vmem:[#allocation34_spill] sm:$0xff]  ;;  %v16509_v25 = vld [vmem:[#allocation35_spill] sm:$0xff] }
 0x2ac   : > { %v6538_v8 = vrot.slane %v6536_v24, 4  ;;  %v6541_v21 = vrot.slane %v6539_v31, 5  ;;  %v6547_v3 = vrot.slane %v6545_v36, 5  ;;  %v6551_v59 = vrot.slane %v6549_v10, 4  ;;  %v16511_v43 = vld [vmem:[#allocation36_spill] sm:$0xff]  ;;  %v16514_v24 = vld [vmem:[#allocation14_spill] sm:$0xff] }
 0x2ad   : > { %11004 = vmatmul.mubr.bf16.gmra.mrb[16].mxu0 %v9834_v30  ;;  %v9836_v9 = vcombine.low %v6452_v62, %v6462_v46  ;;  %v9837_v41 = vcombine.low %v6476_v6, %v6486_v20  ;;  %v6495_v57 = vrot.slane %v6494_v58, 4  ;;  %v6505_v56 = vrot.slane %v6504_v29, 4  ;;  %v16515_v31 = vld [vmem:[#allocation20_spill] sm:$0xff]  ;;  %v16517_v10 = vld [vmem:[#allocation37_spill] sm:$0xff]  ;;  %v16518_v62 = vld [vmem:[#allocation39_spill] sm:$0xff] }
 0x2ae   : > { %11007 = vmatprep.mubr.bf16.mxu0 %v9835_v15  ;;  %v6509_v5 = vrot.slane %v6507_v33, 5  ;;  %v6519_v44 = vrot.slane %v6518_v50, 4  ;;  %v6529_v27 = vrot.slane %v6528_v37, 4  ;;  %v6533_v40 = vrot.slane %v6531_v11, 5  ;;  %v16520_v6 = vld [vmem:[#allocation38_spill] sm:$0xff]  ;;  %v16521_v58 = vld [vmem:[#allocation40_spill] sm:$0xff] }
 0x2af   : > { %v6542_v45 = vor.u32 %v6541_v21, %v6538_v8  ;;  %v6552_v12 = vor.u32 %v6551_v59, %v6547_v3  ;;  %v6555_v48 = vshll.u32 %v14761_v55, 16  ;;  %v6500_v39 = vsel %vm12916_vm15, %v6495_v57, %v6499_v23  ;;  %v16503_v23 = vld [vmem:[#allocation31_spill] sm:$0xff]  ;;  %v16523_v33 = vld [vmem:[#allocation41_spill] sm:$0xff]  ;;  %v16524_v20 = vld [vmem:[#allocation42_spill] sm:$0xff] }
 0x2b0   : > { %v6510_v34 = vsel %vm12916_vm15, %v6505_v56, %v6509_v5  ;;  %v6524_v63 = vsel %vm12916_vm15, %v6519_v44, %v6523_v28  ;;  %v6534_v53 = vsel %vm12916_vm15, %v6529_v27, %v6533_v40  ;;  %v16492_v15 = vcombine.low %v14432_v42, %v14436_v14  ;;  %v16505_v14 = vld [vmem:[#allocation32_spill] sm:$0xff]  ;;  %v16512_v28 = vld [vmem:[#allocation18_spill] sm:$0xff]  ;;  %v16527_v11 = vld [vmem:[#allocation43_spill] sm:$0xff] }
 0x2b1   : > { %v6543_v2 = vrot.slane %v6542_v45, 4  ;;  %v6553_v51 = vrot.slane %v6552_v12, 4  ;;  %v6557_v18 = vrot.slane %v6555_v48, 5  ;;  %v9838_v16 = vcombine.low %v6500_v39, %v6510_v34  ;;  %v16526_v37 = vld [vmem:[#allocation44_spill] sm:$0xff]  ;;  %v16529_v21 = vld [vmem:[#allocation45_spill] sm:$0xff]  ;;  %v16535_v45 = vld [vmem:[#allocation6_spill] sm:$0xff] }
 0x2b2   : > { %v9839_v35 = vcombine.low %v6524_v63, %v6534_v53  ;;  %v16493_v52 = vcombine.low %v14449_v7, %v14455_v17  ;;  %v16495_v22 = vcombine.low %v14469_v47, %v16494_v61  ;;  %v16498_v4 = vcombine.low %v16496_v19, %v16497_v13  ;;  %v16508_v17 = vld [vmem:[#allocation33_spill] sm:$0xff]  ;;  %v11647_v57 = vld [vmem:[%s16282_s8 + $0x18] sm:$0xff]   ;;  %v15021_v39 = vld [vmem:[%s16280_s6] ss:$0 sm:$0xff] }
 0x2b3   : > { %v6548_v55 = vsel %vm12916_vm15, %v6543_v2, %v6547_v3  ;;  %v6558_v60 = vsel %vm12916_vm15, %v6553_v51, %v6557_v18  ;;  %v16501_v49 = vcombine.low %v16499_v1, %v16500_v54  ;;  %v16504_v42 = vcombine.low %v16502_v26, %v16503_v23  ;;  %v16530_v3 = vld [vmem:[#allocation46_spill] sm:$0xff]  ;;  %11073 = vmatprep.subr.bf16.mxu1 %v11647_v57  ;;  %v11648_v56 = vld [vmem:[%s16283_s9] sm:$0xff]   ;;  %v16536_v34 = vld [vmem:[#allocation7_spill] sm:$0xff] }
 0x2b4   : > { %v9840_v30 = vcombine.low %v6548_v55, %v6558_v60  ;;  %v16507_v7 = vcombine.low %v16505_v14, %v16506_v0  ;;  %v16510_v47 = vcombine.low %v16508_v17, %v16509_v25  ;;  %v16513_v32 = vcombine.low %v16511_v43, %v16512_v28  ;;  %11074 = vmatpush3.bf16.msra.mxu1 %v11647_v57  ;;  %v16534_v44 = vld [vmem:[#allocation5_spill] sm:$0xff]  ;;  %v16537_v51 = vld [vmem:[#allocation8_spill] sm:$0xff]  ;;  %v16544_v0 = vld [vmem:[#allocation11_spill] sm:$0xff] }
 0x2b5   : > { %11008 = vmatmul.mubr.bf16.gmra.mrb[20].mxu0 %v9836_v9  ;;  %v16516_v36 = vcombine.low %v16514_v24, %v16515_v31  ;;  %v16519_v46 = vcombine.low %v16517_v10, %v16518_v62  ;;  %v16522_v29 = vcombine.low %v16520_v6, %v16521_v58  ;;  %v16525_v50 = vcombine.low %v16523_v33, %v16524_v20  ;;  %v16532_v9 = vld [vmem:[#allocation62_spill] sm:$0xff]  ;;  %v16539_v19 = vld [vmem:[#allocation9_spill] sm:$0xff]  ;;  %v16545_v43 = vld [vmem:[#allocation12_spill] sm:$0xff] }
 0x2b6   : > { %11011 = vmatprep.mubr.bf16.mxu0 %v9837_v41  ;;  %v16528_v8 = vcombine.low %v16526_v37, %v16527_v11  ;;  %v16531_v59 = vcombine.low %v16529_v21, %v16530_v3  ;;  %v16533_v41 = vcombine.low %v14781_v38, %v16532_v9  ;;  %11107 = vmatprep.subr.bf16.mxu1 %v11648_v56  ;;  %v11649_v31 = vld [vmem:[%s16283_s9 + $0x8] sm:$0xff]   ;;  %v11650_v37 = vld [vmem:[%s16283_s9 + $0x10] sm:$0xff]   ;;  %v16550_v21 = vld [vmem:[#allocation16_spill] sm:$0xff] }
 0x2b7   : > { %v16547_v33 = vld [vmem:[#allocation13_spill] sm:$0xff] }
 0x2b8   : > { %v16552_v57 = vld [vmem:[#allocation17_spill] sm:$0xff] }
 0x2bd   : > { %11012 = vmatmul.mubr.bf16.gmra.mrb[24].mxu0 %v9838_v16 }
 0x2be   : > { %11015 = vmatprep.mubr.bf16.mxu0 %v9839_v35 }
 0x2c5   : > { %11016 = vmatmul.mubr.bf16.gmra.mrb[28].mxu0 %v9840_v30  ;;  %v15030_v30 = vld [vmem:[%s16281_s7] ss:$0 sm:$0xff] }
 0x2c6   : > { %11035 = vmatprep.mubr.bf16.mxu0 %v16492_v15 }
 0x2cd   : > { %11036 = vmatmul.mubr.bf16.vlgmr.msra.gmra.mrb[0].mxu0 %v16493_v52 }
 0x2ce   : > { %11039 = vmatprep.mubr.bf16.mxu0 %v16495_v22 }
 0x2d5   : > { %11040 = vmatmul.mubr.bf16.gmra.mrb[4].mxu0 %v16498_v4 }
 0x2d6   : > { %11043 = vmatprep.mubr.bf16.mxu0 %v16501_v49  ;;  %v16542_v49 = vld [vmem:[#allocation10_spill] sm:$0xff] }
 0x2dd   : > { %11044 = vmatmul.mubr.bf16.gmra.mrb[8].mxu0 %v16504_v42 }
 0x2de   : > { %11047 = vmatprep.mubr.bf16.mxu0 %v16507_v7 }
 0x2e5   : > { %11048 = vmatmul.mubr.bf16.gmra.mrb[12].mxu0 %v16510_v47 }
 0x2e6   : > { %11051 = vmatprep.mubr.bf16.mxu0 %v16513_v32 }
 0x2ed   : > { %11052 = vmatmul.mubr.bf16.gmra.mrb[16].mxu0 %v16516_v36 }
 0x2ee   : > { %11055 = vmatprep.mubr.bf16.mxu0 %v16519_v46 }
 0x2f5   : > { %11056 = vmatmul.mubr.bf16.gmra.mrb[20].mxu0 %v16522_v29 }
 0x2f6   : > { %11059 = vmatprep.mubr.bf16.mxu0 %v16525_v50 }
 0x2fd   : > { %11060 = vmatmul.mubr.bf16.gmra.mrb[24].mxu0 %v16528_v8 }
 0x2fe   : > { %11063 = vmatprep.mubr.bf16.mxu0 %v16531_v59 }
 0x305   : > { %11064 = vmatmul.mubr.bf16.gmra.mrb[28].mxu0 %v16533_v41 }
 0x3a0   : > { %v11037_v5 = vpop.f32.mrb[0].mxu0 }
 0x3a1   : > { %v11259_v27 = vadd.f32 %v11037_v5, %v16534_v44  ;;  %v7220_v40 = vpop.f32.mrb[1].mxu0 }
 0x3a2   : > { %v11260_v12 = vadd.f32 %v7220_v40, %v16535_v45  ;;  %v11038_v48 = vpop.f32.mrb[2].mxu0  ;;  %v16553_v40 = vld [vmem:[#allocation19_spill] sm:$0xff] }
 0x3a3   : > { %v7381_v38 = vmax.f32 %v11259_v27, 0.0  ;;  %v11261_v63 = vadd.f32 %v11038_v48, %v16536_v34  ;;  %v7223_v53 = vpop.f32.mrb[3].mxu0 }
 0x3a4   : > { %v7379_v2 = vmax.f32 %v11260_v12, 0.0  ;;  %v11262_v18 = vadd.f32 %v7223_v53, %v16537_v51 }
 0x3a5   : > { %v7382_v16 = vmax.f32 %v11261_v63, 0.0  ;;  %v7420_v60 = vmul.f32 %v15021_v39, %v7381_v38  ;;  %v11651_v38 = vld [vmem:[%s16283_s9 + $0x18] sm:$0xff]  }
 0x3a6   : > { %v7418_v35 = vmul.f32 %v15021_v39, %v7379_v2  ;;  %v7380_v55 = vmax.f32 %v11262_v18, 0.0 }
 0x3a7   : > { %v7421_v15 = vmul.f32 %v15021_v39, %v7382_v16  ;;  %v15046_v42 = vadd.f32 %v15030_v30, %v7420_v60 }
 0x3a8   : > { %v7419_v52 = vmul.f32 %v15021_v39, %v7380_v55  ;;  %v11041_v61 = vpop.f32.mrb[4].mxu0  ;;  %v15039_v1 = vadd.f32 %v15030_v30, %v7418_v35  ;;  %v16555_v35 = vld [vmem:[#allocation22_spill] sm:$0xff] }
 0x3a9   : > { %v15035_v22 = vadd.f32 %v15030_v30, %v7421_v15  ;;  %v11263_v13 = vadd.f32 %v11041_v61, %v16539_v19  ;;  %v7236_v4 = vpop.f32.mrb[5].mxu0  ;;  %16543 = vst [vmem:[#allocation29_spill] sm:$0xff] %v15046_v42  ;;  %v16558_v61 = vld [vmem:[#allocation23_spill] sm:$0xff] }
 0x3aa   : > { %16540 = vst [vmem:[#allocation26_spill] sm:$0xff] %v15039_v1  ;;  %v15042_v54 = vadd.f32 %v15030_v30, %v7419_v52  ;;  %v11264_v26 = vadd.f32 %v7236_v4, %v16542_v49  ;;  %v11042_v23 = vpop.f32.mrb[6].mxu0 }
 0x3ab   : > { %16538 = vst [vmem:[#allocation27_spill] sm:$0xff] %v15035_v22  ;;  %v7385_v14 = vmax.f32 %v11263_v13, 0.0  ;;  %v11265_v7 = vadd.f32 %v11042_v23, %v16544_v0  ;;  %v7239_v17 = vpop.f32.mrb[7].mxu0  ;;  %v15056_v32 = vpack.c.bf16 %v15035_v22, %v15046_v42 }
 0x3ac   : > { %16541 = vst [vmem:[#allocation28_spill] sm:$0xff] %v15042_v54  ;;  %v15051_v25 = vpack.c.bf16 %v15042_v54, %v15039_v1  ;;  %v7383_v47 = vmax.f32 %v11264_v26, 0.0  ;;  %v11266_v28 = vadd.f32 %v7239_v17, %v16545_v43  ;;  %v16560_v26 = vld [vmem:[#allocation24_spill] sm:$0xff]  ;;  %v16561_v17 = vld [vmem:[#allocation25_spill] sm:$0xff] }
 0x3ad   : > { %v7386_v24 = vmax.f32 %v11265_v7, 0.0  ;;  %v7424_v62 = vmul.f32 %v15021_v39, %v7385_v14 }
 0x3ae   : > { %v7422_v36 = vmul.f32 %v15021_v39, %v7383_v47  ;;  %v7384_v10 = vmax.f32 %v11266_v28, 0.0  ;;  %11075 = vmatprep.mubr.msk.bf16.mxu1 %vm7537_vm2, %v15051_v25 }
 0x3af   : > { %v7425_v46 = vmul.f32 %v15021_v39, %v7386_v24  ;;  %11076 = vmatmul.mubr.msk.bf16.vlgmr.msra.gmra.mrb[32].mxu1 %vm7537_vm2, %v15056_v32  ;;  %v15084_v9 = vadd.f32 %v15030_v30, %v7424_v62 }
 0x3b0   : > { %v7423_v6 = vmul.f32 %v15021_v39, %v7384_v10  ;;  %v11045_v58 = vpop.f32.mrb[8].mxu0  ;;  %11108 = vmatpush3.bf16.msra.mxu1 %v11648_v56  ;;  %v15077_v11 = vadd.f32 %v15030_v30, %v7422_v36 }
 0x3b1   : > { %v15070_v29 = vadd.f32 %v15030_v30, %v7425_v46  ;;  %v11267_v20 = vadd.f32 %v11045_v58, %v16547_v33  ;;  %v7252_v50 = vpop.f32.mrb[9].mxu0  ;;  %11109 = vmatprep.subr.bf16.mxu1 %v11649_v31  ;;  %16551 = vst [vmem:[#allocation32_spill] sm:$0xff] %v15084_v9  ;;  %v16563_v58 = vld [vmem:[#allocation21_spill] sm:$0xff] }
 0x3b2   : > { %16548 = vst [vmem:[#allocation15_spill] sm:$0xff] %v15077_v11  ;;  %v15080_v8 = vadd.f32 %v15030_v30, %v7423_v6  ;;  %v11268_v3 = vadd.f32 %v7252_v50, %v16550_v21  ;;  %v11046_v59 = vpop.f32.mrb[10].mxu0  ;;  %v16566_v21 = vld [vmem:[#allocation47_spill] sm:$0xff] }
 0x3b3   : > { %16546 = vst [vmem:[#allocation30_spill] sm:$0xff] %v15070_v29  ;;  %v7389_v41 = vmax.f32 %v11267_v20, 0.0  ;;  %v11269_v56 = vadd.f32 %v11046_v59, %v16552_v57  ;;  %v7255_v5 = vpop.f32.mrb[11].mxu0  ;;  %v15094_v12 = vpack.c.bf16 %v15070_v29, %v15084_v9 }
 0x3b4   : > { %16549 = vst [vmem:[#allocation31_spill] sm:$0xff] %v15080_v8  ;;  %v15089_v44 = vpack.c.bf16 %v15080_v8, %v15077_v11  ;;  %v7387_v27 = vmax.f32 %v11268_v3, 0.0  ;;  %v11270_v45 = vadd.f32 %v7255_v5, %v16553_v40  ;;  %11110 = vmatpush3.bf16.msra.mxu1 %v11649_v31 }
 0x3b5   : > { %v7390_v48 = vmax.f32 %v11269_v56, 0.0  ;;  %11111 = vmatprep.subr.bf16.mxu1 %v11650_v37  ;;  %v7428_v53 = vmul.f32 %v15021_v39, %v7389_v41  ;;  %v16568_v56 = vld [vmem:[#allocation48_spill] sm:$0xff] }
 0x3b6   : > { %v7426_v34 = vmul.f32 %v15021_v39, %v7387_v27  ;;  %v7388_v63 = vmax.f32 %v11270_v45, 0.0  ;;  %11079 = vmatprep.mubr.msk.bf16.mxu1 %vm7537_vm2, %v15089_v44 }
 0x3b7   : > { %v7429_v2 = vmul.f32 %v15021_v39, %v7390_v48  ;;  %11080 = vmatmul.mubr.msk.bf16.gmra.mrb[36].mxu1 %vm7537_vm2, %v15094_v12  ;;  %v15119_v4 = vadd.f32 %v15030_v30, %v7428_v53  ;;  %v16569_v48 = vld [vmem:[#allocation49_spill] sm:$0xff] }
 0x3b8   : > { %v7427_v51 = vmul.f32 %v15021_v39, %v7388_v63  ;;  %v11049_v18 = vpop.f32.mrb[12].mxu0  ;;  %11112 = vmatpush3.bf16.msra.mxu1 %v11650_v37  ;;  %v15112_v15 = vadd.f32 %v15030_v30, %v7426_v34 }
 0x3b9   : > { %v15108_v16 = vadd.f32 %v15030_v30, %v7429_v2  ;;  %v11271_v55 = vadd.f32 %v11049_v18, %v16555_v35  ;;  %v7268_v60 = vpop.f32.mrb[13].mxu0  ;;  %11113 = vmatprep.subr.bf16.mxu1 %v11651_v38  ;;  %16559 = vst [vmem:[#allocation36_spill] sm:$0xff] %v15119_v4 }
 0x3ba   : > { %16556 = vst [vmem:[#allocation33_spill] sm:$0xff] %v15112_v15  ;;  %v15115_v52 = vadd.f32 %v15030_v30, %v7427_v51  ;;  %v11272_v19 = vadd.f32 %v7268_v60, %v16558_v61  ;;  %v11050_v13 = vpop.f32.mrb[14].mxu0  ;;  %v16571_v61 = vld [vmem:[#allocation50_spill] sm:$0xff] }
 0x3bb   : > { %16554 = vst [vmem:[#allocation34_spill] sm:$0xff] %v15108_v16  ;;  %v7393_v49 = vmax.f32 %v11271_v55, 0.0  ;;  %v11273_v23 = vadd.f32 %v11050_v13, %v16560_v26  ;;  %v7271_v14 = vpop.f32.mrb[15].mxu0  ;;  %v15129_v43 = vpack.c.bf16 %v15108_v16, %v15119_v4 }
 0x3bc   : > { %16557 = vst [vmem:[#allocation35_spill] sm:$0xff] %v15115_v52  ;;  %v15124_v0 = vpack.c.bf16 %v15115_v52, %v15112_v15  ;;  %v7391_v7 = vmax.f32 %v11272_v19, 0.0  ;;  %v11274_v47 = vadd.f32 %v7271_v14, %v16561_v17  ;;  %11114 = vmatpush3.bf16.msra.mxu1 %v11651_v38 }
 0x3bd   : > { %v7394_v28 = vmax.f32 %v11273_v23, 0.0  ;;  %v7432_v36 = vmul.f32 %v15021_v39, %v7393_v49  ;;  %v16574_v23 = vld [vmem:[#allocation51_spill] sm:$0xff] }
 0x3be   : > { %v7430_v24 = vmul.f32 %v15021_v39, %v7391_v7  ;;  %v7392_v31 = vmax.f32 %v11274_v47, 0.0  ;;  %11083 = vmatprep.mubr.msk.bf16.mxu1 %vm7537_vm2, %v15124_v0 }
 0x3bf   : > { %v7433_v10 = vmul.f32 %v15021_v39, %v7394_v28  ;;  %11084 = vmatmul.mubr.msk.bf16.gmra.mrb[40].mxu1 %vm7537_vm2, %v15129_v43  ;;  %v15151_v41 = vadd.f32 %v15030_v30, %v7432_v36  ;;  %v16576_v28 = vld [vmem:[#allocation52_spill] sm:$0xff] }
 0x3c0   : > { %v7431_v62 = vmul.f32 %v15021_v39, %v7392_v31  ;;  %v11053_v46 = vpop.f32.mrb[16].mxu0  ;;  %v15144_v50 = vadd.f32 %v15030_v30, %v7430_v24 }
 0x3c1   : > { %v15140_v6 = vadd.f32 %v15030_v30, %v7433_v10  ;;  %v11275_v33 = vadd.f32 %v11053_v46, %v16563_v58  ;;  %v7284_v20 = vpop.f32.mrb[17].mxu0  ;;  %16567 = vst [vmem:[#allocation37_spill] sm:$0xff] %v15151_v41 }
 0x3c2   : > { %16564 = vst [vmem:[#allocation14_spill] sm:$0xff] %v15144_v50  ;;  %v15147_v37 = vadd.f32 %v15030_v30, %v7431_v62  ;;  %v11276_v3 = vadd.f32 %v7284_v20, %v16566_v21  ;;  %v11054_v59 = vpop.f32.mrb[18].mxu0  ;;  %v16577_v62 = vld [vmem:[#allocation53_spill] sm:$0xff] }
 0x3c3   : > { %16562 = vst [vmem:[#allocation18_spill] sm:$0xff] %v15140_v6  ;;  %v7397_v57 = vmax.f32 %v11275_v33, 0.0  ;;  %v11277_v5 = vadd.f32 %v11054_v59, %v16568_v56  ;;  %v7287_v27 = vpop.f32.mrb[19].mxu0  ;;  %v15161_v34 = vpack.c.bf16 %v15140_v6, %v15151_v41 }
 0x3c4   : > { %16565 = vst [vmem:[#allocation20_spill] sm:$0xff] %v15147_v37  ;;  %v15156_v40 = vpack.c.bf16 %v15147_v37, %v15144_v50  ;;  %v7395_v45 = vmax.f32 %v11276_v3, 0.0  ;;  %v11278_v38 = vadd.f32 %v7287_v27, %v16569_v48  ;;  %v16579_v27 = vld [vmem:[#allocation54_spill] sm:$0xff] }
 0x3c5   : > { %v7398_v63 = vmax.f32 %v11277_v5, 0.0  ;;  %v7436_v51 = vmul.f32 %v15021_v39, %v7397_v57 }
 0x3c6   : > { %v7434_v53 = vmul.f32 %v15021_v39, %v7395_v45  ;;  %v7396_v2 = vmax.f32 %v11278_v38, 0.0  ;;  %11087 = vmatprep.mubr.msk.bf16.mxu1 %vm7537_vm2, %v15156_v40 }
 0x3c7   : > { %v7437_v18 = vmul.f32 %v15021_v39, %v7398_v63  ;;  %11088 = vmatmul.mubr.msk.bf16.gmra.mrb[44].mxu1 %vm7537_vm2, %v15161_v34  ;;  %v15183_v17 = vadd.f32 %v15030_v30, %v7436_v51 }
 0x3c8   : > { %v7435_v35 = vmul.f32 %v15021_v39, %v7396_v2  ;;  %v11057_v55 = vpop.f32.mrb[20].mxu0  ;;  %v15176_v49 = vadd.f32 %v15030_v30, %v7434_v53  ;;  %v16582_v53 = vld [vmem:[#allocation55_spill] sm:$0xff] }
 0x3c9   : > { %v15172_v60 = vadd.f32 %v15030_v30, %v7437_v18  ;;  %v11279_v19 = vadd.f32 %v11057_v55, %v16571_v61  ;;  %v7300_v13 = vpop.f32.mrb[21].mxu0  ;;  %16575 = vst [vmem:[#allocation41_spill] sm:$0xff] %v15183_v17  ;;  %v16584_v55 = vld [vmem:[#allocation56_spill] sm:$0xff] }
 0x3ca   : > { %16572 = vst [vmem:[#allocation38_spill] sm:$0xff] %v15176_v49  ;;  %v15179_v26 = vadd.f32 %v15030_v30, %v7435_v35  ;;  %v11280_v14 = vadd.f32 %v7300_v13, %v16574_v23  ;;  %v11058_v7 = vpop.f32.mrb[22].mxu0 }
 0x3cb   : > { %16570 = vst [vmem:[#allocation39_spill] sm:$0xff] %v15172_v60  ;;  %v7401_v47 = vmax.f32 %v11279_v19, 0.0  ;;  %v11281_v24 = vadd.f32 %v11058_v7, %v16576_v28  ;;  %v7303_v31 = vpop.f32.mrb[23].mxu0  ;;  %v15193_v58 = vpack.c.bf16 %v15172_v60, %v15183_v17 }
 0x3cc   : > { %16573 = vst [vmem:[#allocation40_spill] sm:$0xff] %v15179_v26  ;;  %v15188_v36 = vpack.c.bf16 %v15179_v26, %v15176_v49  ;;  %v7399_v10 = vmax.f32 %v11280_v14, 0.0  ;;  %v11282_v46 = vadd.f32 %v7303_v31, %v16577_v62  ;;  %v16585_v14 = vld [vmem:[#allocation57_spill] sm:$0xff] }
 0x3cd   : > { %v7402_v33 = vmax.f32 %v11281_v24, 0.0  ;;  %v7440_v3 = vmul.f32 %v15021_v39, %v7401_v47 }
 0x3ce   : > { %v7438_v20 = vmul.f32 %v15021_v39, %v7399_v10  ;;  %v7400_v21 = vmax.f32 %v11282_v46, 0.0  ;;  %11091 = vmatprep.mubr.msk.bf16.mxu1 %vm7537_vm2, %v15188_v36 }
 0x3cf   : > { %v7441_v59 = vmul.f32 %v15021_v39, %v7402_v33  ;;  %11092 = vmatmul.mubr.msk.bf16.gmra.mrb[48].mxu1 %vm7537_vm2, %v15193_v58  ;;  %v15215_v18 = vadd.f32 %v15030_v30, %v7440_v3 }
 0x3d0   : > { %v7439_v57 = vmul.f32 %v15021_v39, %v7400_v21  ;;  %v11061_v56 = vpop.f32.mrb[24].mxu0  ;;  %v15208_v38 = vadd.f32 %v15030_v30, %v7438_v20  ;;  %v16587_v21 = vld [vmem:[#allocation58_spill] sm:$0xff] }
 0x3d1   : > { %v15204_v5 = vadd.f32 %v15030_v30, %v7441_v59  ;;  %v11283_v45 = vadd.f32 %v11061_v56, %v16579_v27  ;;  %v7316_v48 = vpop.f32.mrb[25].mxu0  ;;  %16583 = vst [vmem:[#allocation45_spill] sm:$0xff] %v15215_v18  ;;  %v16590_v27 = vld [vmem:[#allocation59_spill] sm:$0xff] }
 0x3d2   : > { %16580 = vst [vmem:[#allocation44_spill] sm:$0xff] %v15208_v38  ;;  %v15211_v63 = vadd.f32 %v15030_v30, %v7439_v57  ;;  %v11284_v2 = vadd.f32 %v7316_v48, %v16582_v53  ;;  %v11062_v51 = vpop.f32.mrb[26].mxu0 }
 0x3d3   : > { %16578 = vst [vmem:[#allocation42_spill] sm:$0xff] %v15204_v5  ;;  %v7405_v35 = vmax.f32 %v11283_v45, 0.0  ;;  %v11285_v61 = vadd.f32 %v11062_v51, %v16584_v55  ;;  %v7319_v19 = vpop.f32.mrb[27].mxu0  ;;  %v7500_v47 = vpack.c.bf16 %v15204_v5, %v15215_v18  ;;  %v16592_v51 = vld [vmem:[#allocation60_spill] sm:$0xff] }
 0x3d4   : > { %16581 = vst [vmem:[#allocation43_spill] sm:$0xff] %v15211_v63  ;;  %v7499_v13 = vpack.c.bf16 %v15211_v63, %v15208_v38  ;;  %v7403_v23 = vmax.f32 %v11284_v2, 0.0  ;;  %v11286_v7 = vadd.f32 %v7319_v19, %v16585_v14 }
 0x3d5   : > { %v7406_v28 = vmax.f32 %v11285_v61, 0.0  ;;  %v7444_v10 = vmul.f32 %v15021_v39, %v7405_v35 }
 0x3d6   : > { %v7442_v24 = vmul.f32 %v15021_v39, %v7403_v23  ;;  %v7404_v31 = vmax.f32 %v11286_v7, 0.0  ;;  %11095 = vmatprep.mubr.msk.bf16.mxu1 %vm7537_vm2, %v7499_v13  ;;  %v16593_v23 = vld [vmem:[#allocation61_spill] sm:$0xff] }
 0x3d7   : > { %v7445_v62 = vmul.f32 %v15021_v39, %v7406_v28  ;;  %11096 = vmatmul.mubr.msk.bf16.gmra.mrb[52].mxu1 %vm7537_vm2, %v7500_v47  ;;  %v15241_v53 = vadd.f32 %v15030_v30, %v7444_v10 }
 0x3d8   : > { %v7443_v46 = vmul.f32 %v15021_v39, %v7404_v31  ;;  %v11065_v33 = vpop.f32.mrb[28].mxu0  ;;  %v15234_v57 = vadd.f32 %v15030_v30, %v7442_v24 }
 0x3d9   : > { %v15230_v20 = vadd.f32 %v15030_v30, %v7445_v62  ;;  %v11287_v3 = vadd.f32 %v11065_v33, %v16587_v21  ;;  %v7332_v59 = vpop.f32.mrb[29].mxu0  ;;  %16591 = vst [vmem:[#allocation6_spill] sm:$0xff] %v15241_v53 }
 0x3da   : > { %16588 = vst [vmem:[#allocation62_spill] sm:$0xff] %v15234_v57  ;;  %v15237_v56 = vadd.f32 %v15030_v30, %v7443_v46  ;;  %v11288_v45 = vadd.f32 %v7332_v59, %v16590_v27  ;;  %v11066_v48 = vpop.f32.mrb[30].mxu0 }
 0x3db   : > { %16586 = vst [vmem:[#allocation46_spill] sm:$0xff] %v15230_v20  ;;  %v7409_v2 = vmax.f32 %v11287_v3, 0.0  ;;  %v11289_v35 = vadd.f32 %v11066_v48, %v16592_v51  ;;  %v7335_v55 = vpop.f32.mrb[31].mxu0  ;;  %v7502_v7 = vpack.c.bf16 %v15230_v20, %v15241_v53 }
 0x3dc   : > { %16589 = vst [vmem:[#allocation5_spill] sm:$0xff] %v15237_v56  ;;  %v7501_v61 = vpack.c.bf16 %v15237_v56, %v15234_v57  ;;  %v7407_v19 = vmax.f32 %v11288_v45, 0.0  ;;  %v11290_v14 = vadd.f32 %v7335_v55, %v16593_v23 }
 0x3dd   : > { %v7410_v28 = vmax.f32 %v11289_v35, 0.0  ;;  %v7448_v10 = vmul.f32 %v15021_v39, %v7409_v2 }
 0x3de   : > { %v7446_v24 = vmul.f32 %v15021_v39, %v7407_v19  ;;  %v7408_v31 = vmax.f32 %v11290_v14, 0.0  ;;  %11099 = vmatprep.mubr.msk.bf16.mxu1 %vm7537_vm2, %v7501_v61 }
 0x3df   : > { %v7449_v62 = vmul.f32 %v15021_v39, %v7410_v28  ;;  %11100 = vmatmul.mubr.msk.bf16.gmra.mrb[56].mxu1 %vm7537_vm2, %v7502_v7  ;;  %v15265_v59 = vadd.f32 %v15030_v30, %v7448_v10 }
 0x3e0   : > { %v7447_v46 = vmul.f32 %v15021_v39, %v7408_v31  ;;  %v15259_v21 = vadd.f32 %v15030_v30, %v7446_v24 }
 0x3e1   : > { %v15256_v33 = vadd.f32 %v15030_v30, %v7449_v62  ;;  %16597 = vst [vmem:[#allocation10_spill] sm:$0xff] %v15265_v59 }
 0x3e2   : > { %16595 = vst [vmem:[#allocation8_spill] sm:$0xff] %v15259_v21  ;;  %v15262_v3 = vadd.f32 %v15030_v30, %v7447_v46 }
 0x3e3   : > { %16594 = vst [vmem:[#allocation7_spill] sm:$0xff] %v15256_v33  ;;  %v7504_v45 = vpack.c.bf16 %v15256_v33, %v15265_v59 }
 0x3e4   : > { %16596 = vst [vmem:[#allocation9_spill] sm:$0xff] %v15262_v3  ;;  %v7503_v27 = vpack.c.bf16 %v15262_v3, %v15259_v21 }
 0x3e6   : > { %11103 = vmatprep.mubr.msk.bf16.mxu1 %vm7537_vm2, %v7503_v27 }
 0x3e7   : > { %11104 = vmatmul.mubr.msk.bf16.gmra.mrb[60].mxu1 %vm7537_vm2, %v7504_v45 }
 0x3e8   : > { %11115 = vmatprep.mubr.msk.bf16.mxu1 %vm7537_vm2, %v15051_v25 }
 0x3ef   : > { %11116 = vmatmul.mubr.msk.bf16.vlgmr.msra.gmra.mrb[64].mxu1 %vm7537_vm2, %v15056_v32 }
 0x3f0   : > { %11119 = vmatprep.mubr.msk.bf16.mxu1 %vm7537_vm2, %v15089_v44 }
 0x3f7   : > { %11120 = vmatmul.mubr.msk.bf16.gmra.mrb[68].mxu1 %vm7537_vm2, %v15094_v12 }
 0x3f8   : > { %11123 = vmatprep.mubr.msk.bf16.mxu1 %vm7537_vm2, %v15124_v0 }
 0x3ff   : > { %11124 = vmatmul.mubr.msk.bf16.gmra.mrb[72].mxu1 %vm7537_vm2, %v15129_v43 }
 0x400   : > { %11127 = vmatprep.mubr.msk.bf16.mxu1 %vm7537_vm2, %v15156_v40 }
 0x407   : > { %11128 = vmatmul.mubr.msk.bf16.gmra.mrb[76].mxu1 %vm7537_vm2, %v15161_v34 }
 0x408   : > { %11131 = vmatprep.mubr.msk.bf16.mxu1 %vm7537_vm2, %v15188_v36 }
 0x40f   : > { %11132 = vmatmul.mubr.msk.bf16.gmra.mrb[80].mxu1 %vm7537_vm2, %v15193_v58 }
 0x410   : > { %11135 = vmatprep.mubr.msk.bf16.mxu1 %vm7537_vm2, %v7499_v13 }
 0x417   : > { %11136 = vmatmul.mubr.msk.bf16.gmra.mrb[84].mxu1 %vm7537_vm2, %v7500_v47 }
 0x418   : > { %11139 = vmatprep.mubr.msk.bf16.mxu1 %vm7537_vm2, %v7501_v61 }
 0x41f   : > { %11140 = vmatmul.mubr.msk.bf16.gmra.mrb[88].mxu1 %vm7537_vm2, %v7502_v7 }
 0x420   : > { %11143 = vmatprep.mubr.msk.bf16.mxu1 %vm7537_vm2, %v7503_v27 }
 0x427   : > { %11144 = vmatmul.mubr.msk.bf16.gmra.mrb[92].mxu1 %vm7537_vm2, %v7504_v45 }
 0x482   : > { %v15299_v39 = vpop.f32.mrb[32].mxu1 }
 0x483   : > { %v7620_v30 = vpop.f32.mrb[33].mxu1 }
 0x484   : > { %7972 = vrot.lane.b32.xlu0 %v7620_v30, %s11878_s19  ;;  %v11078_v25 = vpop.f32.mrb[34].mxu1 }
 0x485   : > { %v11156_v32 = vpack.c.bf16 %v11078_v25, %v15299_v39  ;;  %v7623_v44 = vpop.f32.mrb[35].mxu1 }
 0x486   : > { %v11150_v12 = vpack.c.bf16 %v7623_v44, %v7620_v30  ;;  %7974 = vrot.lane.b32.xlu1 %v7623_v44, %s11878_s19 }
 0x488   : > { %7976 = vrot.lane.b32.xlu0 %v15299_v39, %s11878_s19 }
 0x48a   : > { %7978 = vrot.lane.b32.xlu1 %v11078_v25, %s11878_s19  ;;  %v15307_v0 = vpop.f32.mrb[36].mxu1 }
 0x48b   : > { %v15309_v43 = vpop.f32.mrb[37].mxu1 }
 0x48c   : > { %7980 = vrot.lane.b32.xlu0 %v15309_v43, %s11878_s19  ;;  %v15313_v40 = vpop.f32.mrb[38].mxu1 }
 0x48d   : > { %v11168_v34 = vpack.c.bf16 %v15313_v40, %v15307_v0  ;;  %v7639_v36 = vpop.f32.mrb[39].mxu1 }
 0x48e   : > { %v11162_v58 = vpack.c.bf16 %v7639_v36, %v15309_v43  ;;  %7982 = vrot.lane.b32.xlu1 %v7639_v36, %s11878_s19 }
 0x490   : > { %7984 = vrot.lane.b32.xlu0 %v15307_v0, %s11878_s19 }
 0x492   : > { %7986 = vrot.lane.b32.xlu1 %v15313_v40, %s11878_s19  ;;  %v15323_v13 = vpop.f32.mrb[40].mxu1 }
 0x493   : > { %v15325_v47 = vpop.f32.mrb[41].mxu1 }
 0x494   : > { %7988 = vrot.lane.b32.xlu0 %v15325_v47, %s11878_s19  ;;  %v15329_v48 = vpop.f32.mrb[42].mxu1 }
 0x495   : > { %v11180_v2 = vpack.c.bf16 %v15329_v48, %v15323_v13  ;;  %v15333_v51 = vpop.f32.mrb[43].mxu1 }
 0x496   : > { %v11174_v35 = vpack.c.bf16 %v15333_v51, %v15325_v47  ;;  %7990 = vrot.lane.b32.xlu1 %v15333_v51, %s11878_s19 }
 0x498   : > { %7992 = vrot.lane.b32.xlu0 %v15323_v13, %s11878_s19 }
 0x49a   : > { %7994 = vrot.lane.b32.xlu1 %v15329_v48, %s11878_s19  ;;  %v15343_v55 = vpop.f32.mrb[44].mxu1 }
 0x49b   : > { %v15345_v61 = vpop.f32.mrb[45].mxu1 }
 0x49c   : > { %7996 = vrot.lane.b32.xlu0 %v15345_v61, %s11878_s19  ;;  %v15349_v19 = vpop.f32.mrb[46].mxu1 }
 0x49d   : > { %v11192_v23 = vpack.c.bf16 %v15349_v19, %v15343_v55  ;;  %v15353_v14 = vpop.f32.mrb[47].mxu1 }
 0x49e   : > { %v11186_v7 = vpack.c.bf16 %v15353_v14, %v15345_v61  ;;  %7998 = vrot.lane.b32.xlu1 %v15353_v14, %s11878_s19 }
 0x4a0   : > { %8000 = vrot.lane.b32.xlu0 %v15343_v55, %s11878_s19 }
 0x4a2   : > { %8002 = vrot.lane.b32.xlu1 %v15349_v19, %s11878_s19  ;;  %v11093_v28 = vpop.f32.mrb[48].mxu1 }
 0x4a3   : > { %v7684_v24 = vpop.f32.mrb[49].mxu1 }
 0x4a4   : > { %8004 = vrot.lane.b32.xlu0 %v7684_v24, %s11878_s19  ;;  %v11094_v31 = vpop.f32.mrb[50].mxu1 }
 0x4a5   : > { %v11153_v10 = vpack.c.bf16 %v11094_v31, %v11093_v28  ;;  %v7687_v62 = vpop.f32.mrb[51].mxu1 }
 0x4a6   : > { %v11147_v27 = vpack.c.bf16 %v7687_v62, %v7684_v24  ;;  %8006 = vrot.lane.b32.xlu1 %v7687_v62, %s11878_s19 }
 0x4a8   : > { %8008 = vrot.lane.b32.xlu0 %v11093_v28, %s11878_s19  ;;  %11149 = vmatprep.subr.msk.bf16.mxu1 %vm15366_vm6, %v11147_v27 }
 0x4a9   : > { %11152 = vmatpush3.bf16.xpose.msk.msra.mxu1 %vm15366_vm6, %v11150_v12 }
 0x4aa   : > { %8010 = vrot.lane.b32.xlu1 %v11094_v31, %s11878_s19  ;;  %v11097_v45 = vpop.f32.mrb[52].mxu1  ;;  %11155 = vmatprep.subr.msk.bf16.mxu1 %vm15366_vm6, %v11153_v10 }
 0x4ab   : > { %v7700_v39 = vpop.f32.mrb[53].mxu1 }
 0x4ac   : > { %8012 = vrot.lane.b32.xlu0 %v7700_v39, %s11878_s19  ;;  %v11098_v30 = vpop.f32.mrb[54].mxu1 }
 0x4ad   : > { %v11165_v25 = vpack.c.bf16 %v11098_v30, %v11097_v45  ;;  %v7703_v44 = vpop.f32.mrb[55].mxu1 }
 0x4ae   : > { %v11159_v43 = vpack.c.bf16 %v7703_v44, %v7700_v39  ;;  %8014 = vrot.lane.b32.xlu1 %v7703_v44, %s11878_s19 }
 0x4b0   : > { %8016 = vrot.lane.b32.xlu0 %v11097_v45, %s11878_s19 }
 0x4b1   : > { %11158 = vmatpush3.bf16.xpose.msk.msra.mxu1 %vm15366_vm6, %v11156_v32 }
 0x4b2   : > { %8018 = vrot.lane.b32.xlu1 %v11098_v30, %s11878_s19  ;;  %v11101_v12 = vpop.f32.mrb[56].mxu1  ;;  %11161 = vmatprep.subr.msk.bf16.mxu1 %vm15366_vm6, %v11159_v43 }
 0x4b3   : > { %v7716_v36 = vpop.f32.mrb[57].mxu1 }
 0x4b4   : > { %8020 = vrot.lane.b32.xlu0 %v7716_v36, %s11878_s19  ;;  %v11102_v28 = vpop.f32.mrb[58].mxu1 }
 0x4b5   : > { %v11177_v24 = vpack.c.bf16 %v11102_v28, %v11101_v12  ;;  %v7719_v31 = vpop.f32.mrb[59].mxu1 }
 0x4b6   : > { %v11171_v10 = vpack.c.bf16 %v7719_v31, %v7716_v36  ;;  %8022 = vrot.lane.b32.xlu1 %v7719_v31, %s11878_s19 }
 0x4b8   : > { %8024 = vrot.lane.b32.xlu0 %v11101_v12, %s11878_s19 }
 0x4b9   : > { %11164 = vmatpush3.bf16.xpose.msk.msra.mxu1 %vm15366_vm6, %v11162_v58 }
 0x4ba   : > { %8026 = vrot.lane.b32.xlu1 %v11102_v28, %s11878_s19  ;;  %v11105_v32 = vpop.f32.mrb[60].mxu1  ;;  %11167 = vmatprep.subr.msk.bf16.mxu1 %vm15366_vm6, %v11165_v25 }
 0x4bb   : > { %v7732_v62 = vpop.f32.mrb[61].mxu1 }
 0x4bc   : > { %8028 = vrot.lane.b32.xlu0 %v7732_v62, %s11878_s19  ;;  %v11106_v27 = vpop.f32.mrb[62].mxu1 }
 0x4bd   : > { %v11189_v45 = vpack.c.bf16 %v11106_v27, %v11105_v32  ;;  %v7735_v39 = vpop.f32.mrb[63].mxu1 }
 0x4be   : > { %v11183_v30 = vpack.c.bf16 %v7735_v39, %v7732_v62  ;;  %8030 = vrot.lane.b32.xlu1 %v7735_v39, %s11878_s19 }
 0x4c0   : > { %8032 = vrot.lane.b32.xlu0 %v11105_v32, %s11878_s19 }
 0x4c1   : > { %11170 = vmatpush3.bf16.xpose.msk.msra.mxu1 %vm15366_vm6, %v11168_v34 }
 0x4c2   : > { %11173 = vmatprep.subr.msk.bf16.mxu1 %vm15366_vm6, %v11171_v10  ;;  %8034 = vrot.lane.b32.xlu1 %v11106_v27, %s11878_s19  ;;  %v15406_v58 = vpop.f32.mrb[64].mxu1 }
 0x4c3   : > { %v7813_v25 = vpop.f32.mrb[65].mxu1 }
 0x4c4   : > { %v11118_v44 = vpop.f32.mrb[66].mxu1 }
 0x4c5   : > { %v11199_v43 = vpack.c.bf16 %v11118_v44, %v15406_v58  ;;  %v7816_v12 = vpop.f32.mrb[67].mxu1 }
 0x4c6   : > { %v11196_v36 = vpack.c.bf16 %v7816_v12, %v7813_v25 }
 0x4c9   : > { %11176 = vmatpush3.bf16.xpose.msk.msra.mxu1 %vm15366_vm6, %v11174_v35 }
 0x4ca   : > { %v15414_v0 = vpop.f32.mrb[68].mxu1  ;;  %11179 = vmatprep.subr.msk.bf16.mxu1 %vm15366_vm6, %v11177_v24 }
 0x4cb   : > { %v7829_v40 = vpop.f32.mrb[69].mxu1 }
 0x4cc   : > { %v15418_v34 = vpop.f32.mrb[70].mxu1 }
 0x4cd   : > { %v7832_v31 = vpop.f32.mrb[71].mxu1 }
 0x4ce   : > { %v11202_v10 = vpack.c.bf16 %v7832_v31, %v7829_v40 }
 0x4d1   : > { %11182 = vmatpush3.bf16.xpose.msk.msra.mxu1 %vm15366_vm6, %v11180_v2 }
 0x4d2   : > { %v15427_v47 = vpop.f32.mrb[72].mxu1  ;;  %11185 = vmatprep.subr.msk.bf16.mxu1 %vm15366_vm6, %v11183_v30 }
 0x4d3   : > { %v15431_v51 = vpop.f32.mrb[73].mxu1 }
 0x4d4   : > { %v15433_v35 = vpop.f32.mrb[74].mxu1 }
 0x4d5   : > { %v7848_v32 = vpop.f32.mrb[75].mxu1 }
 0x4d6   : > { %v11208_v62 = vpack.c.bf16 %v7848_v32, %v15431_v51 }
 0x4d9   : > { %11188 = vmatpush3.bf16.xpose.msk.msra.mxu1 %vm15366_vm6, %v11186_v7  ;;  %v11879_v7 = vmov 0.0|0.0  }
 0x4da   : > { %v15443_v13 = vpop.f32.mrb[76].mxu1  ;;  %11191 = vmatprep.subr.msk.bf16.mxu1 %vm15366_vm6, %v11189_v45 }
 0x4db   : > { %v15447_v48 = vpop.f32.mrb[77].mxu1 }
 0x4dc   : > { %v15449_v2 = vpop.f32.mrb[78].mxu1 }
 0x4dd   : > { %v15453_v39 = vpop.f32.mrb[79].mxu1 }
 0x4de   : > { %v11214_v61 = vpack.c.bf16 %v15453_v39, %v15447_v48 }
 0x4e1   : > { %11194 = vmatpush3.bf16.xpose.msk.msra.mxu1 %vm15366_vm6, %v11192_v23 }
 0x4e2   : > { %v15462_v14 = vpop.f32.mrb[80].mxu1  ;;  %11195 = vmatprep.subr.bf16.mxu1 %v11879_v7 }
 0x4e3   : > { %v15465_v45 = vpop.f32.mrb[81].mxu1 }
 0x4e4   : > { %v15467_v30 = vpop.f32.mrb[82].mxu1 }
 0x4e5   : > { %v15471_v25 = vpop.f32.mrb[83].mxu1 }
 0x4ea   : > { %v15475_v19 = vpop.f32.mrb[84].mxu1 }
 0x4eb   : > { %v15477_v23 = vpop.f32.mrb[85].mxu1 }
 0x4ec   : > { %v15479_v46 = vpop.f32.mrb[86].mxu1 }
 0x4ed   : > { %v15483_v12 = vpop.f32.mrb[87].mxu1 }
 0x4f2   : > { %v15487_v31 = vpop.f32.mrb[88].mxu1 }
 0x4f3   : > { %v15489_v51 = vpop.f32.mrb[89].mxu1 }
 0x4f4   : > { %v15491_v32 = vpop.f32.mrb[90].mxu1 }
 0x4f5   : > { %v15495_v39 = vpop.f32.mrb[91].mxu1 }
 0x4f6   : > { %v7973_v44 = vpop.permute.xlu0 %7972 }
 0x4f7   : > { %10571 = vmatprep.mubr.msk.f32.mxu1 %vm8036_vm5, %v7973_v44 }
 0x4f8   : > { %v7975_v55 = vpop.permute.xlu1 %7974  ;;  %10572 = vmatmul.mubr.msk.f32.vlgmr.msra.gmra.mrb[96].mxu1 %vm8036_vm5, %v7973_v44 }
 0x4f9   : > { %11197 = vmatpush1.bf16.msra.mxu1 %v11196_v36  ;;  %10573 = vmatprep.mubr.msk.f32.mxu1 %vm8036_vm5, %v7975_v55 }
 0x4fa   : > { %v15502_v40 = vpop.f32.mrb[92].mxu1  ;;  %11198 = vmatprep.subr.bf16.mxu1 %v11879_v7  ;;  %v7977_v48 = vpop.permute.xlu0 %7976 }
 0x4fb   : > { %v15505_v27 = vpop.f32.mrb[93].mxu1 }
 0x4fc   : > { %v15507_v24 = vpop.f32.mrb[94].mxu1  ;;  %10574 = vmatmul.mubr.msk.f32.gmra.mrb[98].mxu1 %vm8036_vm5, %v7975_v55  ;;  %v7979_v44 = vpop.permute.xlu1 %7978 }
 0x4fd   : > { %11200 = vmatpush1.bf16.msra.mxu1 %v11199_v43  ;;  %v15512_v28 = vpop.f32.mrb[95].mxu1  ;;  %10575 = vmatprep.mubr.msk.f32.mxu1 %vm8036_vm5, %v7977_v48  ;;  %v16600_v43 = vpack.c.bf16 %v15418_v34, %v15414_v0 }
 0x4fe   : > { %v11238_v36 = vpack.c.bf16 %v15512_v28, %v15505_v27  ;;  %11201 = vmatprep.subr.bf16.mxu1 %v11879_v7  ;;  %v7981_v55 = vpop.permute.xlu0 %7980 }
 0x500   : > { %10576 = vmatmul.mubr.msk.f32.gmra.mrb[100].mxu1 %vm8036_vm5, %v7977_v48  ;;  %v7983_v58 = vpop.permute.xlu1 %7982  ;;  %v16601_v48 = vpack.c.bf16 %v15433_v35, %v15427_v47  ;;  %v16603_v35 = vpack.c.bf16 %v15471_v25, %v15465_v45  ;;  %v16605_v45 = vpack.c.bf16 %v15483_v12, %v15477_v23  ;;  %v16607_v25 = vpack.c.bf16 %v15495_v39, %v15489_v51 }
 0x501   : > { %11203 = vmatpush1.bf16.msra.mxu1 %v11202_v10  ;;  %10577 = vmatprep.mubr.msk.f32.mxu1 %vm8036_vm5, %v7979_v44 }
 0x502   : > { %11204 = vmatprep.subr.bf16.mxu1 %v11879_v7  ;;  %v7985_v10 = vpop.permute.xlu0 %7984 }
 0x504   : > { %10578 = vmatmul.mubr.msk.f32.gmra.mrb[102].mxu1 %vm8036_vm5, %v7979_v44  ;;  %v7987_v0 = vpop.permute.xlu1 %7986 }
 0x505   : > { %11206 = vmatpush1.bf16.msra.mxu1 %v16600_v43  ;;  %10579 = vmatprep.mubr.msk.f32.mxu1 %vm8036_vm5, %v7981_v55 }
 0x506   : > { %11207 = vmatprep.subr.bf16.mxu1 %v11879_v7  ;;  %v7989_v34 = vpop.permute.xlu0 %7988 }
 0x508   : > { %10580 = vmatmul.mubr.msk.f32.gmra.mrb[104].mxu1 %vm8036_vm5, %v7981_v55  ;;  %v7991_v47 = vpop.permute.xlu1 %7990 }
 0x509   : > { %11209 = vmatpush1.bf16.msra.mxu1 %v11208_v62  ;;  %10581 = vmatprep.mubr.msk.f32.mxu1 %vm8036_vm5, %v7983_v58  ;;  %v16602_v62 = vpack.c.bf16 %v15449_v2, %v15443_v13  ;;  %v16604_v13 = vpack.c.bf16 %v15467_v30, %v15462_v14  ;;  %v16606_v14 = vpack.c.bf16 %v15479_v46, %v15475_v19 }
 0x50a   : > { %11210 = vmatprep.subr.bf16.mxu1 %v11879_v7  ;;  %v16608_v19 = vpack.c.bf16 %v15491_v32, %v15487_v31  ;;  %v16609_v31 = vpack.c.bf16 %v15507_v24, %v15502_v40 }
 0x50c   : > { %10582 = vmatmul.mubr.msk.f32.gmra.mrb[106].mxu1 %vm8036_vm5, %v7983_v58  ;;  %v7995_v2 = vpop.permute.xlu1 %7994 }
 0x50d   : > { %11212 = vmatpush1.bf16.msra.mxu1 %v16601_v48  ;;  %10583 = vmatprep.mubr.msk.f32.mxu1 %vm8036_vm5, %v7985_v10 }
 0x50e   : > { %11213 = vmatprep.subr.bf16.mxu1 %v11879_v7 }
 0x510   : > { %10584 = vmatmul.mubr.msk.f32.gmra.mrb[108].mxu1 %vm8036_vm5, %v7985_v10  ;;  %v7999_v30 = vpop.permute.xlu1 %7998 }
 0x511   : > { %11215 = vmatpush1.bf16.msra.mxu1 %v11214_v61  ;;  %10585 = vmatprep.mubr.msk.f32.mxu1 %vm8036_vm5, %v7987_v0  ;;  %v7993_v61 = vpop.permute.xlu0 %7992 }
 0x512   : > { %11216 = vmatprep.subr.bf16.mxu1 %v11879_v7 }
 0x514   : > { %10586 = vmatmul.mubr.msk.f32.gmra.mrb[110].mxu1 %vm8036_vm5, %v7987_v0  ;;  %v8003_v46 = vpop.permute.xlu1 %8002 }
 0x515   : > { %11218 = vmatpush1.bf16.msra.mxu1 %v16602_v62  ;;  %10587 = vmatprep.mubr.msk.f32.mxu1 %vm8036_vm5, %v7989_v34  ;;  %v7997_v58 = vpop.permute.xlu0 %7996 }
 0x516   : > { %11219 = vmatprep.subr.bf16.mxu1 %v11879_v7 }
 0x518   : > { %10588 = vmatmul.mubr.msk.f32.gmra.mrb[112].mxu1 %vm8036_vm5, %v7989_v34  ;;  %v8007_v51 = vpop.permute.xlu1 %8006 }
 0x519   : > { %11221 = vmatpush1.bf16.msra.mxu1 %v16603_v35  ;;  %10589 = vmatprep.mubr.msk.f32.mxu1 %vm8036_vm5, %v7991_v47  ;;  %v8001_v23 = vpop.permute.xlu0 %8000 }
 0x51a   : > { %11222 = vmatprep.subr.bf16.mxu1 %v11879_v7 }
 0x51c   : > { %10590 = vmatmul.mubr.msk.f32.gmra.mrb[114].mxu1 %vm8036_vm5, %v7991_v47  ;;  %v8011_v27 = vpop.permute.xlu1 %8010 }
 0x51d   : > { %11224 = vmatpush1.bf16.msra.mxu1 %v16604_v13  ;;  %10591 = vmatprep.mubr.msk.f32.mxu1 %vm8036_vm5, %v7993_v61  ;;  %v8005_v12 = vpop.permute.xlu0 %8004 }
 0x51e   : > { %11225 = vmatprep.subr.bf16.mxu1 %v11879_v7 }
 0x520   : > { %10592 = vmatmul.mubr.msk.f32.gmra.mrb[116].mxu1 %vm8036_vm5, %v7993_v61  ;;  %v8015_v24 = vpop.permute.xlu1 %8014 }
 0x521   : > { %11227 = vmatpush1.bf16.msra.mxu1 %v16605_v45  ;;  %10593 = vmatprep.mubr.msk.f32.mxu1 %vm8036_vm5, %v7995_v2  ;;  %v8009_v28 = vpop.permute.xlu0 %8008 }
 0x522   : > { %11228 = vmatprep.subr.bf16.mxu1 %v11879_v7 }
 0x524   : > { %10594 = vmatmul.mubr.msk.f32.gmra.mrb[118].mxu1 %vm8036_vm5, %v7995_v2  ;;  %v8019_v32 = vpop.permute.xlu1 %8018 }
 0x525   : > { %11230 = vmatpush1.bf16.msra.mxu1 %v16606_v14  ;;  %10595 = vmatprep.mubr.msk.f32.mxu1 %vm8036_vm5, %v7997_v58 }
 0x526   : > { %11231 = vmatprep.subr.bf16.mxu1 %v11879_v7 }
 0x528   : > { %10596 = vmatmul.mubr.msk.f32.gmra.mrb[120].mxu1 %vm8036_vm5, %v7997_v58 }
 0x529   : > { %11233 = vmatpush1.bf16.msra.mxu1 %v16607_v25  ;;  %10597 = vmatprep.mubr.msk.f32.mxu1 %vm8036_vm5, %v7999_v30 }
 0x52a   : > { %11234 = vmatprep.subr.bf16.mxu1 %v11879_v7 }
 0x52c   : > { %10598 = vmatmul.mubr.msk.f32.gmra.mrb[122].mxu1 %vm8036_vm5, %v7999_v30 }
 0x52d   : > { %11236 = vmatpush1.bf16.msra.mxu1 %v16608_v19  ;;  %10599 = vmatprep.mubr.msk.f32.mxu1 %vm8036_vm5, %v8001_v23 }
 0x52e   : > { %11237 = vmatprep.subr.bf16.mxu1 %v11879_v7 }
 0x530   : > { %10600 = vmatmul.mubr.msk.f32.gmra.mrb[124].mxu1 %vm8036_vm5, %v8001_v23 }
 0x531   : > { %11239 = vmatpush1.bf16.msra.mxu1 %v11238_v36  ;;  %10601 = vmatprep.mubr.msk.f32.mxu1 %vm8036_vm5, %v8003_v46  ;;  %v8023_v36 = vpop.permute.xlu1 %8022 }
 0x532   : > { %11240 = vmatprep.subr.bf16.mxu1 %v11879_v7  ;;  %v8013_v7 = vpop.permute.xlu0 %8012 }
 0x534   : > { %10602 = vmatmul.mubr.msk.f32.gmra.mrb[126].mxu1 %vm8036_vm5, %v8003_v46 }
 0x535   : > { %11242 = vmatpush1.bf16.msra.mxu1 %v16609_v31  ;;  %10603 = vmatprep.mubr.msk.f32.mxu1 %vm8036_vm5, %v8005_v12  ;;  %v8027_v55 = vpop.permute.xlu1 %8026 }
 0x536   : > { %v8017_v40 = vpop.permute.xlu0 %8016 }
 0x538   : > { %10604 = vmatmul.mubr.msk.f32.gmra.mrb[128].mxu1 %vm8036_vm5, %v8005_v12 }
 0x539   : > { %10605 = vmatprep.mubr.msk.f32.mxu1 %vm8036_vm5, %v8007_v51  ;;  %v8031_v10 = vpop.permute.xlu1 %8030 }
 0x53a   : > { %v8021_v39 = vpop.permute.xlu0 %8020 }
 0x53c   : > { %10606 = vmatmul.mubr.msk.f32.gmra.mrb[130].mxu1 %vm8036_vm5, %v8007_v51 }
 0x53d   : > { %10607 = vmatprep.mubr.msk.f32.mxu1 %vm8036_vm5, %v8009_v28  ;;  %v8035_v0 = vpop.permute.xlu1 %8034 }
 0x53e   : > { %v8025_v44 = vpop.permute.xlu0 %8024 }
 0x540   : > { %10608 = vmatmul.mubr.msk.f32.gmra.mrb[132].mxu1 %vm8036_vm5, %v8009_v28 }
 0x541   : > { %10609 = vmatprep.mubr.msk.f32.mxu1 %vm8036_vm5, %v8011_v27 }
 0x542   : > { %v8029_v43 = vpop.permute.xlu0 %8028 }
 0x544   : > { %10610 = vmatmul.mubr.msk.f32.gmra.mrb[134].mxu1 %vm8036_vm5, %v8011_v27 }
 0x545   : > { %10611 = vmatprep.mubr.msk.f32.mxu1 %vm8036_vm5, %v8013_v7 }
 0x546   : > { %v8033_v48 = vpop.permute.xlu0 %8032 }
 0x548   : > { %10612 = vmatmul.mubr.msk.f32.gmra.mrb[136].mxu1 %vm8036_vm5, %v8013_v7 }
 0x549   : > { %10613 = vmatprep.mubr.msk.f32.mxu1 %vm8036_vm5, %v8015_v24 }
 0x54c   : > { %10614 = vmatmul.mubr.msk.f32.gmra.mrb[138].mxu1 %vm8036_vm5, %v8015_v24 }
 0x54d   : > { %10615 = vmatprep.mubr.msk.f32.mxu1 %vm8036_vm5, %v8017_v40 }
 0x550   : > { %10616 = vmatmul.mubr.msk.f32.gmra.mrb[140].mxu1 %vm8036_vm5, %v8017_v40 }
 0x551   : > { %10617 = vmatprep.mubr.msk.f32.mxu1 %vm8036_vm5, %v8019_v32 }
 0x554   : > { %10618 = vmatmul.mubr.msk.f32.gmra.mrb[142].mxu1 %vm8036_vm5, %v8019_v32 }
 0x555   : > { %10619 = vmatprep.mubr.msk.f32.mxu1 %vm8036_vm5, %v8021_v39 }
 0x558   : > { %10620 = vmatmul.mubr.msk.f32.gmra.mrb[144].mxu1 %vm8036_vm5, %v8021_v39 }
 0x559   : > { %10621 = vmatprep.mubr.msk.f32.mxu1 %vm8036_vm5, %v8023_v36 }
 0x55c   : > { %10622 = vmatmul.mubr.msk.f32.gmra.mrb[146].mxu1 %vm8036_vm5, %v8023_v36 }
 0x55d   : > { %10623 = vmatprep.mubr.msk.f32.mxu1 %vm8036_vm5, %v8025_v44 }
 0x560   : > { %10624 = vmatmul.mubr.msk.f32.gmra.mrb[148].mxu1 %vm8036_vm5, %v8025_v44 }
 0x561   : > { %10625 = vmatprep.mubr.msk.f32.mxu1 %vm8036_vm5, %v8027_v55 }
 0x564   : > { %10626 = vmatmul.mubr.msk.f32.gmra.mrb[150].mxu1 %vm8036_vm5, %v8027_v55 }
 0x565   : > { %10627 = vmatprep.mubr.msk.f32.mxu1 %vm8036_vm5, %v8029_v43 }
 0x568   : > { %10628 = vmatmul.mubr.msk.f32.gmra.mrb[152].mxu1 %vm8036_vm5, %v8029_v43 }
 0x569   : > { %10629 = vmatprep.mubr.msk.f32.mxu1 %vm8036_vm5, %v8031_v10 }
 0x56c   : > { %10630 = vmatmul.mubr.msk.f32.gmra.mrb[154].mxu1 %vm8036_vm5, %v8031_v10 }
 0x56d   : > { %10631 = vmatprep.mubr.msk.f32.mxu1 %vm8036_vm5, %v8033_v48 }
 0x570   : > { %10632 = vmatmul.mubr.msk.f32.gmra.mrb[156].mxu1 %vm8036_vm5, %v8033_v48 }
 0x571   : > { %10633 = vmatprep.mubr.msk.f32.mxu1 %vm8036_vm5, %v8035_v0 }
 0x574   : > { %10634 = vmatmul.mubr.msk.f32.gmra.mrb[158].mxu1 %vm8036_vm5, %v8035_v0 }
 0x5cb   : > { %v15623_v34 = vpop.f32.mrb[96].mxu1 }
 0x5cc   : > { %v15625_v62 = vpop.f32.mrb[97].mxu1 }
 0x5cd   : > { %v8422_v47 = vmax.f32 %v15623_v34, %v15625_v62 }
 0x5cf   : > { %8423 = vmax.xlane.f32.xlu0 %v8422_v47  ;;  %v15629_v35 = vpop.f32.mrb[98].mxu1 }
 0x5d0   : > { %v15631_v61 = vpop.f32.mrb[99].mxu1 }
 0x5d1   : > { %v8425_v13 = vmax.f32 %v15629_v35, %v15631_v61 }
 0x5d3   : > { %8426 = vmax.xlane.f32.xlu1 %v8425_v13  ;;  %v15635_v2 = vpop.f32.mrb[100].mxu1 }
 0x5d4   : > { %v15637_v45 = vpop.f32.mrb[101].mxu1 }
 0x5d5   : > { %v8428_v58 = vmax.f32 %v15635_v2, %v15637_v45 }
 0x5d7   : > { %8429 = vmax.xlane.f32.xlu0 %v8428_v58  ;;  %v15641_v14 = vpop.f32.mrb[102].mxu1 }
 0x5d8   : > { %v15643_v30 = vpop.f32.mrb[103].mxu1 }
 0x5d9   : > { %v8431_v25 = vmax.f32 %v15641_v14, %v15643_v30 }
 0x5db   : > { %8432 = vmax.xlane.f32.xlu0 %v8431_v25  ;;  %v15647_v23 = vpop.f32.mrb[104].mxu1 }
 0x5dc   : > { %v15649_v19 = vpop.f32.mrb[105].mxu1 }
 0x5dd   : > { %v8434_v46 = vmax.f32 %v15647_v23, %v15649_v19 }
 0x5df   : > { %8435 = vmax.xlane.f32.xlu1 %v8434_v46  ;;  %v15653_v12 = vpop.f32.mrb[106].mxu1 }
 0x5e0   : > { %v15655_v31 = vpop.f32.mrb[107].mxu1 }
 0x5e1   : > { %v8437_v51 = vmax.f32 %v15653_v12, %v15655_v31 }
 0x5e3   : > { %8438 = vmax.xlane.f32.xlu0 %v8437_v51  ;;  %v15659_v28 = vpop.f32.mrb[108].mxu1 }
 0x5e4   : > { %v15661_v27 = vpop.f32.mrb[109].mxu1 }
 0x5e5   : > { %v8440_v7 = vmax.f32 %v15659_v28, %v15661_v27 }
 0x5e7   : > { %8441 = vmax.xlane.f32.xlu1 %v8440_v7  ;;  %v15665_v24 = vpop.f32.mrb[110].mxu1 }
 0x5e8   : > { %v15667_v40 = vpop.f32.mrb[111].mxu1 }
 0x5e9   : > { %v8443_v32 = vmax.f32 %v15665_v24, %v15667_v40 }
 0x5eb   : > { %8444 = vmax.xlane.f32.xlu0 %v8443_v32  ;;  %v15671_v39 = vpop.f32.mrb[112].mxu1 }
 0x5ec   : > { %v15673_v36 = vpop.f32.mrb[113].mxu1 }
 0x5ed   : > { %v8446_v44 = vmax.f32 %v15671_v39, %v15673_v36 }
 0x5ef   : > { %8447 = vmax.xlane.f32.xlu1 %v8446_v44  ;;  %v15677_v55 = vpop.f32.mrb[114].mxu1 }
 0x5f0   : > { %v15679_v43 = vpop.f32.mrb[115].mxu1 }
 0x5f1   : > { %v8449_v10 = vmax.f32 %v15677_v55, %v15679_v43 }
 0x5f3   : > { %8450 = vmax.xlane.f32.xlu0 %v8449_v10  ;;  %v15683_v48 = vpop.f32.mrb[116].mxu1 }
 0x5f4   : > { %v15685_v0 = vpop.f32.mrb[117].mxu1 }
 0x5f5   : > { %v8452_v47 = vmax.f32 %v15683_v48, %v15685_v0 }
 0x5f7   : > { %8453 = vmax.xlane.f32.xlu1 %v8452_v47  ;;  %v15689_v13 = vpop.f32.mrb[118].mxu1 }
 0x5f8   : > { %v15691_v58 = vpop.f32.mrb[119].mxu1 }
 0x5f9   : > { %v8455_v25 = vmax.f32 %v15689_v13, %v15691_v58 }
 0x5fb   : > { %8456 = vmax.xlane.f32.xlu0 %v8455_v25  ;;  %v15695_v46 = vpop.f32.mrb[120].mxu1 }
 0x5fc   : > { %v15697_v51 = vpop.f32.mrb[121].mxu1 }
 0x5fd   : > { %v8458_v7 = vmax.f32 %v15695_v46, %v15697_v51 }
 0x5ff   : > { %8459 = vmax.xlane.f32.xlu1 %v8458_v7  ;;  %v15701_v32 = vpop.f32.mrb[122].mxu1 }
 0x600   : > { %v15703_v44 = vpop.f32.mrb[123].mxu1 }
 0x601   : > { %v8461_v10 = vmax.f32 %v15701_v32, %v15703_v44 }
 0x603   : > { %8462 = vmax.xlane.f32.xlu0 %v8461_v10  ;;  %v15707_v47 = vpop.f32.mrb[124].mxu1 }
 0x604   : > { %v15709_v33 = vpop.f32.mrb[125].mxu1 }
 0x605   : > { %v8464_v25 = vmax.f32 %v15707_v47, %v15709_v33 }
 0x607   : > { %8465 = vmax.xlane.f32.xlu1 %v8464_v25  ;;  %v15713_v59 = vpop.f32.mrb[126].mxu1 }
 0x608   : > { %v15715_v3 = vpop.f32.mrb[127].mxu1 }
 0x609   : > { %v8467_v7 = vmax.f32 %v15713_v59, %v15715_v3 }
 0x60b   : > { %8468 = vmax.xlane.f32.xlu0 %v8467_v7  ;;  %v15719_v21 = vpop.f32.mrb[128].mxu1 }
 0x60c   : > { %v15721_v20 = vpop.f32.mrb[129].mxu1 }
 0x60d   : > { %v8470_v10 = vmax.f32 %v15719_v21, %v15721_v20 }
 0x60f   : > { %8471 = vmax.xlane.f32.xlu1 %v8470_v10  ;;  %v15725_v53 = vpop.f32.mrb[130].mxu1 }
 0x610   : > { %v15727_v56 = vpop.f32.mrb[131].mxu1 }
 0x611   : > { %v8473_v25 = vmax.f32 %v15725_v53, %v15727_v56 }
 0x613   : > { %8474 = vmax.xlane.f32.xlu0 %v8473_v25  ;;  %v15731_v57 = vpop.f32.mrb[132].mxu1 }
 0x614   : > { %v15733_v5 = vpop.f32.mrb[133].mxu1 }
 0x615   : > { %v8476_v7 = vmax.f32 %v15731_v57, %v15733_v5 }
 0x617   : > { %8477 = vmax.xlane.f32.xlu1 %v8476_v7  ;;  %v15737_v18 = vpop.f32.mrb[134].mxu1 }
 0x618   : > { %v15739_v63 = vpop.f32.mrb[135].mxu1 }
 0x619   : > { %v8479_v10 = vmax.f32 %v15737_v18, %v15739_v63 }
 0x61b   : > { %8480 = vmax.xlane.f32.xlu0 %v8479_v10  ;;  %v15743_v38 = vpop.f32.mrb[136].mxu1 }
 0x61c   : > { %v15745_v60 = vpop.f32.mrb[137].mxu1 }
 0x61d   : > { %v8482_v25 = vmax.f32 %v15743_v38, %v15745_v60 }
 0x61f   : > { %8483 = vmax.xlane.f32.xlu1 %v8482_v25  ;;  %v15749_v17 = vpop.f32.mrb[138].mxu1 }
 0x620   : > { %v15751_v26 = vpop.f32.mrb[139].mxu1 }
 0x621   : > { %v8485_v7 = vmax.f32 %v15749_v17, %v15751_v26 }
 0x623   : > { %8486 = vmax.xlane.f32.xlu0 %v8485_v7  ;;  %v15755_v49 = vpop.f32.mrb[140].mxu1 }
 0x624   : > { %v15757_v6 = vpop.f32.mrb[141].mxu1 }
 0x625   : > { %v8488_v10 = vmax.f32 %v15755_v49, %v15757_v6 }
 0x627   : > { %8489 = vmax.xlane.f32.xlu1 %v8488_v10  ;;  %v15761_v41 = vpop.f32.mrb[142].mxu1 }
 0x628   : > { %v15763_v37 = vpop.f32.mrb[143].mxu1 }
 0x629   : > { %v8491_v25 = vmax.f32 %v15761_v41, %v15763_v37 }
 0x62b   : > { %8492 = vmax.xlane.f32.xlu1 %v8491_v25  ;;  %v15767_v50 = vpop.f32.mrb[144].mxu1 }
 0x62c   : > { %v15769_v16 = vpop.f32.mrb[145].mxu1 }
 0x62d   : > { %v8494_v7 = vmax.f32 %v15767_v50, %v15769_v16 }
 0x62f   : > { %8495 = vmax.xlane.f32.xlu1 %v8494_v7  ;;  %v15773_v4 = vpop.f32.mrb[146].mxu1 }
 0x630   : > { %16610 = vst [vmem:[#allocation11_spill] sm:$0xff] %v15773_v4  ;;  %v15775_v52 = vpop.f32.mrb[147].mxu1 }
 0x631   : > { %16611 = vst [vmem:[#allocation12_spill] sm:$0xff] %v15775_v52  ;;  %v8497_v10 = vmax.f32 %v15773_v4, %v15775_v52 }
 0x633   : > { %8498 = vmax.xlane.f32.xlu1 %v8497_v10  ;;  %v15779_v15 = vpop.f32.mrb[148].mxu1 }
 0x634   : > { %16612 = vst [vmem:[#allocation13_spill] sm:$0xff] %v15779_v15  ;;  %v15781_v29 = vpop.f32.mrb[149].mxu1 }
 0x635   : > { %16613 = vst [vmem:[#allocation16_spill] sm:$0xff] %v15781_v29  ;;  %v8500_v25 = vmax.f32 %v15779_v15, %v15781_v29 }
 0x637   : > { %8501 = vmax.xlane.f32.xlu1 %v8500_v25  ;;  %v15785_v9 = vpop.f32.mrb[150].mxu1 }
 0x638   : > { %16614 = vst [vmem:[#allocation17_spill] sm:$0xff] %v15785_v9  ;;  %v15787_v8 = vpop.f32.mrb[151].mxu1 }
 0x639   : > { %16615 = vst [vmem:[#allocation19_spill] sm:$0xff] %v15787_v8  ;;  %v8503_v7 = vmax.f32 %v15785_v9, %v15787_v8 }
 0x63b   : > { %8504 = vmax.xlane.f32.xlu1 %v8503_v7  ;;  %v15791_v11 = vpop.f32.mrb[152].mxu1 }
 0x63c   : > { %16616 = vst [vmem:[#allocation22_spill] sm:$0xff] %v15791_v11  ;;  %v15793_v22 = vpop.f32.mrb[153].mxu1 }
 0x63d   : > { %16617 = vst [vmem:[#allocation23_spill] sm:$0xff] %v15793_v22  ;;  %v8506_v10 = vmax.f32 %v15791_v11, %v15793_v22 }
 0x63f   : > { %8507 = vmax.xlane.f32.xlu1 %v8506_v10  ;;  %v15797_v42 = vpop.f32.mrb[154].mxu1 }
 0x640   : > { %16618 = vst [vmem:[#allocation24_spill] sm:$0xff] %v15797_v42  ;;  %v15799_v54 = vpop.f32.mrb[155].mxu1 }
 0x641   : > { %16619 = vst [vmem:[#allocation25_spill] sm:$0xff] %v15799_v54  ;;  %v8509_v25 = vmax.f32 %v15797_v42, %v15799_v54 }
 0x643   : > { %8510 = vmax.xlane.f32.xlu1 %v8509_v25  ;;  %v15803_v1 = vpop.f32.mrb[156].mxu1 }
 0x644   : > { %16620 = vst [vmem:[#allocation21_spill] sm:$0xff] %v15803_v1  ;;  %v15805_v8 = vpop.f32.mrb[157].mxu1 }
 0x645   : > { %16621 = vst [vmem:[#allocation47_spill] sm:$0xff] %v15805_v8  ;;  %v8512_v7 = vmax.f32 %v15803_v1, %v15805_v8 }
 0x647   : > { %8513 = vmax.xlane.f32.xlu1 %v8512_v7  ;;  %v15809_v9 = vpop.f32.mrb[158].mxu1 }
 0x648   : > { %v15811_v22 = vpop.f32.mrb[159].mxu1 }
 0x649   : > { %16622 = vst [vmem:[#allocation48_spill] sm:$0xff] %v15811_v22  ;;  %v8515_v10 = vmax.f32 %v15809_v9, %v15811_v22 }
 0x64b   : > { %8516 = vmax.xlane.f32.xlu1 %v8515_v10 }
 0x65c   : > { %v8424_v11 = vpop.xlane.xlu0 %8423 }
 0x65d   : > { %v8518_v54 = vsub.f32 %v15623_v34, %v8424_v11  ;;  %v8519_v25 = vsub.f32 %v15625_v62, %v8424_v11 }
 0x65f   : > { %v8582_v42 = vmul.f32 1.442695, %v8518_v54  ;;  %v8584_v29 = vmul.f32 1.442695, %v8519_v25 }
 0x660   : > { %v8427_v15 = vpop.xlane.xlu1 %8426 }
 0x661   : > { %11652 = vpow2.f32 %v8582_v42  ;;  %v8520_v8 = vsub.f32 %v15629_v35, %v8427_v15  ;;  %v8521_v7 = vsub.f32 %v15631_v61, %v8427_v15 }
 0x662   : > { %11654 = vpow2.f32 %v8584_v29 }
 0x663   : > { %v8586_v1 = vmul.f32 1.442695, %v8520_v8  ;;  %v8588_v52 = vmul.f32 1.442695, %v8521_v7 }
 0x664   : > { %v8430_v4 = vpop.xlane.xlu0 %8429 }
 0x665   : > { %11656 = vpow2.f32 %v8586_v1  ;;  %v8522_v10 = vsub.f32 %v15635_v2, %v8430_v4  ;;  %v8523_v22 = vsub.f32 %v15637_v45, %v8430_v4 }
 0x666   : > { %11658 = vpow2.f32 %v8588_v52 }
 0x667   : > { %v8590_v34 = vmul.f32 1.442695, %v8522_v10  ;;  %v8592_v11 = vmul.f32 1.442695, %v8523_v22 }
 0x668   : > { %v8433_v54 = vpop.xlane.xlu0 %8432 }
 0x669   : > { %11660 = vpow2.f32 %v8590_v34  ;;  %v8524_v42 = vsub.f32 %v15641_v14, %v8433_v54  ;;  %v8525_v62 = vsub.f32 %v15643_v30, %v8433_v54 }
 0x66a   : > { %11662 = vpow2.f32 %v8592_v11 }
 0x66b   : > { %v15823_v15 = vpop.eup %11652  ;;  %v8594_v29 = vmul.f32 1.442695, %v8524_v42  ;;  %v8596_v8 = vmul.f32 1.442695, %v8525_v62 }
 0x66c   : > { %v15825_v35 = vpop.eup %11654  ;;  %v8436_v1 = vpop.xlane.xlu1 %8435 }
 0x66d   : > { %11664 = vpow2.f32 %v8594_v29  ;;  %v8526_v4 = vsub.f32 %v15647_v23, %v8436_v1  ;;  %v8527_v52 = vsub.f32 %v15649_v19, %v8436_v1  ;;  %v8710_v22 = vadd.f32 %v15825_v35, %v15823_v15 }
 0x66e   : > { %11666 = vpow2.f32 %v8596_v8 }
 0x66f   : > { %v15831_v61 = vpop.eup %11656  ;;  %v8598_v2 = vmul.f32 1.442695, %v8526_v4  ;;  %v8600_v45 = vmul.f32 1.442695, %v8527_v52  ;;  %8711 = vadd.xlane.f32.xlu0 %v8710_v22 }
 0x670   : > { %v15833_v14 = vpop.eup %11658  ;;  %v8439_v30 = vpop.xlane.xlu0 %8438 }
 0x671   : > { %11668 = vpow2.f32 %v8598_v2  ;;  %v8528_v25 = vsub.f32 %v15653_v12, %v8439_v30  ;;  %v8529_v7 = vsub.f32 %v15655_v31, %v8439_v30  ;;  %v8713_v23 = vadd.f32 %v15833_v14, %v15831_v61 }
 0x672   : > { %11670 = vpow2.f32 %v8600_v45 }
 0x673   : > { %v15839_v19 = vpop.eup %11660  ;;  %v8602_v10 = vmul.f32 1.442695, %v8528_v25  ;;  %v8604_v34 = vmul.f32 1.442695, %v8529_v7  ;;  %8714 = vadd.xlane.f32.xlu0 %v8713_v23 }
 0x674   : > { %v15841_v11 = vpop.eup %11662  ;;  %v8442_v54 = vpop.xlane.xlu1 %8441 }
 0x675   : > { %11672 = vpow2.f32 %v8602_v10  ;;  %v8530_v42 = vsub.f32 %v15659_v28, %v8442_v54  ;;  %v8531_v62 = vsub.f32 %v15661_v27, %v8442_v54  ;;  %v8716_v12 = vadd.f32 %v15841_v11, %v15839_v19 }
 0x676   : > { %11674 = vpow2.f32 %v8604_v34 }
 0x677   : > { %v15847_v31 = vpop.eup %11664  ;;  %v8606_v29 = vmul.f32 1.442695, %v8530_v42  ;;  %v8608_v8 = vmul.f32 1.442695, %v8531_v62  ;;  %8717 = vadd.xlane.f32.xlu0 %v8716_v12 }
 0x678   : > { %v15849_v1 = vpop.eup %11666  ;;  %v8445_v4 = vpop.xlane.xlu0 %8444 }
 0x679   : > { %11676 = vpow2.f32 %v8606_v29  ;;  %v8532_v52 = vsub.f32 %v15665_v24, %v8445_v4  ;;  %v8533_v22 = vsub.f32 %v15667_v40, %v8445_v4  ;;  %v8719_v28 = vadd.f32 %v15849_v1, %v15847_v31 }
 0x67a   : > { %11678 = vpow2.f32 %v8608_v8 }
 0x67b   : > { %v15855_v27 = vpop.eup %11668  ;;  %v8610_v2 = vmul.f32 1.442695, %v8532_v52  ;;  %v8612_v45 = vmul.f32 1.442695, %v8533_v22  ;;  %8720 = vadd.xlane.f32.xlu0 %v8719_v28 }
 0x67c   : > { %v15857_v30 = vpop.eup %11670  ;;  %v8448_v25 = vpop.xlane.xlu1 %8447 }
 0x67d   : > { %11680 = vpow2.f32 %v8610_v2  ;;  %v8534_v7 = vsub.f32 %v15671_v39, %v8448_v25  ;;  %v8535_v23 = vsub.f32 %v15673_v36, %v8448_v25  ;;  %v8722_v24 = vadd.f32 %v15857_v30, %v15855_v27 }
 0x67e   : > { %11682 = vpow2.f32 %v8612_v45 }
 0x67f   : > { %v15863_v40 = vpop.eup %11672  ;;  %v8614_v10 = vmul.f32 1.442695, %v8534_v7  ;;  %v8616_v34 = vmul.f32 1.442695, %v8535_v23  ;;  %8723 = vadd.xlane.f32.xlu0 %v8722_v24 }
 0x680   : > { %v15865_v54 = vpop.eup %11674  ;;  %v8451_v42 = vpop.xlane.xlu0 %8450 }
 0x681   : > { %11684 = vpow2.f32 %v8614_v10  ;;  %v8536_v62 = vsub.f32 %v15677_v55, %v8451_v42  ;;  %v8537_v12 = vsub.f32 %v15679_v43, %v8451_v42  ;;  %v8725_v39 = vadd.f32 %v15865_v54, %v15863_v40 }
 0x682   : > { %11686 = vpow2.f32 %v8616_v34 }
 0x683   : > { %v15871_v36 = vpop.eup %11676  ;;  %v8618_v29 = vmul.f32 1.442695, %v8536_v62  ;;  %v8620_v8 = vmul.f32 1.442695, %v8537_v12  ;;  %8726 = vadd.xlane.f32.xlu0 %v8725_v39 }
 0x684   : > { %v15873_v4 = vpop.eup %11678  ;;  %v8454_v52 = vpop.xlane.xlu1 %8453 }
 0x685   : > { %11688 = vpow2.f32 %v8618_v29  ;;  %v8538_v22 = vsub.f32 %v15683_v48, %v8454_v52  ;;  %v8539_v28 = vsub.f32 %v15685_v0, %v8454_v52  ;;  %v8728_v55 = vadd.f32 %v15873_v4, %v15871_v36 }
 0x686   : > { %11690 = vpow2.f32 %v8620_v8 }
 0x687   : > { %v15879_v43 = vpop.eup %11680  ;;  %v8622_v2 = vmul.f32 1.442695, %v8538_v22  ;;  %v8624_v45 = vmul.f32 1.442695, %v8539_v28  ;;  %8729 = vadd.xlane.f32.xlu0 %v8728_v55 }
 0x688   : > { %v15881_v25 = vpop.eup %11682  ;;  %v8457_v7 = vpop.xlane.xlu0 %8456 }
 0x689   : > { %11692 = vpow2.f32 %v8622_v2  ;;  %v8540_v23 = vsub.f32 %v15689_v13, %v8457_v7  ;;  %v8541_v24 = vsub.f32 %v15691_v58, %v8457_v7  ;;  %v8731_v48 = vadd.f32 %v15881_v25, %v15879_v43 }
 0x68a   : > { %11694 = vpow2.f32 %v8624_v45 }
 0x68b   : > { %v15887_v0 = vpop.eup %11684  ;;  %v8626_v10 = vmul.f32 1.442695, %v8540_v23  ;;  %v8628_v34 = vmul.f32 1.442695, %v8541_v24  ;;  %8732 = vadd.xlane.f32.xlu0 %v8731_v48 }
 0x68c   : > { %v15889_v42 = vpop.eup %11686  ;;  %v8460_v62 = vpop.xlane.xlu1 %8459 }
 0x68d   : > { %11696 = vpow2.f32 %v8626_v10  ;;  %v8542_v12 = vsub.f32 %v15695_v46, %v8460_v62  ;;  %v8543_v39 = vsub.f32 %v15697_v51, %v8460_v62  ;;  %v8734_v13 = vadd.f32 %v15889_v42, %v15887_v0 }
 0x68e   : > { %11698 = vpow2.f32 %v8628_v34 }
 0x68f   : > { %v15895_v58 = vpop.eup %11688  ;;  %v8630_v29 = vmul.f32 1.442695, %v8542_v12  ;;  %v8632_v8 = vmul.f32 1.442695, %v8543_v39  ;;  %8735 = vadd.xlane.f32.xlu0 %v8734_v13 }
 0x690   : > { %v15897_v52 = vpop.eup %11690  ;;  %v8463_v22 = vpop.xlane.xlu0 %8462 }
 0x691   : > { %11700 = vpow2.f32 %v8630_v29  ;;  %v8544_v28 = vsub.f32 %v15701_v32, %v8463_v22  ;;  %v8545_v55 = vsub.f32 %v15703_v44, %v8463_v22  ;;  %v8737_v46 = vadd.f32 %v15897_v52, %v15895_v58 }
 0x692   : > { %11702 = vpow2.f32 %v8632_v8 }
 0x693   : > { %v15903_v51 = vpop.eup %11692  ;;  %v8634_v2 = vmul.f32 1.442695, %v8544_v28  ;;  %v8636_v45 = vmul.f32 1.442695, %v8545_v55  ;;  %8738 = vadd.xlane.f32.xlu0 %v8737_v46 }
 0x694   : > { %v15905_v7 = vpop.eup %11694  ;;  %v8466_v23 = vpop.xlane.xlu1 %8465 }
 0x695   : > { %11704 = vpow2.f32 %v8634_v2  ;;  %v8546_v24 = vsub.f32 %v15707_v47, %v8466_v23  ;;  %v8547_v48 = vsub.f32 %v15709_v33, %v8466_v23  ;;  %v8740_v32 = vadd.f32 %v15905_v7, %v15903_v51 }
 0x696   : > { %11706 = vpow2.f32 %v8636_v45 }
 0x697   : > { %v15911_v44 = vpop.eup %11696  ;;  %v8638_v10 = vmul.f32 1.442695, %v8546_v24  ;;  %v8640_v34 = vmul.f32 1.442695, %v8547_v48  ;;  %8741 = vadd.xlane.f32.xlu1 %v8740_v32 }
 0x698   : > { %v15913_v62 = vpop.eup %11698  ;;  %v8469_v12 = vpop.xlane.xlu0 %8468 }
 0x699   : > { %11708 = vpow2.f32 %v8638_v10  ;;  %v8548_v39 = vsub.f32 %v15713_v59, %v8469_v12  ;;  %v8549_v13 = vsub.f32 %v15715_v3, %v8469_v12  ;;  %v8743_v33 = vadd.f32 %v15913_v62, %v15911_v44 }
 0x69a   : > { %11710 = vpow2.f32 %v8640_v34 }
 0x69b   : > { %v15919_v47 = vpop.eup %11700  ;;  %v8642_v29 = vmul.f32 1.442695, %v8548_v39  ;;  %v8644_v8 = vmul.f32 1.442695, %v8549_v13  ;;  %8744 = vadd.xlane.f32.xlu0 %v8743_v33 }
 0x69c   : > { %v15921_v22 = vpop.eup %11702  ;;  %v8472_v28 = vpop.xlane.xlu1 %8471 }
 0x69d   : > { %11712 = vpow2.f32 %v8642_v29  ;;  %v8550_v55 = vsub.f32 %v15719_v21, %v8472_v28  ;;  %v8551_v46 = vsub.f32 %v15721_v20, %v8472_v28  ;;  %v8746_v3 = vadd.f32 %v15921_v22, %v15919_v47 }
 0x69e   : > { %11714 = vpow2.f32 %v8644_v8 }
 0x69f   : > { %v15927_v59 = vpop.eup %11704  ;;  %v8646_v2 = vmul.f32 1.442695, %v8550_v55  ;;  %v8648_v45 = vmul.f32 1.442695, %v8551_v46  ;;  %8747 = vadd.xlane.f32.xlu1 %v8746_v3 }
 0x6a0   : > { %v15929_v23 = vpop.eup %11706  ;;  %v8475_v24 = vpop.xlane.xlu0 %8474 }
 0x6a1   : > { %11716 = vpow2.f32 %v8646_v2  ;;  %v8552_v48 = vsub.f32 %v15725_v53, %v8475_v24  ;;  %v8553_v32 = vsub.f32 %v15727_v56, %v8475_v24  ;;  %v8749_v20 = vadd.f32 %v15929_v23, %v15927_v59 }
 0x6a2   : > { %11718 = vpow2.f32 %v8648_v45 }
 0x6a3   : > { %v15935_v21 = vpop.eup %11708  ;;  %v8650_v10 = vmul.f32 1.442695, %v8552_v48  ;;  %v8652_v34 = vmul.f32 1.442695, %v8553_v32  ;;  %8750 = vadd.xlane.f32.xlu0 %v8749_v20 }
 0x6a4   : > { %v15937_v12 = vpop.eup %11710  ;;  %v8478_v39 = vpop.xlane.xlu1 %8477 }
 0x6a5   : > { %11720 = vpow2.f32 %v8650_v10  ;;  %v8554_v13 = vsub.f32 %v15731_v57, %v8478_v39  ;;  %v8555_v33 = vsub.f32 %v15733_v5, %v8478_v39  ;;  %v8752_v56 = vadd.f32 %v15937_v12, %v15935_v21 }
 0x6a6   : > { %11722 = vpow2.f32 %v8652_v34 }
 0x6a7   : > { %v15943_v53 = vpop.eup %11712  ;;  %v8654_v29 = vmul.f32 1.442695, %v8554_v13  ;;  %v8656_v8 = vmul.f32 1.442695, %v8555_v33  ;;  %8753 = vadd.xlane.f32.xlu1 %v8752_v56 }
 0x6a8   : > { %v15945_v28 = vpop.eup %11714  ;;  %v8481_v55 = vpop.xlane.xlu0 %8480 }
 0x6a9   : > { %11724 = vpow2.f32 %v8654_v29  ;;  %v8556_v46 = vsub.f32 %v15737_v18, %v8481_v55  ;;  %v8557_v3 = vsub.f32 %v15739_v63, %v8481_v55  ;;  %v8755_v5 = vadd.f32 %v15945_v28, %v15943_v53 }
 0x6aa   : > { %11726 = vpow2.f32 %v8656_v8 }
 0x6ab   : > { %v15951_v57 = vpop.eup %11716  ;;  %v8658_v2 = vmul.f32 1.442695, %v8556_v46  ;;  %v8660_v45 = vmul.f32 1.442695, %v8557_v3  ;;  %8756 = vadd.xlane.f32.xlu0 %v8755_v5 }
 0x6ac   : > { %v15953_v24 = vpop.eup %11718  ;;  %v8484_v48 = vpop.xlane.xlu1 %8483 }
 0x6ad   : > { %11728 = vpow2.f32 %v8658_v2  ;;  %v8558_v32 = vsub.f32 %v15743_v38, %v8484_v48  ;;  %v8559_v20 = vsub.f32 %v15745_v60, %v8484_v48  ;;  %v8758_v63 = vadd.f32 %v15953_v24, %v15951_v57 }
 0x6ae   : > { %11730 = vpow2.f32 %v8660_v45 }
 0x6af   : > { %v15959_v18 = vpop.eup %11720  ;;  %v8662_v10 = vmul.f32 1.442695, %v8558_v32  ;;  %v8664_v34 = vmul.f32 1.442695, %v8559_v20  ;;  %8759 = vadd.xlane.f32.xlu1 %v8758_v63 }
 0x6b0   : > { %v15961_v39 = vpop.eup %11722  ;;  %v8487_v13 = vpop.xlane.xlu0 %8486 }
 0x6b1   : > { %11732 = vpow2.f32 %v8662_v10  ;;  %v8560_v33 = vsub.f32 %v15749_v17, %v8487_v13  ;;  %v8561_v56 = vsub.f32 %v15751_v26, %v8487_v13  ;;  %v8761_v60 = vadd.f32 %v15961_v39, %v15959_v18 }
 0x6b2   : > { %11734 = vpow2.f32 %v8664_v34 }
 0x6b3   : > { %v15967_v38 = vpop.eup %11724  ;;  %v8666_v29 = vmul.f32 1.442695, %v8560_v33  ;;  %v8668_v8 = vmul.f32 1.442695, %v8561_v56  ;;  %8762 = vadd.xlane.f32.xlu0 %v8761_v60 }
 0x6b4   : > { %v15969_v55 = vpop.eup %11726  ;;  %v8490_v46 = vpop.xlane.xlu1 %8489 }
 0x6b5   : > { %11736 = vpow2.f32 %v8666_v29  ;;  %v8562_v3 = vsub.f32 %v15755_v49, %v8490_v46  ;;  %v8563_v5 = vsub.f32 %v15757_v6, %v8490_v46  ;;  %v8764_v26 = vadd.f32 %v15969_v55, %v15967_v38 }
 0x6b6   : > { %11738 = vpow2.f32 %v8668_v8 }
 0x6b7   : > { %v15975_v17 = vpop.eup %11728  ;;  %v8670_v2 = vmul.f32 1.442695, %v8562_v3  ;;  %v8672_v45 = vmul.f32 1.442695, %v8563_v5  ;;  %8765 = vadd.xlane.f32.xlu1 %v8764_v26  ;;  %v16623_v5 = vld [vmem:[#allocation11_spill] sm:$0xff] }
 0x6b8   : > { %v15977_v48 = vpop.eup %11730  ;;  %v8493_v32 = vpop.xlane.xlu1 %8492 }
 0x6b9   : > { %11740 = vpow2.f32 %v8670_v2  ;;  %v8564_v20 = vsub.f32 %v15761_v41, %v8493_v32  ;;  %v8565_v63 = vsub.f32 %v15763_v37, %v8493_v32  ;;  %v8767_v6 = vadd.f32 %v15977_v48, %v15975_v17  ;;  %v16624_v2 = vld [vmem:[#allocation12_spill] sm:$0xff] }
 0x6ba   : > { %11742 = vpow2.f32 %v8672_v45 }
 0x6bb   : > { %v15983_v49 = vpop.eup %11732  ;;  %v8674_v10 = vmul.f32 1.442695, %v8564_v20  ;;  %v8676_v34 = vmul.f32 1.442695, %v8565_v63  ;;  %8768 = vadd.xlane.f32.xlu0 %v8767_v6 }
 0x6bc   : > { %v15985_v13 = vpop.eup %11734  ;;  %v8496_v33 = vpop.xlane.xlu1 %8495 }
 0x6bd   : > { %11744 = vpow2.f32 %v8674_v10  ;;  %v8566_v56 = vsub.f32 %v15767_v50, %v8496_v33  ;;  %v8567_v60 = vsub.f32 %v15769_v16, %v8496_v33  ;;  %v8770_v37 = vadd.f32 %v15985_v13, %v15983_v49  ;;  %v16626_v10 = vld [vmem:[#allocation13_spill] sm:$0xff]  ;;  %v16627_v33 = vld [vmem:[#allocation16_spill] sm:$0xff] }
 0x6be   : > { %11746 = vpow2.f32 %v8676_v34 }
 0x6bf   : > { %v15991_v41 = vpop.eup %11736  ;;  %v8678_v29 = vmul.f32 1.442695, %v8566_v56  ;;  %v8680_v8 = vmul.f32 1.442695, %v8567_v60  ;;  %8771 = vadd.xlane.f32.xlu1 %v8770_v37 }
 0x6c0   : > { %v15993_v46 = vpop.eup %11738  ;;  %v8499_v3 = vpop.xlane.xlu1 %8498 }
 0x6c1   : > { %11748 = vpow2.f32 %v8678_v29  ;;  %v8568_v26 = vsub.f32 %v16623_v5, %v8499_v3  ;;  %v8569_v45 = vsub.f32 %v16624_v2, %v8499_v3  ;;  %v8773_v16 = vadd.f32 %v15993_v46, %v15991_v41 }
 0x6c2   : > { %11750 = vpow2.f32 %v8680_v8 }
 0x6c3   : > { %v15999_v50 = vpop.eup %11740  ;;  %v8682_v32 = vmul.f32 1.442695, %v8568_v26  ;;  %v8684_v20 = vmul.f32 1.442695, %v8569_v45  ;;  %8774 = vadd.xlane.f32.xlu0 %v8773_v16  ;;  %v16630_v26 = vld [vmem:[#allocation17_spill] sm:$0xff]  ;;  %v16631_v45 = vld [vmem:[#allocation19_spill] sm:$0xff] }
 0x6c4   : > { %16625 = vst [vmem:[#allocation49_spill] sm:$0xff] %v15999_v50  ;;  %v16001_v63 = vpop.eup %11742  ;;  %v8502_v6 = vpop.xlane.xlu1 %8501 }
 0x6c5   : > { %11752 = vpow2.f32 %v8682_v32  ;;  %v8570_v34 = vsub.f32 %v16626_v10, %v8502_v6  ;;  %v8571_v56 = vsub.f32 %v16627_v33, %v8502_v6  ;;  %v8776_v60 = vadd.f32 %v16001_v63, %v15999_v50 }
 0x6c6   : > { %11754 = vpow2.f32 %v8684_v20 }
 0x6c7   : > { %v16007_v37 = vpop.eup %11744  ;;  %v8686_v29 = vmul.f32 1.442695, %v8570_v34  ;;  %v8688_v8 = vmul.f32 1.442695, %v8571_v56  ;;  %8777 = vadd.xlane.f32.xlu1 %v8776_v60  ;;  %v16634_v56 = vld [vmem:[#allocation22_spill] sm:$0xff] }
 0x6c8   : > { %16628 = vst [vmem:[#allocation50_spill] sm:$0xff] %v16007_v37  ;;  %v16009_v3 = vpop.eup %11746  ;;  %v8505_v5 = vpop.xlane.xlu1 %8504 }
 0x6c9   : > { %16629 = vst [vmem:[#allocation51_spill] sm:$0xff] %v16009_v3  ;;  %11756 = vpow2.f32 %v8686_v29  ;;  %v8572_v2 = vsub.f32 %v16630_v26, %v8505_v5  ;;  %v8573_v16 = vsub.f32 %v16631_v45, %v8505_v5  ;;  %v8779_v32 = vadd.f32 %v16009_v3, %v16007_v37  ;;  %v16635_v29 = vld [vmem:[#allocation23_spill] sm:$0xff] }
 0x6ca   : > { %11758 = vpow2.f32 %v8688_v8 }
 0x6cb   : > { %v16015_v6 = vpop.eup %11748  ;;  %v8690_v20 = vmul.f32 1.442695, %v8572_v2  ;;  %v8692_v10 = vmul.f32 1.442695, %v8573_v16  ;;  %8780 = vadd.xlane.f32.xlu0 %v8779_v32  ;;  %v16637_v32 = vld [vmem:[#allocation24_spill] sm:$0xff] }
 0x6cc   : > { %16632 = vst [vmem:[#allocation52_spill] sm:$0xff] %v16015_v6  ;;  %v16017_v34 = vpop.eup %11750  ;;  %v8508_v33 = vpop.xlane.xlu1 %8507 }
 0x6cd   : > { %16633 = vst [vmem:[#allocation53_spill] sm:$0xff] %v16017_v34  ;;  %11760 = vpow2.f32 %v8690_v20  ;;  %v8574_v60 = vsub.f32 %v16634_v56, %v8508_v33  ;;  %v8575_v50 = vsub.f32 %v16635_v29, %v8508_v33  ;;  %v8782_v5 = vadd.f32 %v16017_v34, %v16015_v6  ;;  %v16638_v20 = vld [vmem:[#allocation25_spill] sm:$0xff] }
 0x6ce   : > { %11762 = vpow2.f32 %v8692_v10 }
 0x6cf   : > { %v16023_v26 = vpop.eup %11752  ;;  %v8694_v8 = vmul.f32 1.442695, %v8574_v60  ;;  %v8696_v45 = vmul.f32 1.442695, %v8575_v50  ;;  %8783 = vadd.xlane.f32.xlu1 %v8782_v5  ;;  %v16639_v5 = vld [vmem:[#allocation21_spill] sm:$0xff] }
 0x6d0   : > { %16636 = vst [vmem:[#allocation54_spill] sm:$0xff] %v16023_v26  ;;  %v16025_v2 = vpop.eup %11754  ;;  %v8511_v16 = vpop.xlane.xlu1 %8510 }
 0x6d1   : > { %11764 = vpow2.f32 %v8694_v8  ;;  %v8576_v37 = vsub.f32 %v16637_v32, %v8511_v16  ;;  %v8577_v3 = vsub.f32 %v16638_v20, %v8511_v16  ;;  %v8785_v33 = vadd.f32 %v16025_v2, %v16023_v26  ;;  %v16640_v8 = vld [vmem:[#allocation47_spill] sm:$0xff] }
 0x6d2   : > { %11766 = vpow2.f32 %v8696_v45 }
 0x6d3   : > { %v16031_v56 = vpop.eup %11756  ;;  %v8698_v10 = vmul.f32 1.442695, %v8576_v37  ;;  %v8700_v29 = vmul.f32 1.442695, %v8577_v3  ;;  %8786 = vadd.xlane.f32.xlu0 %v8785_v33 }
 0x6d4   : > { %v16033_v60 = vpop.eup %11758  ;;  %v8514_v50 = vpop.xlane.xlu1 %8513 }
 0x6d5   : > { %11768 = vpow2.f32 %v8698_v10  ;;  %v8578_v6 = vsub.f32 %v16639_v5, %v8514_v50  ;;  %v8579_v34 = vsub.f32 %v16640_v8, %v8514_v50  ;;  %v8788_v16 = vadd.f32 %v16033_v60, %v16031_v56  ;;  %v16641_v10 = vld [vmem:[#allocation48_spill] sm:$0xff] }
 0x6d6   : > { %11770 = vpow2.f32 %v8700_v29 }
 0x6d7   : > { %v16039_v32 = vpop.eup %11760  ;;  %v8702_v45 = vmul.f32 1.442695, %v8578_v6  ;;  %v8704_v20 = vmul.f32 1.442695, %v8579_v34  ;;  %8789 = vadd.xlane.f32.xlu1 %v8788_v16 }
 0x6d8   : > { %v16041_v37 = vpop.eup %11762  ;;  %v8517_v3 = vpop.xlane.xlu1 %8516 }
 0x6d9   : > { %11772 = vpow2.f32 %v8702_v45  ;;  %v8580_v33 = vsub.f32 %v15809_v9, %v8517_v3  ;;  %v8581_v26 = vsub.f32 %v16641_v10, %v8517_v3  ;;  %v8791_v50 = vadd.f32 %v16041_v37, %v16039_v32 }
 0x6da   : > { %11774 = vpow2.f32 %v8704_v20 }
 0x6db   : > { %v16047_v5 = vpop.eup %11764  ;;  %v8706_v29 = vmul.f32 1.442695, %v8580_v33  ;;  %v8708_v8 = vmul.f32 1.442695, %v8581_v26  ;;  %8792 = vadd.xlane.f32.xlu0 %v8791_v50 }
 0x6dc   : > { %v16049_v6 = vpop.eup %11766 }
 0x6dd   : > { %11776 = vpow2.f32 %v8706_v29  ;;  %v8794_v34 = vadd.f32 %v16049_v6, %v16047_v5 }
 0x6de   : > { %11778 = vpow2.f32 %v8708_v8 }
 0x6df   : > { %v16053_v16 = vpop.eup %11768  ;;  %8795 = vadd.xlane.f32.xlu1 %v8794_v34 }
 0x6e0   : > { %16642 = vst [vmem:[#allocation55_spill] sm:$0xff] %v16053_v16  ;;  %v16055_v9 = vpop.eup %11770 }
 0x6e1   : > { %16643 = vst [vmem:[#allocation56_spill] sm:$0xff] %v16055_v9  ;;  %v8797_v45 = vadd.f32 %v16055_v9, %v16053_v16 }
 0x6e3   : > { %v16059_v20 = vpop.eup %11772  ;;  %8798 = vadd.xlane.f32.xlu0 %v8797_v45 }
 0x6e4   : > { %16644 = vst [vmem:[#allocation57_spill] sm:$0xff] %v16059_v20  ;;  %v16061_v26 = vpop.eup %11774 }
 0x6e5   : > { %16645 = vst [vmem:[#allocation58_spill] sm:$0xff] %v16061_v26  ;;  %v8800_v3 = vadd.f32 %v16061_v26, %v16059_v20 }
 0x6e7   : > { %v16065_v33 = vpop.eup %11776  ;;  %8801 = vadd.xlane.f32.xlu1 %v8800_v3 }
 0x6e8   : > { %16646 = vst [vmem:[#allocation59_spill] sm:$0xff] %v16065_v33  ;;  %v16067_v10 = vpop.eup %11778 }
 0x6e9   : > { %v8803_v50 = vadd.f32 %v16067_v10, %v16065_v33 }
 0x6eb   : > { %8804 = vadd.xlane.f32.xlu0 %v8803_v50 }
 0x6fc   : > { %v8712_v29 = vpop.xlane.xlu0 %8711 }
 0x6fd   : > { %11780 = vrcp.f32 %v8712_v29 }
 0x700   : > { %v8715_v8 = vpop.xlane.xlu0 %8714 }
 0x701   : > { %11782 = vrcp.f32 %v8715_v8 }
 0x704   : > { %v8718_v34 = vpop.xlane.xlu0 %8717 }
 0x705   : > { %11784 = vrcp.f32 %v8718_v34 }
 0x707   : > { %v11781_v45 = vpop.eup %11780 }
 0x708   : > { %v8838_v16 = vmul.f32 %v11781_v45, %v15823_v15  ;;  %v8721_v9 = vpop.xlane.xlu0 %8720  ;;  %v8839_v20 = vmul.f32 %v11781_v45, %v15825_v35 }
 0x709   : > { %11786 = vrcp.f32 %v8721_v9 }
 0x70a   : > { %8966 = vmatprep.mubr.f32.mxu1 %v8839_v20 }
 0x70b   : > { %v11783_v3 = vpop.eup %11782  ;;  %8967 = vmatmul.mubr.f32.vlgmr.msra.gmra.mrb[160].mxu1 %v8838_v16 }
 0x70c   : > { %v8724_v26 = vpop.xlane.xlu0 %8723  ;;  %v8841_v33 = vmul.f32 %v11783_v3, %v15833_v14  ;;  %v8840_v50 = vmul.f32 %v11783_v3, %v15831_v61 }
 0x70d   : > { %11788 = vrcp.f32 %v8724_v26 }
 0x70e   : > { %8971 = vmatprep.mubr.f32.mxu1 %v8841_v33 }
 0x70f   : > { %v11785_v29 = vpop.eup %11784  ;;  %8972 = vmatmul.mubr.f32.gmra.mrb[162].mxu1 %v8840_v50 }
 0x710   : > { %v8727_v8 = vpop.xlane.xlu0 %8726  ;;  %v8843_v34 = vmul.f32 %v11785_v29, %v15841_v11  ;;  %v8842_v15 = vmul.f32 %v11785_v29, %v15839_v19 }
 0x711   : > { %11790 = vrcp.f32 %v8727_v8 }
 0x712   : > { %8976 = vmatprep.mubr.f32.mxu1 %v8843_v34 }
 0x713   : > { %v11787_v35 = vpop.eup %11786  ;;  %8977 = vmatmul.mubr.f32.gmra.mrb[164].mxu1 %v8842_v15 }
 0x714   : > { %v8730_v9 = vpop.xlane.xlu0 %8729  ;;  %v8845_v16 = vmul.f32 %v11787_v35, %v15849_v1  ;;  %v8844_v14 = vmul.f32 %v11787_v35, %v15847_v31 }
 0x715   : > { %11792 = vrcp.f32 %v8730_v9 }
 0x716   : > { %8981 = vmatprep.mubr.f32.mxu1 %v8845_v16 }
 0x717   : > { %v11789_v61 = vpop.eup %11788  ;;  %8982 = vmatmul.mubr.f32.gmra.mrb[166].mxu1 %v8844_v14 }
 0x718   : > { %v8733_v20 = vpop.xlane.xlu0 %8732  ;;  %v8847_v26 = vmul.f32 %v11789_v61, %v15857_v30  ;;  %v8846_v11 = vmul.f32 %v11789_v61, %v15855_v27 }
 0x719   : > { %11794 = vrcp.f32 %v8733_v20 }
 0x71a   : > { %8986 = vmatprep.mubr.f32.mxu1 %v8847_v26 }
 0x71b   : > { %v11791_v19 = vpop.eup %11790  ;;  %8987 = vmatmul.mubr.f32.gmra.mrb[168].mxu1 %v8846_v11 }
 0x71c   : > { %v8736_v33 = vpop.xlane.xlu0 %8735  ;;  %v8849_v45 = vmul.f32 %v11791_v19, %v15865_v54  ;;  %v8848_v1 = vmul.f32 %v11791_v19, %v15863_v40 }
 0x71d   : > { %11796 = vrcp.f32 %v8736_v33 }
 0x71e   : > { %8991 = vmatprep.mubr.f32.mxu1 %v8849_v45 }
 0x71f   : > { %v11793_v31 = vpop.eup %11792  ;;  %8992 = vmatmul.mubr.f32.gmra.mrb[170].mxu1 %v8848_v1 }
 0x720   : > { %v8739_v3 = vpop.xlane.xlu0 %8738  ;;  %v8851_v50 = vmul.f32 %v11793_v31, %v15873_v4  ;;  %v8850_v30 = vmul.f32 %v11793_v31, %v15871_v36 }
 0x721   : > { %11798 = vrcp.f32 %v8739_v3 }
 0x722   : > { %8996 = vmatprep.mubr.f32.mxu1 %v8851_v50 }
 0x723   : > { %v11795_v27 = vpop.eup %11794  ;;  %8997 = vmatmul.mubr.f32.gmra.mrb[172].mxu1 %v8850_v30 }
 0x724   : > { %v8742_v29 = vpop.xlane.xlu1 %8741  ;;  %v8853_v8 = vmul.f32 %v11795_v27, %v15881_v25  ;;  %v8852_v54 = vmul.f32 %v11795_v27, %v15879_v43 }
 0x725   : > { %11800 = vrcp.f32 %v8742_v29 }
 0x726   : > { %9001 = vmatprep.mubr.f32.mxu1 %v8853_v8 }
 0x727   : > { %v11797_v40 = vpop.eup %11796  ;;  %9002 = vmatmul.mubr.f32.gmra.mrb[174].mxu1 %v8852_v54 }
 0x728   : > { %v8745_v34 = vpop.xlane.xlu0 %8744  ;;  %v8855_v15 = vmul.f32 %v11797_v40, %v15889_v42  ;;  %v8854_v4 = vmul.f32 %v11797_v40, %v15887_v0 }
 0x729   : > { %11802 = vrcp.f32 %v8745_v34 }
 0x72a   : > { %9006 = vmatprep.mubr.f32.mxu1 %v8855_v15 }
 0x72b   : > { %v11799_v36 = vpop.eup %11798  ;;  %9007 = vmatmul.mubr.f32.gmra.mrb[176].mxu1 %v8854_v4 }
 0x72c   : > { %v8748_v35 = vpop.xlane.xlu1 %8747  ;;  %v8857_v9 = vmul.f32 %v11799_v36, %v15897_v52  ;;  %v8856_v25 = vmul.f32 %v11799_v36, %v15895_v58 }
 0x72d   : > { %11804 = vrcp.f32 %v8748_v35 }
 0x72e   : > { %9011 = vmatprep.mubr.f32.mxu1 %v8857_v9 }
 0x72f   : > { %v11801_v43 = vpop.eup %11800  ;;  %9012 = vmatmul.mubr.f32.gmra.mrb[178].mxu1 %v8856_v25 }
 0x730   : > { %v8751_v16 = vpop.xlane.xlu0 %8750  ;;  %v8859_v14 = vmul.f32 %v11801_v43, %v15905_v7  ;;  %v8858_v42 = vmul.f32 %v11801_v43, %v15903_v51  ;;  %v16647_v43 = vld [vmem:[#allocation49_spill] sm:$0xff] }
 0x731   : > { %11806 = vrcp.f32 %v8751_v16 }
 0x732   : > { %9016 = vmatprep.mubr.f32.mxu1 %v8859_v14  ;;  %v16648_v14 = vld [vmem:[#allocation51_spill] sm:$0xff] }
 0x733   : > { %v11803_v0 = vpop.eup %11802  ;;  %9017 = vmatmul.mubr.f32.gmra.mrb[180].mxu1 %v8858_v42 }
 0x734   : > { %v8754_v61 = vpop.xlane.xlu1 %8753  ;;  %v8861_v20 = vmul.f32 %v11803_v0, %v15913_v62  ;;  %v8860_v52 = vmul.f32 %v11803_v0, %v15911_v44  ;;  %v16649_v0 = vld [vmem:[#allocation50_spill] sm:$0xff] }
 0x735   : > { %11808 = vrcp.f32 %v8754_v61 }
 0x736   : > { %9021 = vmatprep.mubr.f32.mxu1 %v8861_v20  ;;  %v16650_v20 = vld [vmem:[#allocation53_spill] sm:$0xff] }
 0x737   : > { %v11805_v58 = vpop.eup %11804  ;;  %9022 = vmatmul.mubr.f32.gmra.mrb[182].mxu1 %v8860_v52 }
 0x738   : > { %v8757_v26 = vpop.xlane.xlu0 %8756  ;;  %v8863_v11 = vmul.f32 %v11805_v58, %v15921_v22  ;;  %v8862_v7 = vmul.f32 %v11805_v58, %v15919_v47  ;;  %v16651_v58 = vld [vmem:[#allocation52_spill] sm:$0xff] }
 0x739   : > { %11810 = vrcp.f32 %v8757_v26 }
 0x73a   : > { %9026 = vmatprep.mubr.f32.mxu1 %v8863_v11 }
 0x73b   : > { %v11807_v51 = vpop.eup %11806  ;;  %9027 = vmatmul.mubr.f32.gmra.mrb[184].mxu1 %v8862_v7 }
 0x73c   : > { %v8760_v19 = vpop.xlane.xlu1 %8759  ;;  %v8865_v33 = vmul.f32 %v11807_v51, %v15929_v23  ;;  %v8864_v62 = vmul.f32 %v11807_v51, %v15927_v59  ;;  %v16652_v51 = vld [vmem:[#allocation54_spill] sm:$0xff] }
 0x73d   : > { %11812 = vrcp.f32 %v8760_v19 }
 0x73e   : > { %9031 = vmatprep.mubr.f32.mxu1 %v8865_v33 }
 0x73f   : > { %v11809_v44 = vpop.eup %11808  ;;  %9032 = vmatmul.mubr.f32.gmra.mrb[186].mxu1 %v8864_v62 }
 0x740   : > { %v8763_v45 = vpop.xlane.xlu0 %8762  ;;  %v8867_v1 = vmul.f32 %v11809_v44, %v15937_v12  ;;  %v8866_v22 = vmul.f32 %v11809_v44, %v15935_v21 }
 0x741   : > { %11814 = vrcp.f32 %v8763_v45 }
 0x742   : > { %9036 = vmatprep.mubr.f32.mxu1 %v8867_v1 }
 0x743   : > { %v11811_v47 = vpop.eup %11810  ;;  %9037 = vmatmul.mubr.f32.gmra.mrb[188].mxu1 %v8866_v22 }
 0x744   : > { %v8766_v31 = vpop.xlane.xlu1 %8765  ;;  %v8869_v3 = vmul.f32 %v11811_v47, %v15945_v28  ;;  %v8868_v23 = vmul.f32 %v11811_v47, %v15943_v53 }
 0x745   : > { %11816 = vrcp.f32 %v8766_v31 }
 0x746   : > { %9041 = vmatprep.mubr.f32.mxu1 %v8869_v3 }
 0x747   : > { %v11813_v59 = vpop.eup %11812  ;;  %9042 = vmatmul.mubr.f32.gmra.mrb[190].mxu1 %v8868_v23 }
 0x748   : > { %v8769_v50 = vpop.xlane.xlu0 %8768  ;;  %v8871_v30 = vmul.f32 %v11813_v59, %v15953_v24  ;;  %v8870_v12 = vmul.f32 %v11813_v59, %v15951_v57  ;;  %v16653_v59 = vld [vmem:[#allocation56_spill] sm:$0xff] }
 0x749   : > { %11818 = vrcp.f32 %v8769_v50 }
 0x74a   : > { %9046 = vmatprep.mubr.f32.mxu1 %v8871_v30  ;;  %v16654_v30 = vld [vmem:[#allocation55_spill] sm:$0xff] }
 0x74b   : > { %v11815_v21 = vpop.eup %11814  ;;  %9047 = vmatmul.mubr.f32.gmra.mrb[192].mxu1 %v8870_v12 }
 0x74c   : > { %v8772_v27 = vpop.xlane.xlu1 %8771  ;;  %v8873_v29 = vmul.f32 %v11815_v21, %v15961_v39  ;;  %v8872_v28 = vmul.f32 %v11815_v21, %v15959_v18 }
 0x74d   : > { %11820 = vrcp.f32 %v8772_v27  ;;  %v16656_v27 = vld [vmem:[#allocation57_spill] sm:$0xff] }
 0x74e   : > { %9051 = vmatprep.mubr.f32.mxu1 %v8873_v29 }
 0x74f   : > { %v11817_v53 = vpop.eup %11816  ;;  %9052 = vmatmul.mubr.f32.gmra.mrb[194].mxu1 %v8872_v28  ;;  %v16657_v28 = vld [vmem:[#allocation59_spill] sm:$0xff] }
 0x750   : > { %v8775_v8 = vpop.xlane.xlu0 %8774  ;;  %v8875_v54 = vmul.f32 %v11817_v53, %v15969_v55  ;;  %v8874_v24 = vmul.f32 %v11817_v53, %v15967_v38 }
 0x751   : > { %11822 = vrcp.f32 %v8775_v8  ;;  %v16135_v8 = vstv %s9127_s13 }
 0x752   : > { %9056 = vmatprep.mubr.f32.mxu1 %v8875_v54 }
 0x753   : > { %v11819_v57 = vpop.eup %11818  ;;  %9057 = vmatmul.mubr.f32.gmra.mrb[196].mxu1 %v8874_v24 }
 0x754   : > { %v8778_v40 = vpop.xlane.xlu1 %8777  ;;  %v8877_v34 = vmul.f32 %v11819_v57, %v15977_v48  ;;  %v8876_v39 = vmul.f32 %v11819_v57, %v15975_v17 }
 0x755   : > { %11824 = vrcp.f32 %v8778_v40  ;;  %v16658_v40 = vld [vmem:[#allocation26_spill] sm:$0xff] }
 0x756   : > { %9061 = vmatprep.mubr.f32.mxu1 %v8877_v34 }
 0x757   : > { %v11821_v18 = vpop.eup %11820  ;;  %9062 = vmatmul.mubr.f32.gmra.mrb[198].mxu1 %v8876_v39 }
 0x758   : > { %v8781_v15 = vpop.xlane.xlu0 %8780  ;;  %v8879_v4 = vmul.f32 %v11821_v18, %v15985_v13  ;;  %v8878_v55 = vmul.f32 %v11821_v18, %v15983_v49 }
 0x759   : > { %11826 = vrcp.f32 %v8781_v15 }
 0x75a   : > { %9066 = vmatprep.mubr.f32.mxu1 %v8879_v4  ;;  %v16659_v4 = vld [vmem:[#allocation28_spill] sm:$0xff] }
 0x75b   : > { %v11823_v38 = vpop.eup %11822  ;;  %9067 = vmatmul.mubr.f32.gmra.mrb[200].mxu1 %v8878_v55 }
 0x75c   : > { %v8784_v36 = vpop.xlane.xlu1 %8783  ;;  %v8881_v35 = vmul.f32 %v11823_v38, %v15993_v46  ;;  %v8880_v48 = vmul.f32 %v11823_v38, %v15991_v41 }
 0x75d   : > { %11828 = vrcp.f32 %v8784_v36 }
 0x75e   : > { %9071 = vmatprep.mubr.f32.mxu1 %v8881_v35 }
 0x75f   : > { %v11825_v17 = vpop.eup %11824  ;;  %9072 = vmatmul.mubr.f32.gmra.mrb[202].mxu1 %v8880_v48 }
 0x760   : > { %v8787_v9 = vpop.xlane.xlu0 %8786  ;;  %v8883_v25 = vmul.f32 %v11825_v17, %v16001_v63  ;;  %v8882_v13 = vmul.f32 %v11825_v17, %v16647_v43  ;;  %v16660_v17 = vld [vmem:[#allocation29_spill] sm:$0xff] }
 0x761   : > { %11830 = vrcp.f32 %v8787_v9 }
 0x762   : > { %9076 = vmatprep.mubr.f32.mxu1 %v8883_v25 }
 0x763   : > { %v11827_v49 = vpop.eup %11826  ;;  %9077 = vmatmul.mubr.f32.gmra.mrb[204].mxu1 %v8882_v13 }
 0x764   : > { %v8790_v16 = vpop.xlane.xlu1 %8789  ;;  %v8885_v42 = vmul.f32 %v11827_v49, %v16648_v14  ;;  %v8884_v46 = vmul.f32 %v11827_v49, %v16649_v0 }
 0x765   : > { %11832 = vrcp.f32 %v8790_v16  ;;  %v16661_v16 = vld [vmem:[#allocation27_spill] sm:$0xff] }
 0x766   : > { %9081 = vmatprep.mubr.f32.mxu1 %v8885_v42 }
 0x767   : > { %v11829_v41 = vpop.eup %11828  ;;  %9082 = vmatmul.mubr.f32.gmra.mrb[206].mxu1 %v8884_v46 }
 0x768   : > { %v8793_v61 = vpop.xlane.xlu0 %8792  ;;  %v8887_v52 = vmul.f32 %v11829_v41, %v16650_v20  ;;  %v8886_v63 = vmul.f32 %v11829_v41, %v16651_v58 }
 0x769   : > { %11834 = vrcp.f32 %v8793_v61  ;;  %v16662_v61 = vld [vmem:[#allocation15_spill] sm:$0xff] }
 0x76a   : > { %9086 = vmatprep.mubr.f32.mxu1 %v8887_v52 }
 0x76b   : > { %v11831_v26 = vpop.eup %11830  ;;  %9087 = vmatmul.mubr.f32.gmra.mrb[208].mxu1 %v8886_v63 }
 0x76c   : > { %v8796_v11 = vpop.xlane.xlu1 %8795  ;;  %v8889_v7 = vmul.f32 %v11831_v26, %v16025_v2  ;;  %v8888_v19 = vmul.f32 %v11831_v26, %v16652_v51 }
 0x76d   : > { %11836 = vrcp.f32 %v8796_v11  ;;  %v16663_v11 = vld [vmem:[#allocation31_spill] sm:$0xff] }
 0x76e   : > { %9091 = vmatprep.mubr.f32.mxu1 %v8889_v7 }
 0x76f   : > { %v11833_v33 = vpop.eup %11832  ;;  %9092 = vmatmul.mubr.f32.gmra.mrb[210].mxu1 %v8888_v19 }
 0x770   : > { %v8799_v62 = vpop.xlane.xlu0 %8798  ;;  %v8891_v44 = vmul.f32 %v11833_v33, %v16033_v60  ;;  %v8890_v45 = vmul.f32 %v11833_v33, %v16031_v56 }
 0x771   : > { %11838 = vrcp.f32 %v8799_v62 }
 0x772   : > { %9096 = vmatprep.mubr.f32.mxu1 %v8891_v44  ;;  %v16664_v44 = vld [vmem:[#allocation32_spill] sm:$0xff] }
 0x773   : > { %v11835_v1 = vpop.eup %11834  ;;  %9097 = vmatmul.mubr.f32.gmra.mrb[212].mxu1 %v8890_v45 }
 0x774   : > { %v8802_v22 = vpop.xlane.xlu1 %8801  ;;  %v8893_v47 = vmul.f32 %v11835_v1, %v16041_v37  ;;  %v8892_v2 = vmul.f32 %v11835_v1, %v16039_v32  ;;  %v16655_v32 = vld [vmem:[#allocation58_spill] sm:$0xff] }
 0x775   : > { %11840 = vrcp.f32 %v8802_v22 }
 0x776   : > { %9101 = vmatprep.mubr.f32.mxu1 %v8893_v47 }
 0x777   : > { %v11837_v31 = vpop.eup %11836  ;;  %9102 = vmatmul.mubr.f32.gmra.mrb[214].mxu1 %v8892_v2 }
 0x778   : > { %v8805_v3 = vpop.xlane.xlu0 %8804  ;;  %v8895_v23 = vmul.f32 %v11837_v31, %v16049_v6  ;;  %v8894_v60 = vmul.f32 %v11837_v31, %v16047_v5  ;;  %v16665_v31 = vld [vmem:[#allocation30_spill] sm:$0xff] }
 0x779   : > { %11842 = vrcp.f32 %v8805_v3 }
 0x77a   : > { %9106 = vmatprep.mubr.f32.mxu1 %v8895_v23 }
 0x77b   : > { %v11839_v56 = vpop.eup %11838  ;;  %9107 = vmatmul.mubr.f32.gmra.mrb[216].mxu1 %v8894_v60 }
 0x77c   : > { %v8897_v50 = vmul.f32 %v11839_v56, %v16653_v59  ;;  %v8896_v12 = vmul.f32 %v11839_v56, %v16654_v30 }
 0x77e   : > { %9111 = vmatprep.mubr.f32.mxu1 %v8897_v50  ;;  %v16666_v50 = vld [vmem:[#allocation33_spill] sm:$0xff] }
 0x77f   : > { %v11841_v37 = vpop.eup %11840  ;;  %9112 = vmatmul.mubr.f32.gmra.mrb[218].mxu1 %v8896_v12 }
 0x780   : > { %v8899_v21 = vmul.f32 %v11841_v37, %v16655_v32  ;;  %v8898_v29 = vmul.f32 %v11841_v37, %v16656_v27  ;;  %v16667_v27 = vld [vmem:[#allocation35_spill] sm:$0xff] }
 0x782   : > { %9116 = vmatprep.mubr.f32.mxu1 %v8899_v21 }
 0x783   : > { %v11843_v6 = vpop.eup %11842  ;;  %9117 = vmatmul.mubr.f32.gmra.mrb[220].mxu1 %v8898_v29 }
 0x784   : > { %v8901_v5 = vmul.f32 %v11843_v6, %v16067_v10  ;;  %v8900_v53 = vmul.f32 %v11843_v6, %v16657_v28 }
 0x786   : > { %9121 = vmatprep.mubr.f32.mxu1 %v8901_v5 }
 0x787   : > { %9122 = vmatmul.mubr.f32.gmra.mrb[222].mxu1 %v8900_v53 }
 0x7de   : > { %v8968_v54 = vpop.f32.mrb[160].mxu1 }
 0x7df   : > { %v9129_v24 = vmul.f32 %v16135_v8, %v8968_v54  ;;  %v8970_v57 = vpop.f32.mrb[161].mxu1  ;;  %v16668_v54 = vld [vmem:[#allocation36_spill] sm:$0xff] }
 0x7e1   : > { %v9161_v34 = vadd.f32 %v9129_v24, %v16658_v40 }
 0x7e2   : > { %v8973_v10 = vpop.f32.mrb[162].mxu1 }
 0x7e3   : > { %v10128_v39 = vpack.c.bf16 %v9161_v34, %v9161_v34  ;;  %v9130_v18 = vmul.f32 %v16135_v8, %v8973_v10  ;;  %v8975_v15 = vpop.f32.mrb[163].mxu1 }
 0x7e5   : > { %9321 = vst.msk [vmem:[%s16143_s17] sm:$0xf] %vm738_vm3, %v10128_v39  ;;  %v9162_v55 = vadd.f32 %v9130_v18, %v16659_v4  ;;  %v16669_v39 = vld [vmem:[#allocation34_spill] sm:$0xff] }
 0x7e6   : > { %v8978_v38 = vpop.f32.mrb[164].mxu1 }
 0x7e7   : > { %v10129_v36 = vpack.c.bf16 %v9162_v55, %v9162_v55  ;;  %v9131_v35 = vmul.f32 %v16135_v8, %v8978_v38  ;;  %v8980_v48 = vpop.f32.mrb[165].mxu1 }
 0x7e9   : > { %9322 = vst.msk [vmem:[%s16143_s17 + $0x4] sm:$0xf] %vm738_vm3, %v10129_v36  ;;  %v9163_v9 = vadd.f32 %v9131_v35, %v16660_v17  ;;  %v16670_v36 = vld [vmem:[#allocation14_spill] sm:$0xff] }
 0x7ea   : > { %v8983_v25 = vpop.f32.mrb[166].mxu1 }
 0x7eb   : > { %v10130_v43 = vpack.c.bf16 %v9163_v9, %v9163_v9  ;;  %v9132_v13 = vmul.f32 %v16135_v8, %v8983_v25  ;;  %v8985_v49 = vpop.f32.mrb[167].mxu1 }
 0x7ed   : > { %9323 = vst.msk [vmem:[%s16143_s17 + $0x8] sm:$0xf] %vm738_vm3, %v10130_v43  ;;  %v9164_v14 = vadd.f32 %v9132_v13, %v16661_v16  ;;  %v16671_v43 = vld [vmem:[#allocation20_spill] sm:$0xff] }
 0x7ee   : > { %v8988_v42 = vpop.f32.mrb[168].mxu1 }
 0x7ef   : > { %v10131_v0 = vpack.c.bf16 %v9164_v14, %v9164_v14  ;;  %v9133_v46 = vmul.f32 %v16135_v8, %v8988_v42  ;;  %v8990_v41 = vpop.f32.mrb[169].mxu1 }
 0x7f1   : > { %9324 = vst.msk [vmem:[%s16143_s17 + $0xc] sm:$0xf] %vm738_vm3, %v10131_v0  ;;  %v9165_v20 = vadd.f32 %v9133_v46, %v16662_v61  ;;  %v16672_v0 = vld [vmem:[#allocation37_spill] sm:$0xff] }
 0x7f2   : > { %v8993_v52 = vpop.f32.mrb[170].mxu1 }
 0x7f3   : > { %v10132_v58 = vpack.c.bf16 %v9165_v20, %v9165_v20  ;;  %v9134_v63 = vmul.f32 %v16135_v8, %v8993_v52  ;;  %v8995_v26 = vpop.f32.mrb[171].mxu1 }
 0x7f5   : > { %9325 = vst.msk [vmem:[%s16143_s17 + $0x10] sm:$0xf] %vm738_vm3, %v10132_v58  ;;  %v9166_v7 = vadd.f32 %v9134_v63, %v16663_v11  ;;  %v16673_v58 = vld [vmem:[#allocation18_spill] sm:$0xff] }
 0x7f6   : > { %v8998_v51 = vpop.f32.mrb[172].mxu1 }
 0x7f7   : > { %v10133_v19 = vpack.c.bf16 %v9166_v7, %v9166_v7  ;;  %v9135_v33 = vmul.f32 %v16135_v8, %v8998_v51  ;;  %v9000_v62 = vpop.f32.mrb[173].mxu1 }
 0x7f9   : > { %9326 = vst.msk [vmem:[%s16143_s17 + $0x14] sm:$0xf] %vm738_vm3, %v10133_v19  ;;  %v9167_v45 = vadd.f32 %v9135_v33, %v16664_v44  ;;  %v16674_v19 = vld [vmem:[#allocation38_spill] sm:$0xff] }
 0x7fa   : > { %v9003_v1 = vpop.f32.mrb[174].mxu1 }
 0x7fb   : > { %v10134_v22 = vpack.c.bf16 %v9167_v45, %v9167_v45  ;;  %v9136_v47 = vmul.f32 %v16135_v8, %v9003_v1  ;;  %v9005_v2 = vpop.f32.mrb[175].mxu1 }
 0x7fd   : > { %9327 = vst.msk [vmem:[%s16143_s17 + $0x18] sm:$0xf] %vm738_vm3, %v10134_v22  ;;  %v9168_v3 = vadd.f32 %v9136_v47, %v16665_v31  ;;  %v16675_v22 = vld [vmem:[#allocation40_spill] sm:$0xff] }
 0x7fe   : > { %v9008_v23 = vpop.f32.mrb[176].mxu1 }
 0x7ff   : > { %v10135_v60 = vpack.c.bf16 %v9168_v3, %v9168_v3  ;;  %v9137_v56 = vmul.f32 %v16135_v8, %v9008_v23  ;;  %v9010_v59 = vpop.f32.mrb[177].mxu1 }
 0x801   : > { %9328 = vst.msk [vmem:[%s16143_s17 + $0x1c] sm:$0xf] %vm738_vm3, %v10135_v60  ;;  %v9169_v30 = vadd.f32 %v9137_v56, %v16666_v50  ;;  %v16676_v60 = vld [vmem:[#allocation41_spill] sm:$0xff] }
 0x802   : > { %v9013_v12 = vpop.f32.mrb[178].mxu1 }
 0x803   : > { %v10136_v37 = vpack.c.bf16 %v9169_v30, %v9169_v30  ;;  %v9138_v32 = vmul.f32 %v16135_v8, %v9013_v12  ;;  %v9015_v21 = vpop.f32.mrb[179].mxu1 }
 0x805   : > { %9329 = vst.msk [vmem:[%s16143_s17 + $0x20] sm:$0xf] %vm738_vm3, %v10136_v37  ;;  %v9170_v29 = vadd.f32 %v9138_v32, %v16667_v27  ;;  %v16677_v37 = vld [vmem:[#allocation39_spill] sm:$0xff] }
 0x806   : > { %v9018_v6 = vpop.f32.mrb[180].mxu1 }
 0x807   : > { %v10137_v5 = vpack.c.bf16 %v9170_v29, %v9170_v29  ;;  %v9139_v28 = vmul.f32 %v16135_v8, %v9018_v6  ;;  %v9020_v53 = vpop.f32.mrb[181].mxu1 }
 0x809   : > { %9330 = vst.msk [vmem:[%s16143_s17 + $0x24] sm:$0xf] %vm738_vm3, %v10137_v5  ;;  %v9171_v24 = vadd.f32 %v9139_v28, %v16668_v54  ;;  %v16678_v5 = vld [vmem:[#allocation44_spill] sm:$0xff] }
 0x80a   : > { %v9023_v57 = vpop.f32.mrb[182].mxu1 }
 0x80b   : > { %v10138_v40 = vpack.c.bf16 %v9171_v24, %v9171_v24  ;;  %v9140_v34 = vmul.f32 %v16135_v8, %v9023_v57  ;;  %v9025_v10 = vpop.f32.mrb[183].mxu1 }
 0x80d   : > { %9331 = vst.msk [vmem:[%s16143_s17 + $0x28] sm:$0xf] %vm738_vm3, %v10138_v40  ;;  %v9172_v18 = vadd.f32 %v9140_v34, %v16669_v39  ;;  %v16679_v40 = vld [vmem:[#allocation43_spill] sm:$0xff] }
 0x80e   : > { %v9028_v15 = vpop.f32.mrb[184].mxu1 }
 0x80f   : > { %v10139_v4 = vpack.c.bf16 %v9172_v18, %v9172_v18  ;;  %v9141_v55 = vmul.f32 %v16135_v8, %v9028_v15  ;;  %v9030_v38 = vpop.f32.mrb[185].mxu1 }
 0x811   : > { %9332 = vst.msk [vmem:[%s16143_s17 + $0x2c] sm:$0xf] %vm738_vm3, %v10139_v4  ;;  %v9173_v35 = vadd.f32 %v9141_v55, %v16670_v36  ;;  %v16680_v4 = vld [vmem:[#allocation45_spill] sm:$0xff] }
 0x812   : > { %v9033_v48 = vpop.f32.mrb[186].mxu1 }
 0x813   : > { %v10140_v17 = vpack.c.bf16 %v9173_v35, %v9173_v35  ;;  %v9142_v9 = vmul.f32 %v16135_v8, %v9033_v48  ;;  %v9035_v25 = vpop.f32.mrb[187].mxu1 }
 0x815   : > { %9333 = vst.msk [vmem:[%s16143_s17 + $0x30] sm:$0xf] %vm738_vm3, %v10140_v17  ;;  %v9174_v13 = vadd.f32 %v9142_v9, %v16671_v43  ;;  %v16681_v17 = vld [vmem:[#allocation42_spill] sm:$0xff] }
 0x816   : > { %v9038_v49 = vpop.f32.mrb[188].mxu1 }
 0x817   : > { %v10141_v16 = vpack.c.bf16 %v9174_v13, %v9174_v13  ;;  %v9143_v14 = vmul.f32 %v16135_v8, %v9038_v49  ;;  %v9040_v42 = vpop.f32.mrb[189].mxu1 }
 0x819   : > { %9334 = vst.msk [vmem:[%s16143_s17 + $0x34] sm:$0xf] %vm738_vm3, %v10141_v16  ;;  %v9175_v46 = vadd.f32 %v9143_v14, %v16672_v0  ;;  %v16682_v16 = vld [vmem:[#allocation62_spill] sm:$0xff] }
 0x81a   : > { %v9043_v41 = vpop.f32.mrb[190].mxu1 }
 0x81b   : > { %v10142_v61 = vpack.c.bf16 %v9175_v46, %v9175_v46  ;;  %v9144_v20 = vmul.f32 %v16135_v8, %v9043_v41  ;;  %v9045_v52 = vpop.f32.mrb[191].mxu1 }
 0x81d   : > { %9335 = vst.msk [vmem:[%s16143_s17 + $0x38] sm:$0xf] %vm738_vm3, %v10142_v61  ;;  %v9176_v63 = vadd.f32 %v9144_v20, %v16673_v58  ;;  %v16683_v61 = vld [vmem:[#allocation5_spill] sm:$0xff] }
 0x81e   : > { %v9048_v26 = vpop.f32.mrb[192].mxu1 }
 0x81f   : > { %v10143_v11 = vpack.c.bf16 %v9176_v63, %v9176_v63  ;;  %v9145_v7 = vmul.f32 %v16135_v8, %v9048_v26  ;;  %v9050_v51 = vpop.f32.mrb[193].mxu1 }
 0x821   : > { %9336 = vst.msk [vmem:[%s16143_s17 + $0x3c] sm:$0xf] %vm738_vm3, %v10143_v11  ;;  %v9177_v33 = vadd.f32 %v9145_v7, %v16674_v19  ;;  %v16684_v11 = vld [vmem:[#allocation6_spill] sm:$0xff] }
 0x822   : > { %v9053_v62 = vpop.f32.mrb[194].mxu1 }
 0x823   : > { %v10144_v44 = vpack.c.bf16 %v9177_v33, %v9177_v33  ;;  %v9146_v45 = vmul.f32 %v16135_v8, %v9053_v62  ;;  %v9055_v1 = vpop.f32.mrb[195].mxu1 }
 0x825   : > { %9337 = vst.msk [vmem:[%s16143_s17 + $0x40] sm:$0xf] %vm738_vm3, %v10144_v44  ;;  %v9178_v47 = vadd.f32 %v9146_v45, %v16675_v22  ;;  %v16685_v44 = vld [vmem:[#allocation46_spill] sm:$0xff] }
 0x826   : > { %v9058_v2 = vpop.f32.mrb[196].mxu1 }
 0x827   : > { %v10145_v31 = vpack.c.bf16 %v9178_v47, %v9178_v47  ;;  %v9147_v3 = vmul.f32 %v16135_v8, %v9058_v2  ;;  %v9060_v23 = vpop.f32.mrb[197].mxu1 }
 0x829   : > { %9338 = vst.msk [vmem:[%s16143_s17 + $0x44] sm:$0xf] %vm738_vm3, %v10145_v31  ;;  %v9179_v56 = vadd.f32 %v9147_v3, %v16676_v60  ;;  %v16686_v31 = vld [vmem:[#allocation8_spill] sm:$0xff] }
 0x82a   : > { %v9063_v59 = vpop.f32.mrb[198].mxu1 }
 0x82b   : > { %v10146_v50 = vpack.c.bf16 %v9179_v56, %v9179_v56  ;;  %v9148_v30 = vmul.f32 %v16135_v8, %v9063_v59  ;;  %v9065_v12 = vpop.f32.mrb[199].mxu1 }
 0x82d   : > { %9339 = vst.msk [vmem:[%s16143_s17 + $0x48] sm:$0xf] %vm738_vm3, %v10146_v50  ;;  %v9180_v32 = vadd.f32 %v9148_v30, %v16677_v37  ;;  %v16687_v50 = vld [vmem:[#allocation9_spill] sm:$0xff] }
 0x82e   : > { %v9068_v21 = vpop.f32.mrb[200].mxu1 }
 0x82f   : > { %v10147_v27 = vpack.c.bf16 %v9180_v32, %v9180_v32  ;;  %v9149_v29 = vmul.f32 %v16135_v8, %v9068_v21  ;;  %v9070_v6 = vpop.f32.mrb[201].mxu1 }
 0x831   : > { %9340 = vst.msk [vmem:[%s16143_s17 + $0x4c] sm:$0xf] %vm738_vm3, %v10147_v27  ;;  %v9181_v28 = vadd.f32 %v9149_v29, %v16678_v5  ;;  %v16688_v27 = vld [vmem:[#allocation10_spill] sm:$0xff] }
 0x832   : > { %v9073_v53 = vpop.f32.mrb[202].mxu1 }
 0x833   : > { %v10148_v54 = vpack.c.bf16 %v9181_v28, %v9181_v28  ;;  %v9150_v24 = vmul.f32 %v16135_v8, %v9073_v53  ;;  %v9075_v57 = vpop.f32.mrb[203].mxu1 }
 0x835   : > { %9341 = vst.msk [vmem:[%s16143_s17 + $0x50] sm:$0xf] %vm738_vm3, %v10148_v54  ;;  %v9182_v34 = vadd.f32 %v9150_v24, %v16679_v40  ;;  %v16689_v54 = vld [vmem:[#allocation7_spill] sm:$0xff] }
 0x836   : > { %v9078_v10 = vpop.f32.mrb[204].mxu1 }
 0x837   : > { %v10149_v39 = vpack.c.bf16 %v9182_v34, %v9182_v34  ;;  %v9151_v18 = vmul.f32 %v16135_v8, %v9078_v10  ;;  %v9080_v15 = vpop.f32.mrb[205].mxu1 }
 0x839   : > { %9342 = vst.msk [vmem:[%s16143_s17 + $0x54] sm:$0xf] %vm738_vm3, %v10149_v39  ;;  %v9183_v55 = vadd.f32 %v9151_v18, %v16680_v4 }
 0x83a   : > { %v9083_v38 = vpop.f32.mrb[206].mxu1 }
 0x83b   : > { %v10150_v36 = vpack.c.bf16 %v9183_v55, %v9183_v55  ;;  %v9152_v35 = vmul.f32 %v16135_v8, %v9083_v38  ;;  %v9085_v48 = vpop.f32.mrb[207].mxu1 }
 0x83d   : > { %9343 = vst.msk [vmem:[%s16143_s17 + $0x58] sm:$0xf] %vm738_vm3, %v10150_v36  ;;  %v9184_v9 = vadd.f32 %v9152_v35, %v16681_v17 }
 0x83e   : > { %v9088_v25 = vpop.f32.mrb[208].mxu1 }
 0x83f   : > { %v10151_v43 = vpack.c.bf16 %v9184_v9, %v9184_v9  ;;  %v9153_v13 = vmul.f32 %v16135_v8, %v9088_v25  ;;  %v9090_v49 = vpop.f32.mrb[209].mxu1 }
 0x841   : > { %9344 = vst.msk [vmem:[%s16143_s17 + $0x5c] sm:$0xf] %vm738_vm3, %v10151_v43  ;;  %v9185_v14 = vadd.f32 %v9153_v13, %v16682_v16 }
 0x842   : > { %v9093_v42 = vpop.f32.mrb[210].mxu1 }
 0x843   : > { %v10152_v0 = vpack.c.bf16 %v9185_v14, %v9185_v14  ;;  %v9154_v46 = vmul.f32 %v16135_v8, %v9093_v42  ;;  %v9095_v41 = vpop.f32.mrb[211].mxu1 }
 0x845   : > { %9345 = vst.msk [vmem:[%s16143_s17 + $0x60] sm:$0xf] %vm738_vm3, %v10152_v0  ;;  %v9186_v20 = vadd.f32 %v9154_v46, %v16683_v61 }
 0x846   : > { %v9098_v52 = vpop.f32.mrb[212].mxu1 }
 0x847   : > { %v10153_v58 = vpack.c.bf16 %v9186_v20, %v9186_v20  ;;  %v9155_v63 = vmul.f32 %v16135_v8, %v9098_v52  ;;  %v9100_v26 = vpop.f32.mrb[213].mxu1 }
 0x849   : > { %9346 = vst.msk [vmem:[%s16143_s17 + $0x64] sm:$0xf] %vm738_vm3, %v10153_v58  ;;  %v9187_v7 = vadd.f32 %v9155_v63, %v16684_v11 }
 0x84a   : > { %v9103_v51 = vpop.f32.mrb[214].mxu1 }
 0x84b   : > { %v10154_v19 = vpack.c.bf16 %v9187_v7, %v9187_v7  ;;  %v9156_v33 = vmul.f32 %v16135_v8, %v9103_v51  ;;  %v9105_v62 = vpop.f32.mrb[215].mxu1 }
 0x84d   : > { %9347 = vst.msk [vmem:[%s16143_s17 + $0x68] sm:$0xf] %vm738_vm3, %v10154_v19  ;;  %v9188_v45 = vadd.f32 %v9156_v33, %v16685_v44 }
 0x84e   : > { %v9108_v1 = vpop.f32.mrb[216].mxu1 }
 0x84f   : > { %v10155_v22 = vpack.c.bf16 %v9188_v45, %v9188_v45  ;;  %v9157_v47 = vmul.f32 %v16135_v8, %v9108_v1  ;;  %v9110_v2 = vpop.f32.mrb[217].mxu1 }
 0x851   : > { %9348 = vst.msk [vmem:[%s16143_s17 + $0x6c] sm:$0xf] %vm738_vm3, %v10155_v22  ;;  %v9189_v3 = vadd.f32 %v9157_v47, %v16686_v31 }
 0x852   : > { %v9113_v23 = vpop.f32.mrb[218].mxu1 }
 0x853   : > { %v10156_v60 = vpack.c.bf16 %v9189_v3, %v9189_v3  ;;  %v9158_v56 = vmul.f32 %v16135_v8, %v9113_v23  ;;  %v9115_v59 = vpop.f32.mrb[219].mxu1 }
 0x855   : > { %9349 = vst.msk [vmem:[%s16143_s17 + $0x70] sm:$0xf] %vm738_vm3, %v10156_v60  ;;  %v9190_v30 = vadd.f32 %v9158_v56, %v16687_v50 }
 0x856   : > { %v9118_v12 = vpop.f32.mrb[220].mxu1 }
 0x857   : > { %v10157_v37 = vpack.c.bf16 %v9190_v30, %v9190_v30  ;;  %v9159_v32 = vmul.f32 %v16135_v8, %v9118_v12  ;;  %v9120_v21 = vpop.f32.mrb[221].mxu1 }
 0x859   : > { %9350 = vst.msk [vmem:[%s16143_s17 + $0x74] sm:$0xf] %vm738_vm3, %v10157_v37  ;;  %v9191_v29 = vadd.f32 %v9159_v32, %v16688_v27 }
 0x85a   : > { %v9123_v6 = vpop.f32.mrb[222].mxu1 }
 0x85b   : > { %v10158_v5 = vpack.c.bf16 %v9191_v29, %v9191_v29  ;;  %v9160_v28 = vmul.f32 %v16135_v8, %v9123_v6  ;;  %v9125_v53 = vpop.f32.mrb[223].mxu1 }
 0x85d   : > { %9351 = vst.msk [vmem:[%s16143_s17 + $0x78] sm:$0xf] %vm738_vm3, %v10158_v5  ;;  %v9192_v24 = vadd.f32 %v9160_v28, %v16689_v54 }
 0x85f   : > { %v10159_v57 = vpack.c.bf16 %v9192_v24, %v9192_v24 }
 0x861   : > { %9352 = vst.msk [vmem:[%s16143_s17 + $0x7c] sm:$0xf] %vm738_vm3, %v10159_v57 }
 0x862 PF: > { %s21_s15 = sadd.s32 1, %s11874_s15  }
 0x863   : > { %p18_p4 = scmp.ge.s32.totalorder %s21_s15, 4  }
 0x865   :  { %20 = sbr.rel (!%p18_p4) target bundleno = 2 (0x2), region = 104 }

</bundles_post_ra>
